<compile_context>
chip_gen: v6e
topology: v6e:2x2x1
jax: 0.10.0
libtpu: 0.0.40
codegen_flags: <defaults>
</compile_context>

<pallas_src>
import math

import jax
import jax.numpy as jnp
from jax import lax
from jax.experimental import pallas as pl
from jax.experimental.pallas import tpu as pltpu

# ----------------------------- model config ---------------------------------
INPUT_DIM = 16
STEP_DIM = 8
ATTN_DIM = 8
N_STEPS = 3
OD = STEP_DIM + ATTN_DIM            # step_dim + attn_dim = 16
GAMMA = 1.3
EPSILON = 1e-15
BN_EPS = 1e-5
SQRT_HALF = math.sqrt(0.5)
TB = 128                            # GBN virtual_batch_size == one 128-lane chunk
MAX_CHUNKS_PER_TILE = 4             # batch tile = up to 4*128 lanes (vreg-pressure sweet spot)


# ---------------------------- in-kernel helpers ------------------------------
def _gbn(z):
    # Training-mode Ghost BatchNorm over the batch (lane) axis, per 128-lane chunk,
    # biased variance, default affine (gamma=1, beta=0).  z: (features, W), W % TB == 0.
    # Static lane-aligned slices -> no relayout; one-pass var removes the serialized
    # second reduction.
    w = z.shape[1]
    outs = []
    for g in range(w // TB):
        zc = z[:, g * TB:(g + 1) * TB]
        mu = jnp.mean(zc, axis=1, keepdims=True)
        var = jnp.mean(zc * zc, axis=1, keepdims=True) - mu * mu
        outs.append((zc - mu) * lax.rsqrt(var + BN_EPS))
    return outs[0] if len(outs) == 1 else jnp.concatenate(outs, axis=1)


def _glu_layer(w, x):
    # w: (2*OD, din) nn.Linear [out, in]; x: (din, W) -> (OD, W); dropout p=0.0 -> identity
    z = jnp.dot(w, x, preferred_element_type=jnp.float32)
    z = _gbn(z)
    return z[:OD, :] * jax.nn.sigmoid(z[OD:, :])


def _feat_transformer(x, wglu_ref, dep_idx):
    # shared GLU block (first=True, n_glu=2) then step-dependent GLU block (n_glu=2)
    h = _glu_layer(wglu_ref[0], x)
    h = (h + _glu_layer(wglu_ref[1], h)) * SQRT_HALF
    h = (h + _glu_layer(wglu_ref[dep_idx], h)) * SQRT_HALF
    h = (h + _glu_layer(wglu_ref[dep_idx + 1], h)) * SQRT_HALF
    return h


def _sparsemax(z):
    # sparsemax over the feature (sublane) axis, sort-free loop form: accumulate per-
    # element rank counts r and >=-sums s without the (D, D, W) temporaries.
    d = z.shape[0]
    r = jnp.zeros_like(z)
    s = jnp.zeros_like(z)
    for j in range(d):
        zj = z[j:j + 1, :]                      # (1, W) sublane-broadcast row
        ge = zj >= z                            # z[j] >= z[i]
        r = r + ge.astype(jnp.float32)
        s = s + jnp.where(ge, zj, 0.0)
    supp = (1.0 + r * z > s).astype(jnp.float32)
    k = jnp.sum(supp, axis=0, keepdims=True)    # support size (>= 1)
    ssum = jnp.sum(z * supp, axis=0, keepdims=True)
    tau = (ssum - 1.0) / k
    return jnp.maximum(z - tau, 0.0)


# -------------------------------- kernel -------------------------------------
def tabnet_encoder_kernel(x_ref, bn_ref, wglu_ref, wattn_ref, steps_out_ref, ent_ref):
    # x_ref:        (TBW, INPUT_DIM)  batch-major tile straight from HBM
    # bn_ref:       (2, INPUT_DIM, 1) [mean; rstd] of the initial full-batch BatchNorm1d
    # wglu_ref:     (10, 2*OD, OD)    [shared fc0, shared fc1, step-dependent fcs x8]
    # wattn_ref:    (N_STEPS, INPUT_DIM, ATTN_DIM)
    # steps_out_ref:(N_STEPS, STEP_DIM, TBW)  lane-dense step outputs
    # ent_ref:      (1, TBW)          per-sample M-loss entropy partials

    xT = x_ref[...].T                                    # (INPUT_DIM, TBW): in-kernel XLU transpose
    x = (xT - bn_ref[0]) * bn_ref[1]                     # initial_bn with full-batch stats
    prior = jnp.ones_like(x)
    ent_acc = jnp.zeros((1, x.shape[1]), jnp.float32)

    # initial splitter -> attention features
    out = _feat_transformer(x, wglu_ref, 2)
    attn = out[STEP_DIM:, :]                             # (ATTN_DIM, TBW)

    for step in range(N_STEPS):
        # ----- attentive transformer -----
        a = jnp.dot(wattn_ref[step], attn, preferred_element_type=jnp.float32)
        a = _gbn(a) * prior
        M = _sparsemax(a)                                # (INPUT_DIM, TBW)
        prior = (GAMMA - M) * prior
        ent_acc = ent_acc + jnp.sum(M * jnp.log(M + EPSILON), axis=0, keepdims=True)

        # ----- feature transformer on masked input -----
        out = _feat_transformer(M * x, wglu_ref, 2 * (step + 2))
        attn = out[STEP_DIM:, :]
        steps_out_ref[step] = jnp.maximum(out[:STEP_DIM, :], 0.0)   # ReLU, lane-dense write

    ent_ref[...] = ent_acc                               # wrapper finishes mean / n_steps


# ------------------------------ wrapper ---------------------------------------
def _pick_chunks_per_tile(n_chunks, max_chunks=MAX_CHUNKS_PER_TILE):
    # Widest tile (in 128-lane GBN chunks) that divides the batch, capped for vreg
    # pressure, while keeping >=2 grid tiles when possible (v7x 2-TC megacore).
    if n_chunks <= 1:
        return 1
    target = min(max_chunks, max(1, n_chunks // 2))
    for g in range(target, 0, -1):
        if n_chunks % g == 0:
            return g
    return 1


@jax.jit
def tabnet_encoder(x, ws0, ws1, wdep, wattn):
    """Returns (steps_out, m_loss).  steps_out is the lane-dense (N_STEPS, STEP_DIM, B)
    slab; steps_out[s].T equals the PyTorch module's steps_output[s] of shape (B, STEP_DIM)."""
    B = x.shape[0]
    # TODO(synk): handle B % 128 != 0 (ragged GBN tail chunk) with a masked/padded last tile.
    assert B % TB == 0, "batch must be a multiple of the GBN virtual batch size (128)"
    n_chunks = B // TB
    g = _pick_chunks_per_tile(n_chunks)
    tbw = g * TB
    num_tiles = n_chunks // g

    # full-batch statistics for the initial (non-ghost) BatchNorm1d (training mode)
    mean = jnp.mean(x, axis=0)
    var = jnp.mean((x - mean) ** 2, axis=0)
    rstd = lax.rsqrt(var + BN_EPS)
    bn_stats = jnp.stack([mean, rstd])[:, :, None]                    # (2, INPUT_DIM, 1)

    # merge the small GLU fc weights into one VMEM-resident operand (INPUT_DIM == OD == 16)
    wglu = jnp.concatenate([ws0[None], ws1[None], wdep], axis=0)      # (10, 2*OD, OD)

    steps_fb, ent_row = pl.pallas_call(
        tabnet_encoder_kernel,
        grid=(num_tiles,),
        out_shape=(
            jax.ShapeDtypeStruct((N_STEPS, STEP_DIM, B), jnp.float32),
            jax.ShapeDtypeStruct((1, B), jnp.float32),
        ),
        in_specs=[
            pl.BlockSpec((tbw, INPUT_DIM), lambda i: (i, 0)),                      # x tile (batch-major)
            pl.BlockSpec((2, INPUT_DIM, 1), lambda i: (0, 0, 0)),                  # initial BN stats
            pl.BlockSpec((2 * (N_STEPS + 1) + 2, 2 * OD, OD), lambda i: (0, 0, 0)),  # GLU fcs (resident)
            pl.BlockSpec((N_STEPS, INPUT_DIM, ATTN_DIM), lambda i: (0, 0, 0)),     # attn fcs (resident)
        ],
        out_specs=(
            pl.BlockSpec((N_STEPS, STEP_DIM, tbw), lambda i: (0, 0, i)),           # lane-dense steps_out
            pl.BlockSpec((1, tbw), lambda i: (0, i)),                              # M-loss partial row
        ),
        compiler_params=pltpu.CompilerParams(dimension_semantics=("parallel",)),
    )(x, bn_stats, wglu, wattn)

    m_loss = (jnp.sum(ent_row) / (B * N_STEPS)).reshape(1)
    return steps_fb, m_loss


# --------------------------- parameter init -----------------------------------
def _xavier_normal(key, out_dim, in_dim, gain):
    std = gain * math.sqrt(2.0 / (in_dim + out_dim))
    return std * jax.random.normal(key, (out_dim, in_dim), dtype=jnp.float32)


def init_params(key):
    gain_shared0 = math.sqrt((INPUT_DIM + 2 * OD) / math.sqrt(INPUT_DIM))
    gain_glu_od = math.sqrt((OD + 2 * OD) / math.sqrt(OD))
    gain_attn = math.sqrt((ATTN_DIM + INPUT_DIM) / math.sqrt(4 * ATTN_DIM))

    n_feat_transformers = 1 + N_STEPS                    # initial splitter + per-step
    keys = jax.random.split(key, 2 + 2 * n_feat_transformers + N_STEPS)
    ki = iter(keys)

    ws0 = _xavier_normal(next(ki), 2 * OD, INPUT_DIM, gain_shared0)       # (32, 16)
    ws1 = _xavier_normal(next(ki), 2 * OD, OD, gain_glu_od)               # (32, 16)
    wdep = jnp.stack([_xavier_normal(next(ki), 2 * OD, OD, gain_glu_od)
                      for _ in range(2 * n_feat_transformers)])           # (8, 32, 16)
    wattn = jnp.stack([_xavier_normal(next(ki), INPUT_DIM, ATTN_DIM, gain_attn)
                       for _ in range(N_STEPS)])                          # (3, 16, 8)
    return ws0, ws1, wdep, wattn


# ------------------------ pure-JAX reference (PyTorch-faithful) ----------------
def _reference_forward(x, ws0, ws1, wdep, wattn):
    hp = lax.Precision.HIGHEST

    def gbn(z):
        outs = []
        for c in range(z.shape[0] // TB):
            zc = z[c * TB:(c + 1) * TB]
            m = jnp.mean(zc, axis=0)
            v = jnp.mean((zc - m) ** 2, axis=0)
            outs.append((zc - m) / jnp.sqrt(v + BN_EPS))
        return jnp.concatenate(outs, axis=0)

    def glu(w, h):
        z = gbn(jnp.dot(h, w.T, precision=hp))
        return z[:, :OD] * jax.nn.sigmoid(z[:, OD:])

    def feat_tf(h, d0, d1):
        y = glu(ws0, h)
        y = (y + glu(ws1, y)) * SQRT_HALF
        y = (y + glu(d0, y)) * SQRT_HALF
        y = (y + glu(d1, y)) * SQRT_HALF
        return y

    def sparsemax(z):
        zs = -jnp.sort(-z, axis=-1)
        ks = jnp.arange(1, z.shape[-1] + 1, dtype=z.dtype)
        zcum = jnp.cumsum(zs, axis=-1) - 1.0
        support = (ks * zs) > zcum
        k = jnp.sum(support.astype(jnp.int32), axis=-1, keepdims=True)
        tau = jnp.take_along_axis(zcum, k - 1, axis=-1) / k.astype(z.dtype)
        return jnp.maximum(z - tau, 0.0)

    mean = jnp.mean(x, axis=0)
    var = jnp.mean((x - mean) ** 2, axis=0)
    xn = (x - mean) / jnp.sqrt(var + BN_EPS)
    prior = jnp.ones_like(xn)
    m_loss = jnp.zeros(())
    attn = feat_tf(xn, wdep[0], wdep[1])[:, STEP_DIM:]
    steps = []
    for step in range(N_STEPS):
        a = gbn(jnp.dot(attn, wattn[step].T, precision=hp)) * prior
        M = sparsemax(a)
        prior = (GAMMA - M) * prior
        m_loss = m_loss + jnp.mean(jnp.sum(M * jnp.log(M + EPSILON), axis=1))
        out = feat_tf(M * xn, wdep[2 * (step + 1)], wdep[2 * (step + 1) + 1])
        attn = out[:, STEP_DIM:]
        steps.append(jnp.maximum(out[:, :STEP_DIM], 0.0))
    return jnp.stack(steps), (m_loss / N_STEPS).reshape(1)


# --------------------------------- main ----------------------------------------
if __name__ == "__main__":
    key = jax.random.PRNGKey(0)
    k_x, k_p = jax.random.split(key)

    B = 512                                   # 4 GBN chunks -> 2 grid tiles of 2 chunks each
    x = jax.random.normal(k_x, (B, INPUT_DIM), dtype=jnp.float32)
    ws0, ws1, wdep, wattn = init_params(k_p)

    steps_fb, m_loss = tabnet_encoder(x, ws0, ws1, wdep, wattn)
    jax.block_until_ready((steps_fb, m_loss))

    assert steps_fb.shape == (N_STEPS, STEP_DIM, B)
    assert m_loss.shape == (1,)
    assert bool(jnp.all(jnp.isfinite(steps_fb)))
    assert bool(jnp.all(jnp.isfinite(m_loss)))

    # cross-check against a pure-JAX, batch-major implementation of the PyTorch forward
    ref_steps, ref_loss = jax.jit(_reference_forward)(x, ws0, ws1, wdep, wattn)
    got_steps = jnp.transpose(steps_fb, (0, 2, 1))        # back to PyTorch (N_STEPS, B, STEP_DIM)
    assert bool(jnp.allclose(got_steps, ref_steps, atol=3e-3, rtol=3e-3))
    assert bool(jnp.allclose(m_loss, ref_loss, atol=3e-3, rtol=3e-3))

    print("KERNEL_OK")
</pallas_src>

<mosaic_0001>
module attributes {stable_mosaic.version = 11 : i64} {
  func.func @tabnet_encoder_kernel(%arg0: i32, %arg1: memref<256x16xf32, #tpu.memory_space<vmem>>, %arg2: memref<2x16x1xf32, #tpu.memory_space<vmem>>, %arg3: memref<10x32x16xf32, #tpu.memory_space<vmem>>, %arg4: memref<3x16x8xf32, #tpu.memory_space<vmem>>, %arg5: memref<3x8x256xf32, #tpu.memory_space<vmem>>, %arg6: memref<1x256xf32, #tpu.memory_space<vmem>>) attributes {dimension_semantics = [#tpu.dimension_semantics<parallel>], iteration_bounds = array<i64: 2>, scalar_prefetch = 0 : i64, scratch_operands = 0 : i64, tpu.core_type = #tpu.core_type<tc>, window_params = [{transform_indices = @transform_0, window_bounds = array<i64: 256, 16>}, {pipeline_mode = #tpu.pipeline_mode<synchronous>, transform_indices = @transform_1, window_bounds = array<i64: 2, 16, 1>}, {pipeline_mode = #tpu.pipeline_mode<synchronous>, transform_indices = @transform_2, window_bounds = array<i64: 10, 32, 16>}, {pipeline_mode = #tpu.pipeline_mode<synchronous>, transform_indices = @transform_3, window_bounds = array<i64: 3, 16, 8>}, {transform_indices = @transform_4, window_bounds = array<i64: 3, 8, 256>}, {transform_indices = @transform_5, window_bounds = array<i64: 1, 256>}]} {
    %c0 = arith.constant 0 : index
    %c0_0 = arith.constant 0 : index
    %0 = vector.load %arg1[%c0, %c0_0] : memref<256x16xf32, #tpu.memory_space<vmem>>, vector<256x16xf32>
    %1 = tpu.transpose %0, [1, 0] : vector<256x16xf32> -> vector<16x256xf32>
    %c0_1 = arith.constant 0 : index
    %c0_2 = arith.constant 0 : index
    %c0_3 = arith.constant 0 : index
    %2 = vector.load %arg2[%c0_1, %c0_2, %c0_3] : memref<2x16x1xf32, #tpu.memory_space<vmem>>, vector<1x16x1xf32>
    %3 = vector.shape_cast %2 : vector<1x16x1xf32> to vector<16x1xf32>
    %4 = vector.broadcast %3 : vector<16x1xf32> to vector<16x256xf32>
    %5 = arith.subf %1, %4 : vector<16x256xf32>
    %c1 = arith.constant 1 : index
    %c0_4 = arith.constant 0 : index
    %c0_5 = arith.constant 0 : index
    %6 = vector.load %arg2[%c1, %c0_4, %c0_5] : memref<2x16x1xf32, #tpu.memory_space<vmem>>, vector<1x16x1xf32>
    %7 = vector.shape_cast %6 : vector<1x16x1xf32> to vector<16x1xf32>
    %8 = vector.broadcast %7 : vector<16x1xf32> to vector<16x256xf32>
    %9 = arith.mulf %5, %8 : vector<16x256xf32>
    %cst = arith.constant 1.000000e+00 : f32
    %10 = vector.broadcast %cst : f32 to vector<16x256xf32>
    %cst_6 = arith.constant 0.000000e+00 : f32
    %11 = vector.broadcast %cst_6 : f32 to vector<1x256xf32>
    %c0_7 = arith.constant 0 : index
    %c0_8 = arith.constant 0 : index
    %c0_9 = arith.constant 0 : index
    %12 = vector.load %arg3[%c0_7, %c0_8, %c0_9] : memref<10x32x16xf32, #tpu.memory_space<vmem>>, vector<1x32x16xf32>
    %13 = vector.shape_cast %12 : vector<1x32x16xf32> to vector<32x16xf32>
    %cst_10 = arith.constant dense<0.000000e+00> : vector<32x256xf32>
    %14 = tpu.matmul %13, %9, %cst_10 {dimension_numbers = #tpu.dot_dimension_numbers<[1], [0], [0], [1], [0, 0, 1, 1], [], []>} : vector<32x16xf32>, vector<16x256xf32>, vector<32x256xf32> -> vector<32x256xf32>
    %15 = vector.extract_strided_slice %14 {offsets = [0, 0], sizes = [32, 128], strides = [1, 1]} : vector<32x256xf32> to vector<32x128xf32>
    %cst_11 = arith.constant dense<0.000000e+00> : vector<32xf32>
    %16 = vector.multi_reduction <add>, %15, %cst_11 [1] : vector<32x128xf32> to vector<32xf32>
    %17 = vector.shape_cast %16 : vector<32xf32> to vector<32x1xf32>
    %cst_12 = arith.constant 1.280000e+02 : f32
    %18 = vector.broadcast %cst_12 : f32 to vector<32x1xf32>
    %19 = arith.divf %17, %18 : vector<32x1xf32>
    %20 = arith.mulf %15, %15 : vector<32x128xf32>
    %cst_13 = arith.constant dense<0.000000e+00> : vector<32xf32>
    %21 = vector.multi_reduction <add>, %20, %cst_13 [1] : vector<32x128xf32> to vector<32xf32>
    %22 = vector.shape_cast %21 : vector<32xf32> to vector<32x1xf32>
    %cst_14 = arith.constant 1.280000e+02 : f32
    %23 = vector.broadcast %cst_14 : f32 to vector<32x1xf32>
    %24 = arith.divf %22, %23 : vector<32x1xf32>
    %25 = arith.mulf %19, %19 : vector<32x1xf32>
    %26 = arith.subf %24, %25 : vector<32x1xf32>
    %27 = vector.broadcast %19 : vector<32x1xf32> to vector<32x128xf32>
    %28 = arith.subf %15, %27 : vector<32x128xf32>
    %cst_15 = arith.constant 9.99999974E-6 : f32
    %29 = vector.broadcast %cst_15 : f32 to vector<32x1xf32>
    %30 = arith.addf %26, %29 : vector<32x1xf32>
    %31 = math.rsqrt %30 : vector<32x1xf32>
    %32 = vector.broadcast %31 : vector<32x1xf32> to vector<32x128xf32>
    %33 = arith.mulf %28, %32 : vector<32x128xf32>
    %34 = vector.extract_strided_slice %14 {offsets = [0, 128], sizes = [32, 128], strides = [1, 1]} : vector<32x256xf32> to vector<32x128xf32>
    %cst_16 = arith.constant dense<0.000000e+00> : vector<32xf32>
    %35 = vector.multi_reduction <add>, %34, %cst_16 [1] : vector<32x128xf32> to vector<32xf32>
    %36 = vector.shape_cast %35 : vector<32xf32> to vector<32x1xf32>
    %cst_17 = arith.constant 1.280000e+02 : f32
    %37 = vector.broadcast %cst_17 : f32 to vector<32x1xf32>
    %38 = arith.divf %36, %37 : vector<32x1xf32>
    %39 = arith.mulf %34, %34 : vector<32x128xf32>
    %cst_18 = arith.constant dense<0.000000e+00> : vector<32xf32>
    %40 = vector.multi_reduction <add>, %39, %cst_18 [1] : vector<32x128xf32> to vector<32xf32>
    %41 = vector.shape_cast %40 : vector<32xf32> to vector<32x1xf32>
    %cst_19 = arith.constant 1.280000e+02 : f32
    %42 = vector.broadcast %cst_19 : f32 to vector<32x1xf32>
    %43 = arith.divf %41, %42 : vector<32x1xf32>
    %44 = arith.mulf %38, %38 : vector<32x1xf32>
    %45 = arith.subf %43, %44 : vector<32x1xf32>
    %46 = vector.broadcast %38 : vector<32x1xf32> to vector<32x128xf32>
    %47 = arith.subf %34, %46 : vector<32x128xf32>
    %cst_20 = arith.constant 9.99999974E-6 : f32
    %48 = vector.broadcast %cst_20 : f32 to vector<32x1xf32>
    %49 = arith.addf %45, %48 : vector<32x1xf32>
    %50 = math.rsqrt %49 : vector<32x1xf32>
    %51 = vector.broadcast %50 : vector<32x1xf32> to vector<32x128xf32>
    %52 = arith.mulf %47, %51 : vector<32x128xf32>
    %53 = tpu.concatenate %33, %52 in 1 : vector<32x128xf32>, vector<32x128xf32> -> vector<32x256xf32>
    %54 = vector.extract_strided_slice %53 {offsets = [0, 0], sizes = [16, 256], strides = [1, 1]} : vector<32x256xf32> to vector<16x256xf32>
    %55 = vector.extract_strided_slice %53 {offsets = [16, 0], sizes = [16, 256], strides = [1, 1]} : vector<32x256xf32> to vector<16x256xf32>
    %56 = arith.negf %55 : vector<16x256xf32>
    %57 = math.exp %56 : vector<16x256xf32>
    %cst_21 = arith.constant 1.000000e+00 : f32
    %58 = vector.broadcast %cst_21 : f32 to vector<16x256xf32>
    %59 = arith.addf %58, %57 : vector<16x256xf32>
    %60 = arith.divf %58, %59 : vector<16x256xf32>
    %61 = arith.mulf %54, %60 : vector<16x256xf32>
    %c1_22 = arith.constant 1 : index
    %c0_23 = arith.constant 0 : index
    %c0_24 = arith.constant 0 : index
    %62 = vector.load %arg3[%c1_22, %c0_23, %c0_24] : memref<10x32x16xf32, #tpu.memory_space<vmem>>, vector<1x32x16xf32>
    %63 = vector.shape_cast %62 : vector<1x32x16xf32> to vector<32x16xf32>
    %cst_25 = arith.constant dense<0.000000e+00> : vector<32x256xf32>
    %64 = tpu.matmul %63, %61, %cst_25 {dimension_numbers = #tpu.dot_dimension_numbers<[1], [0], [0], [1], [0, 0, 1, 1], [], []>} : vector<32x16xf32>, vector<16x256xf32>, vector<32x256xf32> -> vector<32x256xf32>
    %65 = vector.extract_strided_slice %64 {offsets = [0, 0], sizes = [32, 128], strides = [1, 1]} : vector<32x256xf32> to vector<32x128xf32>
    %cst_26 = arith.constant dense<0.000000e+00> : vector<32xf32>
    %66 = vector.multi_reduction <add>, %65, %cst_26 [1] : vector<32x128xf32> to vector<32xf32>
    %67 = vector.shape_cast %66 : vector<32xf32> to vector<32x1xf32>
    %cst_27 = arith.constant 1.280000e+02 : f32
    %68 = vector.broadcast %cst_27 : f32 to vector<32x1xf32>
    %69 = arith.divf %67, %68 : vector<32x1xf32>
    %70 = arith.mulf %65, %65 : vector<32x128xf32>
    %cst_28 = arith.constant dense<0.000000e+00> : vector<32xf32>
    %71 = vector.multi_reduction <add>, %70, %cst_28 [1] : vector<32x128xf32> to vector<32xf32>
    %72 = vector.shape_cast %71 : vector<32xf32> to vector<32x1xf32>
    %cst_29 = arith.constant 1.280000e+02 : f32
    %73 = vector.broadcast %cst_29 : f32 to vector<32x1xf32>
    %74 = arith.divf %72, %73 : vector<32x1xf32>
    %75 = arith.mulf %69, %69 : vector<32x1xf32>
    %76 = arith.subf %74, %75 : vector<32x1xf32>
    %77 = vector.broadcast %69 : vector<32x1xf32> to vector<32x128xf32>
    %78 = arith.subf %65, %77 : vector<32x128xf32>
    %cst_30 = arith.constant 9.99999974E-6 : f32
    %79 = vector.broadcast %cst_30 : f32 to vector<32x1xf32>
    %80 = arith.addf %76, %79 : vector<32x1xf32>
    %81 = math.rsqrt %80 : vector<32x1xf32>
    %82 = vector.broadcast %81 : vector<32x1xf32> to vector<32x128xf32>
    %83 = arith.mulf %78, %82 : vector<32x128xf32>
    %84 = vector.extract_strided_slice %64 {offsets = [0, 128], sizes = [32, 128], strides = [1, 1]} : vector<32x256xf32> to vector<32x128xf32>
    %cst_31 = arith.constant dense<0.000000e+00> : vector<32xf32>
    %85 = vector.multi_reduction <add>, %84, %cst_31 [1] : vector<32x128xf32> to vector<32xf32>
    %86 = vector.shape_cast %85 : vector<32xf32> to vector<32x1xf32>
    %cst_32 = arith.constant 1.280000e+02 : f32
    %87 = vector.broadcast %cst_32 : f32 to vector<32x1xf32>
    %88 = arith.divf %86, %87 : vector<32x1xf32>
    %89 = arith.mulf %84, %84 : vector<32x128xf32>
    %cst_33 = arith.constant dense<0.000000e+00> : vector<32xf32>
    %90 = vector.multi_reduction <add>, %89, %cst_33 [1] : vector<32x128xf32> to vector<32xf32>
    %91 = vector.shape_cast %90 : vector<32xf32> to vector<32x1xf32>
    %cst_34 = arith.constant 1.280000e+02 : f32
    %92 = vector.broadcast %cst_34 : f32 to vector<32x1xf32>
    %93 = arith.divf %91, %92 : vector<32x1xf32>
    %94 = arith.mulf %88, %88 : vector<32x1xf32>
    %95 = arith.subf %93, %94 : vector<32x1xf32>
    %96 = vector.broadcast %88 : vector<32x1xf32> to vector<32x128xf32>
    %97 = arith.subf %84, %96 : vector<32x128xf32>
    %cst_35 = arith.constant 9.99999974E-6 : f32
    %98 = vector.broadcast %cst_35 : f32 to vector<32x1xf32>
    %99 = arith.addf %95, %98 : vector<32x1xf32>
    %100 = math.rsqrt %99 : vector<32x1xf32>
    %101 = vector.broadcast %100 : vector<32x1xf32> to vector<32x128xf32>
    %102 = arith.mulf %97, %101 : vector<32x128xf32>
    %103 = tpu.concatenate %83, %102 in 1 : vector<32x128xf32>, vector<32x128xf32> -> vector<32x256xf32>
    %104 = vector.extract_strided_slice %103 {offsets = [0, 0], sizes = [16, 256], strides = [1, 1]} : vector<32x256xf32> to vector<16x256xf32>
    %105 = vector.extract_strided_slice %103 {offsets = [16, 0], sizes = [16, 256], strides = [1, 1]} : vector<32x256xf32> to vector<16x256xf32>
    %106 = arith.negf %105 : vector<16x256xf32>
    %107 = math.exp %106 : vector<16x256xf32>
    %cst_36 = arith.constant 1.000000e+00 : f32
    %108 = vector.broadcast %cst_36 : f32 to vector<16x256xf32>
    %109 = arith.addf %108, %107 : vector<16x256xf32>
    %110 = arith.divf %108, %109 : vector<16x256xf32>
    %111 = arith.mulf %104, %110 : vector<16x256xf32>
    %112 = arith.addf %61, %111 : vector<16x256xf32>
    %cst_37 = arith.constant 0.707106769 : f32
    %113 = vector.broadcast %cst_37 : f32 to vector<16x256xf32>
    %114 = arith.mulf %112, %113 : vector<16x256xf32>
    %c2 = arith.constant 2 : index
    %c0_38 = arith.constant 0 : index
    %c0_39 = arith.constant 0 : index
    %115 = vector.load %arg3[%c2, %c0_38, %c0_39] : memref<10x32x16xf32, #tpu.memory_space<vmem>>, vector<1x32x16xf32>
    %116 = vector.shape_cast %115 : vector<1x32x16xf32> to vector<32x16xf32>
    %cst_40 = arith.constant dense<0.000000e+00> : vector<32x256xf32>
    %117 = tpu.matmul %116, %114, %cst_40 {dimension_numbers = #tpu.dot_dimension_numbers<[1], [0], [0], [1], [0, 0, 1, 1], [], []>} : vector<32x16xf32>, vector<16x256xf32>, vector<32x256xf32> -> vector<32x256xf32>
    %118 = vector.extract_strided_slice %117 {offsets = [0, 0], sizes = [32, 128], strides = [1, 1]} : vector<32x256xf32> to vector<32x128xf32>
    %cst_41 = arith.constant dense<0.000000e+00> : vector<32xf32>
    %119 = vector.multi_reduction <add>, %118, %cst_41 [1] : vector<32x128xf32> to vector<32xf32>
    %120 = vector.shape_cast %119 : vector<32xf32> to vector<32x1xf32>
    %cst_42 = arith.constant 1.280000e+02 : f32
    %121 = vector.broadcast %cst_42 : f32 to vector<32x1xf32>
    %122 = arith.divf %120, %121 : vector<32x1xf32>
    %123 = arith.mulf %118, %118 : vector<32x128xf32>
    %cst_43 = arith.constant dense<0.000000e+00> : vector<32xf32>
    %124 = vector.multi_reduction <add>, %123, %cst_43 [1] : vector<32x128xf32> to vector<32xf32>
    %125 = vector.shape_cast %124 : vector<32xf32> to vector<32x1xf32>
    %cst_44 = arith.constant 1.280000e+02 : f32
    %126 = vector.broadcast %cst_44 : f32 to vector<32x1xf32>
    %127 = arith.divf %125, %126 : vector<32x1xf32>
    %128 = arith.mulf %122, %122 : vector<32x1xf32>
    %129 = arith.subf %127, %128 : vector<32x1xf32>
    %130 = vector.broadcast %122 : vector<32x1xf32> to vector<32x128xf32>
    %131 = arith.subf %118, %130 : vector<32x128xf32>
    %cst_45 = arith.constant 9.99999974E-6 : f32
    %132 = vector.broadcast %cst_45 : f32 to vector<32x1xf32>
    %133 = arith.addf %129, %132 : vector<32x1xf32>
    %134 = math.rsqrt %133 : vector<32x1xf32>
    %135 = vector.broadcast %134 : vector<32x1xf32> to vector<32x128xf32>
    %136 = arith.mulf %131, %135 : vector<32x128xf32>
    %137 = vector.extract_strided_slice %117 {offsets = [0, 128], sizes = [32, 128], strides = [1, 1]} : vector<32x256xf32> to vector<32x128xf32>
    %cst_46 = arith.constant dense<0.000000e+00> : vector<32xf32>
    %138 = vector.multi_reduction <add>, %137, %cst_46 [1] : vector<32x128xf32> to vector<32xf32>
    %139 = vector.shape_cast %138 : vector<32xf32> to vector<32x1xf32>
    %cst_47 = arith.constant 1.280000e+02 : f32
    %140 = vector.broadcast %cst_47 : f32 to vector<32x1xf32>
    %141 = arith.divf %139, %140 : vector<32x1xf32>
    %142 = arith.mulf %137, %137 : vector<32x128xf32>
    %cst_48 = arith.constant dense<0.000000e+00> : vector<32xf32>
    %143 = vector.multi_reduction <add>, %142, %cst_48 [1] : vector<32x128xf32> to vector<32xf32>
    %144 = vector.shape_cast %143 : vector<32xf32> to vector<32x1xf32>
    %cst_49 = arith.constant 1.280000e+02 : f32
    %145 = vector.broadcast %cst_49 : f32 to vector<32x1xf32>
    %146 = arith.divf %144, %145 : vector<32x1xf32>
    %147 = arith.mulf %141, %141 : vector<32x1xf32>
    %148 = arith.subf %146, %147 : vector<32x1xf32>
    %149 = vector.broadcast %141 : vector<32x1xf32> to vector<32x128xf32>
    %150 = arith.subf %137, %149 : vector<32x128xf32>
    %cst_50 = arith.constant 9.99999974E-6 : f32
    %151 = vector.broadcast %cst_50 : f32 to vector<32x1xf32>
    %152 = arith.addf %148, %151 : vector<32x1xf32>
    %153 = math.rsqrt %152 : vector<32x1xf32>
    %154 = vector.broadcast %153 : vector<32x1xf32> to vector<32x128xf32>
    %155 = arith.mulf %150, %154 : vector<32x128xf32>
    %156 = tpu.concatenate %136, %155 in 1 : vector<32x128xf32>, vector<32x128xf32> -> vector<32x256xf32>
    %157 = vector.extract_strided_slice %156 {offsets = [0, 0], sizes = [16, 256], strides = [1, 1]} : vector<32x256xf32> to vector<16x256xf32>
    %158 = vector.extract_strided_slice %156 {offsets = [16, 0], sizes = [16, 256], strides = [1, 1]} : vector<32x256xf32> to vector<16x256xf32>
    %159 = arith.negf %158 : vector<16x256xf32>
    %160 = math.exp %159 : vector<16x256xf32>
    %cst_51 = arith.constant 1.000000e+00 : f32
    %161 = vector.broadcast %cst_51 : f32 to vector<16x256xf32>
    %162 = arith.addf %161, %160 : vector<16x256xf32>
    %163 = arith.divf %161, %162 : vector<16x256xf32>
    %164 = arith.mulf %157, %163 : vector<16x256xf32>
    %165 = arith.addf %114, %164 : vector<16x256xf32>
    %cst_52 = arith.constant 0.707106769 : f32
    %166 = vector.broadcast %cst_52 : f32 to vector<16x256xf32>
    %167 = arith.mulf %165, %166 : vector<16x256xf32>
    %c3 = arith.constant 3 : index
    %c0_53 = arith.constant 0 : index
    %c0_54 = arith.constant 0 : index
    %168 = vector.load %arg3[%c3, %c0_53, %c0_54] : memref<10x32x16xf32, #tpu.memory_space<vmem>>, vector<1x32x16xf32>
    %169 = vector.shape_cast %168 : vector<1x32x16xf32> to vector<32x16xf32>
    %cst_55 = arith.constant dense<0.000000e+00> : vector<32x256xf32>
    %170 = tpu.matmul %169, %167, %cst_55 {dimension_numbers = #tpu.dot_dimension_numbers<[1], [0], [0], [1], [0, 0, 1, 1], [], []>} : vector<32x16xf32>, vector<16x256xf32>, vector<32x256xf32> -> vector<32x256xf32>
    %171 = vector.extract_strided_slice %170 {offsets = [0, 0], sizes = [32, 128], strides = [1, 1]} : vector<32x256xf32> to vector<32x128xf32>
    %cst_56 = arith.constant dense<0.000000e+00> : vector<32xf32>
    %172 = vector.multi_reduction <add>, %171, %cst_56 [1] : vector<32x128xf32> to vector<32xf32>
    %173 = vector.shape_cast %172 : vector<32xf32> to vector<32x1xf32>
    %cst_57 = arith.constant 1.280000e+02 : f32
    %174 = vector.broadcast %cst_57 : f32 to vector<32x1xf32>
    %175 = arith.divf %173, %174 : vector<32x1xf32>
    %176 = arith.mulf %171, %171 : vector<32x128xf32>
    %cst_58 = arith.constant dense<0.000000e+00> : vector<32xf32>
    %177 = vector.multi_reduction <add>, %176, %cst_58 [1] : vector<32x128xf32> to vector<32xf32>
    %178 = vector.shape_cast %177 : vector<32xf32> to vector<32x1xf32>
    %cst_59 = arith.constant 1.280000e+02 : f32
    %179 = vector.broadcast %cst_59 : f32 to vector<32x1xf32>
    %180 = arith.divf %178, %179 : vector<32x1xf32>
    %181 = arith.mulf %175, %175 : vector<32x1xf32>
    %182 = arith.subf %180, %181 : vector<32x1xf32>
    %183 = vector.broadcast %175 : vector<32x1xf32> to vector<32x128xf32>
    %184 = arith.subf %171, %183 : vector<32x128xf32>
    %cst_60 = arith.constant 9.99999974E-6 : f32
    %185 = vector.broadcast %cst_60 : f32 to vector<32x1xf32>
    %186 = arith.addf %182, %185 : vector<32x1xf32>
    %187 = math.rsqrt %186 : vector<32x1xf32>
    %188 = vector.broadcast %187 : vector<32x1xf32> to vector<32x128xf32>
    %189 = arith.mulf %184, %188 : vector<32x128xf32>
    %190 = vector.extract_strided_slice %170 {offsets = [0, 128], sizes = [32, 128], strides = [1, 1]} : vector<32x256xf32> to vector<32x128xf32>
    %cst_61 = arith.constant dense<0.000000e+00> : vector<32xf32>
    %191 = vector.multi_reduction <add>, %190, %cst_61 [1] : vector<32x128xf32> to vector<32xf32>
    %192 = vector.shape_cast %191 : vector<32xf32> to vector<32x1xf32>
    %cst_62 = arith.constant 1.280000e+02 : f32
    %193 = vector.broadcast %cst_62 : f32 to vector<32x1xf32>
    %194 = arith.divf %192, %193 : vector<32x1xf32>
    %195 = arith.mulf %190, %190 : vector<32x128xf32>
    %cst_63 = arith.constant dense<0.000000e+00> : vector<32xf32>
    %196 = vector.multi_reduction <add>, %195, %cst_63 [1] : vector<32x128xf32> to vector<32xf32>
    %197 = vector.shape_cast %196 : vector<32xf32> to vector<32x1xf32>
    %cst_64 = arith.constant 1.280000e+02 : f32
    %198 = vector.broadcast %cst_64 : f32 to vector<32x1xf32>
    %199 = arith.divf %197, %198 : vector<32x1xf32>
    %200 = arith.mulf %194, %194 : vector<32x1xf32>
    %201 = arith.subf %199, %200 : vector<32x1xf32>
    %202 = vector.broadcast %194 : vector<32x1xf32> to vector<32x128xf32>
    %203 = arith.subf %190, %202 : vector<32x128xf32>
    %cst_65 = arith.constant 9.99999974E-6 : f32
    %204 = vector.broadcast %cst_65 : f32 to vector<32x1xf32>
    %205 = arith.addf %201, %204 : vector<32x1xf32>
    %206 = math.rsqrt %205 : vector<32x1xf32>
    %207 = vector.broadcast %206 : vector<32x1xf32> to vector<32x128xf32>
    %208 = arith.mulf %203, %207 : vector<32x128xf32>
    %209 = tpu.concatenate %189, %208 in 1 : vector<32x128xf32>, vector<32x128xf32> -> vector<32x256xf32>
    %210 = vector.extract_strided_slice %209 {offsets = [0, 0], sizes = [16, 256], strides = [1, 1]} : vector<32x256xf32> to vector<16x256xf32>
    %211 = vector.extract_strided_slice %209 {offsets = [16, 0], sizes = [16, 256], strides = [1, 1]} : vector<32x256xf32> to vector<16x256xf32>
    %212 = arith.negf %211 : vector<16x256xf32>
    %213 = math.exp %212 : vector<16x256xf32>
    %cst_66 = arith.constant 1.000000e+00 : f32
    %214 = vector.broadcast %cst_66 : f32 to vector<16x256xf32>
    %215 = arith.addf %214, %213 : vector<16x256xf32>
    %216 = arith.divf %214, %215 : vector<16x256xf32>
    %217 = arith.mulf %210, %216 : vector<16x256xf32>
    %218 = arith.addf %167, %217 : vector<16x256xf32>
    %cst_67 = arith.constant 0.707106769 : f32
    %219 = vector.broadcast %cst_67 : f32 to vector<16x256xf32>
    %220 = arith.mulf %218, %219 : vector<16x256xf32>
    %221 = vector.extract_strided_slice %220 {offsets = [8, 0], sizes = [8, 256], strides = [1, 1]} : vector<16x256xf32> to vector<8x256xf32>
    %c0_68 = arith.constant 0 : index
    %c0_69 = arith.constant 0 : index
    %c0_70 = arith.constant 0 : index
    %222 = vector.load %arg4[%c0_68, %c0_69, %c0_70] : memref<3x16x8xf32, #tpu.memory_space<vmem>>, vector<1x16x8xf32>
    %223 = vector.shape_cast %222 : vector<1x16x8xf32> to vector<16x8xf32>
    %cst_71 = arith.constant dense<0.000000e+00> : vector<16x256xf32>
    %224 = tpu.matmul %223, %221, %cst_71 {dimension_numbers = #tpu.dot_dimension_numbers<[1], [0], [0], [1], [0, 0, 1, 1], [], []>} : vector<16x8xf32>, vector<8x256xf32>, vector<16x256xf32> -> vector<16x256xf32>
    %225 = vector.extract_strided_slice %224 {offsets = [0, 0], sizes = [16, 128], strides = [1, 1]} : vector<16x256xf32> to vector<16x128xf32>
    %cst_72 = arith.constant dense<0.000000e+00> : vector<16xf32>
    %226 = vector.multi_reduction <add>, %225, %cst_72 [1] : vector<16x128xf32> to vector<16xf32>
    %227 = vector.shape_cast %226 : vector<16xf32> to vector<16x1xf32>
    %cst_73 = arith.constant 1.280000e+02 : f32
    %228 = vector.broadcast %cst_73 : f32 to vector<16x1xf32>
    %229 = arith.divf %227, %228 : vector<16x1xf32>
    %230 = arith.mulf %225, %225 : vector<16x128xf32>
    %cst_74 = arith.constant dense<0.000000e+00> : vector<16xf32>
    %231 = vector.multi_reduction <add>, %230, %cst_74 [1] : vector<16x128xf32> to vector<16xf32>
    %232 = vector.shape_cast %231 : vector<16xf32> to vector<16x1xf32>
    %cst_75 = arith.constant 1.280000e+02 : f32
    %233 = vector.broadcast %cst_75 : f32 to vector<16x1xf32>
    %234 = arith.divf %232, %233 : vector<16x1xf32>
    %235 = arith.mulf %229, %229 : vector<16x1xf32>
    %236 = arith.subf %234, %235 : vector<16x1xf32>
    %237 = vector.broadcast %229 : vector<16x1xf32> to vector<16x128xf32>
    %238 = arith.subf %225, %237 : vector<16x128xf32>
    %cst_76 = arith.constant 9.99999974E-6 : f32
    %239 = vector.broadcast %cst_76 : f32 to vector<16x1xf32>
    %240 = arith.addf %236, %239 : vector<16x1xf32>
    %241 = math.rsqrt %240 : vector<16x1xf32>
    %242 = vector.broadcast %241 : vector<16x1xf32> to vector<16x128xf32>
    %243 = arith.mulf %238, %242 : vector<16x128xf32>
    %244 = vector.extract_strided_slice %224 {offsets = [0, 128], sizes = [16, 128], strides = [1, 1]} : vector<16x256xf32> to vector<16x128xf32>
    %cst_77 = arith.constant dense<0.000000e+00> : vector<16xf32>
    %245 = vector.multi_reduction <add>, %244, %cst_77 [1] : vector<16x128xf32> to vector<16xf32>
    %246 = vector.shape_cast %245 : vector<16xf32> to vector<16x1xf32>
    %cst_78 = arith.constant 1.280000e+02 : f32
    %247 = vector.broadcast %cst_78 : f32 to vector<16x1xf32>
    %248 = arith.divf %246, %247 : vector<16x1xf32>
    %249 = arith.mulf %244, %244 : vector<16x128xf32>
    %cst_79 = arith.constant dense<0.000000e+00> : vector<16xf32>
    %250 = vector.multi_reduction <add>, %249, %cst_79 [1] : vector<16x128xf32> to vector<16xf32>
    %251 = vector.shape_cast %250 : vector<16xf32> to vector<16x1xf32>
    %cst_80 = arith.constant 1.280000e+02 : f32
    %252 = vector.broadcast %cst_80 : f32 to vector<16x1xf32>
    %253 = arith.divf %251, %252 : vector<16x1xf32>
    %254 = arith.mulf %248, %248 : vector<16x1xf32>
    %255 = arith.subf %253, %254 : vector<16x1xf32>
    %256 = vector.broadcast %248 : vector<16x1xf32> to vector<16x128xf32>
    %257 = arith.subf %244, %256 : vector<16x128xf32>
    %cst_81 = arith.constant 9.99999974E-6 : f32
    %258 = vector.broadcast %cst_81 : f32 to vector<16x1xf32>
    %259 = arith.addf %255, %258 : vector<16x1xf32>
    %260 = math.rsqrt %259 : vector<16x1xf32>
    %261 = vector.broadcast %260 : vector<16x1xf32> to vector<16x128xf32>
    %262 = arith.mulf %257, %261 : vector<16x128xf32>
    %263 = tpu.concatenate %243, %262 in 1 : vector<16x128xf32>, vector<16x128xf32> -> vector<16x256xf32>
    %264 = arith.mulf %263, %10 : vector<16x256xf32>
    %cst_82 = arith.constant 0.000000e+00 : f32
    %265 = vector.broadcast %cst_82 : f32 to vector<16x256xf32>
    %cst_83 = arith.constant 0.000000e+00 : f32
    %266 = vector.broadcast %cst_83 : f32 to vector<16x256xf32>
    %267 = vector.extract_strided_slice %264 {offsets = [0, 0], sizes = [1, 256], strides = [1, 1]} : vector<16x256xf32> to vector<1x256xf32>
    %268 = vector.broadcast %267 : vector<1x256xf32> to vector<16x256xf32>
    %269 = arith.cmpf oge, %268, %264 : vector<16x256xf32>
    %270 = arith.extui %269 : vector<16x256xi1> to vector<16x256xi32>
    %271 = arith.sitofp %270 : vector<16x256xi32> to vector<16x256xf32>
    %272 = arith.addf %265, %271 : vector<16x256xf32>
    %cst_84 = arith.constant 0.000000e+00 : f32
    %273 = vector.shape_cast %267 : vector<1x256xf32> to vector<1x256xf32>
    %274 = vector.broadcast %273 : vector<1x256xf32> to vector<16x256xf32>
    %275 = vector.broadcast %cst_84 : f32 to vector<16x256xf32>
    %276 = arith.select %269, %274, %275 : vector<16x256xi1>, vector<16x256xf32>
    %277 = arith.addf %266, %276 : vector<16x256xf32>
    %278 = vector.extract_strided_slice %264 {offsets = [1, 0], sizes = [1, 256], strides = [1, 1]} : vector<16x256xf32> to vector<1x256xf32>
    %279 = vector.broadcast %278 : vector<1x256xf32> to vector<16x256xf32>
    %280 = arith.cmpf oge, %279, %264 : vector<16x256xf32>
    %281 = arith.extui %280 : vector<16x256xi1> to vector<16x256xi32>
    %282 = arith.sitofp %281 : vector<16x256xi32> to vector<16x256xf32>
    %283 = arith.addf %272, %282 : vector<16x256xf32>
    %cst_85 = arith.constant 0.000000e+00 : f32
    %284 = vector.shape_cast %278 : vector<1x256xf32> to vector<1x256xf32>
    %285 = vector.broadcast %284 : vector<1x256xf32> to vector<16x256xf32>
    %286 = vector.broadcast %cst_85 : f32 to vector<16x256xf32>
    %287 = arith.select %280, %285, %286 : vector<16x256xi1>, vector<16x256xf32>
    %288 = arith.addf %277, %287 : vector<16x256xf32>
    %289 = vector.extract_strided_slice %264 {offsets = [2, 0], sizes = [1, 256], strides = [1, 1]} : vector<16x256xf32> to vector<1x256xf32>
    %290 = vector.broadcast %289 : vector<1x256xf32> to vector<16x256xf32>
    %291 = arith.cmpf oge, %290, %264 : vector<16x256xf32>
    %292 = arith.extui %291 : vector<16x256xi1> to vector<16x256xi32>
    %293 = arith.sitofp %292 : vector<16x256xi32> to vector<16x256xf32>
    %294 = arith.addf %283, %293 : vector<16x256xf32>
    %cst_86 = arith.constant 0.000000e+00 : f32
    %295 = vector.shape_cast %289 : vector<1x256xf32> to vector<1x256xf32>
    %296 = vector.broadcast %295 : vector<1x256xf32> to vector<16x256xf32>
    %297 = vector.broadcast %cst_86 : f32 to vector<16x256xf32>
    %298 = arith.select %291, %296, %297 : vector<16x256xi1>, vector<16x256xf32>
    %299 = arith.addf %288, %298 : vector<16x256xf32>
    %300 = vector.extract_strided_slice %264 {offsets = [3, 0], sizes = [1, 256], strides = [1, 1]} : vector<16x256xf32> to vector<1x256xf32>
    %301 = vector.broadcast %300 : vector<1x256xf32> to vector<16x256xf32>
    %302 = arith.cmpf oge, %301, %264 : vector<16x256xf32>
    %303 = arith.extui %302 : vector<16x256xi1> to vector<16x256xi32>
    %304 = arith.sitofp %303 : vector<16x256xi32> to vector<16x256xf32>
    %305 = arith.addf %294, %304 : vector<16x256xf32>
    %cst_87 = arith.constant 0.000000e+00 : f32
    %306 = vector.shape_cast %300 : vector<1x256xf32> to vector<1x256xf32>
    %307 = vector.broadcast %306 : vector<1x256xf32> to vector<16x256xf32>
    %308 = vector.broadcast %cst_87 : f32 to vector<16x256xf32>
    %309 = arith.select %302, %307, %308 : vector<16x256xi1>, vector<16x256xf32>
    %310 = arith.addf %299, %309 : vector<16x256xf32>
    %311 = vector.extract_strided_slice %264 {offsets = [4, 0], sizes = [1, 256], strides = [1, 1]} : vector<16x256xf32> to vector<1x256xf32>
    %312 = vector.broadcast %311 : vector<1x256xf32> to vector<16x256xf32>
    %313 = arith.cmpf oge, %312, %264 : vector<16x256xf32>
    %314 = arith.extui %313 : vector<16x256xi1> to vector<16x256xi32>
    %315 = arith.sitofp %314 : vector<16x256xi32> to vector<16x256xf32>
    %316 = arith.addf %305, %315 : vector<16x256xf32>
    %cst_88 = arith.constant 0.000000e+00 : f32
    %317 = vector.shape_cast %311 : vector<1x256xf32> to vector<1x256xf32>
    %318 = vector.broadcast %317 : vector<1x256xf32> to vector<16x256xf32>
    %319 = vector.broadcast %cst_88 : f32 to vector<16x256xf32>
    %320 = arith.select %313, %318, %319 : vector<16x256xi1>, vector<16x256xf32>
    %321 = arith.addf %310, %320 : vector<16x256xf32>
    %322 = vector.extract_strided_slice %264 {offsets = [5, 0], sizes = [1, 256], strides = [1, 1]} : vector<16x256xf32> to vector<1x256xf32>
    %323 = vector.broadcast %322 : vector<1x256xf32> to vector<16x256xf32>
    %324 = arith.cmpf oge, %323, %264 : vector<16x256xf32>
    %325 = arith.extui %324 : vector<16x256xi1> to vector<16x256xi32>
    %326 = arith.sitofp %325 : vector<16x256xi32> to vector<16x256xf32>
    %327 = arith.addf %316, %326 : vector<16x256xf32>
    %cst_89 = arith.constant 0.000000e+00 : f32
    %328 = vector.shape_cast %322 : vector<1x256xf32> to vector<1x256xf32>
    %329 = vector.broadcast %328 : vector<1x256xf32> to vector<16x256xf32>
    %330 = vector.broadcast %cst_89 : f32 to vector<16x256xf32>
    %331 = arith.select %324, %329, %330 : vector<16x256xi1>, vector<16x256xf32>
    %332 = arith.addf %321, %331 : vector<16x256xf32>
    %333 = vector.extract_strided_slice %264 {offsets = [6, 0], sizes = [1, 256], strides = [1, 1]} : vector<16x256xf32> to vector<1x256xf32>
    %334 = vector.broadcast %333 : vector<1x256xf32> to vector<16x256xf32>
    %335 = arith.cmpf oge, %334, %264 : vector<16x256xf32>
    %336 = arith.extui %335 : vector<16x256xi1> to vector<16x256xi32>
    %337 = arith.sitofp %336 : vector<16x256xi32> to vector<16x256xf32>
    %338 = arith.addf %327, %337 : vector<16x256xf32>
    %cst_90 = arith.constant 0.000000e+00 : f32
    %339 = vector.shape_cast %333 : vector<1x256xf32> to vector<1x256xf32>
    %340 = vector.broadcast %339 : vector<1x256xf32> to vector<16x256xf32>
    %341 = vector.broadcast %cst_90 : f32 to vector<16x256xf32>
    %342 = arith.select %335, %340, %341 : vector<16x256xi1>, vector<16x256xf32>
    %343 = arith.addf %332, %342 : vector<16x256xf32>
    %344 = vector.extract_strided_slice %264 {offsets = [7, 0], sizes = [1, 256], strides = [1, 1]} : vector<16x256xf32> to vector<1x256xf32>
    %345 = vector.broadcast %344 : vector<1x256xf32> to vector<16x256xf32>
    %346 = arith.cmpf oge, %345, %264 : vector<16x256xf32>
    %347 = arith.extui %346 : vector<16x256xi1> to vector<16x256xi32>
    %348 = arith.sitofp %347 : vector<16x256xi32> to vector<16x256xf32>
    %349 = arith.addf %338, %348 : vector<16x256xf32>
    %cst_91 = arith.constant 0.000000e+00 : f32
    %350 = vector.shape_cast %344 : vector<1x256xf32> to vector<1x256xf32>
    %351 = vector.broadcast %350 : vector<1x256xf32> to vector<16x256xf32>
    %352 = vector.broadcast %cst_91 : f32 to vector<16x256xf32>
    %353 = arith.select %346, %351, %352 : vector<16x256xi1>, vector<16x256xf32>
    %354 = arith.addf %343, %353 : vector<16x256xf32>
    %355 = vector.extract_strided_slice %264 {offsets = [8, 0], sizes = [1, 256], strides = [1, 1]} : vector<16x256xf32> to vector<1x256xf32>
    %356 = vector.broadcast %355 : vector<1x256xf32> to vector<16x256xf32>
    %357 = arith.cmpf oge, %356, %264 : vector<16x256xf32>
    %358 = arith.extui %357 : vector<16x256xi1> to vector<16x256xi32>
    %359 = arith.sitofp %358 : vector<16x256xi32> to vector<16x256xf32>
    %360 = arith.addf %349, %359 : vector<16x256xf32>
    %cst_92 = arith.constant 0.000000e+00 : f32
    %361 = vector.shape_cast %355 : vector<1x256xf32> to vector<1x256xf32>
    %362 = vector.broadcast %361 : vector<1x256xf32> to vector<16x256xf32>
    %363 = vector.broadcast %cst_92 : f32 to vector<16x256xf32>
    %364 = arith.select %357, %362, %363 : vector<16x256xi1>, vector<16x256xf32>
    %365 = arith.addf %354, %364 : vector<16x256xf32>
    %366 = vector.extract_strided_slice %264 {offsets = [9, 0], sizes = [1, 256], strides = [1, 1]} : vector<16x256xf32> to vector<1x256xf32>
    %367 = vector.broadcast %366 : vector<1x256xf32> to vector<16x256xf32>
    %368 = arith.cmpf oge, %367, %264 : vector<16x256xf32>
    %369 = arith.extui %368 : vector<16x256xi1> to vector<16x256xi32>
    %370 = arith.sitofp %369 : vector<16x256xi32> to vector<16x256xf32>
    %371 = arith.addf %360, %370 : vector<16x256xf32>
    %cst_93 = arith.constant 0.000000e+00 : f32
    %372 = vector.shape_cast %366 : vector<1x256xf32> to vector<1x256xf32>
    %373 = vector.broadcast %372 : vector<1x256xf32> to vector<16x256xf32>
    %374 = vector.broadcast %cst_93 : f32 to vector<16x256xf32>
    %375 = arith.select %368, %373, %374 : vector<16x256xi1>, vector<16x256xf32>
    %376 = arith.addf %365, %375 : vector<16x256xf32>
    %377 = vector.extract_strided_slice %264 {offsets = [10, 0], sizes = [1, 256], strides = [1, 1]} : vector<16x256xf32> to vector<1x256xf32>
    %378 = vector.broadcast %377 : vector<1x256xf32> to vector<16x256xf32>
    %379 = arith.cmpf oge, %378, %264 : vector<16x256xf32>
    %380 = arith.extui %379 : vector<16x256xi1> to vector<16x256xi32>
    %381 = arith.sitofp %380 : vector<16x256xi32> to vector<16x256xf32>
    %382 = arith.addf %371, %381 : vector<16x256xf32>
    %cst_94 = arith.constant 0.000000e+00 : f32
    %383 = vector.shape_cast %377 : vector<1x256xf32> to vector<1x256xf32>
    %384 = vector.broadcast %383 : vector<1x256xf32> to vector<16x256xf32>
    %385 = vector.broadcast %cst_94 : f32 to vector<16x256xf32>
    %386 = arith.select %379, %384, %385 : vector<16x256xi1>, vector<16x256xf32>
    %387 = arith.addf %376, %386 : vector<16x256xf32>
    %388 = vector.extract_strided_slice %264 {offsets = [11, 0], sizes = [1, 256], strides = [1, 1]} : vector<16x256xf32> to vector<1x256xf32>
    %389 = vector.broadcast %388 : vector<1x256xf32> to vector<16x256xf32>
    %390 = arith.cmpf oge, %389, %264 : vector<16x256xf32>
    %391 = arith.extui %390 : vector<16x256xi1> to vector<16x256xi32>
    %392 = arith.sitofp %391 : vector<16x256xi32> to vector<16x256xf32>
    %393 = arith.addf %382, %392 : vector<16x256xf32>
    %cst_95 = arith.constant 0.000000e+00 : f32
    %394 = vector.shape_cast %388 : vector<1x256xf32> to vector<1x256xf32>
    %395 = vector.broadcast %394 : vector<1x256xf32> to vector<16x256xf32>
    %396 = vector.broadcast %cst_95 : f32 to vector<16x256xf32>
    %397 = arith.select %390, %395, %396 : vector<16x256xi1>, vector<16x256xf32>
    %398 = arith.addf %387, %397 : vector<16x256xf32>
    %399 = vector.extract_strided_slice %264 {offsets = [12, 0], sizes = [1, 256], strides = [1, 1]} : vector<16x256xf32> to vector<1x256xf32>
    %400 = vector.broadcast %399 : vector<1x256xf32> to vector<16x256xf32>
    %401 = arith.cmpf oge, %400, %264 : vector<16x256xf32>
    %402 = arith.extui %401 : vector<16x256xi1> to vector<16x256xi32>
    %403 = arith.sitofp %402 : vector<16x256xi32> to vector<16x256xf32>
    %404 = arith.addf %393, %403 : vector<16x256xf32>
    %cst_96 = arith.constant 0.000000e+00 : f32
    %405 = vector.shape_cast %399 : vector<1x256xf32> to vector<1x256xf32>
    %406 = vector.broadcast %405 : vector<1x256xf32> to vector<16x256xf32>
    %407 = vector.broadcast %cst_96 : f32 to vector<16x256xf32>
    %408 = arith.select %401, %406, %407 : vector<16x256xi1>, vector<16x256xf32>
    %409 = arith.addf %398, %408 : vector<16x256xf32>
    %410 = vector.extract_strided_slice %264 {offsets = [13, 0], sizes = [1, 256], strides = [1, 1]} : vector<16x256xf32> to vector<1x256xf32>
    %411 = vector.broadcast %410 : vector<1x256xf32> to vector<16x256xf32>
    %412 = arith.cmpf oge, %411, %264 : vector<16x256xf32>
    %413 = arith.extui %412 : vector<16x256xi1> to vector<16x256xi32>
    %414 = arith.sitofp %413 : vector<16x256xi32> to vector<16x256xf32>
    %415 = arith.addf %404, %414 : vector<16x256xf32>
    %cst_97 = arith.constant 0.000000e+00 : f32
    %416 = vector.shape_cast %410 : vector<1x256xf32> to vector<1x256xf32>
    %417 = vector.broadcast %416 : vector<1x256xf32> to vector<16x256xf32>
    %418 = vector.broadcast %cst_97 : f32 to vector<16x256xf32>
    %419 = arith.select %412, %417, %418 : vector<16x256xi1>, vector<16x256xf32>
    %420 = arith.addf %409, %419 : vector<16x256xf32>
    %421 = vector.extract_strided_slice %264 {offsets = [14, 0], sizes = [1, 256], strides = [1, 1]} : vector<16x256xf32> to vector<1x256xf32>
    %422 = vector.broadcast %421 : vector<1x256xf32> to vector<16x256xf32>
    %423 = arith.cmpf oge, %422, %264 : vector<16x256xf32>
    %424 = arith.extui %423 : vector<16x256xi1> to vector<16x256xi32>
    %425 = arith.sitofp %424 : vector<16x256xi32> to vector<16x256xf32>
    %426 = arith.addf %415, %425 : vector<16x256xf32>
    %cst_98 = arith.constant 0.000000e+00 : f32
    %427 = vector.shape_cast %421 : vector<1x256xf32> to vector<1x256xf32>
    %428 = vector.broadcast %427 : vector<1x256xf32> to vector<16x256xf32>
    %429 = vector.broadcast %cst_98 : f32 to vector<16x256xf32>
    %430 = arith.select %423, %428, %429 : vector<16x256xi1>, vector<16x256xf32>
    %431 = arith.addf %420, %430 : vector<16x256xf32>
    %432 = vector.extract_strided_slice %264 {offsets = [15, 0], sizes = [1, 256], strides = [1, 1]} : vector<16x256xf32> to vector<1x256xf32>
    %433 = vector.broadcast %432 : vector<1x256xf32> to vector<16x256xf32>
    %434 = arith.cmpf oge, %433, %264 : vector<16x256xf32>
    %435 = arith.extui %434 : vector<16x256xi1> to vector<16x256xi32>
    %436 = arith.sitofp %435 : vector<16x256xi32> to vector<16x256xf32>
    %437 = arith.addf %426, %436 : vector<16x256xf32>
    %cst_99 = arith.constant 0.000000e+00 : f32
    %438 = vector.shape_cast %432 : vector<1x256xf32> to vector<1x256xf32>
    %439 = vector.broadcast %438 : vector<1x256xf32> to vector<16x256xf32>
    %440 = vector.broadcast %cst_99 : f32 to vector<16x256xf32>
    %441 = arith.select %434, %439, %440 : vector<16x256xi1>, vector<16x256xf32>
    %442 = arith.addf %431, %441 : vector<16x256xf32>
    %443 = arith.mulf %437, %264 : vector<16x256xf32>
    %cst_100 = arith.constant 1.000000e+00 : f32
    %444 = vector.broadcast %cst_100 : f32 to vector<16x256xf32>
    %445 = arith.addf %444, %443 : vector<16x256xf32>
    %446 = arith.cmpf ogt, %445, %442 : vector<16x256xf32>
    %447 = arith.extui %446 : vector<16x256xi1> to vector<16x256xi32>
    %448 = arith.sitofp %447 : vector<16x256xi32> to vector<16x256xf32>
    %cst_101 = arith.constant dense<0.000000e+00> : vector<256xf32>
    %449 = vector.multi_reduction <add>, %448, %cst_101 [0] : vector<16x256xf32> to vector<256xf32>
    %450 = vector.shape_cast %449 : vector<256xf32> to vector<1x256xf32>
    %451 = arith.mulf %264, %448 : vector<16x256xf32>
    %cst_102 = arith.constant dense<0.000000e+00> : vector<256xf32>
    %452 = vector.multi_reduction <add>, %451, %cst_102 [0] : vector<16x256xf32> to vector<256xf32>
    %453 = vector.shape_cast %452 : vector<256xf32> to vector<1x256xf32>
    %cst_103 = arith.constant 1.000000e+00 : f32
    %454 = vector.broadcast %cst_103 : f32 to vector<1x256xf32>
    %455 = arith.subf %453, %454 : vector<1x256xf32>
    %456 = arith.divf %455, %450 : vector<1x256xf32>
    %457 = vector.broadcast %456 : vector<1x256xf32> to vector<16x256xf32>
    %458 = arith.subf %264, %457 : vector<16x256xf32>
    %cst_104 = arith.constant 0.000000e+00 : f32
    %459 = vector.broadcast %cst_104 : f32 to vector<16x256xf32>
    %460 = arith.maximumf %458, %459 : vector<16x256xf32>
    %cst_105 = arith.constant 1.300000e+00 : f32
    %461 = vector.broadcast %cst_105 : f32 to vector<16x256xf32>
    %462 = arith.subf %461, %460 : vector<16x256xf32>
    %463 = arith.mulf %462, %10 : vector<16x256xf32>
    %cst_106 = arith.constant 1.000000e-15 : f32
    %464 = vector.broadcast %cst_106 : f32 to vector<16x256xf32>
    %465 = arith.addf %460, %464 : vector<16x256xf32>
    %466 = math.log %465 : vector<16x256xf32>
    %467 = arith.mulf %460, %466 : vector<16x256xf32>
    %cst_107 = arith.constant dense<0.000000e+00> : vector<256xf32>
    %468 = vector.multi_reduction <add>, %467, %cst_107 [0] : vector<16x256xf32> to vector<256xf32>
    %469 = vector.shape_cast %468 : vector<256xf32> to vector<1x256xf32>
    %470 = arith.addf %11, %469 : vector<1x256xf32>
    %471 = arith.mulf %460, %9 : vector<16x256xf32>
    %c0_108 = arith.constant 0 : index
    %c0_109 = arith.constant 0 : index
    %c0_110 = arith.constant 0 : index
    %472 = vector.load %arg3[%c0_108, %c0_109, %c0_110] : memref<10x32x16xf32, #tpu.memory_space<vmem>>, vector<1x32x16xf32>
    %473 = vector.shape_cast %472 : vector<1x32x16xf32> to vector<32x16xf32>
    %cst_111 = arith.constant dense<0.000000e+00> : vector<32x256xf32>
    %474 = tpu.matmul %473, %471, %cst_111 {dimension_numbers = #tpu.dot_dimension_numbers<[1], [0], [0], [1], [0, 0, 1, 1], [], []>} : vector<32x16xf32>, vector<16x256xf32>, vector<32x256xf32> -> vector<32x256xf32>
    %475 = vector.extract_strided_slice %474 {offsets = [0, 0], sizes = [32, 128], strides = [1, 1]} : vector<32x256xf32> to vector<32x128xf32>
    %cst_112 = arith.constant dense<0.000000e+00> : vector<32xf32>
    %476 = vector.multi_reduction <add>, %475, %cst_112 [1] : vector<32x128xf32> to vector<32xf32>
    %477 = vector.shape_cast %476 : vector<32xf32> to vector<32x1xf32>
    %cst_113 = arith.constant 1.280000e+02 : f32
    %478 = vector.broadcast %cst_113 : f32 to vector<32x1xf32>
    %479 = arith.divf %477, %478 : vector<32x1xf32>
    %480 = arith.mulf %475, %475 : vector<32x128xf32>
    %cst_114 = arith.constant dense<0.000000e+00> : vector<32xf32>
    %481 = vector.multi_reduction <add>, %480, %cst_114 [1] : vector<32x128xf32> to vector<32xf32>
    %482 = vector.shape_cast %481 : vector<32xf32> to vector<32x1xf32>
    %cst_115 = arith.constant 1.280000e+02 : f32
    %483 = vector.broadcast %cst_115 : f32 to vector<32x1xf32>
    %484 = arith.divf %482, %483 : vector<32x1xf32>
    %485 = arith.mulf %479, %479 : vector<32x1xf32>
    %486 = arith.subf %484, %485 : vector<32x1xf32>
    %487 = vector.broadcast %479 : vector<32x1xf32> to vector<32x128xf32>
    %488 = arith.subf %475, %487 : vector<32x128xf32>
    %cst_116 = arith.constant 9.99999974E-6 : f32
    %489 = vector.broadcast %cst_116 : f32 to vector<32x1xf32>
    %490 = arith.addf %486, %489 : vector<32x1xf32>
    %491 = math.rsqrt %490 : vector<32x1xf32>
    %492 = vector.broadcast %491 : vector<32x1xf32> to vector<32x128xf32>
    %493 = arith.mulf %488, %492 : vector<32x128xf32>
    %494 = vector.extract_strided_slice %474 {offsets = [0, 128], sizes = [32, 128], strides = [1, 1]} : vector<32x256xf32> to vector<32x128xf32>
    %cst_117 = arith.constant dense<0.000000e+00> : vector<32xf32>
    %495 = vector.multi_reduction <add>, %494, %cst_117 [1] : vector<32x128xf32> to vector<32xf32>
    %496 = vector.shape_cast %495 : vector<32xf32> to vector<32x1xf32>
    %cst_118 = arith.constant 1.280000e+02 : f32
    %497 = vector.broadcast %cst_118 : f32 to vector<32x1xf32>
    %498 = arith.divf %496, %497 : vector<32x1xf32>
    %499 = arith.mulf %494, %494 : vector<32x128xf32>
    %cst_119 = arith.constant dense<0.000000e+00> : vector<32xf32>
    %500 = vector.multi_reduction <add>, %499, %cst_119 [1] : vector<32x128xf32> to vector<32xf32>
    %501 = vector.shape_cast %500 : vector<32xf32> to vector<32x1xf32>
    %cst_120 = arith.constant 1.280000e+02 : f32
    %502 = vector.broadcast %cst_120 : f32 to vector<32x1xf32>
    %503 = arith.divf %501, %502 : vector<32x1xf32>
    %504 = arith.mulf %498, %498 : vector<32x1xf32>
    %505 = arith.subf %503, %504 : vector<32x1xf32>
    %506 = vector.broadcast %498 : vector<32x1xf32> to vector<32x128xf32>
    %507 = arith.subf %494, %506 : vector<32x128xf32>
    %cst_121 = arith.constant 9.99999974E-6 : f32
    %508 = vector.broadcast %cst_121 : f32 to vector<32x1xf32>
    %509 = arith.addf %505, %508 : vector<32x1xf32>
    %510 = math.rsqrt %509 : vector<32x1xf32>
    %511 = vector.broadcast %510 : vector<32x1xf32> to vector<32x128xf32>
    %512 = arith.mulf %507, %511 : vector<32x128xf32>
    %513 = tpu.concatenate %493, %512 in 1 : vector<32x128xf32>, vector<32x128xf32> -> vector<32x256xf32>
    %514 = vector.extract_strided_slice %513 {offsets = [0, 0], sizes = [16, 256], strides = [1, 1]} : vector<32x256xf32> to vector<16x256xf32>
    %515 = vector.extract_strided_slice %513 {offsets = [16, 0], sizes = [16, 256], strides = [1, 1]} : vector<32x256xf32> to vector<16x256xf32>
    %516 = arith.negf %515 : vector<16x256xf32>
    %517 = math.exp %516 : vector<16x256xf32>
    %cst_122 = arith.constant 1.000000e+00 : f32
    %518 = vector.broadcast %cst_122 : f32 to vector<16x256xf32>
    %519 = arith.addf %518, %517 : vector<16x256xf32>
    %520 = arith.divf %518, %519 : vector<16x256xf32>
    %521 = arith.mulf %514, %520 : vector<16x256xf32>
    %c1_123 = arith.constant 1 : index
    %c0_124 = arith.constant 0 : index
    %c0_125 = arith.constant 0 : index
    %522 = vector.load %arg3[%c1_123, %c0_124, %c0_125] : memref<10x32x16xf32, #tpu.memory_space<vmem>>, vector<1x32x16xf32>
    %523 = vector.shape_cast %522 : vector<1x32x16xf32> to vector<32x16xf32>
    %cst_126 = arith.constant dense<0.000000e+00> : vector<32x256xf32>
    %524 = tpu.matmul %523, %521, %cst_126 {dimension_numbers = #tpu.dot_dimension_numbers<[1], [0], [0], [1], [0, 0, 1, 1], [], []>} : vector<32x16xf32>, vector<16x256xf32>, vector<32x256xf32> -> vector<32x256xf32>
    %525 = vector.extract_strided_slice %524 {offsets = [0, 0], sizes = [32, 128], strides = [1, 1]} : vector<32x256xf32> to vector<32x128xf32>
    %cst_127 = arith.constant dense<0.000000e+00> : vector<32xf32>
    %526 = vector.multi_reduction <add>, %525, %cst_127 [1] : vector<32x128xf32> to vector<32xf32>
    %527 = vector.shape_cast %526 : vector<32xf32> to vector<32x1xf32>
    %cst_128 = arith.constant 1.280000e+02 : f32
    %528 = vector.broadcast %cst_128 : f32 to vector<32x1xf32>
    %529 = arith.divf %527, %528 : vector<32x1xf32>
    %530 = arith.mulf %525, %525 : vector<32x128xf32>
    %cst_129 = arith.constant dense<0.000000e+00> : vector<32xf32>
    %531 = vector.multi_reduction <add>, %530, %cst_129 [1] : vector<32x128xf32> to vector<32xf32>
    %532 = vector.shape_cast %531 : vector<32xf32> to vector<32x1xf32>
    %cst_130 = arith.constant 1.280000e+02 : f32
    %533 = vector.broadcast %cst_130 : f32 to vector<32x1xf32>
    %534 = arith.divf %532, %533 : vector<32x1xf32>
    %535 = arith.mulf %529, %529 : vector<32x1xf32>
    %536 = arith.subf %534, %535 : vector<32x1xf32>
    %537 = vector.broadcast %529 : vector<32x1xf32> to vector<32x128xf32>
    %538 = arith.subf %525, %537 : vector<32x128xf32>
    %cst_131 = arith.constant 9.99999974E-6 : f32
    %539 = vector.broadcast %cst_131 : f32 to vector<32x1xf32>
    %540 = arith.addf %536, %539 : vector<32x1xf32>
    %541 = math.rsqrt %540 : vector<32x1xf32>
    %542 = vector.broadcast %541 : vector<32x1xf32> to vector<32x128xf32>
    %543 = arith.mulf %538, %542 : vector<32x128xf32>
    %544 = vector.extract_strided_slice %524 {offsets = [0, 128], sizes = [32, 128], strides = [1, 1]} : vector<32x256xf32> to vector<32x128xf32>
    %cst_132 = arith.constant dense<0.000000e+00> : vector<32xf32>
    %545 = vector.multi_reduction <add>, %544, %cst_132 [1] : vector<32x128xf32> to vector<32xf32>
    %546 = vector.shape_cast %545 : vector<32xf32> to vector<32x1xf32>
    %cst_133 = arith.constant 1.280000e+02 : f32
    %547 = vector.broadcast %cst_133 : f32 to vector<32x1xf32>
    %548 = arith.divf %546, %547 : vector<32x1xf32>
    %549 = arith.mulf %544, %544 : vector<32x128xf32>
    %cst_134 = arith.constant dense<0.000000e+00> : vector<32xf32>
    %550 = vector.multi_reduction <add>, %549, %cst_134 [1] : vector<32x128xf32> to vector<32xf32>
    %551 = vector.shape_cast %550 : vector<32xf32> to vector<32x1xf32>
    %cst_135 = arith.constant 1.280000e+02 : f32
    %552 = vector.broadcast %cst_135 : f32 to vector<32x1xf32>
    %553 = arith.divf %551, %552 : vector<32x1xf32>
    %554 = arith.mulf %548, %548 : vector<32x1xf32>
    %555 = arith.subf %553, %554 : vector<32x1xf32>
    %556 = vector.broadcast %548 : vector<32x1xf32> to vector<32x128xf32>
    %557 = arith.subf %544, %556 : vector<32x128xf32>
    %cst_136 = arith.constant 9.99999974E-6 : f32
    %558 = vector.broadcast %cst_136 : f32 to vector<32x1xf32>
    %559 = arith.addf %555, %558 : vector<32x1xf32>
    %560 = math.rsqrt %559 : vector<32x1xf32>
    %561 = vector.broadcast %560 : vector<32x1xf32> to vector<32x128xf32>
    %562 = arith.mulf %557, %561 : vector<32x128xf32>
    %563 = tpu.concatenate %543, %562 in 1 : vector<32x128xf32>, vector<32x128xf32> -> vector<32x256xf32>
    %564 = vector.extract_strided_slice %563 {offsets = [0, 0], sizes = [16, 256], strides = [1, 1]} : vector<32x256xf32> to vector<16x256xf32>
    %565 = vector.extract_strided_slice %563 {offsets = [16, 0], sizes = [16, 256], strides = [1, 1]} : vector<32x256xf32> to vector<16x256xf32>
    %566 = arith.negf %565 : vector<16x256xf32>
    %567 = math.exp %566 : vector<16x256xf32>
    %cst_137 = arith.constant 1.000000e+00 : f32
    %568 = vector.broadcast %cst_137 : f32 to vector<16x256xf32>
    %569 = arith.addf %568, %567 : vector<16x256xf32>
    %570 = arith.divf %568, %569 : vector<16x256xf32>
    %571 = arith.mulf %564, %570 : vector<16x256xf32>
    %572 = arith.addf %521, %571 : vector<16x256xf32>
    %cst_138 = arith.constant 0.707106769 : f32
    %573 = vector.broadcast %cst_138 : f32 to vector<16x256xf32>
    %574 = arith.mulf %572, %573 : vector<16x256xf32>
    %c4 = arith.constant 4 : index
    %c0_139 = arith.constant 0 : index
    %c0_140 = arith.constant 0 : index
    %575 = vector.load %arg3[%c4, %c0_139, %c0_140] : memref<10x32x16xf32, #tpu.memory_space<vmem>>, vector<1x32x16xf32>
    %576 = vector.shape_cast %575 : vector<1x32x16xf32> to vector<32x16xf32>
    %cst_141 = arith.constant dense<0.000000e+00> : vector<32x256xf32>
    %577 = tpu.matmul %576, %574, %cst_141 {dimension_numbers = #tpu.dot_dimension_numbers<[1], [0], [0], [1], [0, 0, 1, 1], [], []>} : vector<32x16xf32>, vector<16x256xf32>, vector<32x256xf32> -> vector<32x256xf32>
    %578 = vector.extract_strided_slice %577 {offsets = [0, 0], sizes = [32, 128], strides = [1, 1]} : vector<32x256xf32> to vector<32x128xf32>
    %cst_142 = arith.constant dense<0.000000e+00> : vector<32xf32>
    %579 = vector.multi_reduction <add>, %578, %cst_142 [1] : vector<32x128xf32> to vector<32xf32>
    %580 = vector.shape_cast %579 : vector<32xf32> to vector<32x1xf32>
    %cst_143 = arith.constant 1.280000e+02 : f32
    %581 = vector.broadcast %cst_143 : f32 to vector<32x1xf32>
    %582 = arith.divf %580, %581 : vector<32x1xf32>
    %583 = arith.mulf %578, %578 : vector<32x128xf32>
    %cst_144 = arith.constant dense<0.000000e+00> : vector<32xf32>
    %584 = vector.multi_reduction <add>, %583, %cst_144 [1] : vector<32x128xf32> to vector<32xf32>
    %585 = vector.shape_cast %584 : vector<32xf32> to vector<32x1xf32>
    %cst_145 = arith.constant 1.280000e+02 : f32
    %586 = vector.broadcast %cst_145 : f32 to vector<32x1xf32>
    %587 = arith.divf %585, %586 : vector<32x1xf32>
    %588 = arith.mulf %582, %582 : vector<32x1xf32>
    %589 = arith.subf %587, %588 : vector<32x1xf32>
    %590 = vector.broadcast %582 : vector<32x1xf32> to vector<32x128xf32>
    %591 = arith.subf %578, %590 : vector<32x128xf32>
    %cst_146 = arith.constant 9.99999974E-6 : f32
    %592 = vector.broadcast %cst_146 : f32 to vector<32x1xf32>
    %593 = arith.addf %589, %592 : vector<32x1xf32>
    %594 = math.rsqrt %593 : vector<32x1xf32>
    %595 = vector.broadcast %594 : vector<32x1xf32> to vector<32x128xf32>
    %596 = arith.mulf %591, %595 : vector<32x128xf32>
    %597 = vector.extract_strided_slice %577 {offsets = [0, 128], sizes = [32, 128], strides = [1, 1]} : vector<32x256xf32> to vector<32x128xf32>
    %cst_147 = arith.constant dense<0.000000e+00> : vector<32xf32>
    %598 = vector.multi_reduction <add>, %597, %cst_147 [1] : vector<32x128xf32> to vector<32xf32>
    %599 = vector.shape_cast %598 : vector<32xf32> to vector<32x1xf32>
    %cst_148 = arith.constant 1.280000e+02 : f32
    %600 = vector.broadcast %cst_148 : f32 to vector<32x1xf32>
    %601 = arith.divf %599, %600 : vector<32x1xf32>
    %602 = arith.mulf %597, %597 : vector<32x128xf32>
    %cst_149 = arith.constant dense<0.000000e+00> : vector<32xf32>
    %603 = vector.multi_reduction <add>, %602, %cst_149 [1] : vector<32x128xf32> to vector<32xf32>
    %604 = vector.shape_cast %603 : vector<32xf32> to vector<32x1xf32>
    %cst_150 = arith.constant 1.280000e+02 : f32
    %605 = vector.broadcast %cst_150 : f32 to vector<32x1xf32>
    %606 = arith.divf %604, %605 : vector<32x1xf32>
    %607 = arith.mulf %601, %601 : vector<32x1xf32>
    %608 = arith.subf %606, %607 : vector<32x1xf32>
    %609 = vector.broadcast %601 : vector<32x1xf32> to vector<32x128xf32>
    %610 = arith.subf %597, %609 : vector<32x128xf32>
    %cst_151 = arith.constant 9.99999974E-6 : f32
    %611 = vector.broadcast %cst_151 : f32 to vector<32x1xf32>
    %612 = arith.addf %608, %611 : vector<32x1xf32>
    %613 = math.rsqrt %612 : vector<32x1xf32>
    %614 = vector.broadcast %613 : vector<32x1xf32> to vector<32x128xf32>
    %615 = arith.mulf %610, %614 : vector<32x128xf32>
    %616 = tpu.concatenate %596, %615 in 1 : vector<32x128xf32>, vector<32x128xf32> -> vector<32x256xf32>
    %617 = vector.extract_strided_slice %616 {offsets = [0, 0], sizes = [16, 256], strides = [1, 1]} : vector<32x256xf32> to vector<16x256xf32>
    %618 = vector.extract_strided_slice %616 {offsets = [16, 0], sizes = [16, 256], strides = [1, 1]} : vector<32x256xf32> to vector<16x256xf32>
    %619 = arith.negf %618 : vector<16x256xf32>
    %620 = math.exp %619 : vector<16x256xf32>
    %cst_152 = arith.constant 1.000000e+00 : f32
    %621 = vector.broadcast %cst_152 : f32 to vector<16x256xf32>
    %622 = arith.addf %621, %620 : vector<16x256xf32>
    %623 = arith.divf %621, %622 : vector<16x256xf32>
    %624 = arith.mulf %617, %623 : vector<16x256xf32>
    %625 = arith.addf %574, %624 : vector<16x256xf32>
    %cst_153 = arith.constant 0.707106769 : f32
    %626 = vector.broadcast %cst_153 : f32 to vector<16x256xf32>
    %627 = arith.mulf %625, %626 : vector<16x256xf32>
    %c5 = arith.constant 5 : index
    %c0_154 = arith.constant 0 : index
    %c0_155 = arith.constant 0 : index
    %628 = vector.load %arg3[%c5, %c0_154, %c0_155] : memref<10x32x16xf32, #tpu.memory_space<vmem>>, vector<1x32x16xf32>
    %629 = vector.shape_cast %628 : vector<1x32x16xf32> to vector<32x16xf32>
    %cst_156 = arith.constant dense<0.000000e+00> : vector<32x256xf32>
    %630 = tpu.matmul %629, %627, %cst_156 {dimension_numbers = #tpu.dot_dimension_numbers<[1], [0], [0], [1], [0, 0, 1, 1], [], []>} : vector<32x16xf32>, vector<16x256xf32>, vector<32x256xf32> -> vector<32x256xf32>
    %631 = vector.extract_strided_slice %630 {offsets = [0, 0], sizes = [32, 128], strides = [1, 1]} : vector<32x256xf32> to vector<32x128xf32>
    %cst_157 = arith.constant dense<0.000000e+00> : vector<32xf32>
    %632 = vector.multi_reduction <add>, %631, %cst_157 [1] : vector<32x128xf32> to vector<32xf32>
    %633 = vector.shape_cast %632 : vector<32xf32> to vector<32x1xf32>
    %cst_158 = arith.constant 1.280000e+02 : f32
    %634 = vector.broadcast %cst_158 : f32 to vector<32x1xf32>
    %635 = arith.divf %633, %634 : vector<32x1xf32>
    %636 = arith.mulf %631, %631 : vector<32x128xf32>
    %cst_159 = arith.constant dense<0.000000e+00> : vector<32xf32>
    %637 = vector.multi_reduction <add>, %636, %cst_159 [1] : vector<32x128xf32> to vector<32xf32>
    %638 = vector.shape_cast %637 : vector<32xf32> to vector<32x1xf32>
    %cst_160 = arith.constant 1.280000e+02 : f32
    %639 = vector.broadcast %cst_160 : f32 to vector<32x1xf32>
    %640 = arith.divf %638, %639 : vector<32x1xf32>
    %641 = arith.mulf %635, %635 : vector<32x1xf32>
    %642 = arith.subf %640, %641 : vector<32x1xf32>
    %643 = vector.broadcast %635 : vector<32x1xf32> to vector<32x128xf32>
    %644 = arith.subf %631, %643 : vector<32x128xf32>
    %cst_161 = arith.constant 9.99999974E-6 : f32
    %645 = vector.broadcast %cst_161 : f32 to vector<32x1xf32>
    %646 = arith.addf %642, %645 : vector<32x1xf32>
    %647 = math.rsqrt %646 : vector<32x1xf32>
    %648 = vector.broadcast %647 : vector<32x1xf32> to vector<32x128xf32>
    %649 = arith.mulf %644, %648 : vector<32x128xf32>
    %650 = vector.extract_strided_slice %630 {offsets = [0, 128], sizes = [32, 128], strides = [1, 1]} : vector<32x256xf32> to vector<32x128xf32>
    %cst_162 = arith.constant dense<0.000000e+00> : vector<32xf32>
    %651 = vector.multi_reduction <add>, %650, %cst_162 [1] : vector<32x128xf32> to vector<32xf32>
    %652 = vector.shape_cast %651 : vector<32xf32> to vector<32x1xf32>
    %cst_163 = arith.constant 1.280000e+02 : f32
    %653 = vector.broadcast %cst_163 : f32 to vector<32x1xf32>
    %654 = arith.divf %652, %653 : vector<32x1xf32>
    %655 = arith.mulf %650, %650 : vector<32x128xf32>
    %cst_164 = arith.constant dense<0.000000e+00> : vector<32xf32>
    %656 = vector.multi_reduction <add>, %655, %cst_164 [1] : vector<32x128xf32> to vector<32xf32>
    %657 = vector.shape_cast %656 : vector<32xf32> to vector<32x1xf32>
    %cst_165 = arith.constant 1.280000e+02 : f32
    %658 = vector.broadcast %cst_165 : f32 to vector<32x1xf32>
    %659 = arith.divf %657, %658 : vector<32x1xf32>
    %660 = arith.mulf %654, %654 : vector<32x1xf32>
    %661 = arith.subf %659, %660 : vector<32x1xf32>
    %662 = vector.broadcast %654 : vector<32x1xf32> to vector<32x128xf32>
    %663 = arith.subf %650, %662 : vector<32x128xf32>
    %cst_166 = arith.constant 9.99999974E-6 : f32
    %664 = vector.broadcast %cst_166 : f32 to vector<32x1xf32>
    %665 = arith.addf %661, %664 : vector<32x1xf32>
    %666 = math.rsqrt %665 : vector<32x1xf32>
    %667 = vector.broadcast %666 : vector<32x1xf32> to vector<32x128xf32>
    %668 = arith.mulf %663, %667 : vector<32x128xf32>
    %669 = tpu.concatenate %649, %668 in 1 : vector<32x128xf32>, vector<32x128xf32> -> vector<32x256xf32>
    %670 = vector.extract_strided_slice %669 {offsets = [0, 0], sizes = [16, 256], strides = [1, 1]} : vector<32x256xf32> to vector<16x256xf32>
    %671 = vector.extract_strided_slice %669 {offsets = [16, 0], sizes = [16, 256], strides = [1, 1]} : vector<32x256xf32> to vector<16x256xf32>
    %672 = arith.negf %671 : vector<16x256xf32>
    %673 = math.exp %672 : vector<16x256xf32>
    %cst_167 = arith.constant 1.000000e+00 : f32
    %674 = vector.broadcast %cst_167 : f32 to vector<16x256xf32>
    %675 = arith.addf %674, %673 : vector<16x256xf32>
    %676 = arith.divf %674, %675 : vector<16x256xf32>
    %677 = arith.mulf %670, %676 : vector<16x256xf32>
    %678 = arith.addf %627, %677 : vector<16x256xf32>
    %cst_168 = arith.constant 0.707106769 : f32
    %679 = vector.broadcast %cst_168 : f32 to vector<16x256xf32>
    %680 = arith.mulf %678, %679 : vector<16x256xf32>
    %681 = vector.extract_strided_slice %680 {offsets = [8, 0], sizes = [8, 256], strides = [1, 1]} : vector<16x256xf32> to vector<8x256xf32>
    %682 = vector.extract_strided_slice %680 {offsets = [0, 0], sizes = [8, 256], strides = [1, 1]} : vector<16x256xf32> to vector<8x256xf32>
    %cst_169 = arith.constant 0.000000e+00 : f32
    %683 = vector.broadcast %cst_169 : f32 to vector<8x256xf32>
    %684 = arith.maximumf %682, %683 : vector<8x256xf32>
    %c0_170 = arith.constant 0 : index
    %c0_171 = arith.constant 0 : index
    %c0_172 = arith.constant 0 : index
    %685 = vector.load %arg5[%c0_170, %c0_171, %c0_172] : memref<3x8x256xf32, #tpu.memory_space<vmem>>, vector<1x8x256xf32>
    %686 = vector.shape_cast %685 : vector<1x8x256xf32> to vector<8x256xf32>
    %687 = vector.shape_cast %684 : vector<8x256xf32> to vector<1x8x256xf32>
    tpu.vector_store %arg5[%c0_170, %c0_171, %c0_172], %687 {strides = array<i32>} : memref<3x8x256xf32, #tpu.memory_space<vmem>>, vector<1x8x256xf32>,
    %c1_173 = arith.constant 1 : index
    %c0_174 = arith.constant 0 : index
    %c0_175 = arith.constant 0 : index
    %688 = vector.load %arg4[%c1_173, %c0_174, %c0_175] : memref<3x16x8xf32, #tpu.memory_space<vmem>>, vector<1x16x8xf32>
    %689 = vector.shape_cast %688 : vector<1x16x8xf32> to vector<16x8xf32>
    %cst_176 = arith.constant dense<0.000000e+00> : vector<16x256xf32>
    %690 = tpu.matmul %689, %681, %cst_176 {dimension_numbers = #tpu.dot_dimension_numbers<[1], [0], [0], [1], [0, 0, 1, 1], [], []>} : vector<16x8xf32>, vector<8x256xf32>, vector<16x256xf32> -> vector<16x256xf32>
    %691 = vector.extract_strided_slice %690 {offsets = [0, 0], sizes = [16, 128], strides = [1, 1]} : vector<16x256xf32> to vector<16x128xf32>
    %cst_177 = arith.constant dense<0.000000e+00> : vector<16xf32>
    %692 = vector.multi_reduction <add>, %691, %cst_177 [1] : vector<16x128xf32> to vector<16xf32>
    %693 = vector.shape_cast %692 : vector<16xf32> to vector<16x1xf32>
    %cst_178 = arith.constant 1.280000e+02 : f32
    %694 = vector.broadcast %cst_178 : f32 to vector<16x1xf32>
    %695 = arith.divf %693, %694 : vector<16x1xf32>
    %696 = arith.mulf %691, %691 : vector<16x128xf32>
    %cst_179 = arith.constant dense<0.000000e+00> : vector<16xf32>
    %697 = vector.multi_reduction <add>, %696, %cst_179 [1] : vector<16x128xf32> to vector<16xf32>
    %698 = vector.shape_cast %697 : vector<16xf32> to vector<16x1xf32>
    %cst_180 = arith.constant 1.280000e+02 : f32
    %699 = vector.broadcast %cst_180 : f32 to vector<16x1xf32>
    %700 = arith.divf %698, %699 : vector<16x1xf32>
    %701 = arith.mulf %695, %695 : vector<16x1xf32>
    %702 = arith.subf %700, %701 : vector<16x1xf32>
    %703 = vector.broadcast %695 : vector<16x1xf32> to vector<16x128xf32>
    %704 = arith.subf %691, %703 : vector<16x128xf32>
    %cst_181 = arith.constant 9.99999974E-6 : f32
    %705 = vector.broadcast %cst_181 : f32 to vector<16x1xf32>
    %706 = arith.addf %702, %705 : vector<16x1xf32>
    %707 = math.rsqrt %706 : vector<16x1xf32>
    %708 = vector.broadcast %707 : vector<16x1xf32> to vector<16x128xf32>
    %709 = arith.mulf %704, %708 : vector<16x128xf32>
    %710 = vector.extract_strided_slice %690 {offsets = [0, 128], sizes = [16, 128], strides = [1, 1]} : vector<16x256xf32> to vector<16x128xf32>
    %cst_182 = arith.constant dense<0.000000e+00> : vector<16xf32>
    %711 = vector.multi_reduction <add>, %710, %cst_182 [1] : vector<16x128xf32> to vector<16xf32>
    %712 = vector.shape_cast %711 : vector<16xf32> to vector<16x1xf32>
    %cst_183 = arith.constant 1.280000e+02 : f32
    %713 = vector.broadcast %cst_183 : f32 to vector<16x1xf32>
    %714 = arith.divf %712, %713 : vector<16x1xf32>
    %715 = arith.mulf %710, %710 : vector<16x128xf32>
    %cst_184 = arith.constant dense<0.000000e+00> : vector<16xf32>
    %716 = vector.multi_reduction <add>, %715, %cst_184 [1] : vector<16x128xf32> to vector<16xf32>
    %717 = vector.shape_cast %716 : vector<16xf32> to vector<16x1xf32>
    %cst_185 = arith.constant 1.280000e+02 : f32
    %718 = vector.broadcast %cst_185 : f32 to vector<16x1xf32>
    %719 = arith.divf %717, %718 : vector<16x1xf32>
    %720 = arith.mulf %714, %714 : vector<16x1xf32>
    %721 = arith.subf %719, %720 : vector<16x1xf32>
    %722 = vector.broadcast %714 : vector<16x1xf32> to vector<16x128xf32>
    %723 = arith.subf %710, %722 : vector<16x128xf32>
    %cst_186 = arith.constant 9.99999974E-6 : f32
    %724 = vector.broadcast %cst_186 : f32 to vector<16x1xf32>
    %725 = arith.addf %721, %724 : vector<16x1xf32>
    %726 = math.rsqrt %725 : vector<16x1xf32>
    %727 = vector.broadcast %726 : vector<16x1xf32> to vector<16x128xf32>
    %728 = arith.mulf %723, %727 : vector<16x128xf32>
    %729 = tpu.concatenate %709, %728 in 1 : vector<16x128xf32>, vector<16x128xf32> -> vector<16x256xf32>
    %730 = arith.mulf %729, %463 : vector<16x256xf32>
    %cst_187 = arith.constant 0.000000e+00 : f32
    %731 = vector.broadcast %cst_187 : f32 to vector<16x256xf32>
    %cst_188 = arith.constant 0.000000e+00 : f32
    %732 = vector.broadcast %cst_188 : f32 to vector<16x256xf32>
    %733 = vector.extract_strided_slice %730 {offsets = [0, 0], sizes = [1, 256], strides = [1, 1]} : vector<16x256xf32> to vector<1x256xf32>
    %734 = vector.broadcast %733 : vector<1x256xf32> to vector<16x256xf32>
    %735 = arith.cmpf oge, %734, %730 : vector<16x256xf32>
    %736 = arith.extui %735 : vector<16x256xi1> to vector<16x256xi32>
    %737 = arith.sitofp %736 : vector<16x256xi32> to vector<16x256xf32>
    %738 = arith.addf %731, %737 : vector<16x256xf32>
    %cst_189 = arith.constant 0.000000e+00 : f32
    %739 = vector.shape_cast %733 : vector<1x256xf32> to vector<1x256xf32>
    %740 = vector.broadcast %739 : vector<1x256xf32> to vector<16x256xf32>
    %741 = vector.broadcast %cst_189 : f32 to vector<16x256xf32>
    %742 = arith.select %735, %740, %741 : vector<16x256xi1>, vector<16x256xf32>
    %743 = arith.addf %732, %742 : vector<16x256xf32>
    %744 = vector.extract_strided_slice %730 {offsets = [1, 0], sizes = [1, 256], strides = [1, 1]} : vector<16x256xf32> to vector<1x256xf32>
    %745 = vector.broadcast %744 : vector<1x256xf32> to vector<16x256xf32>
    %746 = arith.cmpf oge, %745, %730 : vector<16x256xf32>
    %747 = arith.extui %746 : vector<16x256xi1> to vector<16x256xi32>
    %748 = arith.sitofp %747 : vector<16x256xi32> to vector<16x256xf32>
    %749 = arith.addf %738, %748 : vector<16x256xf32>
    %cst_190 = arith.constant 0.000000e+00 : f32
    %750 = vector.shape_cast %744 : vector<1x256xf32> to vector<1x256xf32>
    %751 = vector.broadcast %750 : vector<1x256xf32> to vector<16x256xf32>
    %752 = vector.broadcast %cst_190 : f32 to vector<16x256xf32>
    %753 = arith.select %746, %751, %752 : vector<16x256xi1>, vector<16x256xf32>
    %754 = arith.addf %743, %753 : vector<16x256xf32>
    %755 = vector.extract_strided_slice %730 {offsets = [2, 0], sizes = [1, 256], strides = [1, 1]} : vector<16x256xf32> to vector<1x256xf32>
    %756 = vector.broadcast %755 : vector<1x256xf32> to vector<16x256xf32>
    %757 = arith.cmpf oge, %756, %730 : vector<16x256xf32>
    %758 = arith.extui %757 : vector<16x256xi1> to vector<16x256xi32>
    %759 = arith.sitofp %758 : vector<16x256xi32> to vector<16x256xf32>
    %760 = arith.addf %749, %759 : vector<16x256xf32>
    %cst_191 = arith.constant 0.000000e+00 : f32
    %761 = vector.shape_cast %755 : vector<1x256xf32> to vector<1x256xf32>
    %762 = vector.broadcast %761 : vector<1x256xf32> to vector<16x256xf32>
    %763 = vector.broadcast %cst_191 : f32 to vector<16x256xf32>
    %764 = arith.select %757, %762, %763 : vector<16x256xi1>, vector<16x256xf32>
    %765 = arith.addf %754, %764 : vector<16x256xf32>
    %766 = vector.extract_strided_slice %730 {offsets = [3, 0], sizes = [1, 256], strides = [1, 1]} : vector<16x256xf32> to vector<1x256xf32>
    %767 = vector.broadcast %766 : vector<1x256xf32> to vector<16x256xf32>
    %768 = arith.cmpf oge, %767, %730 : vector<16x256xf32>
    %769 = arith.extui %768 : vector<16x256xi1> to vector<16x256xi32>
    %770 = arith.sitofp %769 : vector<16x256xi32> to vector<16x256xf32>
    %771 = arith.addf %760, %770 : vector<16x256xf32>
    %cst_192 = arith.constant 0.000000e+00 : f32
    %772 = vector.shape_cast %766 : vector<1x256xf32> to vector<1x256xf32>
    %773 = vector.broadcast %772 : vector<1x256xf32> to vector<16x256xf32>
    %774 = vector.broadcast %cst_192 : f32 to vector<16x256xf32>
    %775 = arith.select %768, %773, %774 : vector<16x256xi1>, vector<16x256xf32>
    %776 = arith.addf %765, %775 : vector<16x256xf32>
    %777 = vector.extract_strided_slice %730 {offsets = [4, 0], sizes = [1, 256], strides = [1, 1]} : vector<16x256xf32> to vector<1x256xf32>
    %778 = vector.broadcast %777 : vector<1x256xf32> to vector<16x256xf32>
    %779 = arith.cmpf oge, %778, %730 : vector<16x256xf32>
    %780 = arith.extui %779 : vector<16x256xi1> to vector<16x256xi32>
    %781 = arith.sitofp %780 : vector<16x256xi32> to vector<16x256xf32>
    %782 = arith.addf %771, %781 : vector<16x256xf32>
    %cst_193 = arith.constant 0.000000e+00 : f32
    %783 = vector.shape_cast %777 : vector<1x256xf32> to vector<1x256xf32>
    %784 = vector.broadcast %783 : vector<1x256xf32> to vector<16x256xf32>
    %785 = vector.broadcast %cst_193 : f32 to vector<16x256xf32>
    %786 = arith.select %779, %784, %785 : vector<16x256xi1>, vector<16x256xf32>
    %787 = arith.addf %776, %786 : vector<16x256xf32>
    %788 = vector.extract_strided_slice %730 {offsets = [5, 0], sizes = [1, 256], strides = [1, 1]} : vector<16x256xf32> to vector<1x256xf32>
    %789 = vector.broadcast %788 : vector<1x256xf32> to vector<16x256xf32>
    %790 = arith.cmpf oge, %789, %730 : vector<16x256xf32>
    %791 = arith.extui %790 : vector<16x256xi1> to vector<16x256xi32>
    %792 = arith.sitofp %791 : vector<16x256xi32> to vector<16x256xf32>
    %793 = arith.addf %782, %792 : vector<16x256xf32>
    %cst_194 = arith.constant 0.000000e+00 : f32
    %794 = vector.shape_cast %788 : vector<1x256xf32> to vector<1x256xf32>
    %795 = vector.broadcast %794 : vector<1x256xf32> to vector<16x256xf32>
    %796 = vector.broadcast %cst_194 : f32 to vector<16x256xf32>
    %797 = arith.select %790, %795, %796 : vector<16x256xi1>, vector<16x256xf32>
    %798 = arith.addf %787, %797 : vector<16x256xf32>
    %799 = vector.extract_strided_slice %730 {offsets = [6, 0], sizes = [1, 256], strides = [1, 1]} : vector<16x256xf32> to vector<1x256xf32>
    %800 = vector.broadcast %799 : vector<1x256xf32> to vector<16x256xf32>
    %801 = arith.cmpf oge, %800, %730 : vector<16x256xf32>
    %802 = arith.extui %801 : vector<16x256xi1> to vector<16x256xi32>
    %803 = arith.sitofp %802 : vector<16x256xi32> to vector<16x256xf32>
    %804 = arith.addf %793, %803 : vector<16x256xf32>
    %cst_195 = arith.constant 0.000000e+00 : f32
    %805 = vector.shape_cast %799 : vector<1x256xf32> to vector<1x256xf32>
    %806 = vector.broadcast %805 : vector<1x256xf32> to vector<16x256xf32>
    %807 = vector.broadcast %cst_195 : f32 to vector<16x256xf32>
    %808 = arith.select %801, %806, %807 : vector<16x256xi1>, vector<16x256xf32>
    %809 = arith.addf %798, %808 : vector<16x256xf32>
    %810 = vector.extract_strided_slice %730 {offsets = [7, 0], sizes = [1, 256], strides = [1, 1]} : vector<16x256xf32> to vector<1x256xf32>
    %811 = vector.broadcast %810 : vector<1x256xf32> to vector<16x256xf32>
    %812 = arith.cmpf oge, %811, %730 : vector<16x256xf32>
    %813 = arith.extui %812 : vector<16x256xi1> to vector<16x256xi32>
    %814 = arith.sitofp %813 : vector<16x256xi32> to vector<16x256xf32>
    %815 = arith.addf %804, %814 : vector<16x256xf32>
    %cst_196 = arith.constant 0.000000e+00 : f32
    %816 = vector.shape_cast %810 : vector<1x256xf32> to vector<1x256xf32>
    %817 = vector.broadcast %816 : vector<1x256xf32> to vector<16x256xf32>
    %818 = vector.broadcast %cst_196 : f32 to vector<16x256xf32>
    %819 = arith.select %812, %817, %818 : vector<16x256xi1>, vector<16x256xf32>
    %820 = arith.addf %809, %819 : vector<16x256xf32>
    %821 = vector.extract_strided_slice %730 {offsets = [8, 0], sizes = [1, 256], strides = [1, 1]} : vector<16x256xf32> to vector<1x256xf32>
    %822 = vector.broadcast %821 : vector<1x256xf32> to vector<16x256xf32>
    %823 = arith.cmpf oge, %822, %730 : vector<16x256xf32>
    %824 = arith.extui %823 : vector<16x256xi1> to vector<16x256xi32>
    %825 = arith.sitofp %824 : vector<16x256xi32> to vector<16x256xf32>
    %826 = arith.addf %815, %825 : vector<16x256xf32>
    %cst_197 = arith.constant 0.000000e+00 : f32
    %827 = vector.shape_cast %821 : vector<1x256xf32> to vector<1x256xf32>
    %828 = vector.broadcast %827 : vector<1x256xf32> to vector<16x256xf32>
    %829 = vector.broadcast %cst_197 : f32 to vector<16x256xf32>
    %830 = arith.select %823, %828, %829 : vector<16x256xi1>, vector<16x256xf32>
    %831 = arith.addf %820, %830 : vector<16x256xf32>
    %832 = vector.extract_strided_slice %730 {offsets = [9, 0], sizes = [1, 256], strides = [1, 1]} : vector<16x256xf32> to vector<1x256xf32>
    %833 = vector.broadcast %832 : vector<1x256xf32> to vector<16x256xf32>
    %834 = arith.cmpf oge, %833, %730 : vector<16x256xf32>
    %835 = arith.extui %834 : vector<16x256xi1> to vector<16x256xi32>
    %836 = arith.sitofp %835 : vector<16x256xi32> to vector<16x256xf32>
    %837 = arith.addf %826, %836 : vector<16x256xf32>
    %cst_198 = arith.constant 0.000000e+00 : f32
    %838 = vector.shape_cast %832 : vector<1x256xf32> to vector<1x256xf32>
    %839 = vector.broadcast %838 : vector<1x256xf32> to vector<16x256xf32>
    %840 = vector.broadcast %cst_198 : f32 to vector<16x256xf32>
    %841 = arith.select %834, %839, %840 : vector<16x256xi1>, vector<16x256xf32>
    %842 = arith.addf %831, %841 : vector<16x256xf32>
    %843 = vector.extract_strided_slice %730 {offsets = [10, 0], sizes = [1, 256], strides = [1, 1]} : vector<16x256xf32> to vector<1x256xf32>
    %844 = vector.broadcast %843 : vector<1x256xf32> to vector<16x256xf32>
    %845 = arith.cmpf oge, %844, %730 : vector<16x256xf32>
    %846 = arith.extui %845 : vector<16x256xi1> to vector<16x256xi32>
    %847 = arith.sitofp %846 : vector<16x256xi32> to vector<16x256xf32>
    %848 = arith.addf %837, %847 : vector<16x256xf32>
    %cst_199 = arith.constant 0.000000e+00 : f32
    %849 = vector.shape_cast %843 : vector<1x256xf32> to vector<1x256xf32>
    %850 = vector.broadcast %849 : vector<1x256xf32> to vector<16x256xf32>
    %851 = vector.broadcast %cst_199 : f32 to vector<16x256xf32>
    %852 = arith.select %845, %850, %851 : vector<16x256xi1>, vector<16x256xf32>
    %853 = arith.addf %842, %852 : vector<16x256xf32>
    %854 = vector.extract_strided_slice %730 {offsets = [11, 0], sizes = [1, 256], strides = [1, 1]} : vector<16x256xf32> to vector<1x256xf32>
    %855 = vector.broadcast %854 : vector<1x256xf32> to vector<16x256xf32>
    %856 = arith.cmpf oge, %855, %730 : vector<16x256xf32>
    %857 = arith.extui %856 : vector<16x256xi1> to vector<16x256xi32>
    %858 = arith.sitofp %857 : vector<16x256xi32> to vector<16x256xf32>
    %859 = arith.addf %848, %858 : vector<16x256xf32>
    %cst_200 = arith.constant 0.000000e+00 : f32
    %860 = vector.shape_cast %854 : vector<1x256xf32> to vector<1x256xf32>
    %861 = vector.broadcast %860 : vector<1x256xf32> to vector<16x256xf32>
    %862 = vector.broadcast %cst_200 : f32 to vector<16x256xf32>
    %863 = arith.select %856, %861, %862 : vector<16x256xi1>, vector<16x256xf32>
    %864 = arith.addf %853, %863 : vector<16x256xf32>
    %865 = vector.extract_strided_slice %730 {offsets = [12, 0], sizes = [1, 256], strides = [1, 1]} : vector<16x256xf32> to vector<1x256xf32>
    %866 = vector.broadcast %865 : vector<1x256xf32> to vector<16x256xf32>
    %867 = arith.cmpf oge, %866, %730 : vector<16x256xf32>
    %868 = arith.extui %867 : vector<16x256xi1> to vector<16x256xi32>
    %869 = arith.sitofp %868 : vector<16x256xi32> to vector<16x256xf32>
    %870 = arith.addf %859, %869 : vector<16x256xf32>
    %cst_201 = arith.constant 0.000000e+00 : f32
    %871 = vector.shape_cast %865 : vector<1x256xf32> to vector<1x256xf32>
    %872 = vector.broadcast %871 : vector<1x256xf32> to vector<16x256xf32>
    %873 = vector.broadcast %cst_201 : f32 to vector<16x256xf32>
    %874 = arith.select %867, %872, %873 : vector<16x256xi1>, vector<16x256xf32>
    %875 = arith.addf %864, %874 : vector<16x256xf32>
    %876 = vector.extract_strided_slice %730 {offsets = [13, 0], sizes = [1, 256], strides = [1, 1]} : vector<16x256xf32> to vector<1x256xf32>
    %877 = vector.broadcast %876 : vector<1x256xf32> to vector<16x256xf32>
    %878 = arith.cmpf oge, %877, %730 : vector<16x256xf32>
    %879 = arith.extui %878 : vector<16x256xi1> to vector<16x256xi32>
    %880 = arith.sitofp %879 : vector<16x256xi32> to vector<16x256xf32>
    %881 = arith.addf %870, %880 : vector<16x256xf32>
    %cst_202 = arith.constant 0.000000e+00 : f32
    %882 = vector.shape_cast %876 : vector<1x256xf32> to vector<1x256xf32>
    %883 = vector.broadcast %882 : vector<1x256xf32> to vector<16x256xf32>
    %884 = vector.broadcast %cst_202 : f32 to vector<16x256xf32>
    %885 = arith.select %878, %883, %884 : vector<16x256xi1>, vector<16x256xf32>
    %886 = arith.addf %875, %885 : vector<16x256xf32>
    %887 = vector.extract_strided_slice %730 {offsets = [14, 0], sizes = [1, 256], strides = [1, 1]} : vector<16x256xf32> to vector<1x256xf32>
    %888 = vector.broadcast %887 : vector<1x256xf32> to vector<16x256xf32>
    %889 = arith.cmpf oge, %888, %730 : vector<16x256xf32>
    %890 = arith.extui %889 : vector<16x256xi1> to vector<16x256xi32>
    %891 = arith.sitofp %890 : vector<16x256xi32> to vector<16x256xf32>
    %892 = arith.addf %881, %891 : vector<16x256xf32>
    %cst_203 = arith.constant 0.000000e+00 : f32
    %893 = vector.shape_cast %887 : vector<1x256xf32> to vector<1x256xf32>
    %894 = vector.broadcast %893 : vector<1x256xf32> to vector<16x256xf32>
    %895 = vector.broadcast %cst_203 : f32 to vector<16x256xf32>
    %896 = arith.select %889, %894, %895 : vector<16x256xi1>, vector<16x256xf32>
    %897 = arith.addf %886, %896 : vector<16x256xf32>
    %898 = vector.extract_strided_slice %730 {offsets = [15, 0], sizes = [1, 256], strides = [1, 1]} : vector<16x256xf32> to vector<1x256xf32>
    %899 = vector.broadcast %898 : vector<1x256xf32> to vector<16x256xf32>
    %900 = arith.cmpf oge, %899, %730 : vector<16x256xf32>
    %901 = arith.extui %900 : vector<16x256xi1> to vector<16x256xi32>
    %902 = arith.sitofp %901 : vector<16x256xi32> to vector<16x256xf32>
    %903 = arith.addf %892, %902 : vector<16x256xf32>
    %cst_204 = arith.constant 0.000000e+00 : f32
    %904 = vector.shape_cast %898 : vector<1x256xf32> to vector<1x256xf32>
    %905 = vector.broadcast %904 : vector<1x256xf32> to vector<16x256xf32>
    %906 = vector.broadcast %cst_204 : f32 to vector<16x256xf32>
    %907 = arith.select %900, %905, %906 : vector<16x256xi1>, vector<16x256xf32>
    %908 = arith.addf %897, %907 : vector<16x256xf32>
    %909 = arith.mulf %903, %730 : vector<16x256xf32>
    %cst_205 = arith.constant 1.000000e+00 : f32
    %910 = vector.broadcast %cst_205 : f32 to vector<16x256xf32>
    %911 = arith.addf %910, %909 : vector<16x256xf32>
    %912 = arith.cmpf ogt, %911, %908 : vector<16x256xf32>
    %913 = arith.extui %912 : vector<16x256xi1> to vector<16x256xi32>
    %914 = arith.sitofp %913 : vector<16x256xi32> to vector<16x256xf32>
    %cst_206 = arith.constant dense<0.000000e+00> : vector<256xf32>
    %915 = vector.multi_reduction <add>, %914, %cst_206 [0] : vector<16x256xf32> to vector<256xf32>
    %916 = vector.shape_cast %915 : vector<256xf32> to vector<1x256xf32>
    %917 = arith.mulf %730, %914 : vector<16x256xf32>
    %cst_207 = arith.constant dense<0.000000e+00> : vector<256xf32>
    %918 = vector.multi_reduction <add>, %917, %cst_207 [0] : vector<16x256xf32> to vector<256xf32>
    %919 = vector.shape_cast %918 : vector<256xf32> to vector<1x256xf32>
    %cst_208 = arith.constant 1.000000e+00 : f32
    %920 = vector.broadcast %cst_208 : f32 to vector<1x256xf32>
    %921 = arith.subf %919, %920 : vector<1x256xf32>
    %922 = arith.divf %921, %916 : vector<1x256xf32>
    %923 = vector.broadcast %922 : vector<1x256xf32> to vector<16x256xf32>
    %924 = arith.subf %730, %923 : vector<16x256xf32>
    %cst_209 = arith.constant 0.000000e+00 : f32
    %925 = vector.broadcast %cst_209 : f32 to vector<16x256xf32>
    %926 = arith.maximumf %924, %925 : vector<16x256xf32>
    %cst_210 = arith.constant 1.300000e+00 : f32
    %927 = vector.broadcast %cst_210 : f32 to vector<16x256xf32>
    %928 = arith.subf %927, %926 : vector<16x256xf32>
    %929 = arith.mulf %928, %463 : vector<16x256xf32>
    %cst_211 = arith.constant 1.000000e-15 : f32
    %930 = vector.broadcast %cst_211 : f32 to vector<16x256xf32>
    %931 = arith.addf %926, %930 : vector<16x256xf32>
    %932 = math.log %931 : vector<16x256xf32>
    %933 = arith.mulf %926, %932 : vector<16x256xf32>
    %cst_212 = arith.constant dense<0.000000e+00> : vector<256xf32>
    %934 = vector.multi_reduction <add>, %933, %cst_212 [0] : vector<16x256xf32> to vector<256xf32>
    %935 = vector.shape_cast %934 : vector<256xf32> to vector<1x256xf32>
    %936 = arith.addf %470, %935 : vector<1x256xf32>
    %937 = arith.mulf %926, %9 : vector<16x256xf32>
    %c0_213 = arith.constant 0 : index
    %c0_214 = arith.constant 0 : index
    %c0_215 = arith.constant 0 : index
    %938 = vector.load %arg3[%c0_213, %c0_214, %c0_215] : memref<10x32x16xf32, #tpu.memory_space<vmem>>, vector<1x32x16xf32>
    %939 = vector.shape_cast %938 : vector<1x32x16xf32> to vector<32x16xf32>
    %cst_216 = arith.constant dense<0.000000e+00> : vector<32x256xf32>
    %940 = tpu.matmul %939, %937, %cst_216 {dimension_numbers = #tpu.dot_dimension_numbers<[1], [0], [0], [1], [0, 0, 1, 1], [], []>} : vector<32x16xf32>, vector<16x256xf32>, vector<32x256xf32> -> vector<32x256xf32>
    %941 = vector.extract_strided_slice %940 {offsets = [0, 0], sizes = [32, 128], strides = [1, 1]} : vector<32x256xf32> to vector<32x128xf32>
    %cst_217 = arith.constant dense<0.000000e+00> : vector<32xf32>
    %942 = vector.multi_reduction <add>, %941, %cst_217 [1] : vector<32x128xf32> to vector<32xf32>
    %943 = vector.shape_cast %942 : vector<32xf32> to vector<32x1xf32>
    %cst_218 = arith.constant 1.280000e+02 : f32
    %944 = vector.broadcast %cst_218 : f32 to vector<32x1xf32>
    %945 = arith.divf %943, %944 : vector<32x1xf32>
    %946 = arith.mulf %941, %941 : vector<32x128xf32>
    %cst_219 = arith.constant dense<0.000000e+00> : vector<32xf32>
    %947 = vector.multi_reduction <add>, %946, %cst_219 [1] : vector<32x128xf32> to vector<32xf32>
    %948 = vector.shape_cast %947 : vector<32xf32> to vector<32x1xf32>
    %cst_220 = arith.constant 1.280000e+02 : f32
    %949 = vector.broadcast %cst_220 : f32 to vector<32x1xf32>
    %950 = arith.divf %948, %949 : vector<32x1xf32>
    %951 = arith.mulf %945, %945 : vector<32x1xf32>
    %952 = arith.subf %950, %951 : vector<32x1xf32>
    %953 = vector.broadcast %945 : vector<32x1xf32> to vector<32x128xf32>
    %954 = arith.subf %941, %953 : vector<32x128xf32>
    %cst_221 = arith.constant 9.99999974E-6 : f32
    %955 = vector.broadcast %cst_221 : f32 to vector<32x1xf32>
    %956 = arith.addf %952, %955 : vector<32x1xf32>
    %957 = math.rsqrt %956 : vector<32x1xf32>
    %958 = vector.broadcast %957 : vector<32x1xf32> to vector<32x128xf32>
    %959 = arith.mulf %954, %958 : vector<32x128xf32>
    %960 = vector.extract_strided_slice %940 {offsets = [0, 128], sizes = [32, 128], strides = [1, 1]} : vector<32x256xf32> to vector<32x128xf32>
    %cst_222 = arith.constant dense<0.000000e+00> : vector<32xf32>
    %961 = vector.multi_reduction <add>, %960, %cst_222 [1] : vector<32x128xf32> to vector<32xf32>
    %962 = vector.shape_cast %961 : vector<32xf32> to vector<32x1xf32>
    %cst_223 = arith.constant 1.280000e+02 : f32
    %963 = vector.broadcast %cst_223 : f32 to vector<32x1xf32>
    %964 = arith.divf %962, %963 : vector<32x1xf32>
    %965 = arith.mulf %960, %960 : vector<32x128xf32>
    %cst_224 = arith.constant dense<0.000000e+00> : vector<32xf32>
    %966 = vector.multi_reduction <add>, %965, %cst_224 [1] : vector<32x128xf32> to vector<32xf32>
    %967 = vector.shape_cast %966 : vector<32xf32> to vector<32x1xf32>
    %cst_225 = arith.constant 1.280000e+02 : f32
    %968 = vector.broadcast %cst_225 : f32 to vector<32x1xf32>
    %969 = arith.divf %967, %968 : vector<32x1xf32>
    %970 = arith.mulf %964, %964 : vector<32x1xf32>
    %971 = arith.subf %969, %970 : vector<32x1xf32>
    %972 = vector.broadcast %964 : vector<32x1xf32> to vector<32x128xf32>
    %973 = arith.subf %960, %972 : vector<32x128xf32>
    %cst_226 = arith.constant 9.99999974E-6 : f32
    %974 = vector.broadcast %cst_226 : f32 to vector<32x1xf32>
    %975 = arith.addf %971, %974 : vector<32x1xf32>
    %976 = math.rsqrt %975 : vector<32x1xf32>
    %977 = vector.broadcast %976 : vector<32x1xf32> to vector<32x128xf32>
    %978 = arith.mulf %973, %977 : vector<32x128xf32>
    %979 = tpu.concatenate %959, %978 in 1 : vector<32x128xf32>, vector<32x128xf32> -> vector<32x256xf32>
    %980 = vector.extract_strided_slice %979 {offsets = [0, 0], sizes = [16, 256], strides = [1, 1]} : vector<32x256xf32> to vector<16x256xf32>
    %981 = vector.extract_strided_slice %979 {offsets = [16, 0], sizes = [16, 256], strides = [1, 1]} : vector<32x256xf32> to vector<16x256xf32>
    %982 = arith.negf %981 : vector<16x256xf32>
    %983 = math.exp %982 : vector<16x256xf32>
    %cst_227 = arith.constant 1.000000e+00 : f32
    %984 = vector.broadcast %cst_227 : f32 to vector<16x256xf32>
    %985 = arith.addf %984, %983 : vector<16x256xf32>
    %986 = arith.divf %984, %985 : vector<16x256xf32>
    %987 = arith.mulf %980, %986 : vector<16x256xf32>
    %c1_228 = arith.constant 1 : index
    %c0_229 = arith.constant 0 : index
    %c0_230 = arith.constant 0 : index
    %988 = vector.load %arg3[%c1_228, %c0_229, %c0_230] : memref<10x32x16xf32, #tpu.memory_space<vmem>>, vector<1x32x16xf32>
    %989 = vector.shape_cast %988 : vector<1x32x16xf32> to vector<32x16xf32>
    %cst_231 = arith.constant dense<0.000000e+00> : vector<32x256xf32>
    %990 = tpu.matmul %989, %987, %cst_231 {dimension_numbers = #tpu.dot_dimension_numbers<[1], [0], [0], [1], [0, 0, 1, 1], [], []>} : vector<32x16xf32>, vector<16x256xf32>, vector<32x256xf32> -> vector<32x256xf32>
    %991 = vector.extract_strided_slice %990 {offsets = [0, 0], sizes = [32, 128], strides = [1, 1]} : vector<32x256xf32> to vector<32x128xf32>
    %cst_232 = arith.constant dense<0.000000e+00> : vector<32xf32>
    %992 = vector.multi_reduction <add>, %991, %cst_232 [1] : vector<32x128xf32> to vector<32xf32>
    %993 = vector.shape_cast %992 : vector<32xf32> to vector<32x1xf32>
    %cst_233 = arith.constant 1.280000e+02 : f32
    %994 = vector.broadcast %cst_233 : f32 to vector<32x1xf32>
    %995 = arith.divf %993, %994 : vector<32x1xf32>
    %996 = arith.mulf %991, %991 : vector<32x128xf32>
    %cst_234 = arith.constant dense<0.000000e+00> : vector<32xf32>
    %997 = vector.multi_reduction <add>, %996, %cst_234 [1] : vector<32x128xf32> to vector<32xf32>
    %998 = vector.shape_cast %997 : vector<32xf32> to vector<32x1xf32>
    %cst_235 = arith.constant 1.280000e+02 : f32
    %999 = vector.broadcast %cst_235 : f32 to vector<32x1xf32>
    %1000 = arith.divf %998, %999 : vector<32x1xf32>
    %1001 = arith.mulf %995, %995 : vector<32x1xf32>
    %1002 = arith.subf %1000, %1001 : vector<32x1xf32>
    %1003 = vector.broadcast %995 : vector<32x1xf32> to vector<32x128xf32>
    %1004 = arith.subf %991, %1003 : vector<32x128xf32>
    %cst_236 = arith.constant 9.99999974E-6 : f32
    %1005 = vector.broadcast %cst_236 : f32 to vector<32x1xf32>
    %1006 = arith.addf %1002, %1005 : vector<32x1xf32>
    %1007 = math.rsqrt %1006 : vector<32x1xf32>
    %1008 = vector.broadcast %1007 : vector<32x1xf32> to vector<32x128xf32>
    %1009 = arith.mulf %1004, %1008 : vector<32x128xf32>
    %1010 = vector.extract_strided_slice %990 {offsets = [0, 128], sizes = [32, 128], strides = [1, 1]} : vector<32x256xf32> to vector<32x128xf32>
    %cst_237 = arith.constant dense<0.000000e+00> : vector<32xf32>
    %1011 = vector.multi_reduction <add>, %1010, %cst_237 [1] : vector<32x128xf32> to vector<32xf32>
    %1012 = vector.shape_cast %1011 : vector<32xf32> to vector<32x1xf32>
    %cst_238 = arith.constant 1.280000e+02 : f32
    %1013 = vector.broadcast %cst_238 : f32 to vector<32x1xf32>
    %1014 = arith.divf %1012, %1013 : vector<32x1xf32>
    %1015 = arith.mulf %1010, %1010 : vector<32x128xf32>
    %cst_239 = arith.constant dense<0.000000e+00> : vector<32xf32>
    %1016 = vector.multi_reduction <add>, %1015, %cst_239 [1] : vector<32x128xf32> to vector<32xf32>
    %1017 = vector.shape_cast %1016 : vector<32xf32> to vector<32x1xf32>
    %cst_240 = arith.constant 1.280000e+02 : f32
    %1018 = vector.broadcast %cst_240 : f32 to vector<32x1xf32>
    %1019 = arith.divf %1017, %1018 : vector<32x1xf32>
    %1020 = arith.mulf %1014, %1014 : vector<32x1xf32>
    %1021 = arith.subf %1019, %1020 : vector<32x1xf32>
    %1022 = vector.broadcast %1014 : vector<32x1xf32> to vector<32x128xf32>
    %1023 = arith.subf %1010, %1022 : vector<32x128xf32>
    %cst_241 = arith.constant 9.99999974E-6 : f32
    %1024 = vector.broadcast %cst_241 : f32 to vector<32x1xf32>
    %1025 = arith.addf %1021, %1024 : vector<32x1xf32>
    %1026 = math.rsqrt %1025 : vector<32x1xf32>
    %1027 = vector.broadcast %1026 : vector<32x1xf32> to vector<32x128xf32>
    %1028 = arith.mulf %1023, %1027 : vector<32x128xf32>
    %1029 = tpu.concatenate %1009, %1028 in 1 : vector<32x128xf32>, vector<32x128xf32> -> vector<32x256xf32>
    %1030 = vector.extract_strided_slice %1029 {offsets = [0, 0], sizes = [16, 256], strides = [1, 1]} : vector<32x256xf32> to vector<16x256xf32>
    %1031 = vector.extract_strided_slice %1029 {offsets = [16, 0], sizes = [16, 256], strides = [1, 1]} : vector<32x256xf32> to vector<16x256xf32>
    %1032 = arith.negf %1031 : vector<16x256xf32>
    %1033 = math.exp %1032 : vector<16x256xf32>
    %cst_242 = arith.constant 1.000000e+00 : f32
    %1034 = vector.broadcast %cst_242 : f32 to vector<16x256xf32>
    %1035 = arith.addf %1034, %1033 : vector<16x256xf32>
    %1036 = arith.divf %1034, %1035 : vector<16x256xf32>
    %1037 = arith.mulf %1030, %1036 : vector<16x256xf32>
    %1038 = arith.addf %987, %1037 : vector<16x256xf32>
    %cst_243 = arith.constant 0.707106769 : f32
    %1039 = vector.broadcast %cst_243 : f32 to vector<16x256xf32>
    %1040 = arith.mulf %1038, %1039 : vector<16x256xf32>
    %c6 = arith.constant 6 : index
    %c0_244 = arith.constant 0 : index
    %c0_245 = arith.constant 0 : index
    %1041 = vector.load %arg3[%c6, %c0_244, %c0_245] : memref<10x32x16xf32, #tpu.memory_space<vmem>>, vector<1x32x16xf32>
    %1042 = vector.shape_cast %1041 : vector<1x32x16xf32> to vector<32x16xf32>
    %cst_246 = arith.constant dense<0.000000e+00> : vector<32x256xf32>
    %1043 = tpu.matmul %1042, %1040, %cst_246 {dimension_numbers = #tpu.dot_dimension_numbers<[1], [0], [0], [1], [0, 0, 1, 1], [], []>} : vector<32x16xf32>, vector<16x256xf32>, vector<32x256xf32> -> vector<32x256xf32>
    %1044 = vector.extract_strided_slice %1043 {offsets = [0, 0], sizes = [32, 128], strides = [1, 1]} : vector<32x256xf32> to vector<32x128xf32>
    %cst_247 = arith.constant dense<0.000000e+00> : vector<32xf32>
    %1045 = vector.multi_reduction <add>, %1044, %cst_247 [1] : vector<32x128xf32> to vector<32xf32>
    %1046 = vector.shape_cast %1045 : vector<32xf32> to vector<32x1xf32>
    %cst_248 = arith.constant 1.280000e+02 : f32
    %1047 = vector.broadcast %cst_248 : f32 to vector<32x1xf32>
    %1048 = arith.divf %1046, %1047 : vector<32x1xf32>
    %1049 = arith.mulf %1044, %1044 : vector<32x128xf32>
    %cst_249 = arith.constant dense<0.000000e+00> : vector<32xf32>
    %1050 = vector.multi_reduction <add>, %1049, %cst_249 [1] : vector<32x128xf32> to vector<32xf32>
    %1051 = vector.shape_cast %1050 : vector<32xf32> to vector<32x1xf32>
    %cst_250 = arith.constant 1.280000e+02 : f32
    %1052 = vector.broadcast %cst_250 : f32 to vector<32x1xf32>
    %1053 = arith.divf %1051, %1052 : vector<32x1xf32>
    %1054 = arith.mulf %1048, %1048 : vector<32x1xf32>
    %1055 = arith.subf %1053, %1054 : vector<32x1xf32>
    %1056 = vector.broadcast %1048 : vector<32x1xf32> to vector<32x128xf32>
    %1057 = arith.subf %1044, %1056 : vector<32x128xf32>
    %cst_251 = arith.constant 9.99999974E-6 : f32
    %1058 = vector.broadcast %cst_251 : f32 to vector<32x1xf32>
    %1059 = arith.addf %1055, %1058 : vector<32x1xf32>
    %1060 = math.rsqrt %1059 : vector<32x1xf32>
    %1061 = vector.broadcast %1060 : vector<32x1xf32> to vector<32x128xf32>
    %1062 = arith.mulf %1057, %1061 : vector<32x128xf32>
    %1063 = vector.extract_strided_slice %1043 {offsets = [0, 128], sizes = [32, 128], strides = [1, 1]} : vector<32x256xf32> to vector<32x128xf32>
    %cst_252 = arith.constant dense<0.000000e+00> : vector<32xf32>
    %1064 = vector.multi_reduction <add>, %1063, %cst_252 [1] : vector<32x128xf32> to vector<32xf32>
    %1065 = vector.shape_cast %1064 : vector<32xf32> to vector<32x1xf32>
    %cst_253 = arith.constant 1.280000e+02 : f32
    %1066 = vector.broadcast %cst_253 : f32 to vector<32x1xf32>
    %1067 = arith.divf %1065, %1066 : vector<32x1xf32>
    %1068 = arith.mulf %1063, %1063 : vector<32x128xf32>
    %cst_254 = arith.constant dense<0.000000e+00> : vector<32xf32>
    %1069 = vector.multi_reduction <add>, %1068, %cst_254 [1] : vector<32x128xf32> to vector<32xf32>
    %1070 = vector.shape_cast %1069 : vector<32xf32> to vector<32x1xf32>
    %cst_255 = arith.constant 1.280000e+02 : f32
    %1071 = vector.broadcast %cst_255 : f32 to vector<32x1xf32>
    %1072 = arith.divf %1070, %1071 : vector<32x1xf32>
    %1073 = arith.mulf %1067, %1067 : vector<32x1xf32>
    %1074 = arith.subf %1072, %1073 : vector<32x1xf32>
    %1075 = vector.broadcast %1067 : vector<32x1xf32> to vector<32x128xf32>
    %1076 = arith.subf %1063, %1075 : vector<32x128xf32>
    %cst_256 = arith.constant 9.99999974E-6 : f32
    %1077 = vector.broadcast %cst_256 : f32 to vector<32x1xf32>
    %1078 = arith.addf %1074, %1077 : vector<32x1xf32>
    %1079 = math.rsqrt %1078 : vector<32x1xf32>
    %1080 = vector.broadcast %1079 : vector<32x1xf32> to vector<32x128xf32>
    %1081 = arith.mulf %1076, %1080 : vector<32x128xf32>
    %1082 = tpu.concatenate %1062, %1081 in 1 : vector<32x128xf32>, vector<32x128xf32> -> vector<32x256xf32>
    %1083 = vector.extract_strided_slice %1082 {offsets = [0, 0], sizes = [16, 256], strides = [1, 1]} : vector<32x256xf32> to vector<16x256xf32>
    %1084 = vector.extract_strided_slice %1082 {offsets = [16, 0], sizes = [16, 256], strides = [1, 1]} : vector<32x256xf32> to vector<16x256xf32>
    %1085 = arith.negf %1084 : vector<16x256xf32>
    %1086 = math.exp %1085 : vector<16x256xf32>
    %cst_257 = arith.constant 1.000000e+00 : f32
    %1087 = vector.broadcast %cst_257 : f32 to vector<16x256xf32>
    %1088 = arith.addf %1087, %1086 : vector<16x256xf32>
    %1089 = arith.divf %1087, %1088 : vector<16x256xf32>
    %1090 = arith.mulf %1083, %1089 : vector<16x256xf32>
    %1091 = arith.addf %1040, %1090 : vector<16x256xf32>
    %cst_258 = arith.constant 0.707106769 : f32
    %1092 = vector.broadcast %cst_258 : f32 to vector<16x256xf32>
    %1093 = arith.mulf %1091, %1092 : vector<16x256xf32>
    %c7 = arith.constant 7 : index
    %c0_259 = arith.constant 0 : index
    %c0_260 = arith.constant 0 : index
    %1094 = vector.load %arg3[%c7, %c0_259, %c0_260] : memref<10x32x16xf32, #tpu.memory_space<vmem>>, vector<1x32x16xf32>
    %1095 = vector.shape_cast %1094 : vector<1x32x16xf32> to vector<32x16xf32>
    %cst_261 = arith.constant dense<0.000000e+00> : vector<32x256xf32>
    %1096 = tpu.matmul %1095, %1093, %cst_261 {dimension_numbers = #tpu.dot_dimension_numbers<[1], [0], [0], [1], [0, 0, 1, 1], [], []>} : vector<32x16xf32>, vector<16x256xf32>, vector<32x256xf32> -> vector<32x256xf32>
    %1097 = vector.extract_strided_slice %1096 {offsets = [0, 0], sizes = [32, 128], strides = [1, 1]} : vector<32x256xf32> to vector<32x128xf32>
    %cst_262 = arith.constant dense<0.000000e+00> : vector<32xf32>
    %1098 = vector.multi_reduction <add>, %1097, %cst_262 [1] : vector<32x128xf32> to vector<32xf32>
    %1099 = vector.shape_cast %1098 : vector<32xf32> to vector<32x1xf32>
    %cst_263 = arith.constant 1.280000e+02 : f32
    %1100 = vector.broadcast %cst_263 : f32 to vector<32x1xf32>
    %1101 = arith.divf %1099, %1100 : vector<32x1xf32>
    %1102 = arith.mulf %1097, %1097 : vector<32x128xf32>
    %cst_264 = arith.constant dense<0.000000e+00> : vector<32xf32>
    %1103 = vector.multi_reduction <add>, %1102, %cst_264 [1] : vector<32x128xf32> to vector<32xf32>
    %1104 = vector.shape_cast %1103 : vector<32xf32> to vector<32x1xf32>
    %cst_265 = arith.constant 1.280000e+02 : f32
    %1105 = vector.broadcast %cst_265 : f32 to vector<32x1xf32>
    %1106 = arith.divf %1104, %1105 : vector<32x1xf32>
    %1107 = arith.mulf %1101, %1101 : vector<32x1xf32>
    %1108 = arith.subf %1106, %1107 : vector<32x1xf32>
    %1109 = vector.broadcast %1101 : vector<32x1xf32> to vector<32x128xf32>
    %1110 = arith.subf %1097, %1109 : vector<32x128xf32>
    %cst_266 = arith.constant 9.99999974E-6 : f32
    %1111 = vector.broadcast %cst_266 : f32 to vector<32x1xf32>
    %1112 = arith.addf %1108, %1111 : vector<32x1xf32>
    %1113 = math.rsqrt %1112 : vector<32x1xf32>
    %1114 = vector.broadcast %1113 : vector<32x1xf32> to vector<32x128xf32>
    %1115 = arith.mulf %1110, %1114 : vector<32x128xf32>
    %1116 = vector.extract_strided_slice %1096 {offsets = [0, 128], sizes = [32, 128], strides = [1, 1]} : vector<32x256xf32> to vector<32x128xf32>
    %cst_267 = arith.constant dense<0.000000e+00> : vector<32xf32>
    %1117 = vector.multi_reduction <add>, %1116, %cst_267 [1] : vector<32x128xf32> to vector<32xf32>
    %1118 = vector.shape_cast %1117 : vector<32xf32> to vector<32x1xf32>
    %cst_268 = arith.constant 1.280000e+02 : f32
    %1119 = vector.broadcast %cst_268 : f32 to vector<32x1xf32>
    %1120 = arith.divf %1118, %1119 : vector<32x1xf32>
    %1121 = arith.mulf %1116, %1116 : vector<32x128xf32>
    %cst_269 = arith.constant dense<0.000000e+00> : vector<32xf32>
    %1122 = vector.multi_reduction <add>, %1121, %cst_269 [1] : vector<32x128xf32> to vector<32xf32>
    %1123 = vector.shape_cast %1122 : vector<32xf32> to vector<32x1xf32>
    %cst_270 = arith.constant 1.280000e+02 : f32
    %1124 = vector.broadcast %cst_270 : f32 to vector<32x1xf32>
    %1125 = arith.divf %1123, %1124 : vector<32x1xf32>
    %1126 = arith.mulf %1120, %1120 : vector<32x1xf32>
    %1127 = arith.subf %1125, %1126 : vector<32x1xf32>
    %1128 = vector.broadcast %1120 : vector<32x1xf32> to vector<32x128xf32>
    %1129 = arith.subf %1116, %1128 : vector<32x128xf32>
    %cst_271 = arith.constant 9.99999974E-6 : f32
    %1130 = vector.broadcast %cst_271 : f32 to vector<32x1xf32>
    %1131 = arith.addf %1127, %1130 : vector<32x1xf32>
    %1132 = math.rsqrt %1131 : vector<32x1xf32>
    %1133 = vector.broadcast %1132 : vector<32x1xf32> to vector<32x128xf32>
    %1134 = arith.mulf %1129, %1133 : vector<32x128xf32>
    %1135 = tpu.concatenate %1115, %1134 in 1 : vector<32x128xf32>, vector<32x128xf32> -> vector<32x256xf32>
    %1136 = vector.extract_strided_slice %1135 {offsets = [0, 0], sizes = [16, 256], strides = [1, 1]} : vector<32x256xf32> to vector<16x256xf32>
    %1137 = vector.extract_strided_slice %1135 {offsets = [16, 0], sizes = [16, 256], strides = [1, 1]} : vector<32x256xf32> to vector<16x256xf32>
    %1138 = arith.negf %1137 : vector<16x256xf32>
    %1139 = math.exp %1138 : vector<16x256xf32>
    %cst_272 = arith.constant 1.000000e+00 : f32
    %1140 = vector.broadcast %cst_272 : f32 to vector<16x256xf32>
    %1141 = arith.addf %1140, %1139 : vector<16x256xf32>
    %1142 = arith.divf %1140, %1141 : vector<16x256xf32>
    %1143 = arith.mulf %1136, %1142 : vector<16x256xf32>
    %1144 = arith.addf %1093, %1143 : vector<16x256xf32>
    %cst_273 = arith.constant 0.707106769 : f32
    %1145 = vector.broadcast %cst_273 : f32 to vector<16x256xf32>
    %1146 = arith.mulf %1144, %1145 : vector<16x256xf32>
    %1147 = vector.extract_strided_slice %1146 {offsets = [8, 0], sizes = [8, 256], strides = [1, 1]} : vector<16x256xf32> to vector<8x256xf32>
    %1148 = vector.extract_strided_slice %1146 {offsets = [0, 0], sizes = [8, 256], strides = [1, 1]} : vector<16x256xf32> to vector<8x256xf32>
    %cst_274 = arith.constant 0.000000e+00 : f32
    %1149 = vector.broadcast %cst_274 : f32 to vector<8x256xf32>
    %1150 = arith.maximumf %1148, %1149 : vector<8x256xf32>
    %c1_275 = arith.constant 1 : index
    %c0_276 = arith.constant 0 : index
    %c0_277 = arith.constant 0 : index
    %1151 = vector.load %arg5[%c1_275, %c0_276, %c0_277] : memref<3x8x256xf32, #tpu.memory_space<vmem>>, vector<1x8x256xf32>
    %1152 = vector.shape_cast %1151 : vector<1x8x256xf32> to vector<8x256xf32>
    %1153 = vector.shape_cast %1150 : vector<8x256xf32> to vector<1x8x256xf32>
    tpu.vector_store %arg5[%c1_275, %c0_276, %c0_277], %1153 {strides = array<i32>} : memref<3x8x256xf32, #tpu.memory_space<vmem>>, vector<1x8x256xf32>,
    %c2_278 = arith.constant 2 : index
    %c0_279 = arith.constant 0 : index
    %c0_280 = arith.constant 0 : index
    %1154 = vector.load %arg4[%c2_278, %c0_279, %c0_280] : memref<3x16x8xf32, #tpu.memory_space<vmem>>, vector<1x16x8xf32>
    %1155 = vector.shape_cast %1154 : vector<1x16x8xf32> to vector<16x8xf32>
    %cst_281 = arith.constant dense<0.000000e+00> : vector<16x256xf32>
    %1156 = tpu.matmul %1155, %1147, %cst_281 {dimension_numbers = #tpu.dot_dimension_numbers<[1], [0], [0], [1], [0, 0, 1, 1], [], []>} : vector<16x8xf32>, vector<8x256xf32>, vector<16x256xf32> -> vector<16x256xf32>
    %1157 = vector.extract_strided_slice %1156 {offsets = [0, 0], sizes = [16, 128], strides = [1, 1]} : vector<16x256xf32> to vector<16x128xf32>
    %cst_282 = arith.constant dense<0.000000e+00> : vector<16xf32>
    %1158 = vector.multi_reduction <add>, %1157, %cst_282 [1] : vector<16x128xf32> to vector<16xf32>
    %1159 = vector.shape_cast %1158 : vector<16xf32> to vector<16x1xf32>
    %cst_283 = arith.constant 1.280000e+02 : f32
    %1160 = vector.broadcast %cst_283 : f32 to vector<16x1xf32>
    %1161 = arith.divf %1159, %1160 : vector<16x1xf32>
    %1162 = arith.mulf %1157, %1157 : vector<16x128xf32>
    %cst_284 = arith.constant dense<0.000000e+00> : vector<16xf32>
    %1163 = vector.multi_reduction <add>, %1162, %cst_284 [1] : vector<16x128xf32> to vector<16xf32>
    %1164 = vector.shape_cast %1163 : vector<16xf32> to vector<16x1xf32>
    %cst_285 = arith.constant 1.280000e+02 : f32
    %1165 = vector.broadcast %cst_285 : f32 to vector<16x1xf32>
    %1166 = arith.divf %1164, %1165 : vector<16x1xf32>
    %1167 = arith.mulf %1161, %1161 : vector<16x1xf32>
    %1168 = arith.subf %1166, %1167 : vector<16x1xf32>
    %1169 = vector.broadcast %1161 : vector<16x1xf32> to vector<16x128xf32>
    %1170 = arith.subf %1157, %1169 : vector<16x128xf32>
    %cst_286 = arith.constant 9.99999974E-6 : f32
    %1171 = vector.broadcast %cst_286 : f32 to vector<16x1xf32>
    %1172 = arith.addf %1168, %1171 : vector<16x1xf32>
    %1173 = math.rsqrt %1172 : vector<16x1xf32>
    %1174 = vector.broadcast %1173 : vector<16x1xf32> to vector<16x128xf32>
    %1175 = arith.mulf %1170, %1174 : vector<16x128xf32>
    %1176 = vector.extract_strided_slice %1156 {offsets = [0, 128], sizes = [16, 128], strides = [1, 1]} : vector<16x256xf32> to vector<16x128xf32>
    %cst_287 = arith.constant dense<0.000000e+00> : vector<16xf32>
    %1177 = vector.multi_reduction <add>, %1176, %cst_287 [1] : vector<16x128xf32> to vector<16xf32>
    %1178 = vector.shape_cast %1177 : vector<16xf32> to vector<16x1xf32>
    %cst_288 = arith.constant 1.280000e+02 : f32
    %1179 = vector.broadcast %cst_288 : f32 to vector<16x1xf32>
    %1180 = arith.divf %1178, %1179 : vector<16x1xf32>
    %1181 = arith.mulf %1176, %1176 : vector<16x128xf32>
    %cst_289 = arith.constant dense<0.000000e+00> : vector<16xf32>
    %1182 = vector.multi_reduction <add>, %1181, %cst_289 [1] : vector<16x128xf32> to vector<16xf32>
    %1183 = vector.shape_cast %1182 : vector<16xf32> to vector<16x1xf32>
    %cst_290 = arith.constant 1.280000e+02 : f32
    %1184 = vector.broadcast %cst_290 : f32 to vector<16x1xf32>
    %1185 = arith.divf %1183, %1184 : vector<16x1xf32>
    %1186 = arith.mulf %1180, %1180 : vector<16x1xf32>
    %1187 = arith.subf %1185, %1186 : vector<16x1xf32>
    %1188 = vector.broadcast %1180 : vector<16x1xf32> to vector<16x128xf32>
    %1189 = arith.subf %1176, %1188 : vector<16x128xf32>
    %cst_291 = arith.constant 9.99999974E-6 : f32
    %1190 = vector.broadcast %cst_291 : f32 to vector<16x1xf32>
    %1191 = arith.addf %1187, %1190 : vector<16x1xf32>
    %1192 = math.rsqrt %1191 : vector<16x1xf32>
    %1193 = vector.broadcast %1192 : vector<16x1xf32> to vector<16x128xf32>
    %1194 = arith.mulf %1189, %1193 : vector<16x128xf32>
    %1195 = tpu.concatenate %1175, %1194 in 1 : vector<16x128xf32>, vector<16x128xf32> -> vector<16x256xf32>
    %1196 = arith.mulf %1195, %929 : vector<16x256xf32>
    %cst_292 = arith.constant 0.000000e+00 : f32
    %1197 = vector.broadcast %cst_292 : f32 to vector<16x256xf32>
    %cst_293 = arith.constant 0.000000e+00 : f32
    %1198 = vector.broadcast %cst_293 : f32 to vector<16x256xf32>
    %1199 = vector.extract_strided_slice %1196 {offsets = [0, 0], sizes = [1, 256], strides = [1, 1]} : vector<16x256xf32> to vector<1x256xf32>
    %1200 = vector.broadcast %1199 : vector<1x256xf32> to vector<16x256xf32>
    %1201 = arith.cmpf oge, %1200, %1196 : vector<16x256xf32>
    %1202 = arith.extui %1201 : vector<16x256xi1> to vector<16x256xi32>
    %1203 = arith.sitofp %1202 : vector<16x256xi32> to vector<16x256xf32>
    %1204 = arith.addf %1197, %1203 : vector<16x256xf32>
    %cst_294 = arith.constant 0.000000e+00 : f32
    %1205 = vector.shape_cast %1199 : vector<1x256xf32> to vector<1x256xf32>
    %1206 = vector.broadcast %1205 : vector<1x256xf32> to vector<16x256xf32>
    %1207 = vector.broadcast %cst_294 : f32 to vector<16x256xf32>
    %1208 = arith.select %1201, %1206, %1207 : vector<16x256xi1>, vector<16x256xf32>
    %1209 = arith.addf %1198, %1208 : vector<16x256xf32>
    %1210 = vector.extract_strided_slice %1196 {offsets = [1, 0], sizes = [1, 256], strides = [1, 1]} : vector<16x256xf32> to vector<1x256xf32>
    %1211 = vector.broadcast %1210 : vector<1x256xf32> to vector<16x256xf32>
    %1212 = arith.cmpf oge, %1211, %1196 : vector<16x256xf32>
    %1213 = arith.extui %1212 : vector<16x256xi1> to vector<16x256xi32>
    %1214 = arith.sitofp %1213 : vector<16x256xi32> to vector<16x256xf32>
    %1215 = arith.addf %1204, %1214 : vector<16x256xf32>
    %cst_295 = arith.constant 0.000000e+00 : f32
    %1216 = vector.shape_cast %1210 : vector<1x256xf32> to vector<1x256xf32>
    %1217 = vector.broadcast %1216 : vector<1x256xf32> to vector<16x256xf32>
    %1218 = vector.broadcast %cst_295 : f32 to vector<16x256xf32>
    %1219 = arith.select %1212, %1217, %1218 : vector<16x256xi1>, vector<16x256xf32>
    %1220 = arith.addf %1209, %1219 : vector<16x256xf32>
    %1221 = vector.extract_strided_slice %1196 {offsets = [2, 0], sizes = [1, 256], strides = [1, 1]} : vector<16x256xf32> to vector<1x256xf32>
    %1222 = vector.broadcast %1221 : vector<1x256xf32> to vector<16x256xf32>
    %1223 = arith.cmpf oge, %1222, %1196 : vector<16x256xf32>
    %1224 = arith.extui %1223 : vector<16x256xi1> to vector<16x256xi32>
    %1225 = arith.sitofp %1224 : vector<16x256xi32> to vector<16x256xf32>
    %1226 = arith.addf %1215, %1225 : vector<16x256xf32>
    %cst_296 = arith.constant 0.000000e+00 : f32
    %1227 = vector.shape_cast %1221 : vector<1x256xf32> to vector<1x256xf32>
    %1228 = vector.broadcast %1227 : vector<1x256xf32> to vector<16x256xf32>
    %1229 = vector.broadcast %cst_296 : f32 to vector<16x256xf32>
    %1230 = arith.select %1223, %1228, %1229 : vector<16x256xi1>, vector<16x256xf32>
    %1231 = arith.addf %1220, %1230 : vector<16x256xf32>
    %1232 = vector.extract_strided_slice %1196 {offsets = [3, 0], sizes = [1, 256], strides = [1, 1]} : vector<16x256xf32> to vector<1x256xf32>
    %1233 = vector.broadcast %1232 : vector<1x256xf32> to vector<16x256xf32>
    %1234 = arith.cmpf oge, %1233, %1196 : vector<16x256xf32>
    %1235 = arith.extui %1234 : vector<16x256xi1> to vector<16x256xi32>
    %1236 = arith.sitofp %1235 : vector<16x256xi32> to vector<16x256xf32>
    %1237 = arith.addf %1226, %1236 : vector<16x256xf32>
    %cst_297 = arith.constant 0.000000e+00 : f32
    %1238 = vector.shape_cast %1232 : vector<1x256xf32> to vector<1x256xf32>
    %1239 = vector.broadcast %1238 : vector<1x256xf32> to vector<16x256xf32>
    %1240 = vector.broadcast %cst_297 : f32 to vector<16x256xf32>
    %1241 = arith.select %1234, %1239, %1240 : vector<16x256xi1>, vector<16x256xf32>
    %1242 = arith.addf %1231, %1241 : vector<16x256xf32>
    %1243 = vector.extract_strided_slice %1196 {offsets = [4, 0], sizes = [1, 256], strides = [1, 1]} : vector<16x256xf32> to vector<1x256xf32>
    %1244 = vector.broadcast %1243 : vector<1x256xf32> to vector<16x256xf32>
    %1245 = arith.cmpf oge, %1244, %1196 : vector<16x256xf32>
    %1246 = arith.extui %1245 : vector<16x256xi1> to vector<16x256xi32>
    %1247 = arith.sitofp %1246 : vector<16x256xi32> to vector<16x256xf32>
    %1248 = arith.addf %1237, %1247 : vector<16x256xf32>
    %cst_298 = arith.constant 0.000000e+00 : f32
    %1249 = vector.shape_cast %1243 : vector<1x256xf32> to vector<1x256xf32>
    %1250 = vector.broadcast %1249 : vector<1x256xf32> to vector<16x256xf32>
    %1251 = vector.broadcast %cst_298 : f32 to vector<16x256xf32>
    %1252 = arith.select %1245, %1250, %1251 : vector<16x256xi1>, vector<16x256xf32>
    %1253 = arith.addf %1242, %1252 : vector<16x256xf32>
    %1254 = vector.extract_strided_slice %1196 {offsets = [5, 0], sizes = [1, 256], strides = [1, 1]} : vector<16x256xf32> to vector<1x256xf32>
    %1255 = vector.broadcast %1254 : vector<1x256xf32> to vector<16x256xf32>
    %1256 = arith.cmpf oge, %1255, %1196 : vector<16x256xf32>
    %1257 = arith.extui %1256 : vector<16x256xi1> to vector<16x256xi32>
    %1258 = arith.sitofp %1257 : vector<16x256xi32> to vector<16x256xf32>
    %1259 = arith.addf %1248, %1258 : vector<16x256xf32>
    %cst_299 = arith.constant 0.000000e+00 : f32
    %1260 = vector.shape_cast %1254 : vector<1x256xf32> to vector<1x256xf32>
    %1261 = vector.broadcast %1260 : vector<1x256xf32> to vector<16x256xf32>
    %1262 = vector.broadcast %cst_299 : f32 to vector<16x256xf32>
    %1263 = arith.select %1256, %1261, %1262 : vector<16x256xi1>, vector<16x256xf32>
    %1264 = arith.addf %1253, %1263 : vector<16x256xf32>
    %1265 = vector.extract_strided_slice %1196 {offsets = [6, 0], sizes = [1, 256], strides = [1, 1]} : vector<16x256xf32> to vector<1x256xf32>
    %1266 = vector.broadcast %1265 : vector<1x256xf32> to vector<16x256xf32>
    %1267 = arith.cmpf oge, %1266, %1196 : vector<16x256xf32>
    %1268 = arith.extui %1267 : vector<16x256xi1> to vector<16x256xi32>
    %1269 = arith.sitofp %1268 : vector<16x256xi32> to vector<16x256xf32>
    %1270 = arith.addf %1259, %1269 : vector<16x256xf32>
    %cst_300 = arith.constant 0.000000e+00 : f32
    %1271 = vector.shape_cast %1265 : vector<1x256xf32> to vector<1x256xf32>
    %1272 = vector.broadcast %1271 : vector<1x256xf32> to vector<16x256xf32>
    %1273 = vector.broadcast %cst_300 : f32 to vector<16x256xf32>
    %1274 = arith.select %1267, %1272, %1273 : vector<16x256xi1>, vector<16x256xf32>
    %1275 = arith.addf %1264, %1274 : vector<16x256xf32>
    %1276 = vector.extract_strided_slice %1196 {offsets = [7, 0], sizes = [1, 256], strides = [1, 1]} : vector<16x256xf32> to vector<1x256xf32>
    %1277 = vector.broadcast %1276 : vector<1x256xf32> to vector<16x256xf32>
    %1278 = arith.cmpf oge, %1277, %1196 : vector<16x256xf32>
    %1279 = arith.extui %1278 : vector<16x256xi1> to vector<16x256xi32>
    %1280 = arith.sitofp %1279 : vector<16x256xi32> to vector<16x256xf32>
    %1281 = arith.addf %1270, %1280 : vector<16x256xf32>
    %cst_301 = arith.constant 0.000000e+00 : f32
    %1282 = vector.shape_cast %1276 : vector<1x256xf32> to vector<1x256xf32>
    %1283 = vector.broadcast %1282 : vector<1x256xf32> to vector<16x256xf32>
    %1284 = vector.broadcast %cst_301 : f32 to vector<16x256xf32>
    %1285 = arith.select %1278, %1283, %1284 : vector<16x256xi1>, vector<16x256xf32>
    %1286 = arith.addf %1275, %1285 : vector<16x256xf32>
    %1287 = vector.extract_strided_slice %1196 {offsets = [8, 0], sizes = [1, 256], strides = [1, 1]} : vector<16x256xf32> to vector<1x256xf32>
    %1288 = vector.broadcast %1287 : vector<1x256xf32> to vector<16x256xf32>
    %1289 = arith.cmpf oge, %1288, %1196 : vector<16x256xf32>
    %1290 = arith.extui %1289 : vector<16x256xi1> to vector<16x256xi32>
    %1291 = arith.sitofp %1290 : vector<16x256xi32> to vector<16x256xf32>
    %1292 = arith.addf %1281, %1291 : vector<16x256xf32>
    %cst_302 = arith.constant 0.000000e+00 : f32
    %1293 = vector.shape_cast %1287 : vector<1x256xf32> to vector<1x256xf32>
    %1294 = vector.broadcast %1293 : vector<1x256xf32> to vector<16x256xf32>
    %1295 = vector.broadcast %cst_302 : f32 to vector<16x256xf32>
    %1296 = arith.select %1289, %1294, %1295 : vector<16x256xi1>, vector<16x256xf32>
    %1297 = arith.addf %1286, %1296 : vector<16x256xf32>
    %1298 = vector.extract_strided_slice %1196 {offsets = [9, 0], sizes = [1, 256], strides = [1, 1]} : vector<16x256xf32> to vector<1x256xf32>
    %1299 = vector.broadcast %1298 : vector<1x256xf32> to vector<16x256xf32>
    %1300 = arith.cmpf oge, %1299, %1196 : vector<16x256xf32>
    %1301 = arith.extui %1300 : vector<16x256xi1> to vector<16x256xi32>
    %1302 = arith.sitofp %1301 : vector<16x256xi32> to vector<16x256xf32>
    %1303 = arith.addf %1292, %1302 : vector<16x256xf32>
    %cst_303 = arith.constant 0.000000e+00 : f32
    %1304 = vector.shape_cast %1298 : vector<1x256xf32> to vector<1x256xf32>
    %1305 = vector.broadcast %1304 : vector<1x256xf32> to vector<16x256xf32>
    %1306 = vector.broadcast %cst_303 : f32 to vector<16x256xf32>
    %1307 = arith.select %1300, %1305, %1306 : vector<16x256xi1>, vector<16x256xf32>
    %1308 = arith.addf %1297, %1307 : vector<16x256xf32>
    %1309 = vector.extract_strided_slice %1196 {offsets = [10, 0], sizes = [1, 256], strides = [1, 1]} : vector<16x256xf32> to vector<1x256xf32>
    %1310 = vector.broadcast %1309 : vector<1x256xf32> to vector<16x256xf32>
    %1311 = arith.cmpf oge, %1310, %1196 : vector<16x256xf32>
    %1312 = arith.extui %1311 : vector<16x256xi1> to vector<16x256xi32>
    %1313 = arith.sitofp %1312 : vector<16x256xi32> to vector<16x256xf32>
    %1314 = arith.addf %1303, %1313 : vector<16x256xf32>
    %cst_304 = arith.constant 0.000000e+00 : f32
    %1315 = vector.shape_cast %1309 : vector<1x256xf32> to vector<1x256xf32>
    %1316 = vector.broadcast %1315 : vector<1x256xf32> to vector<16x256xf32>
    %1317 = vector.broadcast %cst_304 : f32 to vector<16x256xf32>
    %1318 = arith.select %1311, %1316, %1317 : vector<16x256xi1>, vector<16x256xf32>
    %1319 = arith.addf %1308, %1318 : vector<16x256xf32>
    %1320 = vector.extract_strided_slice %1196 {offsets = [11, 0], sizes = [1, 256], strides = [1, 1]} : vector<16x256xf32> to vector<1x256xf32>
    %1321 = vector.broadcast %1320 : vector<1x256xf32> to vector<16x256xf32>
    %1322 = arith.cmpf oge, %1321, %1196 : vector<16x256xf32>
    %1323 = arith.extui %1322 : vector<16x256xi1> to vector<16x256xi32>
    %1324 = arith.sitofp %1323 : vector<16x256xi32> to vector<16x256xf32>
    %1325 = arith.addf %1314, %1324 : vector<16x256xf32>
    %cst_305 = arith.constant 0.000000e+00 : f32
    %1326 = vector.shape_cast %1320 : vector<1x256xf32> to vector<1x256xf32>
    %1327 = vector.broadcast %1326 : vector<1x256xf32> to vector<16x256xf32>
    %1328 = vector.broadcast %cst_305 : f32 to vector<16x256xf32>
    %1329 = arith.select %1322, %1327, %1328 : vector<16x256xi1>, vector<16x256xf32>
    %1330 = arith.addf %1319, %1329 : vector<16x256xf32>
    %1331 = vector.extract_strided_slice %1196 {offsets = [12, 0], sizes = [1, 256], strides = [1, 1]} : vector<16x256xf32> to vector<1x256xf32>
    %1332 = vector.broadcast %1331 : vector<1x256xf32> to vector<16x256xf32>
    %1333 = arith.cmpf oge, %1332, %1196 : vector<16x256xf32>
    %1334 = arith.extui %1333 : vector<16x256xi1> to vector<16x256xi32>
    %1335 = arith.sitofp %1334 : vector<16x256xi32> to vector<16x256xf32>
    %1336 = arith.addf %1325, %1335 : vector<16x256xf32>
    %cst_306 = arith.constant 0.000000e+00 : f32
    %1337 = vector.shape_cast %1331 : vector<1x256xf32> to vector<1x256xf32>
    %1338 = vector.broadcast %1337 : vector<1x256xf32> to vector<16x256xf32>
    %1339 = vector.broadcast %cst_306 : f32 to vector<16x256xf32>
    %1340 = arith.select %1333, %1338, %1339 : vector<16x256xi1>, vector<16x256xf32>
    %1341 = arith.addf %1330, %1340 : vector<16x256xf32>
    %1342 = vector.extract_strided_slice %1196 {offsets = [13, 0], sizes = [1, 256], strides = [1, 1]} : vector<16x256xf32> to vector<1x256xf32>
    %1343 = vector.broadcast %1342 : vector<1x256xf32> to vector<16x256xf32>
    %1344 = arith.cmpf oge, %1343, %1196 : vector<16x256xf32>
    %1345 = arith.extui %1344 : vector<16x256xi1> to vector<16x256xi32>
    %1346 = arith.sitofp %1345 : vector<16x256xi32> to vector<16x256xf32>
    %1347 = arith.addf %1336, %1346 : vector<16x256xf32>
    %cst_307 = arith.constant 0.000000e+00 : f32
    %1348 = vector.shape_cast %1342 : vector<1x256xf32> to vector<1x256xf32>
    %1349 = vector.broadcast %1348 : vector<1x256xf32> to vector<16x256xf32>
    %1350 = vector.broadcast %cst_307 : f32 to vector<16x256xf32>
    %1351 = arith.select %1344, %1349, %1350 : vector<16x256xi1>, vector<16x256xf32>
    %1352 = arith.addf %1341, %1351 : vector<16x256xf32>
    %1353 = vector.extract_strided_slice %1196 {offsets = [14, 0], sizes = [1, 256], strides = [1, 1]} : vector<16x256xf32> to vector<1x256xf32>
    %1354 = vector.broadcast %1353 : vector<1x256xf32> to vector<16x256xf32>
    %1355 = arith.cmpf oge, %1354, %1196 : vector<16x256xf32>
    %1356 = arith.extui %1355 : vector<16x256xi1> to vector<16x256xi32>
    %1357 = arith.sitofp %1356 : vector<16x256xi32> to vector<16x256xf32>
    %1358 = arith.addf %1347, %1357 : vector<16x256xf32>
    %cst_308 = arith.constant 0.000000e+00 : f32
    %1359 = vector.shape_cast %1353 : vector<1x256xf32> to vector<1x256xf32>
    %1360 = vector.broadcast %1359 : vector<1x256xf32> to vector<16x256xf32>
    %1361 = vector.broadcast %cst_308 : f32 to vector<16x256xf32>
    %1362 = arith.select %1355, %1360, %1361 : vector<16x256xi1>, vector<16x256xf32>
    %1363 = arith.addf %1352, %1362 : vector<16x256xf32>
    %1364 = vector.extract_strided_slice %1196 {offsets = [15, 0], sizes = [1, 256], strides = [1, 1]} : vector<16x256xf32> to vector<1x256xf32>
    %1365 = vector.broadcast %1364 : vector<1x256xf32> to vector<16x256xf32>
    %1366 = arith.cmpf oge, %1365, %1196 : vector<16x256xf32>
    %1367 = arith.extui %1366 : vector<16x256xi1> to vector<16x256xi32>
    %1368 = arith.sitofp %1367 : vector<16x256xi32> to vector<16x256xf32>
    %1369 = arith.addf %1358, %1368 : vector<16x256xf32>
    %cst_309 = arith.constant 0.000000e+00 : f32
    %1370 = vector.shape_cast %1364 : vector<1x256xf32> to vector<1x256xf32>
    %1371 = vector.broadcast %1370 : vector<1x256xf32> to vector<16x256xf32>
    %1372 = vector.broadcast %cst_309 : f32 to vector<16x256xf32>
    %1373 = arith.select %1366, %1371, %1372 : vector<16x256xi1>, vector<16x256xf32>
    %1374 = arith.addf %1363, %1373 : vector<16x256xf32>
    %1375 = arith.mulf %1369, %1196 : vector<16x256xf32>
    %cst_310 = arith.constant 1.000000e+00 : f32
    %1376 = vector.broadcast %cst_310 : f32 to vector<16x256xf32>
    %1377 = arith.addf %1376, %1375 : vector<16x256xf32>
    %1378 = arith.cmpf ogt, %1377, %1374 : vector<16x256xf32>
    %1379 = arith.extui %1378 : vector<16x256xi1> to vector<16x256xi32>
    %1380 = arith.sitofp %1379 : vector<16x256xi32> to vector<16x256xf32>
    %cst_311 = arith.constant dense<0.000000e+00> : vector<256xf32>
    %1381 = vector.multi_reduction <add>, %1380, %cst_311 [0] : vector<16x256xf32> to vector<256xf32>
    %1382 = vector.shape_cast %1381 : vector<256xf32> to vector<1x256xf32>
    %1383 = arith.mulf %1196, %1380 : vector<16x256xf32>
    %cst_312 = arith.constant dense<0.000000e+00> : vector<256xf32>
    %1384 = vector.multi_reduction <add>, %1383, %cst_312 [0] : vector<16x256xf32> to vector<256xf32>
    %1385 = vector.shape_cast %1384 : vector<256xf32> to vector<1x256xf32>
    %cst_313 = arith.constant 1.000000e+00 : f32
    %1386 = vector.broadcast %cst_313 : f32 to vector<1x256xf32>
    %1387 = arith.subf %1385, %1386 : vector<1x256xf32>
    %1388 = arith.divf %1387, %1382 : vector<1x256xf32>
    %1389 = vector.broadcast %1388 : vector<1x256xf32> to vector<16x256xf32>
    %1390 = arith.subf %1196, %1389 : vector<16x256xf32>
    %cst_314 = arith.constant 0.000000e+00 : f32
    %1391 = vector.broadcast %cst_314 : f32 to vector<16x256xf32>
    %1392 = arith.maximumf %1390, %1391 : vector<16x256xf32>
    %cst_315 = arith.constant 1.000000e-15 : f32
    %1393 = vector.broadcast %cst_315 : f32 to vector<16x256xf32>
    %1394 = arith.addf %1392, %1393 : vector<16x256xf32>
    %1395 = math.log %1394 : vector<16x256xf32>
    %1396 = arith.mulf %1392, %1395 : vector<16x256xf32>
    %cst_316 = arith.constant dense<0.000000e+00> : vector<256xf32>
    %1397 = vector.multi_reduction <add>, %1396, %cst_316 [0] : vector<16x256xf32> to vector<256xf32>
    %1398 = vector.shape_cast %1397 : vector<256xf32> to vector<1x256xf32>
    %1399 = arith.addf %936, %1398 : vector<1x256xf32>
    %1400 = arith.mulf %1392, %9 : vector<16x256xf32>
    %c0_317 = arith.constant 0 : index
    %c0_318 = arith.constant 0 : index
    %c0_319 = arith.constant 0 : index
    %1401 = vector.load %arg3[%c0_317, %c0_318, %c0_319] : memref<10x32x16xf32, #tpu.memory_space<vmem>>, vector<1x32x16xf32>
    %1402 = vector.shape_cast %1401 : vector<1x32x16xf32> to vector<32x16xf32>
    %cst_320 = arith.constant dense<0.000000e+00> : vector<32x256xf32>
    %1403 = tpu.matmul %1402, %1400, %cst_320 {dimension_numbers = #tpu.dot_dimension_numbers<[1], [0], [0], [1], [0, 0, 1, 1], [], []>} : vector<32x16xf32>, vector<16x256xf32>, vector<32x256xf32> -> vector<32x256xf32>
    %1404 = vector.extract_strided_slice %1403 {offsets = [0, 0], sizes = [32, 128], strides = [1, 1]} : vector<32x256xf32> to vector<32x128xf32>
    %cst_321 = arith.constant dense<0.000000e+00> : vector<32xf32>
    %1405 = vector.multi_reduction <add>, %1404, %cst_321 [1] : vector<32x128xf32> to vector<32xf32>
    %1406 = vector.shape_cast %1405 : vector<32xf32> to vector<32x1xf32>
    %cst_322 = arith.constant 1.280000e+02 : f32
    %1407 = vector.broadcast %cst_322 : f32 to vector<32x1xf32>
    %1408 = arith.divf %1406, %1407 : vector<32x1xf32>
    %1409 = arith.mulf %1404, %1404 : vector<32x128xf32>
    %cst_323 = arith.constant dense<0.000000e+00> : vector<32xf32>
    %1410 = vector.multi_reduction <add>, %1409, %cst_323 [1] : vector<32x128xf32> to vector<32xf32>
    %1411 = vector.shape_cast %1410 : vector<32xf32> to vector<32x1xf32>
    %cst_324 = arith.constant 1.280000e+02 : f32
    %1412 = vector.broadcast %cst_324 : f32 to vector<32x1xf32>
    %1413 = arith.divf %1411, %1412 : vector<32x1xf32>
    %1414 = arith.mulf %1408, %1408 : vector<32x1xf32>
    %1415 = arith.subf %1413, %1414 : vector<32x1xf32>
    %1416 = vector.broadcast %1408 : vector<32x1xf32> to vector<32x128xf32>
    %1417 = arith.subf %1404, %1416 : vector<32x128xf32>
    %cst_325 = arith.constant 9.99999974E-6 : f32
    %1418 = vector.broadcast %cst_325 : f32 to vector<32x1xf32>
    %1419 = arith.addf %1415, %1418 : vector<32x1xf32>
    %1420 = math.rsqrt %1419 : vector<32x1xf32>
    %1421 = vector.broadcast %1420 : vector<32x1xf32> to vector<32x128xf32>
    %1422 = arith.mulf %1417, %1421 : vector<32x128xf32>
    %1423 = vector.extract_strided_slice %1403 {offsets = [0, 128], sizes = [32, 128], strides = [1, 1]} : vector<32x256xf32> to vector<32x128xf32>
    %cst_326 = arith.constant dense<0.000000e+00> : vector<32xf32>
    %1424 = vector.multi_reduction <add>, %1423, %cst_326 [1] : vector<32x128xf32> to vector<32xf32>
    %1425 = vector.shape_cast %1424 : vector<32xf32> to vector<32x1xf32>
    %cst_327 = arith.constant 1.280000e+02 : f32
    %1426 = vector.broadcast %cst_327 : f32 to vector<32x1xf32>
    %1427 = arith.divf %1425, %1426 : vector<32x1xf32>
    %1428 = arith.mulf %1423, %1423 : vector<32x128xf32>
    %cst_328 = arith.constant dense<0.000000e+00> : vector<32xf32>
    %1429 = vector.multi_reduction <add>, %1428, %cst_328 [1] : vector<32x128xf32> to vector<32xf32>
    %1430 = vector.shape_cast %1429 : vector<32xf32> to vector<32x1xf32>
    %cst_329 = arith.constant 1.280000e+02 : f32
    %1431 = vector.broadcast %cst_329 : f32 to vector<32x1xf32>
    %1432 = arith.divf %1430, %1431 : vector<32x1xf32>
    %1433 = arith.mulf %1427, %1427 : vector<32x1xf32>
    %1434 = arith.subf %1432, %1433 : vector<32x1xf32>
    %1435 = vector.broadcast %1427 : vector<32x1xf32> to vector<32x128xf32>
    %1436 = arith.subf %1423, %1435 : vector<32x128xf32>
    %cst_330 = arith.constant 9.99999974E-6 : f32
    %1437 = vector.broadcast %cst_330 : f32 to vector<32x1xf32>
    %1438 = arith.addf %1434, %1437 : vector<32x1xf32>
    %1439 = math.rsqrt %1438 : vector<32x1xf32>
    %1440 = vector.broadcast %1439 : vector<32x1xf32> to vector<32x128xf32>
    %1441 = arith.mulf %1436, %1440 : vector<32x128xf32>
    %1442 = tpu.concatenate %1422, %1441 in 1 : vector<32x128xf32>, vector<32x128xf32> -> vector<32x256xf32>
    %1443 = vector.extract_strided_slice %1442 {offsets = [0, 0], sizes = [16, 256], strides = [1, 1]} : vector<32x256xf32> to vector<16x256xf32>
    %1444 = vector.extract_strided_slice %1442 {offsets = [16, 0], sizes = [16, 256], strides = [1, 1]} : vector<32x256xf32> to vector<16x256xf32>
    %1445 = arith.negf %1444 : vector<16x256xf32>
    %1446 = math.exp %1445 : vector<16x256xf32>
    %cst_331 = arith.constant 1.000000e+00 : f32
    %1447 = vector.broadcast %cst_331 : f32 to vector<16x256xf32>
    %1448 = arith.addf %1447, %1446 : vector<16x256xf32>
    %1449 = arith.divf %1447, %1448 : vector<16x256xf32>
    %1450 = arith.mulf %1443, %1449 : vector<16x256xf32>
    %c1_332 = arith.constant 1 : index
    %c0_333 = arith.constant 0 : index
    %c0_334 = arith.constant 0 : index
    %1451 = vector.load %arg3[%c1_332, %c0_333, %c0_334] : memref<10x32x16xf32, #tpu.memory_space<vmem>>, vector<1x32x16xf32>
    %1452 = vector.shape_cast %1451 : vector<1x32x16xf32> to vector<32x16xf32>
    %cst_335 = arith.constant dense<0.000000e+00> : vector<32x256xf32>
    %1453 = tpu.matmul %1452, %1450, %cst_335 {dimension_numbers = #tpu.dot_dimension_numbers<[1], [0], [0], [1], [0, 0, 1, 1], [], []>} : vector<32x16xf32>, vector<16x256xf32>, vector<32x256xf32> -> vector<32x256xf32>
    %1454 = vector.extract_strided_slice %1453 {offsets = [0, 0], sizes = [32, 128], strides = [1, 1]} : vector<32x256xf32> to vector<32x128xf32>
    %cst_336 = arith.constant dense<0.000000e+00> : vector<32xf32>
    %1455 = vector.multi_reduction <add>, %1454, %cst_336 [1] : vector<32x128xf32> to vector<32xf32>
    %1456 = vector.shape_cast %1455 : vector<32xf32> to vector<32x1xf32>
    %cst_337 = arith.constant 1.280000e+02 : f32
    %1457 = vector.broadcast %cst_337 : f32 to vector<32x1xf32>
    %1458 = arith.divf %1456, %1457 : vector<32x1xf32>
    %1459 = arith.mulf %1454, %1454 : vector<32x128xf32>
    %cst_338 = arith.constant dense<0.000000e+00> : vector<32xf32>
    %1460 = vector.multi_reduction <add>, %1459, %cst_338 [1] : vector<32x128xf32> to vector<32xf32>
    %1461 = vector.shape_cast %1460 : vector<32xf32> to vector<32x1xf32>
    %cst_339 = arith.constant 1.280000e+02 : f32
    %1462 = vector.broadcast %cst_339 : f32 to vector<32x1xf32>
    %1463 = arith.divf %1461, %1462 : vector<32x1xf32>
    %1464 = arith.mulf %1458, %1458 : vector<32x1xf32>
    %1465 = arith.subf %1463, %1464 : vector<32x1xf32>
    %1466 = vector.broadcast %1458 : vector<32x1xf32> to vector<32x128xf32>
    %1467 = arith.subf %1454, %1466 : vector<32x128xf32>
    %cst_340 = arith.constant 9.99999974E-6 : f32
    %1468 = vector.broadcast %cst_340 : f32 to vector<32x1xf32>
    %1469 = arith.addf %1465, %1468 : vector<32x1xf32>
    %1470 = math.rsqrt %1469 : vector<32x1xf32>
    %1471 = vector.broadcast %1470 : vector<32x1xf32> to vector<32x128xf32>
    %1472 = arith.mulf %1467, %1471 : vector<32x128xf32>
    %1473 = vector.extract_strided_slice %1453 {offsets = [0, 128], sizes = [32, 128], strides = [1, 1]} : vector<32x256xf32> to vector<32x128xf32>
    %cst_341 = arith.constant dense<0.000000e+00> : vector<32xf32>
    %1474 = vector.multi_reduction <add>, %1473, %cst_341 [1] : vector<32x128xf32> to vector<32xf32>
    %1475 = vector.shape_cast %1474 : vector<32xf32> to vector<32x1xf32>
    %cst_342 = arith.constant 1.280000e+02 : f32
    %1476 = vector.broadcast %cst_342 : f32 to vector<32x1xf32>
    %1477 = arith.divf %1475, %1476 : vector<32x1xf32>
    %1478 = arith.mulf %1473, %1473 : vector<32x128xf32>
    %cst_343 = arith.constant dense<0.000000e+00> : vector<32xf32>
    %1479 = vector.multi_reduction <add>, %1478, %cst_343 [1] : vector<32x128xf32> to vector<32xf32>
    %1480 = vector.shape_cast %1479 : vector<32xf32> to vector<32x1xf32>
    %cst_344 = arith.constant 1.280000e+02 : f32
    %1481 = vector.broadcast %cst_344 : f32 to vector<32x1xf32>
    %1482 = arith.divf %1480, %1481 : vector<32x1xf32>
    %1483 = arith.mulf %1477, %1477 : vector<32x1xf32>
    %1484 = arith.subf %1482, %1483 : vector<32x1xf32>
    %1485 = vector.broadcast %1477 : vector<32x1xf32> to vector<32x128xf32>
    %1486 = arith.subf %1473, %1485 : vector<32x128xf32>
    %cst_345 = arith.constant 9.99999974E-6 : f32
    %1487 = vector.broadcast %cst_345 : f32 to vector<32x1xf32>
    %1488 = arith.addf %1484, %1487 : vector<32x1xf32>
    %1489 = math.rsqrt %1488 : vector<32x1xf32>
    %1490 = vector.broadcast %1489 : vector<32x1xf32> to vector<32x128xf32>
    %1491 = arith.mulf %1486, %1490 : vector<32x128xf32>
    %1492 = tpu.concatenate %1472, %1491 in 1 : vector<32x128xf32>, vector<32x128xf32> -> vector<32x256xf32>
    %1493 = vector.extract_strided_slice %1492 {offsets = [0, 0], sizes = [16, 256], strides = [1, 1]} : vector<32x256xf32> to vector<16x256xf32>
    %1494 = vector.extract_strided_slice %1492 {offsets = [16, 0], sizes = [16, 256], strides = [1, 1]} : vector<32x256xf32> to vector<16x256xf32>
    %1495 = arith.negf %1494 : vector<16x256xf32>
    %1496 = math.exp %1495 : vector<16x256xf32>
    %cst_346 = arith.constant 1.000000e+00 : f32
    %1497 = vector.broadcast %cst_346 : f32 to vector<16x256xf32>
    %1498 = arith.addf %1497, %1496 : vector<16x256xf32>
    %1499 = arith.divf %1497, %1498 : vector<16x256xf32>
    %1500 = arith.mulf %1493, %1499 : vector<16x256xf32>
    %1501 = arith.addf %1450, %1500 : vector<16x256xf32>
    %cst_347 = arith.constant 0.707106769 : f32
    %1502 = vector.broadcast %cst_347 : f32 to vector<16x256xf32>
    %1503 = arith.mulf %1501, %1502 : vector<16x256xf32>
    %c8 = arith.constant 8 : index
    %c0_348 = arith.constant 0 : index
    %c0_349 = arith.constant 0 : index
    %1504 = vector.load %arg3[%c8, %c0_348, %c0_349] : memref<10x32x16xf32, #tpu.memory_space<vmem>>, vector<1x32x16xf32>
    %1505 = vector.shape_cast %1504 : vector<1x32x16xf32> to vector<32x16xf32>
    %cst_350 = arith.constant dense<0.000000e+00> : vector<32x256xf32>
    %1506 = tpu.matmul %1505, %1503, %cst_350 {dimension_numbers = #tpu.dot_dimension_numbers<[1], [0], [0], [1], [0, 0, 1, 1], [], []>} : vector<32x16xf32>, vector<16x256xf32>, vector<32x256xf32> -> vector<32x256xf32>
    %1507 = vector.extract_strided_slice %1506 {offsets = [0, 0], sizes = [32, 128], strides = [1, 1]} : vector<32x256xf32> to vector<32x128xf32>
    %cst_351 = arith.constant dense<0.000000e+00> : vector<32xf32>
    %1508 = vector.multi_reduction <add>, %1507, %cst_351 [1] : vector<32x128xf32> to vector<32xf32>
    %1509 = vector.shape_cast %1508 : vector<32xf32> to vector<32x1xf32>
    %cst_352 = arith.constant 1.280000e+02 : f32
    %1510 = vector.broadcast %cst_352 : f32 to vector<32x1xf32>
    %1511 = arith.divf %1509, %1510 : vector<32x1xf32>
    %1512 = arith.mulf %1507, %1507 : vector<32x128xf32>
    %cst_353 = arith.constant dense<0.000000e+00> : vector<32xf32>
    %1513 = vector.multi_reduction <add>, %1512, %cst_353 [1] : vector<32x128xf32> to vector<32xf32>
    %1514 = vector.shape_cast %1513 : vector<32xf32> to vector<32x1xf32>
    %cst_354 = arith.constant 1.280000e+02 : f32
    %1515 = vector.broadcast %cst_354 : f32 to vector<32x1xf32>
    %1516 = arith.divf %1514, %1515 : vector<32x1xf32>
    %1517 = arith.mulf %1511, %1511 : vector<32x1xf32>
    %1518 = arith.subf %1516, %1517 : vector<32x1xf32>
    %1519 = vector.broadcast %1511 : vector<32x1xf32> to vector<32x128xf32>
    %1520 = arith.subf %1507, %1519 : vector<32x128xf32>
    %cst_355 = arith.constant 9.99999974E-6 : f32
    %1521 = vector.broadcast %cst_355 : f32 to vector<32x1xf32>
    %1522 = arith.addf %1518, %1521 : vector<32x1xf32>
    %1523 = math.rsqrt %1522 : vector<32x1xf32>
    %1524 = vector.broadcast %1523 : vector<32x1xf32> to vector<32x128xf32>
    %1525 = arith.mulf %1520, %1524 : vector<32x128xf32>
    %1526 = vector.extract_strided_slice %1506 {offsets = [0, 128], sizes = [32, 128], strides = [1, 1]} : vector<32x256xf32> to vector<32x128xf32>
    %cst_356 = arith.constant dense<0.000000e+00> : vector<32xf32>
    %1527 = vector.multi_reduction <add>, %1526, %cst_356 [1] : vector<32x128xf32> to vector<32xf32>
    %1528 = vector.shape_cast %1527 : vector<32xf32> to vector<32x1xf32>
    %cst_357 = arith.constant 1.280000e+02 : f32
    %1529 = vector.broadcast %cst_357 : f32 to vector<32x1xf32>
    %1530 = arith.divf %1528, %1529 : vector<32x1xf32>
    %1531 = arith.mulf %1526, %1526 : vector<32x128xf32>
    %cst_358 = arith.constant dense<0.000000e+00> : vector<32xf32>
    %1532 = vector.multi_reduction <add>, %1531, %cst_358 [1] : vector<32x128xf32> to vector<32xf32>
    %1533 = vector.shape_cast %1532 : vector<32xf32> to vector<32x1xf32>
    %cst_359 = arith.constant 1.280000e+02 : f32
    %1534 = vector.broadcast %cst_359 : f32 to vector<32x1xf32>
    %1535 = arith.divf %1533, %1534 : vector<32x1xf32>
    %1536 = arith.mulf %1530, %1530 : vector<32x1xf32>
    %1537 = arith.subf %1535, %1536 : vector<32x1xf32>
    %1538 = vector.broadcast %1530 : vector<32x1xf32> to vector<32x128xf32>
    %1539 = arith.subf %1526, %1538 : vector<32x128xf32>
    %cst_360 = arith.constant 9.99999974E-6 : f32
    %1540 = vector.broadcast %cst_360 : f32 to vector<32x1xf32>
    %1541 = arith.addf %1537, %1540 : vector<32x1xf32>
    %1542 = math.rsqrt %1541 : vector<32x1xf32>
    %1543 = vector.broadcast %1542 : vector<32x1xf32> to vector<32x128xf32>
    %1544 = arith.mulf %1539, %1543 : vector<32x128xf32>
    %1545 = tpu.concatenate %1525, %1544 in 1 : vector<32x128xf32>, vector<32x128xf32> -> vector<32x256xf32>
    %1546 = vector.extract_strided_slice %1545 {offsets = [0, 0], sizes = [16, 256], strides = [1, 1]} : vector<32x256xf32> to vector<16x256xf32>
    %1547 = vector.extract_strided_slice %1545 {offsets = [16, 0], sizes = [16, 256], strides = [1, 1]} : vector<32x256xf32> to vector<16x256xf32>
    %1548 = arith.negf %1547 : vector<16x256xf32>
    %1549 = math.exp %1548 : vector<16x256xf32>
    %cst_361 = arith.constant 1.000000e+00 : f32
    %1550 = vector.broadcast %cst_361 : f32 to vector<16x256xf32>
    %1551 = arith.addf %1550, %1549 : vector<16x256xf32>
    %1552 = arith.divf %1550, %1551 : vector<16x256xf32>
    %1553 = arith.mulf %1546, %1552 : vector<16x256xf32>
    %1554 = arith.addf %1503, %1553 : vector<16x256xf32>
    %cst_362 = arith.constant 0.707106769 : f32
    %1555 = vector.broadcast %cst_362 : f32 to vector<16x256xf32>
    %1556 = arith.mulf %1554, %1555 : vector<16x256xf32>
    %c9 = arith.constant 9 : index
    %c0_363 = arith.constant 0 : index
    %c0_364 = arith.constant 0 : index
    %1557 = vector.load %arg3[%c9, %c0_363, %c0_364] : memref<10x32x16xf32, #tpu.memory_space<vmem>>, vector<1x32x16xf32>
    %1558 = vector.shape_cast %1557 : vector<1x32x16xf32> to vector<32x16xf32>
    %cst_365 = arith.constant dense<0.000000e+00> : vector<32x256xf32>
    %1559 = tpu.matmul %1558, %1556, %cst_365 {dimension_numbers = #tpu.dot_dimension_numbers<[1], [0], [0], [1], [0, 0, 1, 1], [], []>} : vector<32x16xf32>, vector<16x256xf32>, vector<32x256xf32> -> vector<32x256xf32>
    %1560 = vector.extract_strided_slice %1559 {offsets = [0, 0], sizes = [32, 128], strides = [1, 1]} : vector<32x256xf32> to vector<32x128xf32>
    %cst_366 = arith.constant dense<0.000000e+00> : vector<32xf32>
    %1561 = vector.multi_reduction <add>, %1560, %cst_366 [1] : vector<32x128xf32> to vector<32xf32>
    %1562 = vector.shape_cast %1561 : vector<32xf32> to vector<32x1xf32>
    %cst_367 = arith.constant 1.280000e+02 : f32
    %1563 = vector.broadcast %cst_367 : f32 to vector<32x1xf32>
    %1564 = arith.divf %1562, %1563 : vector<32x1xf32>
    %1565 = arith.mulf %1560, %1560 : vector<32x128xf32>
    %cst_368 = arith.constant dense<0.000000e+00> : vector<32xf32>
    %1566 = vector.multi_reduction <add>, %1565, %cst_368 [1] : vector<32x128xf32> to vector<32xf32>
    %1567 = vector.shape_cast %1566 : vector<32xf32> to vector<32x1xf32>
    %cst_369 = arith.constant 1.280000e+02 : f32
    %1568 = vector.broadcast %cst_369 : f32 to vector<32x1xf32>
    %1569 = arith.divf %1567, %1568 : vector<32x1xf32>
    %1570 = arith.mulf %1564, %1564 : vector<32x1xf32>
    %1571 = arith.subf %1569, %1570 : vector<32x1xf32>
    %1572 = vector.broadcast %1564 : vector<32x1xf32> to vector<32x128xf32>
    %1573 = arith.subf %1560, %1572 : vector<32x128xf32>
    %cst_370 = arith.constant 9.99999974E-6 : f32
    %1574 = vector.broadcast %cst_370 : f32 to vector<32x1xf32>
    %1575 = arith.addf %1571, %1574 : vector<32x1xf32>
    %1576 = math.rsqrt %1575 : vector<32x1xf32>
    %1577 = vector.broadcast %1576 : vector<32x1xf32> to vector<32x128xf32>
    %1578 = arith.mulf %1573, %1577 : vector<32x128xf32>
    %1579 = vector.extract_strided_slice %1559 {offsets = [0, 128], sizes = [32, 128], strides = [1, 1]} : vector<32x256xf32> to vector<32x128xf32>
    %cst_371 = arith.constant dense<0.000000e+00> : vector<32xf32>
    %1580 = vector.multi_reduction <add>, %1579, %cst_371 [1] : vector<32x128xf32> to vector<32xf32>
    %1581 = vector.shape_cast %1580 : vector<32xf32> to vector<32x1xf32>
    %cst_372 = arith.constant 1.280000e+02 : f32
    %1582 = vector.broadcast %cst_372 : f32 to vector<32x1xf32>
    %1583 = arith.divf %1581, %1582 : vector<32x1xf32>
    %1584 = arith.mulf %1579, %1579 : vector<32x128xf32>
    %cst_373 = arith.constant dense<0.000000e+00> : vector<32xf32>
    %1585 = vector.multi_reduction <add>, %1584, %cst_373 [1] : vector<32x128xf32> to vector<32xf32>
    %1586 = vector.shape_cast %1585 : vector<32xf32> to vector<32x1xf32>
    %cst_374 = arith.constant 1.280000e+02 : f32
    %1587 = vector.broadcast %cst_374 : f32 to vector<32x1xf32>
    %1588 = arith.divf %1586, %1587 : vector<32x1xf32>
    %1589 = arith.mulf %1583, %1583 : vector<32x1xf32>
    %1590 = arith.subf %1588, %1589 : vector<32x1xf32>
    %1591 = vector.broadcast %1583 : vector<32x1xf32> to vector<32x128xf32>
    %1592 = arith.subf %1579, %1591 : vector<32x128xf32>
    %cst_375 = arith.constant 9.99999974E-6 : f32
    %1593 = vector.broadcast %cst_375 : f32 to vector<32x1xf32>
    %1594 = arith.addf %1590, %1593 : vector<32x1xf32>
    %1595 = math.rsqrt %1594 : vector<32x1xf32>
    %1596 = vector.broadcast %1595 : vector<32x1xf32> to vector<32x128xf32>
    %1597 = arith.mulf %1592, %1596 : vector<32x128xf32>
    %1598 = tpu.concatenate %1578, %1597 in 1 : vector<32x128xf32>, vector<32x128xf32> -> vector<32x256xf32>
    %1599 = vector.extract_strided_slice %1598 {offsets = [0, 0], sizes = [16, 256], strides = [1, 1]} : vector<32x256xf32> to vector<16x256xf32>
    %1600 = vector.extract_strided_slice %1598 {offsets = [16, 0], sizes = [16, 256], strides = [1, 1]} : vector<32x256xf32> to vector<16x256xf32>
    %1601 = arith.negf %1600 : vector<16x256xf32>
    %1602 = math.exp %1601 : vector<16x256xf32>
    %cst_376 = arith.constant 1.000000e+00 : f32
    %1603 = vector.broadcast %cst_376 : f32 to vector<16x256xf32>
    %1604 = arith.addf %1603, %1602 : vector<16x256xf32>
    %1605 = arith.divf %1603, %1604 : vector<16x256xf32>
    %1606 = arith.mulf %1599, %1605 : vector<16x256xf32>
    %1607 = arith.addf %1556, %1606 : vector<16x256xf32>
    %cst_377 = arith.constant 0.707106769 : f32
    %1608 = vector.broadcast %cst_377 : f32 to vector<16x256xf32>
    %1609 = arith.mulf %1607, %1608 : vector<16x256xf32>
    %1610 = vector.extract_strided_slice %1609 {offsets = [0, 0], sizes = [8, 256], strides = [1, 1]} : vector<16x256xf32> to vector<8x256xf32>
    %cst_378 = arith.constant 0.000000e+00 : f32
    %1611 = vector.broadcast %cst_378 : f32 to vector<8x256xf32>
    %1612 = arith.maximumf %1610, %1611 : vector<8x256xf32>
    %c2_379 = arith.constant 2 : index
    %c0_380 = arith.constant 0 : index
    %c0_381 = arith.constant 0 : index
    %1613 = vector.load %arg5[%c2_379, %c0_380, %c0_381] : memref<3x8x256xf32, #tpu.memory_space<vmem>>, vector<1x8x256xf32>
    %1614 = vector.shape_cast %1613 : vector<1x8x256xf32> to vector<8x256xf32>
    %1615 = vector.shape_cast %1612 : vector<8x256xf32> to vector<1x8x256xf32>
    tpu.vector_store %arg5[%c2_379, %c0_380, %c0_381], %1615 {strides = array<i32>} : memref<3x8x256xf32, #tpu.memory_space<vmem>>, vector<1x8x256xf32>,
    %c0_382 = arith.constant 0 : index
    %c0_383 = arith.constant 0 : index
    %1616 = vector.load %arg6[%c0_382, %c0_383] : memref<1x256xf32, #tpu.memory_space<vmem>>, vector<1x256xf32>
    tpu.vector_store %arg6[%c0_382, %c0_383], %1399 {strides = array<i32>} : memref<1x256xf32, #tpu.memory_space<vmem>>, vector<1x256xf32>,
    return
  }
  func.func @transform_0(%arg0: i32) -> (i32, i32) {
    %c0_i32 = arith.constant 0 : i32
    %c0_i32_0 = arith.constant 0 : i32
    return %arg0, %c0_i32 : i32, i32
  }
  func.func @transform_1(%arg0: i32) -> (i32, i32, i32) {
    %c0_i32 = arith.constant 0 : i32
    %c0_i32_0 = arith.constant 0 : i32
    %c0_i32_1 = arith.constant 0 : i32
    %c0_i32_2 = arith.constant 0 : i32
    return %c0_i32, %c0_i32_0, %c0_i32_1 : i32, i32, i32
  }
  func.func @transform_2(%arg0: i32) -> (i32, i32, i32) {
    %c0_i32 = arith.constant 0 : i32
    %c0_i32_0 = arith.constant 0 : i32
    %c0_i32_1 = arith.constant 0 : i32
    %c0_i32_2 = arith.constant 0 : i32
    return %c0_i32, %c0_i32_0, %c0_i32_1 : i32, i32, i32
  }
  func.func @transform_3(%arg0: i32) -> (i32, i32, i32) {
    %c0_i32 = arith.constant 0 : i32
    %c0_i32_0 = arith.constant 0 : i32
    %c0_i32_1 = arith.constant 0 : i32
    %c0_i32_2 = arith.constant 0 : i32
    return %c0_i32, %c0_i32_0, %c0_i32_1 : i32, i32, i32
  }
  func.func @transform_4(%arg0: i32) -> (i32, i32, i32) {
    %c0_i32 = arith.constant 0 : i32
    %c0_i32_0 = arith.constant 0 : i32
    %c0_i32_1 = arith.constant 0 : i32
    return %c0_i32, %c0_i32_0, %arg0 : i32, i32, i32
  }
  func.func @transform_5(%arg0: i32) -> (i32, i32) {
    %c0_i32 = arith.constant 0 : i32
    %c0_i32_0 = arith.constant 0 : i32
    return %c0_i32, %arg0 : i32, i32
  }
}

</mosaic_0001>

<bundles_post_ra>
// kernel: tabnet_encoder.1
= control target key start
LH: loop header
LB: loop body
LE: loop exit
PB: predicated region body
PF: predicated region fallthrough
CT: control target
= control target key end

     0   :  { %11 = vsyncpa [#allocation3], 0  ;;  %s10209_s0 = inlined_call_operand.vmem [shape: f32[512,16], index: 0, kind: input, shape index: {}]   ;;  %s10210_s1 = inlined_call_operand.vmem [shape: f32[2,16,1], index: 1, kind: input, shape index: {}]   ;;  %s10211_s2 = inlined_call_operand.vmem [shape: f32[10,32,16], index: 2, kind: input, shape index: {}]   ;;  %s10212_s3 = inlined_call_operand.vmem [shape: f32[3,16,8], index: 3, kind: input, shape index: {}]   ;;  %s10213_s4 = inlined_call_operand.hbm [shape: f32[3,8,512], index: 4, kind: output, shape index: {0}]   ;;  %s10214_s5 = inlined_call_operand.vmem [shape: f32[1,512], index: 5, kind: output, shape index: {1}]  }
   0x1   :  { %13 = vsyncpa [#allocation3 + $0x1], 0  ;;  %s7608_s18 = smov 0   ;;  %s7610_s19 = smov 0  }
   0x2   :  { %s7612_s20 = smov 0   ;;  %s7614_s21 = smov 0  }
   0x3 LB: > { %s7629_s22 = sadd.s32 4294967295, %s7569_s21   ;;  %s6503_s23 = sadd.s32 4294967294, %s7569_s21   ;;  %s7569_s21 = sphi %s7614_s21, %s10251_s21   ;;  %s7565_s20 = sphi %s7612_s20, %s10250_s20   ;;  %s7561_s19 = sphi %s7610_s19, %s10249_s19   ;;  %s7557_s18 = sphi %s7608_s18, %s10248_s18  }
   0x4   : > { %s7633_s24 = sadd.s32 1, %s7569_s21   ;;  %s115_s25 = sadd.s32 1, %s7565_s20 }
   0x5   : > { %s112_s26 = ssub.s32 %s7569_s21, %s7633_s24  ;;  %p125_p0 = scmp.ne.s32.totalorder %s7565_s20, %s7561_s19 }
   0x6   : > { %p113_p1 = scmp.eq.s32.totalorder %s112_s26, 0  ;;  %p126_p2 = scmp.eq.s32.totalorder %s7629_s22, 1 }
   0x7   : > { %p131_p3 = scmp.ne.s32.totalorder %s7561_s19, %s7557_s18  ;;  %p132_p4 = scmp.eq.s32.totalorder %s6503_s23, 1 }
   0x8   : > { %s7644_s27 = scalar_select %p113_p1, %s7565_s20, %s115_s25  }
   0x9   : > { %p7646_p5 = por %p126_p2, %p125_p0  ;;  %p7650_p6 = por %p132_p4, %p131_p3 }
   0xa   : > { %p6506_p7 = scmp.ge.s32.totalorder %s7569_s21, 1  ;;  %p194_p8 = scmp.lt.s32.totalorder %s7569_s21, 3 }
   0xc   : > { %p195_p9 = pnand %p6506_p7, %p194_p8 }
   0xe   : > { %198 = sbr.rel (%p195_p9) target bundleno = 8326 (0x2086), region = 36 }
  0x13   : > { %v6511_v0 = vld [vmem:[%s10210_s1 + $0x18] sm:$0xff]  ;;  %v335_v1 = vld [vmem:[%s10210_s1 + $0x8] sm:$0xff]  ;;  %v7571_v2 = vmov 0   ;;  %v6510_v3 = vld [vmem:[%s10210_s1 + $0x10] sm:$0xff]  ;;  %s6507_s13 = sshll.u32 %s7629_s22, 5  ;;  %v7572_v14 = vmov 0.0  }
  0x14   : > { %6960 = vset.pattern.permute.xlu1 %v7571_v2  ;;  %6959 = vset.pattern.permute.xlu0 %v7571_v2  ;;  %v334_v4 = vld [vmem:[%s10210_s1] sm:$0xff]  ;;  %p227_p10 = scmp.lt.s32.totalorder %s6507_s13, 63  ;;  %vm371_vm0 = vcmask 130048   ;;  %v370_v55 = vld [vmem:[%s10211_s2 + $0x18] sm:$0xff]  ;;  %v368_v56 = vld [vmem:[%s10211_s2 + $0x8] sm:$0xff]  ;;  %vm1272_vm1 = vcmask 64512  }
  0x15   : > { %360 = vperm.xlu1 %6960, %v6511_v0   ;;  %343 = vperm.xlu0 %6959, %v335_v1   ;;  %v367_v54 = vld [vmem:[%s10211_s2] sm:$0xff]  ;;  %v369_v57 = vld [vmem:[%s10211_s2 + $0x10] sm:$0xff]  ;;  %s6509_s6 = sshll.u32 %s7629_s22, 1  ;;  %s217_s23 = sand.u32 1, %s7561_s19  }
  0x16   : > { %s10253_s13 = smov (!%p227_p10, %s6507_s13), 63  ;;  %448 = vmatprep.mubr.f32.mxu0 %v7572_v14  ;;  %466 = vmatprep.mubr.f32.mxu1 %v7572_v14  ;;  %p234_p11 = scmp.lt.s32.totalorder %s6509_s6, 3 }
  0x17   : > { %s6508_s14 = sshll.u32 %s10253_s13, 3  ;;  %s6913_s25 = smul.u32 48, %s217_s23 }
  0x18   : > { %s7672_s17 = scalar_lea.vmem %s10209_s0, %s6508_s14  ;;  %s10255_s6 = smov (!%p234_p11, %s6509_s6), 3 }
  0x19   : > { %355 = vperm.xlu1 %6960, %v6510_v3   ;;  %338 = vperm.xlu0 %6959, %v334_v4   ;;  %v254_v5 = vld [vmem:[%s7672_s17 + $0x80] sm:$0xff]  ;;  %v255_v6 = vld [vmem:[%s7672_s17 + $0x88] sm:$0xff]  ;;  %v256_v7 = vld [vmem:[%s7672_s17 + $0x90] sm:$0xff]  ;;  %s236_s9 = scalar_lea.vmem %s10214_s5, %s10255_s6  ;;  %s10143_s26 = scalar_lea.vmem [#allocation2], %s6913_s25 }
  0x1a   : > { %v238_v8 = vld [vmem:[%s7672_s17] sm:$0xff]  ;;  %v257_v9 = vld [vmem:[%s7672_s17 + $0x98] sm:$0xff]  ;;  %v239_v10 = vld [vmem:[%s7672_s17 + $0x8] sm:$0xff]  ;;  %s6908_s30 = sshll.u32 %s7629_s22, 8  ;;  %s6417_s6 = sshll.u32 %s10143_s26, 4  ;;  %s10163_s6 = int_to_ptr.vmem [resolvable:$true] %s6417_s6 }
  0x1b   : > { %v258_v11 = vld [vmem:[%s7672_s17 + $0xa0] sm:$0xff]  ;;  %v240_v12 = vld [vmem:[%s7672_s17 + $0x10] sm:$0xff]  ;;  %v259_v13 = vld [vmem:[%s7672_s17 + $0xa8] sm:$0xff]  ;;  %s10169_s22 = scalar_lea.sflag [#allocation3], %s217_s23  ;;  %s7509_s10 = scalar_lea.vmem %s10163_s6, 768 }
  0x1c   : > { %v241_v15 = vld [vmem:[%s7672_s17 + $0x18] sm:$0xff]  ;;  %v260_v16 = vld [vmem:[%s7672_s17 + $0xb0] sm:$0xff]  ;;  %v242_v17 = vld [vmem:[%s7672_s17 + $0x20] sm:$0xff]  ;;  %p7510_p12 = scmp.ne.s32.totalorder %s10163_s6, %s7509_s10  ;;  %s7574_s11 = smov [#allocation2]  }
  0x1d   : > { %v261_v18 = vld [vmem:[%s7672_s17 + $0xb8] sm:$0xff]  ;;  %v243_v19 = vld [vmem:[%s7672_s17 + $0x28] sm:$0xff]  ;;  %v262_v20 = vld [vmem:[%s7672_s17 + $0xc0] sm:$0xff]  ;;  %s7513_s12 = sshll.u32 %s7574_s11, 4  ;;  %s7514_s12 = int_to_ptr.vmem [resolvable:$false] %s7513_s12 }
  0x1e   : > { %v244_v21 = vld [vmem:[%s7672_s17 + $0x30] sm:$0xff]  ;;  %v263_v22 = vld [vmem:[%s7672_s17 + $0xc8] sm:$0xff]  ;;  %v245_v23 = vld [vmem:[%s7672_s17 + $0x38] sm:$0xff]  ;;  %p7511_p13 = pnand %p7510_p12, %p7646_p5  ;;  %s7515_s13 = scalar_lea.vmem %s7514_s12, 1536 }
  0x1f   : > { %v264_v24 = vld [vmem:[%s7672_s17 + $0xd0] sm:$0xff]  ;;  %v246_v25 = vld [vmem:[%s7672_s17 + $0x40] sm:$0xff]  ;;  %v265_v26 = vld [vmem:[%s7672_s17 + $0xd8] sm:$0xff]  ;;  %p7516_p1 = scmp.lt.s32.totalorder %s10163_s6, %s7514_s12  ;;  %p7517_p2 = scmp.lt.s32.totalorder %s7515_s13, %s7509_s10 }
  0x20   : > { %v247_v27 = vld [vmem:[%s7672_s17 + $0x48] sm:$0xff]  ;;  %v266_v28 = vld [vmem:[%s7672_s17 + $0xe0] sm:$0xff]  ;;  %v248_v29 = vld [vmem:[%s7672_s17 + $0x50] sm:$0xff]  ;;  %p7512_p0 = pneg %p7511_p13 }
  0x21   : > { %v267_v30 = vld [vmem:[%s7672_s17 + $0xe8] sm:$0xff]  ;;  %v249_v31 = vld [vmem:[%s7672_s17 + $0x58] sm:$0xff]  ;;  %v268_v32 = vld [vmem:[%s7672_s17 + $0xf0] sm:$0xff]  ;;  %p7518_p3 = por %p7517_p2, %p7516_p1 }
  0x22   : > { %v250_v33 = vld [vmem:[%s7672_s17 + $0x60] sm:$0xff]  ;;  %v269_v34 = vld [vmem:[%s7672_s17 + $0xf8] sm:$0xff]  ;;  %v251_v35 = vld [vmem:[%s7672_s17 + $0x68] sm:$0xff] }
  0x23   : > { %v252_v36 = vld [vmem:[%s7672_s17 + $0x70] sm:$0xff]  ;;  %v253_v37 = vld [vmem:[%s7672_s17 + $0x78] sm:$0xff]  ;;  %p7519_p4 = pnand %p7518_p3, %p7512_p0 }
  0x37   : > { %302 = vxpose.xlu0.b32.start [1/16] (narrow) %v254_v5, 16 }
  0x3b   : > { %303 = vxpose.xlu0.b32.cont [2/16] (narrow) %v255_v6, 16 }
  0x3f   : > { %304 = vxpose.xlu0.b32.cont [3/16] (narrow) %v256_v7, 16 }
  0x42   : > { %270 = vxpose.xlu1.b32.start [1/16] (narrow) %v238_v8, 16 }
  0x43   : > { %305 = vxpose.xlu0.b32.cont [4/16] (narrow) %v257_v9, 16 }
  0x46   : > { %271 = vxpose.xlu1.b32.cont [2/16] (narrow) %v239_v10, 16 }
  0x47   : > { %306 = vxpose.xlu0.b32.cont [5/16] (narrow) %v258_v11, 16 }
  0x4a   : > { %272 = vxpose.xlu1.b32.cont [3/16] (narrow) %v240_v12, 16 }
  0x4b   : > { %307 = vxpose.xlu0.b32.cont [6/16] (narrow) %v259_v13, 16 }
  0x4e   : > { %273 = vxpose.xlu1.b32.cont [4/16] (narrow) %v241_v15, 16 }
  0x4f   : > { %308 = vxpose.xlu0.b32.cont [7/16] (narrow) %v260_v16, 16 }
  0x52   : > { %274 = vxpose.xlu1.b32.cont [5/16] (narrow) %v242_v17, 16 }
  0x53   : > { %309 = vxpose.xlu0.b32.cont [8/16] (narrow) %v261_v18, 16 }
  0x56   : > { %275 = vxpose.xlu1.b32.cont [6/16] (narrow) %v243_v19, 16 }
  0x57   : > { %310 = vxpose.xlu0.b32.cont [9/16] (narrow) %v262_v20, 16 }
  0x5a   : > { %276 = vxpose.xlu1.b32.cont [7/16] (narrow) %v244_v21, 16 }
  0x5b   : > { %311 = vxpose.xlu0.b32.cont [10/16] (narrow) %v263_v22, 16 }
  0x5e   : > { %277 = vxpose.xlu1.b32.cont [8/16] (narrow) %v245_v23, 16 }
  0x5f   : > { %312 = vxpose.xlu0.b32.cont [11/16] (narrow) %v264_v24, 16 }
  0x62   : > { %278 = vxpose.xlu1.b32.cont [9/16] (narrow) %v246_v25, 16 }
  0x63   : > { %313 = vxpose.xlu0.b32.cont [12/16] (narrow) %v265_v26, 16 }
  0x66   : > { %279 = vxpose.xlu1.b32.cont [10/16] (narrow) %v247_v27, 16 }
  0x67   : > { %314 = vxpose.xlu0.b32.cont [13/16] (narrow) %v266_v28, 16 }
  0x6a   : > { %280 = vxpose.xlu1.b32.cont [11/16] (narrow) %v248_v29, 16 }
  0x6b   : > { %315 = vxpose.xlu0.b32.cont [14/16] (narrow) %v267_v30, 16 }
  0x6e   : > { %281 = vxpose.xlu1.b32.cont [12/16] (narrow) %v249_v31, 16 }
  0x6f   : > { %316 = vxpose.xlu0.b32.cont [15/16] (narrow) %v268_v32, 16 }
  0x72   : > { %282 = vxpose.xlu1.b32.cont [13/16] (narrow) %v250_v33, 16 }
  0x73   : > { %317 = vxpose.xlu0.b32.end [16/16] (narrow) %v269_v34, 16 }
  0x76   : > { %283 = vxpose.xlu1.b32.cont [14/16] (narrow) %v251_v35, 16 }
  0x7a   : > { %284 = vxpose.xlu1.b32.cont [15/16] (narrow) %v252_v36, 16 }
  0x7e   : > { %285 = vxpose.xlu1.b32.end [16/16] (narrow) %v253_v37, 16 }
  0x90   : > { %v344_v38 = vpop.permute.xlu0 %343  ;;  %v361_v41 = vpop.permute.xlu1 %360 }
  0x94   : > { %v339_v39 = vpop.permute.xlu0 %338  ;;  %v356_v44 = vpop.permute.xlu1 %355 }
  0xb3   : > { %v318_v40 = vpop.trf.xlu0 }
  0xb4   : > { %v347_v47 = vsub.f32 %v318_v40, %v339_v39 }
  0xb6   : > { %v7714_v52 = vmul.f32 %v356_v44, %v347_v47 }
  0xb7   : > { %v319_v42 = vpop.trf.xlu0 }
  0xb8   : > { %v349_v43 = vsub.f32 %v319_v42, %v344_v38 }
  0xba   : > { %v7708_v45 = vmul.f32 %v361_v41, %v349_v43 }
  0xbc   : > { %412 = vmatprep.subr.mxu0 %v7708_v45  ;;  %6909 = vmatprep.subr.mxu1 %v7708_v45 }
  0xbe   : > { %v286_v46 = vpop.trf.xlu1 }
  0xbf   : > { %v346_v49 = vsub.f32 %v286_v46, %v339_v39 }
  0xc1   : > { %v7716_v53 = vmul.f32 %v356_v44, %v346_v49 }
  0xc2   : > { %v287_v48 = vpop.trf.xlu1 }
  0xc3   : > { %v348_v50 = vsub.f32 %v287_v48, %v344_v38 }
  0xc5   : > { %v7712_v51 = vmul.f32 %v361_v41, %v348_v50 }
  0xc7   : > { %413 = vmatpush1.msra.mxu0 %v7712_v51  ;;  %6911 = vmatpush1.msra.mxu1 %v7712_v51 }
  0xc8   : > { %414 = vmatprep.subr.mxu0 %v7714_v52  ;;  %6910 = vmatprep.subr.mxu1 %v7714_v52 }
  0xc9   : > { %415 = vmatpush1.msra.mxu0 %v7716_v53  ;;  %6912 = vmatpush1.msra.mxu1 %v7716_v53 }
  0xca   : > { %6512 = vmatmul.mubr.msk.f32.vlgmr.msra.gmra.mxu0 %vm371_vm0, %v367_v54  ;;  %6515 = vmatmul.mubr.msk.f32.vlgmr.msra.gmra.mxu1 %vm371_vm0, %v370_v55 }
  0xcb   : > { %454 = vmatprep.mubr.f32.mxu0 %v7572_v14  ;;  %687 = vmatprep.mubr.f32.mxu1 %v7572_v14 }
  0xce   : > { %6513 = vmatmul.mubr.msk.f32.gmra.mxu0 %vm371_vm0, %v368_v56 }
  0xcf   : > { %460 = vmatprep.mubr.f32.mxu0 %v7572_v14 }
  0xd2   : > { %6514 = vmatmul.mubr.msk.f32.gmra.mxu0 %vm371_vm0, %v369_v57 }
  0xd3   : > { %933 = vmatprep.mubr.f32.mxu0 %v7572_v14 }
 0x18a   : > { %v7744_v58 = vpop.f32.mrf.mxu0  ;;  %v7746_v59 = vpop.f32.mrf.mxu1 }
 0x18b   : > { %479 = vadd.xlane.f32.xlu1 %v7746_v59  ;;  %v489_v63 = vmul.f32 %v7746_v59, %v7746_v59  ;;  %v486_v9 = vmul.f32 %v7744_v58, %v7744_v58 }
 0x18c   : > { %v7749_v60 = vpop.f32.mrf.mxu0  ;;  %v7751_v61 = vpop.f32.mrf.mxu1 }
 0x18d   : > { %532 = vadd.xlane.f32.xlu0 %v7751_v61  ;;  %v541_v2 = vmul.f32 %v7751_v61, %v7751_v61  ;;  %v538_v7 = vmul.f32 %v7749_v60, %v7749_v60 }
 0x18e   : > { %v7754_v62 = vpop.f32.mrf.mxu0 }
 0x18f   : > { %v487_v8 = vmul.f32 %v7754_v62, %v7754_v62 }
 0x190   : > { %v7758_v0 = vpop.f32.mrf.mxu0 }
 0x191   : > { %496 = vadd.xlane.f32.xlu0 %v489_v63  ;;  %v539_v6 = vmul.f32 %v7758_v0, %v7758_v0 }
 0x192   : > { %v7760_v1 = vpop.f32.mrf.mxu0 }
 0x193   : > { %477 = vadd.xlane.f32.xlu1 %v7760_v1  ;;  %v488_v5 = vmul.f32 %v7760_v1, %v7760_v1 }
 0x194   : > { %v7765_v3 = vpop.f32.mrf.mxu0 }
 0x195   : > { %548 = vadd.xlane.f32.xlu0 %v541_v2  ;;  %v540_v4 = vmul.f32 %v7765_v3, %v7765_v3 }
 0x197   : > { %546 = vadd.xlane.f32.xlu1 %v540_v4 }
 0x199   : > { %530 = vadd.xlane.f32.xlu0 %v7765_v3 }
 0x19b   : > { %528 = vadd.xlane.f32.xlu1 %v7758_v0 }
 0x19d   : > { %494 = vadd.xlane.f32.xlu0 %v488_v5 }
 0x19f   : > { %526 = vadd.xlane.f32.xlu1 %v7749_v60 }
 0x1a1   : > { %475 = vadd.xlane.f32.xlu0 %v7754_v62 }
 0x1a3   : > { %473 = vadd.xlane.f32.xlu1 %v7744_v58 }
 0x1a5   : > { %544 = vadd.xlane.f32.xlu0 %v539_v6 }
 0x1a7   : > { %542 = vadd.xlane.f32.xlu1 %v538_v7 }
 0x1a9   : > { %492 = vadd.xlane.f32.xlu0 %v487_v8 }
 0x1ad   : > { %490 = vadd.xlane.f32.xlu0 %v486_v9 }
 0x214   : > { %v480_v10 = vpop.xlane.xlu1 %479 }
 0x215   : > { %v485_v12 = vmul.f32 0.0078125, %v480_v10 }
 0x216   : > { %v533_v11 = vpop.xlane.xlu0 %532 }
 0x217   : > { %v505_v15 = vmul.f32 %v485_v12, %v485_v12  ;;  %v537_v16 = vmul.f32 0.0078125, %v533_v11  ;;  %v513_v41 = vsub.f32 %v7746_v59, %v485_v12 }
 0x219   : > { %v557_v21 = vmul.f32 %v537_v16, %v537_v16  ;;  %v565_v47 = vsub.f32 %v7751_v61, %v537_v16 }
 0x21a   : > { %v497_v13 = vpop.xlane.xlu0 %496 }
 0x21b   : > { %v501_v17 = vmul.f32 0.0078125, %v497_v13 }
 0x21c   : > { %v478_v18 = vpop.xlane.xlu1 %477 }
 0x21d   : > { %v509_v19 = vsub.f32 %v501_v17, %v505_v15  ;;  %v484_v29 = vmul.f32 0.0078125, %v478_v18 }
 0x21e   : > { %v549_v20 = vpop.xlane.xlu0 %548 }
 0x21f   : > { %v517_v22 = vadd.f32 1e-05, %v509_v19  ;;  %v553_v23 = vmul.f32 0.0078125, %v549_v20  ;;  %v504_v33 = vmul.f32 %v484_v29, %v484_v29  ;;  %v512_v6 = vsub.f32 %v7760_v1, %v484_v29 }
 0x220   : > { %v547_v25 = vpop.xlane.xlu1 %546 }
 0x221   : > { %6961 = vrsqrt.f32 %v517_v22  ;;  %v561_v24 = vsub.f32 %v553_v23, %v557_v21  ;;  %v552_v30 = vmul.f32 0.0078125, %v547_v25 }
 0x222   : > { %v531_v26 = vpop.xlane.xlu0 %530 }
 0x223   : > { %v569_v27 = vadd.f32 1e-05, %v561_v24  ;;  %v536_v28 = vmul.f32 0.0078125, %v531_v26 }
 0x224   : > { %v529_v36 = vpop.xlane.xlu1 %528 }
 0x225   : > { %6963 = vrsqrt.f32 %v569_v27  ;;  %v556_v31 = vmul.f32 %v536_v28, %v536_v28  ;;  %v535_v56 = vmul.f32 0.0078125, %v529_v36  ;;  %v564_v2 = vsub.f32 %v7765_v3, %v536_v28 }
 0x226   : > { %v495_v32 = vpop.xlane.xlu0 %494 }
 0x227   : > { %v560_v34 = vsub.f32 %v552_v30, %v556_v31  ;;  %v500_v35 = vmul.f32 0.0078125, %v495_v32  ;;  %v555_v8 = vmul.f32 %v535_v56, %v535_v56 }
 0x228   : > { %v527_v43 = vpop.xlane.xlu1 %526 }
 0x229   : > { %v568_v37 = vadd.f32 1e-05, %v560_v34  ;;  %v508_v38 = vsub.f32 %v500_v35, %v504_v33  ;;  %v534_v13 = vmul.f32 0.0078125, %v527_v43 }
 0x22a   : > { %v476_v39 = vpop.xlane.xlu0 %475 }
 0x22b   : > { %6965 = vrsqrt.f32 %v568_v37  ;;  %v516_v40 = vadd.f32 1e-05, %v508_v38  ;;  %v483_v63 = vmul.f32 0.0078125, %v476_v39  ;;  %v554_v20 = vmul.f32 %v534_v13, %v534_v13 }
 0x22c   : > { %v474_v54 = vpop.xlane.xlu1 %473  ;;  %v563_v38 = vsub.f32 %v7758_v0, %v535_v56 }
 0x22d   : > { %6967 = vrsqrt.f32 %v516_v40  ;;  %v503_v9 = vmul.f32 %v483_v63, %v483_v63  ;;  %v482_v19 = vmul.f32 0.0078125, %v474_v54  ;;  %v511_v39 = vsub.f32 %v7754_v62, %v483_v63  ;;  %v6522_v63 = vld [vmem:[%s10211_s2 + $0x30] sm:$0xff] }
 0x22e   : > { %v6962_v42 = vpop.eup %6961  ;;  %v545_v46 = vpop.xlane.xlu0 %544 }
 0x22f   : > { %v525_v44 = vmul.f32 %v6962_v42, %v513_v41  ;;  %v551_v59 = vmul.f32 0.0078125, %v545_v46  ;;  %v502_v24 = vmul.f32 %v482_v19, %v482_v19  ;;  %v510_v0 = vsub.f32 %v7744_v58, %v482_v19  ;;  %v6521_v58 = vld [vmem:[%s10211_s2 + $0x28] sm:$0xff] }
 0x230   : > { %v543_v10 = vpop.xlane.xlu1 %542 }
 0x231   : > { %v6518_v48 = vmul.f32 -1.442695, %v525_v44  ;;  %v559_v15 = vsub.f32 %v551_v59, %v555_v8  ;;  %v550_v3 = vmul.f32 0.0078125, %v543_v10 }
 0x232   : > { %v6964_v49 = vpop.eup %6963  ;;  %v493_v57 = vpop.xlane.xlu0 %492 }
 0x233   : > { %6969 = vpow2.f32 %v6518_v48  ;;  %v577_v50 = vmul.f32 %v6964_v49, %v565_v47  ;;  %v499_v5 = vmul.f32 0.0078125, %v493_v57  ;;  %v567_v21 = vadd.f32 1e-05, %v559_v15 }
 0x234   : > { %v558_v25 = vsub.f32 %v550_v3, %v554_v20  ;;  %v562_v48 = vsub.f32 %v7749_v60, %v534_v13  ;;  %v6520_v60 = vld [vmem:[%s10211_s2 + $0x20] sm:$0xff] }
 0x235   : > { %v6519_v55 = vmul.f32 -1.442695, %v577_v50  ;;  %v507_v16 = vsub.f32 %v499_v5, %v503_v9 }
 0x236   : > { %v491_v17 = vpop.xlane.xlu0 %490  ;;  %v566_v29 = vadd.f32 1e-05, %v558_v25 }
 0x237   : > { %6971 = vpow2.f32 %v6519_v55  ;;  %v498_v22 = vmul.f32 0.0078125, %v491_v17  ;;  %v515_v23 = vadd.f32 1e-05, %v507_v16 }
 0x238   : > { %v6966_v4 = vpop.eup %6965 }
 0x239   : > { %v576_v7 = vmul.f32 %v6966_v4, %v564_v2  ;;  %v506_v27 = vsub.f32 %v498_v22, %v502_v24  ;;  %v6523_v2 = vld [vmem:[%s10211_s2 + $0x38] sm:$0xff] }
 0x23a   : > { %v6968_v61 = vpop.eup %6967 }
 0x23b   : > { %v6517_v11 = vmul.f32 -1.442695, %v576_v7  ;;  %v524_v12 = vmul.f32 %v6968_v61, %v512_v6  ;;  %v514_v31 = vadd.f32 1e-05, %v506_v27 }
 0x23d   : > { %6973 = vpow2.f32 %v6517_v11  ;;  %v6516_v18 = vmul.f32 -1.442695, %v524_v12 }
 0x23f   : > { %6975 = vpow2.f32 %v6516_v18 }
 0x240   : > { %v6970_v1 = vpop.eup %6969  ;;  %6977 = vrsqrt.f32 %v567_v21 }
 0x241   : > { %v592_v26 = vadd.f32 1.0, %v6970_v1  ;;  %6979 = vrsqrt.f32 %v515_v23 }
 0x243   : > { %6981 = vrcp.f32 %v592_v26 }
 0x244   : > { %v6972_v28 = vpop.eup %6971 }
 0x245   : > { %v593_v30 = vadd.f32 1.0, %v6972_v28 }
 0x247   : > { %6983 = vrcp.f32 %v593_v30 }
 0x248   : > { %6985 = vrsqrt.f32 %v566_v29 }
 0x249   : > { %6987 = vrsqrt.f32 %v514_v31 }
 0x24a   : > { %v6974_v32 = vpop.eup %6973 }
 0x24b   : > { %v591_v33 = vadd.f32 1.0, %v6974_v32 }
 0x24c   : > { %v6976_v34 = vpop.eup %6975 }
 0x24d   : > { %6989 = vrcp.f32 %v591_v33  ;;  %v590_v35 = vadd.f32 1.0, %v6976_v34  ;;  %v6978_v36 = vpop.eup %6977 }
 0x24e   : > { %v6980_v37 = vpop.eup %6979  ;;  %v575_v41 = vmul.f32 %v6978_v36, %v563_v38 }
 0x24f   : > { %6991 = vrcp.f32 %v590_v35  ;;  %v523_v43 = vmul.f32 %v6980_v37, %v511_v39 }
 0x250   : > { %v6982_v40 = vpop.eup %6981 }
 0x251   : > { %v7792_v47 = vmul.f32 %v6982_v40, %v523_v43 }
 0x254   : > { %v6984_v42 = vpop.eup %6983 }
 0x255   : > { %v7790_v44 = vmul.f32 %v6984_v42, %v575_v41  ;;  %v6986_v46 = vpop.eup %6985 }
 0x256   : > { %v6988_v49 = vpop.eup %6987  ;;  %v574_v50 = vmul.f32 %v6986_v46, %v562_v48 }
 0x257   : > { %651 = vmatprep.subr.mxu1 %v7790_v44  ;;  %v522_v55 = vmul.f32 %v6988_v49, %v510_v0 }
 0x258   : > { %652 = vmatpush1.msra.mxu1 %v7792_v47 }
 0x25a   : > { %v6990_v62 = vpop.eup %6989 }
 0x25b   : > { %v7798_v54 = vmul.f32 %v6990_v62, %v574_v50 }
 0x25c   : > { %v6992_v56 = vpop.eup %6991 }
 0x25d   : > { %653 = vmatprep.subr.mxu1 %v7798_v54  ;;  %v7801_v57 = vmul.f32 %v6992_v56, %v522_v55 }
 0x25f   : > { %654 = vmatpush1.msra.mxu1 %v7801_v57 }
 0x260   : > { %6524 = vmatmul.mubr.msk.f32.vlgmr.msra.gmra.mxu1 %vm371_vm0, %v6520_v60 }
 0x261   : > { %693 = vmatprep.mubr.f32.mxu1 %v7572_v14 }
 0x264   : > { %6525 = vmatmul.mubr.msk.f32.gmra.mxu1 %vm371_vm0, %v6521_v58 }
 0x265   : > { %699 = vmatprep.mubr.f32.mxu1 %v7572_v14 }
 0x268   : > { %6526 = vmatmul.mubr.msk.f32.gmra.mxu1 %vm371_vm0, %v6522_v63 }
 0x269   : > { %705 = vmatprep.mubr.f32.mxu1 %v7572_v14 }
 0x26c   : > { %6527 = vmatmul.mubr.msk.f32.gmra.mxu1 %vm371_vm0, %v6523_v2 }
 0x26d   : > { %1179 = vmatprep.mubr.f32.mxu1 %v7572_v14 }
 0x320   : > { %v7824_v59 = vpop.f32.mrf.mxu1 }
 0x321   : > { %v724_v18 = vmul.f32 %v7824_v59, %v7824_v59 }
 0x322   : > { %v7826_v4 = vpop.f32.mrf.mxu1 }
 0x323   : > { %v776_v16 = vmul.f32 %v7826_v4, %v7826_v4 }
 0x324   : > { %v7828_v5 = vpop.f32.mrf.mxu1 }
 0x325   : > { %v725_v17 = vmul.f32 %v7828_v5, %v7828_v5 }
 0x326   : > { %v7830_v6 = vpop.f32.mrf.mxu1 }
 0x327   : > { %v777_v15 = vmul.f32 %v7830_v6, %v7830_v6 }
 0x328   : > { %v7832_v7 = vpop.f32.mrf.mxu1 }
 0x329   : > { %716 = vadd.xlane.f32.xlu1 %v7832_v7  ;;  %v726_v13 = vmul.f32 %v7832_v7, %v7832_v7 }
 0x32a   : > { %v7835_v8 = vpop.f32.mrf.mxu1 }
 0x32b   : > { %v778_v11 = vmul.f32 %v7835_v8, %v7835_v8 }
 0x32c   : > { %v7837_v61 = vpop.f32.mrf.mxu1 }
 0x32d   : > { %768 = vadd.xlane.f32.xlu1 %v7835_v8  ;;  %718 = vadd.xlane.f32.xlu0 %v7837_v61  ;;  %v727_v9 = vmul.f32 %v7837_v61, %v7837_v61 }
 0x32e   : > { %v7843_v10 = vpop.f32.mrf.mxu1 }
 0x32f   : > { %v779_v12 = vmul.f32 %v7843_v10, %v7843_v10 }
 0x331   : > { %734 = vadd.xlane.f32.xlu0 %v727_v9  ;;  %770 = vadd.xlane.f32.xlu1 %v7843_v10 }
 0x335   : > { %784 = vadd.xlane.f32.xlu1 %v778_v11  ;;  %786 = vadd.xlane.f32.xlu0 %v779_v12 }
 0x339   : > { %766 = vadd.xlane.f32.xlu1 %v7830_v6  ;;  %732 = vadd.xlane.f32.xlu0 %v726_v13 }
 0x33d   : > { %764 = vadd.xlane.f32.xlu1 %v7826_v4  ;;  %714 = vadd.xlane.f32.xlu0 %v7828_v5 }
 0x341   : > { %712 = vadd.xlane.f32.xlu1 %v7824_v59  ;;  %782 = vadd.xlane.f32.xlu0 %v777_v15 }
 0x345   : > { %780 = vadd.xlane.f32.xlu1 %v776_v16  ;;  %730 = vadd.xlane.f32.xlu0 %v725_v17 }
 0x349   : > { %728 = vadd.xlane.f32.xlu0 %v724_v18 }
 0x3b2   : > { %v717_v19 = vpop.xlane.xlu1 %716 }
 0x3b3   : > { %v722_v28 = vmul.f32 0.0078125, %v717_v19 }
 0x3b5   : > { %v742_v40 = vmul.f32 %v722_v28, %v722_v28  ;;  %v750_v19 = vsub.f32 %v7832_v7, %v722_v28 }
 0x3b6   : > { %v769_v3 = vpop.xlane.xlu1 %768  ;;  %v719_v20 = vpop.xlane.xlu0 %718 }
 0x3b7   : > { %v723_v21 = vmul.f32 0.0078125, %v719_v20  ;;  %v774_v22 = vmul.f32 0.0078125, %v769_v3 }
 0x3b9   : > { %v743_v24 = vmul.f32 %v723_v21, %v723_v21  ;;  %v794_v29 = vmul.f32 %v774_v22, %v774_v22  ;;  %v751_v62 = vsub.f32 %v7837_v61, %v723_v21  ;;  %v802_v58 = vsub.f32 %v7835_v8, %v774_v22 }
 0x3ba   : > { %v735_v1 = vpop.xlane.xlu0 %734  ;;  %v771_v23 = vpop.xlane.xlu1 %770 }
 0x3bb   : > { %v739_v25 = vmul.f32 0.0078125, %v735_v1  ;;  %v775_v26 = vmul.f32 0.0078125, %v771_v23 }
 0x3bd   : > { %v747_v27 = vsub.f32 %v739_v25, %v743_v24  ;;  %v795_v33 = vmul.f32 %v775_v26, %v775_v26  ;;  %v803_v11 = vsub.f32 %v7843_v10, %v775_v26 }
 0x3be   : > { %v785_v30 = vpop.xlane.xlu1 %784  ;;  %v787_v31 = vpop.xlane.xlu0 %786 }
 0x3bf   : > { %v755_v32 = vadd.f32 1e-05, %v747_v27  ;;  %v790_v34 = vmul.f32 0.0078125, %v785_v30  ;;  %v791_v35 = vmul.f32 0.0078125, %v787_v31 }
 0x3c1   : > { %6993 = vrsqrt.f32 %v755_v32  ;;  %v798_v36 = vsub.f32 %v790_v34, %v794_v29  ;;  %v799_v37 = vsub.f32 %v791_v35, %v795_v33 }
 0x3c2   : > { %v767_v38 = vpop.xlane.xlu1 %766  ;;  %v733_v39 = vpop.xlane.xlu0 %732 }
 0x3c3   : > { %v806_v41 = vadd.f32 1e-05, %v798_v36  ;;  %v807_v42 = vadd.f32 1e-05, %v799_v37  ;;  %v738_v43 = vmul.f32 0.0078125, %v733_v39  ;;  %v773_v1 = vmul.f32 0.0078125, %v767_v38 }
 0x3c5   : > { %6995 = vrsqrt.f32 %v806_v41  ;;  %v746_v46 = vsub.f32 %v738_v43, %v742_v40  ;;  %v793_v30 = vmul.f32 %v773_v1, %v773_v1 }
 0x3c6   : > { %6997 = vrsqrt.f32 %v807_v42  ;;  %v715_v48 = vpop.xlane.xlu0 %714  ;;  %v765_v0 = vpop.xlane.xlu1 %764 }
 0x3c7   : > { %v754_v49 = vadd.f32 1e-05, %v746_v46  ;;  %v721_v15 = vmul.f32 0.0078125, %v715_v48  ;;  %v772_v18 = vmul.f32 0.0078125, %v765_v0 }
 0x3c9   : > { %6999 = vrsqrt.f32 %v754_v49  ;;  %v741_v23 = vmul.f32 %v721_v15, %v721_v15  ;;  %v792_v10 = vmul.f32 %v772_v18, %v772_v18 }
 0x3ca   : > { %v783_v50 = vpop.xlane.xlu0 %782  ;;  %v713_v55 = vpop.xlane.xlu1 %712 }
 0x3cb   : > { %v720_v25 = vmul.f32 0.0078125, %v713_v55  ;;  %v789_v26 = vmul.f32 0.0078125, %v783_v50  ;;  %v749_v50 = vsub.f32 %v7828_v5, %v721_v15 }
 0x3cd   : > { %v740_v7 = vmul.f32 %v720_v25, %v720_v25  ;;  %v797_v28 = vsub.f32 %v789_v26, %v793_v30 }
 0x3ce   : > { %v6994_v56 = vpop.eup %6993  ;;  %v731_v2 = vpop.xlane.xlu0 %730 }
 0x3cf   : > { %v763_v60 = vmul.f32 %v6994_v56, %v751_v62  ;;  %v781_v16 = vpop.xlane.xlu1 %780  ;;  %v737_v3 = vmul.f32 0.0078125, %v731_v2  ;;  %v805_v37 = vadd.f32 1e-05, %v797_v28  ;;  %v800_v56 = vsub.f32 %v7826_v4, %v772_v18 }
 0x3d0   : > { %v788_v8 = vmul.f32 0.0078125, %v781_v16  ;;  %v748_v16 = vsub.f32 %v7824_v59, %v720_v25 }
 0x3d1   : > { %v6530_v63 = vmul.f32 -1.442695, %v763_v60  ;;  %v745_v29 = vsub.f32 %v737_v3, %v741_v23 }
 0x3d2   : > { %v6996_v9 = vpop.eup %6995  ;;  %v729_v24 = vpop.xlane.xlu0 %728  ;;  %v796_v31 = vsub.f32 %v788_v8, %v792_v10 }
 0x3d3   : > { %v6998_v12 = vpop.eup %6997  ;;  %7001 = vpow2.f32 %v6530_v63  ;;  %v814_v13 = vmul.f32 %v6996_v9, %v802_v58  ;;  %v736_v32 = vmul.f32 0.0078125, %v729_v24  ;;  %v753_v33 = vadd.f32 1e-05, %v745_v29 }
 0x3d4   : > { %v815_v17 = vmul.f32 %v6998_v12, %v803_v11  ;;  %v804_v34 = vadd.f32 1e-05, %v796_v31  ;;  %v801_v58 = vsub.f32 %v7830_v6, %v773_v1  ;;  %v6535_v1 = vld [vmem:[%s10211_s2 + $0x58] sm:$0xff] }
 0x3d5   : > { %v6529_v61 = vmul.f32 -1.442695, %v814_v13  ;;  %v744_v35 = vsub.f32 %v736_v32, %v740_v7 }
 0x3d6   : > { %v7000_v20 = vpop.eup %6999  ;;  %v6531_v21 = vmul.f32 -1.442695, %v815_v17 }
 0x3d7   : > { %7003 = vpow2.f32 %v6529_v61  ;;  %v762_v22 = vmul.f32 %v7000_v20, %v750_v19  ;;  %v752_v39 = vadd.f32 1e-05, %v744_v35 }
 0x3d8   : > { %7005 = vpow2.f32 %v6531_v21 }
 0x3d9   : > { %v6528_v27 = vmul.f32 -1.442695, %v762_v22 }
 0x3db   : > { %7007 = vpow2.f32 %v6528_v27 }
 0x3dc   : > { %7009 = vrsqrt.f32 %v753_v33 }
 0x3dd   : > { %7011 = vrsqrt.f32 %v804_v34 }
 0x3e0   : > { %v7002_v36 = vpop.eup %7001 }
 0x3e1   : > { %v830_v38 = vadd.f32 1.0, %v7002_v36 }
 0x3e3   : > { %7013 = vrcp.f32 %v830_v38 }
 0x3e4   : > { %v7004_v40 = vpop.eup %7003  ;;  %7015 = vrsqrt.f32 %v805_v37 }
 0x3e5   : > { %v7006_v41 = vpop.eup %7005  ;;  %v829_v42 = vadd.f32 1.0, %v7004_v40  ;;  %7017 = vrsqrt.f32 %v752_v39 }
 0x3e6   : > { %v831_v43 = vadd.f32 1.0, %v7006_v41 }
 0x3e7   : > { %7019 = vrcp.f32 %v829_v42 }
 0x3e8   : > { %v7008_v46 = vpop.eup %7007  ;;  %7021 = vrcp.f32 %v831_v43 }
 0x3e9   : > { %v828_v48 = vadd.f32 1.0, %v7008_v46  ;;  %v7010_v49 = vpop.eup %7009 }
 0x3ea   : > { %v7012_v0 = vpop.eup %7011  ;;  %v761_v60 = vmul.f32 %v7010_v49, %v749_v50 }
 0x3eb   : > { %7023 = vrcp.f32 %v828_v48  ;;  %v812_v9 = vmul.f32 %v7012_v0, %v800_v56 }
 0x3f0   : > { %v7014_v62 = vpop.eup %7013 }
 0x3f1   : > { %v7016_v55 = vpop.eup %7015  ;;  %v842_v2 = vmul.f32 %v7014_v62, %v761_v60 }
 0x3f2   : > { %v7018_v63 = vpop.eup %7017  ;;  %v813_v12 = vmul.f32 %v7016_v55, %v801_v58 }
 0x3f3   : > { %v846_v61 = vadd.f32 %v842_v2, %v7792_v47  ;;  %v760_v5 = vmul.f32 %v7018_v63, %v748_v16 }
 0x3f4   : > { %v7020_v11 = vpop.eup %7019 }
 0x3f5   : > { %v7022_v13 = vpop.eup %7021  ;;  %v841_v17 = vmul.f32 %v7020_v11, %v812_v9  ;;  %v7877_v20 = vmul.f32 0.70710677, %v846_v61 }
 0x3f6   : > { %v843_v19 = vmul.f32 %v7022_v13, %v813_v12 }
 0x3f7   : > { %v845_v4 = vadd.f32 %v841_v17, %v7798_v54  ;;  %v6533_v54 = vld [vmem:[%s10211_s2 + $0x48] sm:$0xff] }
 0x3f8   : > { %v7024_v15 = vpop.eup %7023  ;;  %v847_v3 = vadd.f32 %v843_v19, %v7790_v44  ;;  %v6532_v44 = vld [vmem:[%s10211_s2 + $0x40] sm:$0xff] }
 0x3f9   : > { %v840_v18 = vmul.f32 %v7024_v15, %v760_v5  ;;  %v7881_v59 = vmul.f32 0.70710677, %v845_v4 }
 0x3fa   : > { %v7875_v6 = vmul.f32 0.70710677, %v847_v3 }
 0x3fb   : > { %v844_v21 = vadd.f32 %v840_v18, %v7801_v57  ;;  %v6534_v57 = vld [vmem:[%s10211_s2 + $0x50] sm:$0xff] }
 0x3fc   : > { %897 = vmatprep.subr.mxu0 %v7875_v6 }
 0x3fd   : > { %898 = vmatpush1.msra.mxu0 %v7877_v20  ;;  %v7884_v47 = vmul.f32 0.70710677, %v844_v21 }
 0x3fe   : > { %899 = vmatprep.subr.mxu0 %v7881_v59 }
 0x3ff   : > { %900 = vmatpush1.msra.mxu0 %v7884_v47 }
 0x400   : > { %6536 = vmatmul.mubr.msk.f32.vlgmr.msra.gmra.mxu0 %vm371_vm0, %v6532_v44 }
 0x401   : > { %939 = vmatprep.mubr.f32.mxu0 %v7572_v14 }
 0x404   : > { %6537 = vmatmul.mubr.msk.f32.gmra.mxu0 %vm371_vm0, %v6533_v54 }
 0x405   : > { %945 = vmatprep.mubr.f32.mxu0 %v7572_v14 }
 0x408   : > { %6538 = vmatmul.mubr.msk.f32.gmra.mxu0 %vm371_vm0, %v6534_v57 }
 0x409   : > { %951 = vmatprep.mubr.f32.mxu0 %v7572_v14 }
 0x40c   : > { %6539 = vmatmul.mubr.msk.f32.gmra.mxu0 %vm371_vm0, %v6535_v1 }
 0x40d   : > { %1343 = vmatprep.mubr.f32.mxu0 %v7572_v14 }
 0x4c0   : > { %v7908_v8 = vpop.f32.mrf.mxu0 }
 0x4c1   : > { %v970_v34 = vmul.f32 %v7908_v8, %v7908_v8 }
 0x4c2   : > { %v7910_v22 = vpop.f32.mrf.mxu0 }
 0x4c3   : > { %v1022_v28 = vmul.f32 %v7910_v22, %v7910_v22 }
 0x4c4   : > { %v7912_v23 = vpop.f32.mrf.mxu0 }
 0x4c5   : > { %v971_v33 = vmul.f32 %v7912_v23, %v7912_v23 }
 0x4c6   : > { %v7914_v24 = vpop.f32.mrf.mxu0 }
 0x4c7   : > { %v1023_v7 = vmul.f32 %v7914_v24, %v7914_v24 }
 0x4c8   : > { %v7916_v10 = vpop.f32.mrf.mxu0 }
 0x4c9   : > { %962 = vadd.xlane.f32.xlu1 %v7916_v10  ;;  %v972_v32 = vmul.f32 %v7916_v10, %v7916_v10 }
 0x4ca   : > { %v7919_v25 = vpop.f32.mrf.mxu0 }
 0x4cb   : > { %v1024_v30 = vmul.f32 %v7919_v25, %v7919_v25 }
 0x4cc   : > { %v7921_v26 = vpop.f32.mrf.mxu0 }
 0x4cd   : > { %1014 = vadd.xlane.f32.xlu1 %v7919_v25  ;;  %964 = vadd.xlane.f32.xlu0 %v7921_v26  ;;  %v973_v27 = vmul.f32 %v7921_v26, %v7921_v26 }
 0x4ce   : > { %v7927_v29 = vpop.f32.mrf.mxu0 }
 0x4cf   : > { %v1025_v31 = vmul.f32 %v7927_v29, %v7927_v29 }
 0x4d1   : > { %980 = vadd.xlane.f32.xlu0 %v973_v27  ;;  %1016 = vadd.xlane.f32.xlu1 %v7927_v29 }
 0x4d5   : > { %1030 = vadd.xlane.f32.xlu1 %v1024_v30  ;;  %1032 = vadd.xlane.f32.xlu0 %v1025_v31 }
 0x4d9   : > { %1012 = vadd.xlane.f32.xlu1 %v7914_v24  ;;  %978 = vadd.xlane.f32.xlu0 %v972_v32 }
 0x4dd   : > { %1010 = vadd.xlane.f32.xlu1 %v7910_v22  ;;  %960 = vadd.xlane.f32.xlu0 %v7912_v23 }
 0x4e1   : > { %958 = vadd.xlane.f32.xlu1 %v7908_v8  ;;  %1028 = vadd.xlane.f32.xlu0 %v1023_v7 }
 0x4e5   : > { %1026 = vadd.xlane.f32.xlu1 %v1022_v28  ;;  %976 = vadd.xlane.f32.xlu0 %v971_v33 }
 0x4e9   : > { %974 = vadd.xlane.f32.xlu0 %v970_v34 }
 0x552   : > { %v963_v35 = vpop.xlane.xlu1 %962 }
 0x553   : > { %v968_v49 = vmul.f32 0.0078125, %v963_v35 }
 0x555   : > { %v988_v12 = vmul.f32 %v968_v49, %v968_v49  ;;  %v996_v35 = vsub.f32 %v7916_v10, %v968_v49 }
 0x556   : > { %v1015_v36 = vpop.xlane.xlu1 %1014  ;;  %v965_v37 = vpop.xlane.xlu0 %964 }
 0x557   : > { %v969_v38 = vmul.f32 0.0078125, %v965_v37  ;;  %v1020_v39 = vmul.f32 0.0078125, %v1015_v36 }
 0x559   : > { %v989_v42 = vmul.f32 %v969_v38, %v969_v38  ;;  %v1040_v0 = vmul.f32 %v1020_v39, %v1020_v39  ;;  %v997_v4 = vsub.f32 %v7921_v26, %v969_v38  ;;  %v1048_v54 = vsub.f32 %v7919_v25, %v1020_v39 }
 0x55a   : > { %v981_v40 = vpop.xlane.xlu0 %980  ;;  %v1017_v41 = vpop.xlane.xlu1 %1016 }
 0x55b   : > { %v985_v43 = vmul.f32 0.0078125, %v981_v40  ;;  %v1021_v46 = vmul.f32 0.0078125, %v1017_v41 }
 0x55d   : > { %v993_v48 = vsub.f32 %v985_v43, %v989_v42  ;;  %v1041_v56 = vmul.f32 %v1021_v46, %v1021_v46  ;;  %v1049_v30 = vsub.f32 %v7927_v29, %v1021_v46 }
 0x55e   : > { %v1031_v50 = vpop.xlane.xlu1 %1030  ;;  %v1033_v62 = vpop.xlane.xlu0 %1032 }
 0x55f   : > { %v1001_v55 = vadd.f32 1e-05, %v993_v48  ;;  %v1036_v60 = vmul.f32 0.0078125, %v1031_v50  ;;  %v1037_v58 = vmul.f32 0.0078125, %v1033_v62 }
 0x561   : > { %7025 = vrsqrt.f32 %v1001_v55  ;;  %v1044_v63 = vsub.f32 %v1036_v60, %v1040_v0  ;;  %v1045_v2 = vsub.f32 %v1037_v58, %v1041_v56 }
 0x562   : > { %v1013_v9 = vpop.xlane.xlu1 %1012  ;;  %v979_v11 = vpop.xlane.xlu0 %978 }
 0x563   : > { %v1052_v13 = vadd.f32 1e-05, %v1044_v63  ;;  %v1053_v16 = vadd.f32 1e-05, %v1045_v2  ;;  %v984_v17 = vmul.f32 0.0078125, %v979_v11  ;;  %v1019_v40 = vmul.f32 0.0078125, %v1013_v9 }
 0x565   : > { %7027 = vrsqrt.f32 %v1052_v13  ;;  %v992_v19 = vsub.f32 %v984_v17, %v988_v12  ;;  %v1039_v50 = vmul.f32 %v1019_v40, %v1019_v40 }
 0x566   : > { %7029 = vrsqrt.f32 %v1053_v16  ;;  %v961_v61 = vpop.xlane.xlu0 %960  ;;  %v1011_v15 = vpop.xlane.xlu1 %1010 }
 0x567   : > { %v1000_v5 = vadd.f32 1e-05, %v992_v19  ;;  %v967_v7 = vmul.f32 0.0078125, %v961_v61  ;;  %v1018_v34 = vmul.f32 0.0078125, %v1011_v15 }
 0x569   : > { %7031 = vrsqrt.f32 %v1000_v5  ;;  %v987_v41 = vmul.f32 %v967_v7, %v967_v7  ;;  %v1038_v29 = vmul.f32 %v1018_v34, %v1018_v34 }
 0x56a   : > { %v1029_v3 = vpop.xlane.xlu0 %1028  ;;  %v959_v18 = vpop.xlane.xlu1 %958 }
 0x56b   : > { %v966_v43 = vmul.f32 0.0078125, %v959_v18  ;;  %v1035_v46 = vmul.f32 0.0078125, %v1029_v3  ;;  %v995_v3 = vsub.f32 %v7912_v23, %v967_v7 }
 0x56d   : > { %v986_v10 = vmul.f32 %v966_v43, %v966_v43  ;;  %v1043_v49 = vsub.f32 %v1035_v46, %v1039_v50 }
 0x56e   : > { %v7026_v21 = vpop.eup %7025  ;;  %v977_v1 = vpop.xlane.xlu0 %976 }
 0x56f   : > { %v1009_v44 = vmul.f32 %v7026_v21, %v997_v4  ;;  %v1027_v28 = vpop.xlane.xlu1 %1026  ;;  %v983_v36 = vmul.f32 0.0078125, %v977_v1  ;;  %v1051_v2 = vadd.f32 1e-05, %v1043_v49  ;;  %v1046_v21 = vsub.f32 %v7910_v22, %v1018_v34 }
 0x570   : > { %v1034_v25 = vmul.f32 0.0078125, %v1027_v28  ;;  %v994_v28 = vsub.f32 %v7908_v8, %v966_v43 }
 0x571   : > { %v6542_v57 = vmul.f32 -1.442695, %v1009_v44  ;;  %v991_v0 = vsub.f32 %v983_v36, %v987_v41 }
 0x572   : > { %v7028_v27 = vpop.eup %7027  ;;  %v975_v42 = vpop.xlane.xlu0 %974  ;;  %v1042_v62 = vsub.f32 %v1034_v25, %v1038_v29 }
 0x573   : > { %v7030_v31 = vpop.eup %7029  ;;  %7033 = vpow2.f32 %v6542_v57  ;;  %v1060_v32 = vmul.f32 %v7028_v27, %v1048_v54  ;;  %v982_v55 = vmul.f32 0.0078125, %v975_v42  ;;  %v999_v56 = vadd.f32 1e-05, %v991_v0 }
 0x574   : > { %v1061_v33 = vmul.f32 %v7030_v31, %v1049_v30  ;;  %v1050_v60 = vadd.f32 1e-05, %v1042_v62  ;;  %v1047_v54 = vsub.f32 %v7914_v24, %v1019_v40 }
 0x575   : > { %v6541_v26 = vmul.f32 -1.442695, %v1060_v32  ;;  %v990_v58 = vsub.f32 %v982_v55, %v986_v10 }
 0x576   : > { %v7032_v37 = vpop.eup %7031  ;;  %v6543_v38 = vmul.f32 -1.442695, %v1061_v33 }
 0x577   : > { %7035 = vpow2.f32 %v6541_v26  ;;  %v1008_v39 = vmul.f32 %v7032_v37, %v996_v35  ;;  %v998_v11 = vadd.f32 1e-05, %v990_v58 }
 0x578   : > { %7037 = vpow2.f32 %v6543_v38 }
 0x579   : > { %v6540_v48 = vmul.f32 -1.442695, %v1008_v39 }
 0x57b   : > { %7039 = vpow2.f32 %v6540_v48 }
 0x57c   : > { %7041 = vrsqrt.f32 %v999_v56 }
 0x57d   : > { %7043 = vrsqrt.f32 %v1050_v60 }
 0x580   : > { %v7034_v63 = vpop.eup %7033 }
 0x581   : > { %v1076_v9 = vadd.f32 1.0, %v7034_v63 }
 0x583   : > { %7045 = vrcp.f32 %v1076_v9 }
 0x584   : > { %v7036_v12 = vpop.eup %7035  ;;  %7047 = vrsqrt.f32 %v1051_v2 }
 0x585   : > { %v7038_v13 = vpop.eup %7037  ;;  %v1075_v16 = vadd.f32 1.0, %v7036_v12  ;;  %7049 = vrsqrt.f32 %v998_v11 }
 0x586   : > { %v1077_v17 = vadd.f32 1.0, %v7038_v13 }
 0x587   : > { %7051 = vrcp.f32 %v1075_v16 }
 0x588   : > { %v7040_v19 = vpop.eup %7039  ;;  %7053 = vrcp.f32 %v1077_v17 }
 0x589   : > { %v1074_v61 = vadd.f32 1.0, %v7040_v19  ;;  %v7042_v5 = vpop.eup %7041 }
 0x58a   : > { %v7044_v15 = vpop.eup %7043  ;;  %v1007_v44 = vmul.f32 %v7042_v5, %v995_v3 }
 0x58b   : > { %7055 = vrcp.f32 %v1074_v61  ;;  %v1058_v27 = vmul.f32 %v7044_v15, %v1046_v21 }
 0x590   : > { %v7046_v4 = vpop.eup %7045 }
 0x591   : > { %v7048_v18 = vpop.eup %7047  ;;  %v1088_v1 = vmul.f32 %v7046_v4, %v1007_v44 }
 0x592   : > { %v7050_v57 = vpop.eup %7049  ;;  %v1059_v31 = vmul.f32 %v7048_v18, %v1047_v54 }
 0x593   : > { %v1092_v26 = vadd.f32 %v1088_v1, %v7877_v20  ;;  %v1006_v23 = vmul.f32 %v7050_v57, %v994_v28  ;;  %v6544_v20 = vld [vmem:[%s10211_s2 + $0x60] sm:$0xff] }
 0x594   : > { %v7052_v30 = vpop.eup %7051 }
 0x595   : > { %v7054_v32 = vpop.eup %7053  ;;  %v1087_v33 = vmul.f32 %v7052_v30, %v1058_v27  ;;  %v7961_v37 = vmul.f32 0.70710677, %v1092_v26 }
 0x596   : > { %v1089_v35 = vmul.f32 %v7054_v32, %v1059_v31 }
 0x597   : > { %v1091_v22 = vadd.f32 %v1087_v33, %v7881_v59  ;;  %v6546_v59 = vld [vmem:[%s10211_s2 + $0x70] sm:$0xff] }
 0x598   : > { %v7056_v7 = vpop.eup %7055  ;;  %v1093_v36 = vadd.f32 %v1089_v35, %v7875_v6  ;;  %v6545_v6 = vld [vmem:[%s10211_s2 + $0x68] sm:$0xff] }
 0x599   : > { %v1086_v34 = vmul.f32 %v7056_v7, %v1006_v23  ;;  %v1095_v8 = vmul.f32 0.70710677, %v1091_v22 }
 0x59a   : > { %v7959_v24 = vmul.f32 0.70710677, %v1093_v36 }
 0x59b   : > { %v1090_v38 = vadd.f32 %v1086_v34, %v7884_v47  ;;  %v6547_v47 = vld [vmem:[%s10211_s2 + $0x78] sm:$0xff] }
 0x59c   : > { %1143 = vmatprep.subr.mxu1 %v7959_v24 }
 0x59d   : > { %1144 = vmatpush1.msra.mxu1 %v7961_v37  ;;  %v1094_v40 = vmul.f32 0.70710677, %v1090_v38 }
 0x59e   : > { %1145 = vmatprep.subr.mxu1 %v1095_v8 }
 0x59f   : > { %1146 = vmatpush1.msra.mxu1 %v1094_v40 }
 0x5a0   : > { %6548 = vmatmul.mubr.msk.f32.vlgmr.msra.gmra.mxu1 %vm371_vm0, %v6544_v20 }
 0x5a1   : > { %1183 = vmatprep.mubr.f32.mxu1 %v7572_v14 }
 0x5a4   : > { %6549 = vmatmul.mubr.msk.f32.gmra.mxu1 %vm371_vm0, %v6545_v6 }
 0x5a5   : > { %1189 = vmatprep.mubr.f32.mxu1 %v7572_v14 }
 0x5a8   : > { %6550 = vmatmul.mubr.msk.f32.gmra.mxu1 %vm371_vm0, %v6546_v59 }
 0x5a9   : > { %1193 = vmatprep.mubr.f32.mxu1 %v7572_v14 }
 0x5ac   : > { %6551 = vmatmul.mubr.msk.f32.gmra.mxu1 %vm371_vm0, %v6547_v47 }
 0x5ad   : > { %2090 = vmatprep.mubr.f32.mxu1 %v7572_v14 }
 0x660   : > { %v1181_v25 = vpop.f32.mrf.mxu1 }
 0x662   : > { %v1182_v39 = vpop.f32.mrf.mxu1 }
 0x664   : > { %v7986_v41 = vpop.f32.mrf.mxu1 }
 0x665   : > { %v1206_v62 = vmul.f32 %v7986_v41, %v7986_v41 }
 0x666   : > { %v7988_v42 = vpop.f32.mrf.mxu1 }
 0x667   : > { %v1232_v55 = vmul.f32 %v7988_v42, %v7988_v42 }
 0x668   : > { %v1191_v29 = vpop.f32.mrf.mxu1 }
 0x66a   : > { %v1192_v43 = vpop.f32.mrf.mxu1 }
 0x66c   : > { %v1195_v46 = vpop.f32.mrf.mxu1 }
 0x66d   : > { %1202 = vadd.xlane.f32.xlu0 %v1195_v46  ;;  %v1207_v0 = vmul.f32 %v1195_v46, %v1195_v46 }
 0x66e   : > { %v1197_v48 = vpop.f32.mrf.mxu1 }
 0x66f   : > { %1228 = vadd.xlane.f32.xlu1 %v1197_v48  ;;  %v1233_v50 = vmul.f32 %v1197_v48, %v1197_v48 }
 0x671   : > { %1210 = vadd.xlane.f32.xlu0 %v1207_v0 }
 0x673   : > { %1236 = vadd.xlane.f32.xlu1 %v1233_v50 }
 0x675   : > { %1200 = vadd.xlane.f32.xlu0 %v7986_v41 }
 0x677   : > { %1226 = vadd.xlane.f32.xlu1 %v7988_v42 }
 0x679   : > { %1208 = vadd.xlane.f32.xlu0 %v1206_v62 }
 0x67b   : > { %1234 = vadd.xlane.f32.xlu1 %v1232_v55  ;;  %v1270_v55 = vld [vmem:[%s10212_s3] sm:$0xff] }
 0x6f6   : > { %v1203_v10 = vpop.xlane.xlu0 %1202 }
 0x6f7   : > { %v1205_v49 = vmul.f32 0.0078125, %v1203_v10 }
 0x6f8   : > { %v1229_v56 = vpop.xlane.xlu1 %1228 }
 0x6f9   : > { %v1231_v60 = vmul.f32 0.0078125, %v1229_v56  ;;  %v1215_v63 = vmul.f32 %v1205_v49, %v1205_v49  ;;  %v1219_v15 = vsub.f32 %v1195_v46, %v1205_v49 }
 0x6fa   : > { %v1211_v58 = vpop.xlane.xlu0 %1210 }
 0x6fb   : > { %v1213_v2 = vmul.f32 0.0078125, %v1211_v58  ;;  %v1241_v11 = vmul.f32 %v1231_v60, %v1231_v60  ;;  %v1245_v4 = vsub.f32 %v1197_v48, %v1231_v60 }
 0x6fc   : > { %v1237_v9 = vpop.xlane.xlu1 %1236 }
 0x6fd   : > { %v1217_v12 = vsub.f32 %v1213_v2, %v1215_v63  ;;  %v1239_v13 = vmul.f32 0.0078125, %v1237_v9 }
 0x6fe   : > { %v1201_v61 = vpop.xlane.xlu0 %1200 }
 0x6ff   : > { %v1221_v16 = vadd.f32 1e-05, %v1217_v12  ;;  %v1243_v17 = vsub.f32 %v1239_v13, %v1241_v11  ;;  %v1204_v1 = vmul.f32 0.0078125, %v1201_v61 }
 0x700   : > { %v1227_v5 = vpop.xlane.xlu1 %1226 }
 0x701   : > { %7057 = vrsqrt.f32 %v1221_v16  ;;  %v1247_v19 = vadd.f32 1e-05, %v1243_v17  ;;  %v1230_v31 = vmul.f32 0.0078125, %v1227_v5  ;;  %v1214_v28 = vmul.f32 %v1204_v1, %v1204_v1 }
 0x702   : > { %v1209_v44 = vpop.xlane.xlu0 %1208  ;;  %v1218_v20 = vsub.f32 %v7986_v41, %v1204_v1  ;;  %v1271_v41 = vld [vmem:[%s10212_s3 + $0x8] sm:$0xff] }
 0x703   : > { %7059 = vrsqrt.f32 %v1247_v19  ;;  %v1212_v32 = vmul.f32 0.0078125, %v1209_v44  ;;  %v1240_v35 = vmul.f32 %v1230_v31, %v1230_v31  ;;  %v1244_v59 = vsub.f32 %v7988_v42, %v1230_v31 }
 0x704   : > { %v1235_v27 = vpop.xlane.xlu1 %1234  ;;  %v10215_v31 = vlaneseq }
 0x705   : > { %v1238_v33 = vmul.f32 0.0078125, %v1235_v27  ;;  %v1216_v26 = vsub.f32 %v1212_v32, %v1214_v28 }
 0x707   : > { %v1242_v23 = vsub.f32 %v1238_v33, %v1240_v35  ;;  %v1220_v7 = vadd.f32 1e-05, %v1216_v26  ;;  %v8034_v26 = vshrl.u32 %v10215_v31, 7 }
 0x709   : > { %v1246_v36 = vadd.f32 1e-05, %v1242_v23 }
 0x70e   : > { %v7058_v3 = vpop.eup %7057 }
 0x70f   : > { %v1225_v18 = vmul.f32 %v7058_v3, %v1219_v15 }
 0x710   : > { %v7060_v21 = vpop.eup %7059 }
 0x711   : > { %v6552_v54 = vmul.f32 -1.442695, %v1225_v18  ;;  %v1251_v57 = vmul.f32 %v7060_v21, %v1245_v4 }
 0x713   : > { %7061 = vpow2.f32 %v6552_v54  ;;  %v6553_v30 = vmul.f32 -1.442695, %v1251_v57 }
 0x715   : > { %7063 = vpow2.f32 %v6553_v30 }
 0x716   : > { %7065 = vrsqrt.f32 %v1220_v7 }
 0x717   : > { %7067 = vrsqrt.f32 %v1246_v36  ;;  %v8037_v36 = vsub.s32 0, %v8034_v26 }
 0x720   : > { %v7062_v22 = vpop.eup %7061 }
 0x721   : > { %v1258_v34 = vadd.f32 1.0, %v7062_v22  ;;  %v8040_v22 = vsub.s32 1, %v8034_v26 }
 0x722   : > { %v7064_v38 = vpop.eup %7063 }
 0x723   : > { %7069 = vrcp.f32 %v1258_v34  ;;  %v1259_v8 = vadd.f32 1.0, %v7064_v38  ;;  %v7066_v40 = vpop.eup %7065 }
 0x724   : > { %v7068_v6 = vpop.eup %7067  ;;  %v1224_v47 = vmul.f32 %v7066_v40, %v1218_v20  ;;  %v8046_v40 = vsub.s32 3, %v8034_v26  ;;  %v8049_v20 = vsub.s32 4, %v8034_v26 }
 0x725   : > { %7071 = vrcp.f32 %v1259_v8  ;;  %v1250_v39 = vmul.f32 %v7068_v6, %v1244_v59  ;;  %v8043_v8 = vsub.s32 2, %v8034_v26  ;;  %v8054_v59 = vsub.s32 5, %v8034_v26 }
 0x730   : > { %v7070_v25 = vpop.eup %7069 }
 0x731   : > { %v1264_v29 = vmul.f32 %v7070_v25, %v1224_v47  ;;  %v8058_v25 = vsub.s32 6, %v8034_v26 }
 0x732   : > { %v7072_v43 = vpop.eup %7071 }
 0x733   : > { %v1265_v46 = vmul.f32 %v7072_v43, %v1250_v39  ;;  %v1266_v48 = vadd.f32 %v1264_v29, %v7961_v37  ;;  %v8061_v39 = vsub.s32 7, %v8034_v26 }
 0x735   : > { %v1267_v0 = vadd.f32 %v1265_v46, %v7959_v24  ;;  %v1268_v62 = vmul.f32 0.70710677, %v1266_v48 }
 0x737   : > { %v1269_v50 = vmul.f32 0.70710677, %v1267_v0 }
 0x739   : > { %1309 = vmatprep.subr.mxu0 %v1269_v50 }
 0x73a   : > { %1310 = vmatpush1.msra.mxu0 %v1268_v62 }
 0x73b   : > { %6554 = vmatmul.mubr.msk.f32.vlgmr.msra.gmra.mxu0 %vm1272_vm1, %v1270_v55 }
 0x73c   : > { %1349 = vmatprep.mubr.f32.mxu0 %v7572_v14 }
 0x73f   : > { %6555 = vmatmul.mubr.msk.f32.gmra.mxu0 %vm1272_vm1, %v1271_v41 }
 0x740   : > { %2311 = vmatprep.mubr.f32.mxu0 %v7572_v14 }
 0x7fb   : > { %v1345_v24 = vpop.f32.mrf.mxu0 }
 0x7fc   : > { %1356 = vadd.xlane.f32.xlu0 %v1345_v24  ;;  %v1362_v42 = vmul.f32 %v1345_v24, %v1345_v24 }
 0x7fd   : > { %v8010_v37 = vpop.f32.mrf.mxu0 }
 0x7fe   : > { %1382 = vadd.xlane.f32.xlu1 %v8010_v37  ;;  %v1388_v49 = vmul.f32 %v8010_v37, %v8010_v37 }
 0x7ff   : > { %v8013_v10 = vpop.f32.mrf.mxu0 }
 0x800   : > { %1364 = vadd.xlane.f32.xlu0 %v1362_v42  ;;  %v1363_v60 = vmul.f32 %v8013_v10, %v8013_v10 }
 0x801   : > { %v8018_v56 = vpop.f32.mrf.mxu0 }
 0x802   : > { %1358 = vadd.xlane.f32.xlu1 %v8013_v10  ;;  %v1389_v58 = vmul.f32 %v8018_v56, %v8018_v56 }
 0x804   : > { %1390 = vadd.xlane.f32.xlu0 %v1388_v49 }
 0x806   : > { %1384 = vadd.xlane.f32.xlu1 %v8018_v56 }
 0x808   : > { %1366 = vadd.xlane.f32.xlu0 %v1363_v60 }
 0x80a   : > { %1392 = vadd.xlane.f32.xlu1 %v1389_v58 }
 0x885   : > { %v1357_v63 = vpop.xlane.xlu0 %1356 }
 0x886   : > { %v1360_v2 = vmul.f32 0.0078125, %v1357_v63 }
 0x887   : > { %v1383_v9 = vpop.xlane.xlu1 %1382 }
 0x888   : > { %v1370_v12 = vmul.f32 %v1360_v2, %v1360_v2  ;;  %v1386_v13 = vmul.f32 0.0078125, %v1383_v9  ;;  %v1374_v7 = vsub.f32 %v1345_v24, %v1360_v2 }
 0x889   : > { %v1365_v11 = vpop.xlane.xlu0 %1364 }
 0x88a   : > { %v1368_v16 = vmul.f32 0.0078125, %v1365_v11  ;;  %v1396_v5 = vmul.f32 %v1386_v13, %v1386_v13  ;;  %v1400_v47 = vsub.f32 %v8010_v37, %v1386_v13 }
 0x88b   : > { %v1359_v17 = vpop.xlane.xlu1 %1358 }
 0x88c   : > { %v1372_v19 = vsub.f32 %v1368_v16, %v1370_v12  ;;  %v8027_v57 = vmul.f32 0.0078125, %v1359_v17 }
 0x88d   : > { %v1391_v61 = vpop.xlane.xlu0 %1390 }
 0x88e   : > { %v1376_v15 = vadd.f32 1e-05, %v1372_v19  ;;  %v1394_v3 = vmul.f32 0.0078125, %v1391_v61  ;;  %v1371_v33 = vmul.f32 %v8027_v57, %v8027_v57  ;;  %v1375_v29 = vsub.f32 %v8013_v10, %v8027_v57 }
 0x88f   : > { %v1385_v4 = vpop.xlane.xlu1 %1384 }
 0x890   : > { %7073 = vrsqrt.f32 %v1376_v15  ;;  %v1398_v18 = vsub.f32 %v1394_v3, %v1396_v5  ;;  %v8025_v21 = vmul.f32 0.0078125, %v1385_v4 }
 0x891   : > { %v1367_v54 = vpop.xlane.xlu0 %1366 }
 0x892   : > { %v1402_v44 = vadd.f32 1e-05, %v1398_v18  ;;  %v1397_v27 = vmul.f32 %v8025_v21, %v8025_v21  ;;  %v1369_v32 = vmul.f32 0.0078125, %v1367_v54  ;;  %v1401_v43 = vsub.f32 %v8018_v56, %v8025_v21 }
 0x893   : > { %v1393_v1 = vpop.xlane.xlu1 %1392 }
 0x894   : > { %7075 = vrsqrt.f32 %v1402_v44  ;;  %v1395_v30 = vmul.f32 0.0078125, %v1393_v1  ;;  %v1373_v23 = vsub.f32 %v1369_v32, %v1371_v33 }
 0x896   : > { %v1399_v28 = vsub.f32 %v1395_v30, %v1397_v27  ;;  %v1377_v38 = vadd.f32 1e-05, %v1373_v23 }
 0x898   : > { %v1403_v35 = vadd.f32 1e-05, %v1399_v28 }
 0x89a   : > { %7077 = vrsqrt.f32 %v1403_v35 }
 0x89b   : > { %7079 = vrsqrt.f32 %v1377_v38 }
 0x89d   : > { %v7074_v34 = vpop.eup %7073 }
 0x89e   : > { %v8051_v6 = vmul.f32 %v7074_v34, %v1374_v7 }
 0x8a0   : > { %v8069_v46 = vrot.slane %v8051_v6, %v8037_v36  ;;  %v8073_v48 = vrot.slane %v8051_v6, %v8040_v22  ;;  %v8077_v50 = vrot.slane %v8051_v6, %v8043_v8  ;;  %v8081_v62 = vrot.slane %v8051_v6, %v8046_v40 }
 0x8a1   : > { %v7076_v0 = vpop.eup %7075  ;;  %v8085_v55 = vrot.slane %v8051_v6, %v8049_v20  ;;  %v8095_v24 = vrot.slane %v8051_v6, %v8054_v59  ;;  %v8105_v49 = vrot.slane %v8051_v6, %v8058_v25  ;;  %v8109_v56 = vrot.slane %v8051_v6, %v8061_v39 }
 0x8a2   : > { %v8087_v41 = vmul.f32 %v7076_v0, %v1400_v47  ;;  %vm1416_vm2 = vcmp.ge.f32.partialorder %v8069_v46, %v8051_v6  ;;  %vm1448_vm3 = vcmp.ge.f32.partialorder %v8073_v48, %v8051_v6 }
 0x8a3   : > { %v8098_v37 = vsel %vm1416_vm2, 1.0, %v7572_v14  ;;  %v8101_v42 = vsel %vm1416_vm2, %v8069_v46, 0.0  ;;  %v8121_v2 = vsel %vm1448_vm3, 1.0, %v7572_v14 }
 0x8a4   : > { %v1415_v60 = vrot.slane %v8087_v41, %v8037_v36  ;;  %v1447_v58 = vrot.slane %v8087_v41, %v8040_v22  ;;  %v1479_v63 = vrot.slane %v8087_v41, %v8043_v8  ;;  %v1511_v9 = vrot.slane %v8087_v41, %v8046_v40 }
 0x8a5   : > { %v1543_v11 = vrot.slane %v8087_v41, %v8049_v20  ;;  %v1575_v12 = vrot.slane %v8087_v41, %v8054_v59  ;;  %v8131_v13 = vrot.slane %v8087_v41, %v8058_v25  ;;  %v8138_v16 = vrot.slane %v8087_v41, %v8061_v39 }
 0x8a6   : > { %vm1417_vm4 = vcmp.ge.f32.partialorder %v1415_v60, %v8087_v41  ;;  %vm1449_vm5 = vcmp.ge.f32.partialorder %v1447_v58, %v8087_v41  ;;  %vm1481_vm6 = vcmp.ge.f32.partialorder %v1479_v63, %v8087_v41  ;;  %vm1513_vm7 = vcmp.ge.f32.partialorder %v1511_v9, %v8087_v41 }
 0x8a7   : > { %v7078_v17 = vpop.eup %7077  ;;  %v6557_v19 = vsel %vm1417_vm4, 1.0, %v7572_v14  ;;  %v1433_v61 = vsel %vm1417_vm4, %v1415_v60, 0.0  ;;  %v6561_v5 = vsel %vm1449_vm5, 1.0, %v7572_v14  ;;  %v1465_v15 = vsel %vm1449_vm5, %v1447_v58, 0.0 }
 0x8a8   : > { %v8142_v3 = vmul.f32 %v7078_v17, %v1401_v43  ;;  %v1461_v4 = vadd.f32 %v6561_v5, %v6557_v19  ;;  %v1469_v18 = vadd.f32 %v1465_v15, %v1433_v61  ;;  %v6565_v21 = vsel %vm1481_vm6, 1.0, %v7572_v14  ;;  %v7080_v47 = vpop.eup %7079 }
 0x8a9   : > { %v1497_v44 = vsel %vm1481_vm6, %v1479_v63, 0.0  ;;  %vm1545_vm8 = vcmp.ge.f32.partialorder %v1543_v11, %v8087_v41  ;;  %vm1577_vm9 = vcmp.ge.f32.partialorder %v1575_v12, %v8087_v41  ;;  %v6569_v34 = vsel %vm1513_vm7, 1.0, %v7572_v14 }
 0x8aa   : > { %vm1419_vm10 = vcmp.ge.f32.partialorder %v1415_v60, %v8142_v3  ;;  %vm1451_vm11 = vcmp.ge.f32.partialorder %v1447_v58, %v8142_v3  ;;  %vm1483_vm12 = vcmp.ge.f32.partialorder %v1479_v63, %v8142_v3  ;;  %v1493_v54 = vadd.f32 %v6565_v21, %v1461_v4 }
 0x8ab   : > { %v6559_v1 = vsel %vm1419_vm10, 1.0, %v7572_v14  ;;  %v1435_v27 = vsel %vm1419_vm10, %v1415_v60, 0.0  ;;  %v6563_v30 = vsel %vm1451_vm11, 1.0, %v7572_v14  ;;  %v1467_v32 = vsel %vm1451_vm11, %v1447_v58, 0.0 }
 0x8ac   : > { %v1463_v28 = vadd.f32 %v6563_v30, %v6559_v1  ;;  %v1471_v33 = vadd.f32 %v1467_v32, %v1435_v27  ;;  %v6567_v35 = vsel %vm1483_vm12, 1.0, %v7572_v14  ;;  %v1499_v23 = vsel %vm1483_vm12, %v1479_v63, 0.0 }
 0x8ad   : > { %v1501_v7 = vadd.f32 %v1497_v44, %v1469_v18  ;;  %vm1515_vm13 = vcmp.ge.f32.partialorder %v1511_v9, %v8142_v3  ;;  %v1529_v38 = vsel %vm1513_vm7, %v1511_v9, 0.0  ;;  %v1525_v58 = vadd.f32 %v6569_v34, %v1493_v54 }
 0x8ae   : > { %v1495_v43 = vadd.f32 %v6567_v35, %v1463_v28  ;;  %v1503_v0 = vadd.f32 %v1499_v23, %v1471_v33  ;;  %v6571_v60 = vsel %vm1515_vm13, 1.0, %v7572_v14  ;;  %v1531_v17 = vsel %vm1515_vm13, %v1511_v9, 0.0 }
 0x8af   : > { %v1533_v19 = vadd.f32 %v1529_v38, %v1501_v7  ;;  %vm1547_vm14 = vcmp.ge.f32.partialorder %v1543_v11, %v8142_v3  ;;  %v6573_v63 = vsel %vm1545_vm8, 1.0, %v7572_v14  ;;  %v1561_v18 = vsel %vm1545_vm8, %v1543_v11, 0.0 }
 0x8b0   : > { %v1527_v61 = vadd.f32 %v6571_v60, %v1495_v43  ;;  %v1535_v5 = vadd.f32 %v1531_v17, %v1503_v0  ;;  %v6575_v15 = vsel %vm1547_vm14, 1.0, %v7572_v14  ;;  %v1557_v4 = vadd.f32 %v6573_v63, %v1525_v58 }
 0x8b1   : > { %v1563_v21 = vsel %vm1547_vm14, %v1543_v11, 0.0  ;;  %vm1579_vm15 = vcmp.ge.f32.partialorder %v1575_v12, %v8142_v3  ;;  %v6577_v9 = vsel %vm1577_vm9, 1.0, %v7572_v14  ;;  %v1565_v54 = vadd.f32 %v1561_v18, %v1533_v19 }
 0x8b2   : > { %v1559_v44 = vadd.f32 %v6575_v15, %v1527_v61  ;;  %v1567_v1 = vadd.f32 %v1563_v21, %v1535_v5  ;;  %v6579_v27 = vsel %vm1579_vm15, 1.0, %v7572_v14  ;;  %v1589_v30 = vadd.f32 %v6577_v9, %v1557_v4 }
 0x8b3   : > { %v1593_v32 = vsel %vm1577_vm9, %v1575_v12, 0.0  ;;  %v1595_v28 = vsel %vm1579_vm15, %v1575_v12, 0.0  ;;  %vm1609_vm2 = vcmp.ge.f32.partialorder %v8131_v13, %v8087_v41  ;;  %vm1611_vm4 = vcmp.ge.f32.partialorder %v8131_v13, %v8142_v3 }
 0x8b4   : > { %v1591_v11 = vadd.f32 %v6579_v27, %v1559_v44  ;;  %v1597_v33 = vadd.f32 %v1593_v32, %v1565_v54  ;;  %v1599_v35 = vadd.f32 %v1595_v28, %v1567_v1  ;;  %v6581_v23 = vsel %vm1609_vm2, 1.0, %v7572_v14 }
 0x8b5   : > { %v6583_v7 = vsel %vm1611_vm4, 1.0, %v7572_v14  ;;  %v1625_v34 = vsel %vm1609_vm2, %v8131_v13, 0.0  ;;  %v1627_v38 = vsel %vm1611_vm4, %v8131_v13, 0.0  ;;  %v1621_v43 = vadd.f32 %v6581_v23, %v1589_v30 }
 0x8b6   : > { %v1623_v0 = vadd.f32 %v6583_v7, %v1591_v11  ;;  %v1629_v12 = vadd.f32 %v1625_v34, %v1597_v33  ;;  %v1631_v60 = vadd.f32 %v1627_v38, %v1599_v35  ;;  %vm1641_vm5 = vcmp.ge.f32.partialorder %v8138_v16, %v8087_v41 }
 0x8b7   : > { %vm1643_vm6 = vcmp.ge.f32.partialorder %v8138_v16, %v8142_v3  ;;  %v1671_v58 = vrot.slane %v8142_v3, %v8037_v36  ;;  %v1703_v17 = vrot.slane %v8142_v3, %v8040_v22  ;;  %v6585_v19 = vsel %vm1641_vm5, 1.0, %v7572_v14 }
 0x8b8   : > { %v6587_v13 = vsel %vm1643_vm6, 1.0, %v7572_v14  ;;  %v1657_v63 = vsel %vm1641_vm5, %v8138_v16, 0.0  ;;  %v1659_v61 = vsel %vm1643_vm6, %v8138_v16, 0.0  ;;  %v1653_v5 = vadd.f32 %v6585_v19, %v1621_v43 }
 0x8b9   : > { %v1655_v15 = vadd.f32 %v6587_v13, %v1623_v0  ;;  %v1661_v4 = vadd.f32 %v1657_v63, %v1629_v12  ;;  %v1663_v18 = vadd.f32 %v1659_v61, %v1631_v60  ;;  %vm1673_vm7 = vcmp.ge.f32.partialorder %v1671_v58, %v8087_v41 }
 0x8ba   : > { %vm1675_vm8 = vcmp.ge.f32.partialorder %v1671_v58, %v8142_v3  ;;  %vm1705_vm9 = vcmp.ge.f32.partialorder %v1703_v17, %v8087_v41  ;;  %vm1707_vm10 = vcmp.ge.f32.partialorder %v1703_v17, %v8142_v3  ;;  %v6589_v21 = vsel %vm1673_vm7, 1.0, %v7572_v14 }
 0x8bb   : > { %v6591_v9 = vsel %vm1675_vm8, 1.0, %v7572_v14  ;;  %v1689_v44 = vsel %vm1673_vm7, %v1671_v58, 0.0  ;;  %v1691_v54 = vsel %vm1675_vm8, %v1671_v58, 0.0  ;;  %v1685_v1 = vadd.f32 %v6589_v21, %v1653_v5 }
 0x8bc   : > { %v1687_v16 = vadd.f32 %v6591_v9, %v1655_v15  ;;  %v1693_v27 = vadd.f32 %v1689_v44, %v1661_v4  ;;  %v1695_v30 = vadd.f32 %v1691_v54, %v1663_v18  ;;  %v8204_v32 = vmul.f32 %v7080_v47, %v1375_v29 }
 0x8bd   : > { %v6593_v28 = vsel %vm1705_vm9, 1.0, %v7572_v14  ;;  %v6595_v11 = vsel %vm1707_vm10, 1.0, %v7572_v14  ;;  %v8216_v33 = vsel %vm1448_vm3, %v8073_v48, 0.0  ;;  %v1721_v10 = vsel %vm1705_vm9, %v1703_v17, 0.0 }
 0x8be   : > { %v1717_v35 = vadd.f32 %v6593_v28, %v1685_v1  ;;  %v1719_v23 = vadd.f32 %v6595_v11, %v1687_v16  ;;  %v1723_v57 = vsel %vm1707_vm10, %v1703_v17, 0.0  ;;  %v1725_v29 = vadd.f32 %v1721_v10, %v1693_v27 }
 0x8bf   : > { %v1727_v47 = vadd.f32 %v1723_v57, %v1695_v30  ;;  %v1735_v7 = vrot.slane %v8142_v3, %v8043_v8  ;;  %v1767_v34 = vrot.slane %v8142_v3, %v8046_v40  ;;  %v1799_v38 = vrot.slane %v8142_v3, %v8049_v20 }
 0x8c0   : > { %v1831_v43 = vrot.slane %v8142_v3, %v8054_v59  ;;  %v1863_v0 = vrot.slane %v8142_v3, %v8058_v25  ;;  %v1895_v12 = vrot.slane %v8142_v3, %v8061_v39  ;;  %vm1418_vm14 = vcmp.ge.f32.partialorder %v8069_v46, %v8204_v32 }
 0x8c1   : > { %vm1737_vm3 = vcmp.ge.f32.partialorder %v1735_v7, %v8087_v41  ;;  %vm1739_vm11 = vcmp.ge.f32.partialorder %v1735_v7, %v8142_v3  ;;  %vm1769_vm12 = vcmp.ge.f32.partialorder %v1767_v34, %v8087_v41  ;;  %vm1771_vm13 = vcmp.ge.f32.partialorder %v1767_v34, %v8142_v3 }
 0x8c2   : > { %v6597_v60 = vsel %vm1737_vm3, 1.0, %v7572_v14  ;;  %v6599_v58 = vsel %vm1739_vm11, 1.0, %v7572_v14  ;;  %v1753_v17 = vsel %vm1737_vm3, %v1735_v7, 0.0  ;;  %v1755_v19 = vsel %vm1739_vm11, %v1735_v7, 0.0 }
 0x8c3   : > { %v1749_v13 = vadd.f32 %v6597_v60, %v1717_v35  ;;  %v1751_v63 = vadd.f32 %v6599_v58, %v1719_v23  ;;  %v1757_v61 = vadd.f32 %v1753_v17, %v1725_v29  ;;  %v1759_v5 = vadd.f32 %v1755_v19, %v1727_v47 }
 0x8c4   : > { %v6601_v15 = vsel %vm1769_vm12, 1.0, %v7572_v14  ;;  %v6603_v4 = vsel %vm1771_vm13, 1.0, %v7572_v14  ;;  %v1785_v18 = vsel %vm1769_vm12, %v1767_v34, 0.0  ;;  %v1787_v21 = vsel %vm1771_vm13, %v1767_v34, 0.0 }
 0x8c5   : > { %v1781_v9 = vadd.f32 %v6601_v15, %v1749_v13  ;;  %v1783_v44 = vadd.f32 %v6603_v4, %v1751_v63  ;;  %v1789_v54 = vadd.f32 %v1785_v18, %v1757_v61  ;;  %v1791_v1 = vadd.f32 %v1787_v21, %v1759_v5 }
 0x8c6   : > { %vm1450_vm15 = vcmp.ge.f32.partialorder %v8073_v48, %v8204_v32  ;;  %vm1801_vm2 = vcmp.ge.f32.partialorder %v1799_v38, %v8087_v41  ;;  %vm1803_vm4 = vcmp.ge.f32.partialorder %v1799_v38, %v8142_v3  ;;  %vm1833_vm5 = vcmp.ge.f32.partialorder %v1831_v43, %v8087_v41 }
 0x8c7   : > { %vm1835_vm6 = vcmp.ge.f32.partialorder %v1831_v43, %v8142_v3  ;;  %v6605_v16 = vsel %vm1801_vm2, 1.0, %v7572_v14  ;;  %v6607_v27 = vsel %vm1803_vm4, 1.0, %v7572_v14  ;;  %v1817_v30 = vsel %vm1801_vm2, %v1799_v38, 0.0 }
 0x8c8   : > { %v1819_v28 = vsel %vm1803_vm4, %v1799_v38, 0.0  ;;  %vm1480_vm7 = vcmp.ge.f32.partialorder %v8077_v50, %v8051_v6  ;;  %v1813_v11 = vadd.f32 %v6605_v16, %v1781_v9  ;;  %v1815_v35 = vadd.f32 %v6607_v27, %v1783_v44 }
 0x8c9   : > { %v1821_v23 = vadd.f32 %v1817_v30, %v1789_v54  ;;  %v1823_v10 = vadd.f32 %v1819_v28, %v1791_v1  ;;  %v6609_v57 = vsel %vm1833_vm5, 1.0, %v7572_v14  ;;  %v6611_v29 = vsel %vm1835_vm6, 1.0, %v7572_v14 }
 0x8ca   : > { %v1849_v47 = vsel %vm1833_vm5, %v1831_v43, 0.0  ;;  %v1851_v7 = vsel %vm1835_vm6, %v1831_v43, 0.0  ;;  %v1845_v34 = vadd.f32 %v6609_v57, %v1813_v11  ;;  %v1847_v60 = vadd.f32 %v6611_v29, %v1815_v35 }
 0x8cb   : > { %v1853_v58 = vadd.f32 %v1849_v47, %v1821_v23  ;;  %v1855_v17 = vadd.f32 %v1851_v7, %v1823_v10  ;;  %vm1865_vm8 = vcmp.ge.f32.partialorder %v1863_v0, %v8087_v41  ;;  %vm1867_vm9 = vcmp.ge.f32.partialorder %v1863_v0, %v8142_v3 }
 0x8cc   : > { %vm1897_vm10 = vcmp.ge.f32.partialorder %v1895_v12, %v8087_v41  ;;  %vm1899_vm3 = vcmp.ge.f32.partialorder %v1895_v12, %v8142_v3  ;;  %v6613_v38 = vsel %vm1865_vm8, 1.0, %v7572_v14  ;;  %v6615_v19 = vsel %vm1867_vm9, 1.0, %v7572_v14 }
 0x8cd   : > { %v1881_v13 = vsel %vm1865_vm8, %v1863_v0, 0.0  ;;  %v1883_v63 = vsel %vm1867_vm9, %v1863_v0, 0.0  ;;  %v1877_v61 = vadd.f32 %v6613_v38, %v1845_v34  ;;  %v1879_v43 = vadd.f32 %v6615_v19, %v1847_v60 }
 0x8ce   : > { %v1885_v5 = vadd.f32 %v1881_v13, %v1853_v58  ;;  %v1887_v15 = vadd.f32 %v1883_v63, %v1855_v17  ;;  %v6617_v4 = vsel %vm1897_vm10, 1.0, %v7572_v14  ;;  %v6619_v18 = vsel %vm1899_vm3, 1.0, %v7572_v14 }
 0x8cf   : > { %v1913_v21 = vsel %vm1897_vm10, %v1895_v12, 0.0  ;;  %v1915_v9 = vsel %vm1899_vm3, %v1895_v12, 0.0  ;;  %v1909_v44 = vadd.f32 %v6617_v4, %v1877_v61  ;;  %v1911_v54 = vadd.f32 %v6619_v18, %v1879_v43 }
 0x8d0   : > { %v1917_v1 = vadd.f32 %v1913_v21, %v1885_v5  ;;  %v1919_v16 = vadd.f32 %v1915_v9, %v1887_v15  ;;  %v6558_v27 = vsel %vm1418_vm14, 1.0, %v7572_v14  ;;  %v1434_v0 = vsel %vm1418_vm14, %v8069_v46, 0.0 }
 0x8d1   : > { %v6562_v30 = vsel %vm1450_vm15, 1.0, %v7572_v14  ;;  %v1460_v12 = vadd.f32 %v8121_v2, %v8098_v37  ;;  %v1921_v28 = vmul.f32 %v1909_v44, %v8087_v41  ;;  %v1923_v11 = vmul.f32 %v1911_v54, %v8142_v3 }
 0x8d2   : > { %v1462_v35 = vadd.f32 %v6562_v30, %v6558_v27  ;;  %v1466_v23 = vsel %vm1450_vm15, %v8073_v48, 0.0  ;;  %v1468_v46 = vadd.f32 %v8216_v33, %v8101_v42  ;;  %vm1482_vm11 = vcmp.ge.f32.partialorder %v8077_v50, %v8204_v32 }
 0x8d3   : > { %v1470_v10 = vadd.f32 %v1466_v23, %v1434_v0  ;;  %v6564_v37 = vsel %vm1480_vm7, 1.0, %v7572_v14  ;;  %v1925_v2 = vadd.f32 1.0, %v1921_v28  ;;  %v1927_v57 = vadd.f32 1.0, %v1923_v11 }
 0x8d4   : > { %v6566_v29 = vsel %vm1482_vm11, 1.0, %v7572_v14  ;;  %v1492_v47 = vadd.f32 %v6564_v37, %v1460_v12  ;;  %v1496_v48 = vsel %vm1480_vm7, %v8077_v50, 0.0  ;;  %v1498_v42 = vsel %vm1482_vm11, %v8077_v50, 0.0 }
 0x8d5   : > { %v1494_v7 = vadd.f32 %v6566_v29, %v1462_v35  ;;  %vm1512_vm12 = vcmp.ge.f32.partialorder %v8081_v62, %v8051_v6  ;;  %vm1929_vm13 = vcmp.gt.f32.partialorder %v1925_v2, %v1917_v1  ;;  %vm1931_vm14 = vcmp.gt.f32.partialorder %v1927_v57, %v1919_v16 }
 0x8d6   : > { %v1500_v33 = vadd.f32 %v1496_v48, %v1468_v46  ;;  %v1502_v34 = vadd.f32 %v1498_v42, %v1470_v10  ;;  %v6621_v60 = vsel %vm1929_vm13, 1.0, %v7572_v14  ;;  %v6623_v58 = vsel %vm1931_vm14, 1.0, %v7572_v14 }
 0x8d7   : > { %vm1514_vm15 = vcmp.ge.f32.partialorder %v8081_v62, %v8204_v32  ;;  %v6568_v17 = vsel %vm1512_vm12, 1.0, %v7572_v14  ;;  %v1947_v38 = vadd.f32 %v6623_v58, %v6621_v60  ;;  %v1955_v19 = vmul.f32 %v6621_v60, %v8087_v41 }
 0x8d8   : > { %v1957_v50 = vmul.f32 %v6623_v58, %v8142_v3  ;;  %v6570_v13 = vsel %vm1514_vm15, 1.0, %v7572_v14  ;;  %v1524_v63 = vadd.f32 %v6568_v17, %v1492_v47  ;;  %v1528_v43 = vsel %vm1512_vm12, %v8081_v62, 0.0 }
 0x8d9   : > { %v1526_v61 = vadd.f32 %v6570_v13, %v1494_v7  ;;  %v1530_v5 = vsel %vm1514_vm15, %v8081_v62, 0.0  ;;  %v1948_v15 = vrot.slane %v1947_v38, 4  ;;  %v1532_v18 = vadd.f32 %v1528_v43, %v1500_v33 }
 0x8da   : > { %v1965_v4 = vadd.f32 %v1957_v50, %v1955_v19  ;;  %v1534_v21 = vadd.f32 %v1530_v5, %v1502_v34  ;;  %vm1544_vm2 = vcmp.ge.f32.partialorder %v8085_v55, %v8051_v6  ;;  %vm1546_vm4 = vcmp.ge.f32.partialorder %v8085_v55, %v8204_v32 }
 0x8db   : > { %vm1576_vm5 = vcmp.ge.f32.partialorder %v8095_v24, %v8051_v6  ;;  %vm1578_vm6 = vcmp.ge.f32.partialorder %v8095_v24, %v8204_v32  ;;  %v1949_v9 = vadd.f32 %v1948_v15, %v1947_v38  ;;  %v6572_v62 = vsel %vm1544_vm2, 1.0, %v7572_v14 }
 0x8dc   : > { %v1966_v44 = vrot.slane %v1965_v4, 4  ;;  %v6574_v54 = vsel %vm1546_vm4, 1.0, %v7572_v14  ;;  %v1556_v1 = vadd.f32 %v6572_v62, %v1524_v63  ;;  %v1560_v27 = vsel %vm1544_vm2, %v8085_v55, 0.0 }
 0x8dd   : > { %v1558_v16 = vadd.f32 %v6574_v54, %v1526_v61  ;;  %v1562_v0 = vsel %vm1546_vm4, %v8085_v55, 0.0  ;;  %v1950_v30 = vrot.slane %v1949_v9, 2  ;;  %v1564_v28 = vadd.f32 %v1560_v27, %v1532_v18 }
 0x8de   : > { %v1967_v12 = vadd.f32 %v1966_v44, %v1965_v4  ;;  %v1566_v11 = vadd.f32 %v1562_v0, %v1534_v21  ;;  %v6576_v35 = vsel %vm1576_vm5, 1.0, %v7572_v14  ;;  %v6578_v23 = vsel %vm1578_vm6, 1.0, %v7572_v14 }
 0x8df   : > { %v1592_v46 = vsel %vm1576_vm5, %v8095_v24, 0.0  ;;  %v1594_v55 = vsel %vm1578_vm6, %v8095_v24, 0.0  ;;  %v1951_v10 = vadd.f32 %v1950_v30, %v1949_v9  ;;  %v1588_v2 = vadd.f32 %v6576_v35, %v1556_v1 }
 0x8e0   : > { %v1968_v37 = vrot.slane %v1967_v12, 2  ;;  %v1590_v57 = vadd.f32 %v6578_v23, %v1558_v16  ;;  %v1596_v29 = vadd.f32 %v1592_v46, %v1564_v28  ;;  %v1598_v47 = vadd.f32 %v1594_v55, %v1566_v11 }
 0x8e1   : > { %vm1608_vm7 = vcmp.ge.f32.partialorder %v8105_v49, %v8051_v6  ;;  %vm1610_vm8 = vcmp.ge.f32.partialorder %v8105_v49, %v8204_v32  ;;  %v1952_v7 = vrot.slane %v1951_v10, 1  ;;  %vm1640_vm9 = vcmp.ge.f32.partialorder %v8109_v56, %v8051_v6 }
 0x8e2   : > { %v1969_v48 = vadd.f32 %v1968_v37, %v1967_v12  ;;  %v6580_v42 = vsel %vm1608_vm7, 1.0, %v7572_v14  ;;  %v6582_v33 = vsel %vm1610_vm8, 1.0, %v7572_v14  ;;  %v1624_v60 = vsel %vm1608_vm7, %v8105_v49, 0.0 }
 0x8e3   : > { %v1620_v34 = vadd.f32 %v6580_v42, %v1588_v2  ;;  %v1622_v24 = vadd.f32 %v6582_v33, %v1590_v57  ;;  %v1626_v58 = vsel %vm1610_vm8, %v8105_v49, 0.0  ;;  %v1953_v17 = vadd.f32 %v1952_v7, %v1951_v10 }
 0x8e4   : > { %v1970_v38 = vrot.slane %v1969_v48, 1  ;;  %v1628_v19 = vadd.f32 %v1624_v60, %v1596_v29  ;;  %v1630_v50 = vadd.f32 %v1626_v58, %v1598_v47  ;;  %vm1642_vm10 = vcmp.ge.f32.partialorder %v8109_v56, %v8204_v32 }
 0x8e5   : > { %v1667_v13 = vrot.slane %v8204_v32, %v8037_v36  ;;  %v1699_v63 = vrot.slane %v8204_v32, %v8040_v22  ;;  %7081 = vrcp.f32 %v1953_v17  ;;  %v6584_v61 = vsel %vm1640_vm9, 1.0, %v7572_v14 }
 0x8e6   : > { %v6586_v49 = vsel %vm1642_vm10, 1.0, %v7572_v14  ;;  %v1652_v43 = vadd.f32 %v6584_v61, %v1620_v34  ;;  %v1656_v15 = vsel %vm1640_vm9, %v8109_v56, 0.0  ;;  %v1658_v4 = vsel %vm1642_vm10, %v8109_v56, 0.0 }
 0x8e7   : > { %v1654_v5 = vadd.f32 %v6586_v49, %v1622_v24  ;;  %v1971_v18 = vadd.f32 %v1970_v38, %v1969_v48  ;;  %v1660_v21 = vadd.f32 %v1656_v15, %v1628_v19  ;;  %v1662_v9 = vadd.f32 %v1658_v4, %v1630_v50 }
 0x8e8   : > { %vm1672_vm3 = vcmp.ge.f32.partialorder %v1667_v13, %v8051_v6  ;;  %vm1674_vm11 = vcmp.ge.f32.partialorder %v1667_v13, %v8204_v32  ;;  %vm1704_vm12 = vcmp.ge.f32.partialorder %v1699_v63, %v8051_v6  ;;  %vm1706_vm13 = vcmp.ge.f32.partialorder %v1699_v63, %v8204_v32 }
 0x8e9   : > { %v6588_v44 = vsel %vm1672_vm3, 1.0, %v7572_v14  ;;  %v1688_v62 = vsel %vm1672_vm3, %v1667_v13, 0.0  ;;  %v6590_v54 = vsel %vm1674_vm11, 1.0, %v7572_v14  ;;  %v1690_v16 = vsel %vm1674_vm11, %v1667_v13, 0.0 }
 0x8ea   : > { %v1684_v1 = vadd.f32 %v6588_v44, %v1652_v43  ;;  %v1692_v27 = vadd.f32 %v1688_v62, %v1660_v21  ;;  %v1686_v0 = vadd.f32 %v6590_v54, %v1654_v5  ;;  %v1694_v30 = vadd.f32 %v1690_v16, %v1662_v9 }
 0x8eb   : > { %v6592_v56 = vsel %vm1704_vm12, 1.0, %v7572_v14  ;;  %v6594_v12 = vsel %vm1706_vm13, 1.0, %v7572_v14  ;;  %v1720_v11 = vsel %vm1704_vm12, %v1699_v63, 0.0  ;;  %v1722_v35 = vsel %vm1706_vm13, %v1699_v63, 0.0 }
 0x8ec   : > { %v1716_v28 = vadd.f32 %v6592_v56, %v1684_v1  ;;  %v1718_v23 = vadd.f32 %v6594_v12, %v1686_v0  ;;  %v1724_v46 = vadd.f32 %v1720_v11, %v1692_v27  ;;  %v1726_v55 = vadd.f32 %v1722_v35, %v1694_v30 }
 0x8ed   : > { %v1731_v10 = vrot.slane %v8204_v32, %v8043_v8  ;;  %v6625_v37 = vadd.f32 -1.0, %v1971_v18  ;;  %v1763_v2 = vrot.slane %v8204_v32, %v8046_v40  ;;  %v1795_v57 = vrot.slane %v8204_v32, %v8049_v20 }
 0x8ee   : > { %v1827_v29 = vrot.slane %v8204_v32, %v8054_v59  ;;  %v1859_v47 = vrot.slane %v8204_v32, %v8058_v25  ;;  %v8380_v7 = vrot.slane %v8204_v32, %v8061_v39 }
 0x8ef   : > { %vm1736_vm14 = vcmp.ge.f32.partialorder %v1731_v10, %v8051_v6  ;;  %vm1738_vm15 = vcmp.ge.f32.partialorder %v1731_v10, %v8204_v32  ;;  %vm1768_vm2 = vcmp.ge.f32.partialorder %v1763_v2, %v8051_v6  ;;  %vm1770_vm4 = vcmp.ge.f32.partialorder %v1763_v2, %v8204_v32 }
 0x8f0   : > { %v6596_v48 = vsel %vm1736_vm14, 1.0, %v7572_v14  ;;  %v6598_v42 = vsel %vm1738_vm15, 1.0, %v7572_v14  ;;  %v1752_v33 = vsel %vm1736_vm14, %v1731_v10, 0.0  ;;  %v1754_v34 = vsel %vm1738_vm15, %v1731_v10, 0.0 }
 0x8f1   : > { %v1748_v24 = vadd.f32 %v6596_v48, %v1716_v28  ;;  %v1750_v60 = vadd.f32 %v6598_v42, %v1718_v23  ;;  %v1756_v58 = vadd.f32 %v1752_v33, %v1724_v46  ;;  %v1758_v17 = vadd.f32 %v1754_v34, %v1726_v55 }
 0x8f2   : > { %vm1800_vm5 = vcmp.ge.f32.partialorder %v1795_v57, %v8051_v6  ;;  %vm1802_vm6 = vcmp.ge.f32.partialorder %v1795_v57, %v8204_v32  ;;  %v7082_v38 = vpop.eup %7081  ;;  %v6600_v19 = vsel %vm1768_vm2, 1.0, %v7572_v14  ;;  %v6602_v50 = vsel %vm1770_vm4, 1.0, %v7572_v14 }
 0x8f3   : > { %v1784_v13 = vsel %vm1768_vm2, %v1763_v2, 0.0  ;;  %v1786_v63 = vsel %vm1770_vm4, %v1763_v2, 0.0  ;;  %v1977_v61 = vmul.f32 %v7082_v38, %v6625_v37  ;;  %v1780_v49 = vadd.f32 %v6600_v19, %v1748_v24 }
 0x8f4   : > { %v1782_v43 = vadd.f32 %v6602_v50, %v1750_v60  ;;  %v1788_v5 = vadd.f32 %v1784_v13, %v1756_v58  ;;  %v1790_v15 = vadd.f32 %v1786_v63, %v1758_v17  ;;  %v6604_v4 = vsel %vm1800_vm5, 1.0, %v7572_v14 }
 0x8f5   : > { %v6606_v18 = vsel %vm1802_vm6, 1.0, %v7572_v14  ;;  %v1816_v21 = vsel %vm1800_vm5, %v1795_v57, 0.0  ;;  %v1981_v9 = vsub.f32 %v8142_v3, %v1977_v61  ;;  %v1812_v44 = vadd.f32 %v6604_v4, %v1780_v49 }
 0x8f6   : > { %v1814_v62 = vadd.f32 %v6606_v18, %v1782_v43  ;;  %v1818_v54 = vsel %vm1802_vm6, %v1795_v57, 0.0  ;;  %v1820_v1 = vadd.f32 %v1816_v21, %v1788_v5  ;;  %vm1832_vm7 = vcmp.ge.f32.partialorder %v1827_v29, %v8051_v6 }
 0x8f7   : > { %v1822_v16 = vadd.f32 %v1818_v54, %v1790_v15  ;;  %vm1834_vm8 = vcmp.ge.f32.partialorder %v1827_v29, %v8204_v32  ;;  %v8399_v27 = vmax.f32 %v1981_v9, 0.0  ;;  %v6608_v0 = vsel %vm1832_vm7, 1.0, %v7572_v14 }
 0x8f8   : > { %v6610_v30 = vsel %vm1834_vm8, 1.0, %v7572_v14  ;;  %v1844_v56 = vadd.f32 %v6608_v0, %v1812_v44  ;;  %v1848_v3 = vsel %vm1832_vm7, %v1827_v29, 0.0  ;;  %v1850_v28 = vsel %vm1834_vm8, %v1827_v29, 0.0 }
 0x8f9   : > { %v1846_v12 = vadd.f32 %v6610_v30, %v1814_v62  ;;  %v2025_v11 = vmul.f32 %v8399_v27, %v7708_v45  ;;  %v1852_v35 = vadd.f32 %v1848_v3, %v1820_v1  ;;  %v1854_v23 = vadd.f32 %v1850_v28, %v1822_v16 }
 0x8fa   : > { %vm1864_vm9 = vcmp.ge.f32.partialorder %v1859_v47, %v8051_v6  ;;  %vm1866_vm10 = vcmp.ge.f32.partialorder %v1859_v47, %v8204_v32  ;;  %vm1896_vm3 = vcmp.ge.f32.partialorder %v8380_v7, %v8051_v6  ;;  %vm1898_vm11 = vcmp.ge.f32.partialorder %v8380_v7, %v8204_v32 }
 0x8fb   : > { %v1993_v46 = vadd.f32 1e-15, %v8399_v27  ;;  %2054 = vmatprep.subr.mxu1 %v2025_v11  ;;  %v6612_v55 = vsel %vm1864_vm9, 1.0, %v7572_v14  ;;  %v6614_v10 = vsel %vm1866_vm10, 1.0, %v7572_v14  ;;  %v1880_v57 = vsel %vm1864_vm9, %v1859_v47, 0.0 }
 0x8fc   : > { %v1876_v37 = vadd.f32 %v6612_v55, %v1844_v56  ;;  %v1878_v2 = vadd.f32 %v6614_v10, %v1846_v12  ;;  %v1882_v29 = vsel %vm1866_vm10, %v1859_v47, 0.0  ;;  %v6616_v48 = vsel %vm1896_vm3, 1.0, %v7572_v14 }
 0x8fd   : > { %v6618_v42 = vsel %vm1898_vm11, 1.0, %v7572_v14  ;;  %v1884_v33 = vadd.f32 %v1880_v57, %v1852_v35  ;;  %v1886_v34 = vadd.f32 %v1882_v29, %v1854_v23  ;;  %7083 = vlog2.f32 %v1993_v46 }
 0x8fe   : > { %v1908_v24 = vadd.f32 %v6616_v48, %v1876_v37  ;;  %v1910_v60 = vadd.f32 %v6618_v42, %v1878_v2  ;;  %v1979_v58 = vsub.f32 %v8087_v41, %v1977_v61  ;;  %v1912_v38 = vsel %vm1896_vm3, %v8380_v7, 0.0 }
 0x8ff   : > { %v1914_v19 = vsel %vm1898_vm11, %v8380_v7, 0.0  ;;  %v1916_v13 = vadd.f32 %v1912_v38, %v1884_v33 }
 0x900   : > { %v1920_v17 = vmul.f32 %v1908_v24, %v8051_v6  ;;  %v1922_v47 = vmul.f32 %v1910_v60, %v8204_v32  ;;  %v8433_v50 = vmax.f32 %v1979_v58, 0.0  ;;  %v1918_v63 = vadd.f32 %v1914_v19, %v1886_v34 }
 0x902   : > { %v1924_v49 = vadd.f32 1.0, %v1920_v17  ;;  %v1926_v41 = vadd.f32 1.0, %v1922_v47  ;;  %v1991_v61 = vadd.f32 1e-15, %v8433_v50  ;;  %v2023_v58 = vmul.f32 %v8433_v50, %v7714_v52  ;;  %v7502_v17 = vld [vmem:[%s10211_s2 + $0x8] sm:$0xff]  ;;  %v7503_v47 = vld [vmem:[%s10211_s2 + $0x10] sm:$0xff] }
 0x904   : > { %vm1928_vm12 = vcmp.gt.f32.partialorder %v1924_v49, %v1916_v13  ;;  %vm1930_vm13 = vcmp.gt.f32.partialorder %v1926_v41, %v1918_v63  ;;  %7085 = vlog2.f32 %v1991_v61  ;;  %v7504_v49 = vld [vmem:[%s10211_s2 + $0x18] sm:$0xff] }
 0x905   : > { %v6620_v43 = vsel %vm1928_vm12, 1.0, %v7572_v14  ;;  %v6622_v5 = vsel %vm1930_vm13, 1.0, %v7572_v14 }
 0x906   : > { %v1940_v15 = vadd.f32 %v6622_v5, %v6620_v43  ;;  %v1954_v4 = vmul.f32 %v6620_v43, %v8051_v6  ;;  %v1956_v7 = vmul.f32 %v6622_v5, %v8204_v32 }
 0x908   : > { %v1941_v18 = vrot.slane %v1940_v15, 4  ;;  %v1958_v21 = vadd.f32 %v1956_v7, %v1954_v4 }
 0x90a   : > { %v1942_v9 = vadd.f32 %v1941_v18, %v1940_v15  ;;  %v1959_v44 = vrot.slane %v1958_v21, 4  ;;  %v7084_v62 = vpop.eup %7083 }
 0x90b   : > { %v2001_v0 = vmul.f32 0.6931472, %v7084_v62 }
 0x90c   : > { %v1943_v54 = vrot.slane %v1942_v9, 2  ;;  %v1960_v1 = vadd.f32 %v1959_v44, %v1958_v21 }
 0x90d   : > { %v2005_v28 = vmul.f32 %v2001_v0, %v8399_v27 }
 0x90e   : > { %v1944_v16 = vadd.f32 %v1943_v54, %v1942_v9  ;;  %v1961_v56 = vrot.slane %v1960_v1, 2 }
 0x910   : > { %v1945_v30 = vrot.slane %v1944_v16, 1  ;;  %v1962_v35 = vadd.f32 %v1961_v56, %v1960_v1 }
 0x911   : > { %v7086_v12 = vpop.eup %7085 }
 0x912   : > { %v1946_v3 = vadd.f32 %v1945_v30, %v1944_v16  ;;  %v1997_v11 = vmul.f32 0.6931472, %v7086_v12  ;;  %v1963_v55 = vrot.slane %v1962_v35, 1 }
 0x914   : > { %7087 = vrcp.f32 %v1946_v3  ;;  %v2003_v23 = vmul.f32 %v1997_v11, %v8433_v50  ;;  %v1964_v10 = vadd.f32 %v1963_v55, %v1962_v35 }
 0x916   : > { %v8442_v46 = vadd.f32 %v2005_v28, %v2003_v23  ;;  %v6624_v37 = vadd.f32 -1.0, %v1964_v10 }
 0x921   : > { %v7088_v2 = vpop.eup %7087 }
 0x922   : > { %v1975_v57 = vmul.f32 %v7088_v2, %v6624_v37 }
 0x924   : > { %v1980_v29 = vsub.f32 %v8204_v32, %v1975_v57  ;;  %v1978_v48 = vsub.f32 %v8051_v6, %v1975_v57  ;;  %v7501_v6 = vld [vmem:[%s10211_s2] sm:$0xff] }
 0x926   : > { %v8446_v42 = vmax.f32 %v1980_v29, 0.0  ;;  %v8448_v33 = vmax.f32 %v1978_v48, 0.0 }
 0x928   : > { %v1992_v34 = vadd.f32 1e-15, %v8446_v42  ;;  %v2024_v24 = vmul.f32 %v8446_v42, %v7712_v51  ;;  %v1990_v60 = vadd.f32 1e-15, %v8448_v33  ;;  %v2022_v32 = vmul.f32 %v8448_v33, %v7716_v53 }
 0x92a   : > { %7089 = vlog2.f32 %v1992_v34  ;;  %2055 = vmatpush1.msra.mxu1 %v2024_v24 }
 0x92b   : > { %2056 = vmatprep.subr.mxu1 %v2023_v58  ;;  %7091 = vlog2.f32 %v1990_v60 }
 0x92c   : > { %2057 = vmatpush1.msra.mxu1 %v2022_v32 }
 0x92d   : > { %6626 = vmatmul.mubr.msk.f32.vlgmr.msra.gmra.mxu1 %vm371_vm0, %v7501_v6 }
 0x92e   : > { %2096 = vmatprep.mubr.f32.mxu1 %v7572_v14 }
 0x931   : > { %6627 = vmatmul.mubr.msk.f32.gmra.mxu1 %vm371_vm0, %v7502_v17 }
 0x932   : > { %2102 = vmatprep.mubr.f32.mxu1 %v7572_v14 }
 0x935   : > { %6628 = vmatmul.mubr.msk.f32.gmra.mxu1 %vm371_vm0, %v7503_v47 }
 0x936   : > { %2108 = vmatprep.mubr.f32.mxu1 %v7572_v14 }
 0x937   : > { %v7090_v38 = vpop.eup %7089 }
 0x938   : > { %v7092_v19 = vpop.eup %7091  ;;  %v1999_v13 = vmul.f32 0.6931472, %v7090_v38 }
 0x939   : > { %v1995_v63 = vmul.f32 0.6931472, %v7092_v19  ;;  %6629 = vmatmul.mubr.msk.f32.gmra.mxu1 %vm371_vm0, %v7504_v49 }
 0x93a   : > { %v2004_v41 = vmul.f32 %v1999_v13, %v8446_v42  ;;  %2557 = vmatprep.mubr.f32.mxu1 %v7572_v14 }
 0x93b   : > { %v2002_v61 = vmul.f32 %v1995_v63, %v8448_v33 }
 0x93d   : > { %v8480_v43 = vadd.f32 %v2004_v41, %v2002_v61 }
 0x9ed   : > { %v8482_v5 = vpop.f32.mrf.mxu1 }
 0x9ee   : > { %v2127_v12 = vmul.f32 %v8482_v5, %v8482_v5 }
 0x9ef   : > { %v8484_v15 = vpop.f32.mrf.mxu1 }
 0x9f0   : > { %v2179_v30 = vmul.f32 %v8484_v15, %v8484_v15 }
 0x9f1   : > { %v8486_v4 = vpop.f32.mrf.mxu1 }
 0x9f2   : > { %v2128_v56 = vmul.f32 %v8486_v4, %v8486_v4 }
 0x9f3   : > { %v8488_v7 = vpop.f32.mrf.mxu1 }
 0x9f4   : > { %v2180_v0 = vmul.f32 %v8488_v7, %v8488_v7 }
 0x9f5   : > { %v8490_v18 = vpop.f32.mrf.mxu1 }
 0x9f6   : > { %2119 = vadd.xlane.f32.xlu1 %v8490_v18  ;;  %v2129_v16 = vmul.f32 %v8490_v18, %v8490_v18 }
 0x9f7   : > { %v8493_v21 = vpop.f32.mrf.mxu1 }
 0x9f8   : > { %v2181_v54 = vmul.f32 %v8493_v21, %v8493_v21 }
 0x9f9   : > { %v8495_v9 = vpop.f32.mrf.mxu1 }
 0x9fa   : > { %2171 = vadd.xlane.f32.xlu1 %v8493_v21  ;;  %2121 = vadd.xlane.f32.xlu0 %v8495_v9  ;;  %v2130_v44 = vmul.f32 %v8495_v9, %v8495_v9 }
 0x9fb   : > { %v8501_v62 = vpop.f32.mrf.mxu1 }
 0x9fc   : > { %v2182_v1 = vmul.f32 %v8501_v62, %v8501_v62 }
 0x9fe   : > { %2137 = vadd.xlane.f32.xlu0 %v2130_v44  ;;  %2173 = vadd.xlane.f32.xlu1 %v8501_v62 }
 0xa02   : > { %2187 = vadd.xlane.f32.xlu1 %v2181_v54  ;;  %2189 = vadd.xlane.f32.xlu0 %v2182_v1 }
 0xa06   : > { %2169 = vadd.xlane.f32.xlu1 %v8488_v7  ;;  %2135 = vadd.xlane.f32.xlu0 %v2129_v16 }
 0xa0a   : > { %2167 = vadd.xlane.f32.xlu1 %v8484_v15  ;;  %2117 = vadd.xlane.f32.xlu0 %v8486_v4 }
 0xa0e   : > { %2115 = vadd.xlane.f32.xlu1 %v8482_v5  ;;  %2185 = vadd.xlane.f32.xlu0 %v2180_v0 }
 0xa12   : > { %2183 = vadd.xlane.f32.xlu1 %v2179_v30  ;;  %2133 = vadd.xlane.f32.xlu0 %v2128_v56 }
 0xa16   : > { %2131 = vadd.xlane.f32.xlu0 %v2127_v12 }
 0xa7f   : > { %v2120_v3 = vpop.xlane.xlu1 %2119 }
 0xa80   : > { %v2125_v48 = vmul.f32 0.0078125, %v2120_v3 }
 0xa82   : > { %v2145_v63 = vmul.f32 %v2125_v48, %v2125_v48 }
 0xa83   : > { %v2172_v28 = vpop.xlane.xlu1 %2171  ;;  %v2122_v11 = vpop.xlane.xlu0 %2121 }
 0xa84   : > { %v2126_v35 = vmul.f32 0.0078125, %v2122_v11  ;;  %v2177_v23 = vmul.f32 0.0078125, %v2172_v28 }
 0xa86   : > { %v2146_v37 = vmul.f32 %v2126_v35, %v2126_v35  ;;  %v2197_v34 = vmul.f32 %v2177_v23, %v2177_v23  ;;  %v2154_v30 = vsub.f32 %v8495_v9, %v2126_v35  ;;  %v2205_v11 = vsub.f32 %v8493_v21, %v2177_v23 }
 0xa87   : > { %v2138_v55 = vpop.xlane.xlu0 %2137  ;;  %v2174_v10 = vpop.xlane.xlu1 %2173 }
 0xa88   : > { %v2142_v2 = vmul.f32 0.0078125, %v2138_v55  ;;  %v2178_v57 = vmul.f32 0.0078125, %v2174_v10 }
 0xa8a   : > { %v2150_v29 = vsub.f32 %v2142_v2, %v2146_v37  ;;  %v2198_v32 = vmul.f32 %v2178_v57, %v2178_v57  ;;  %v2206_v37 = vsub.f32 %v8501_v62, %v2178_v57 }
 0xa8b   : > { %v2188_v24 = vpop.xlane.xlu1 %2187  ;;  %v2190_v60 = vpop.xlane.xlu0 %2189 }
 0xa8c   : > { %v2158_v58 = vadd.f32 1e-05, %v2150_v29  ;;  %v2193_v6 = vmul.f32 0.0078125, %v2188_v24  ;;  %v2194_v17 = vmul.f32 0.0078125, %v2190_v60 }
 0xa8e   : > { %7093 = vrsqrt.f32 %v2158_v58  ;;  %v2201_v47 = vsub.f32 %v2193_v6, %v2197_v34  ;;  %v2202_v38 = vsub.f32 %v2194_v17, %v2198_v32  ;;  %v2153_v58 = vsub.f32 %v8490_v18, %v2125_v48 }
 0xa8f   : > { %v2170_v19 = vpop.xlane.xlu1 %2169  ;;  %v2136_v13 = vpop.xlane.xlu0 %2135 }
 0xa90   : > { %v2209_v49 = vadd.f32 1e-05, %v2201_v47  ;;  %v2210_v41 = vadd.f32 1e-05, %v2202_v38  ;;  %v2141_v61 = vmul.f32 0.0078125, %v2136_v13  ;;  %v2176_v24 = vmul.f32 0.0078125, %v2170_v19 }
 0xa92   : > { %7095 = vrsqrt.f32 %v2209_v49  ;;  %v2149_v44 = vsub.f32 %v2141_v61, %v2145_v63  ;;  %v2196_v62 = vmul.f32 %v2176_v24, %v2176_v24 }
 0xa93   : > { %7097 = vrsqrt.f32 %v2210_v41  ;;  %v2118_v54 = vpop.xlane.xlu0 %2117  ;;  %v2168_v16 = vpop.xlane.xlu1 %2167 }
 0xa94   : > { %v2157_v1 = vadd.f32 1e-05, %v2149_v44  ;;  %v2175_v9 = vmul.f32 0.0078125, %v2168_v16  ;;  %v2124_v17 = vmul.f32 0.0078125, %v2118_v54 }
 0xa96   : > { %7099 = vrsqrt.f32 %v2157_v1  ;;  %v2195_v49 = vmul.f32 %v2175_v9, %v2175_v9  ;;  %v2144_v41 = vmul.f32 %v2124_v17, %v2124_v17 }
 0xa97   : > { %v2186_v0 = vpop.xlane.xlu0 %2185  ;;  %v2116_v12 = vpop.xlane.xlu1 %2115 }
 0xa98   : > { %v2192_v47 = vmul.f32 0.0078125, %v2186_v0  ;;  %v2123_v23 = vmul.f32 0.0078125, %v2116_v12 }
 0xa9a   : > { %v2200_v61 = vsub.f32 %v2192_v47, %v2196_v62  ;;  %v2143_v18 = vmul.f32 %v2123_v23, %v2123_v23  ;;  %v2203_v47 = vsub.f32 %v8484_v15, %v2175_v9  ;;  %v7506_v15 = vld [vmem:[%s10211_s2 + $0x28] sm:$0xff]  ;;  %v7508_v9 = vld [vmem:[%s10211_s2 + $0x38] sm:$0xff] }
 0xa9b   : > { %v7094_v56 = vpop.eup %7093  ;;  %v2134_v28 = vpop.xlane.xlu0 %2133 }
 0xa9c   : > { %v2166_v3 = vmul.f32 %v7094_v56, %v2154_v30  ;;  %v2184_v60 = vpop.xlane.xlu1 %2183  ;;  %v2140_v57 = vmul.f32 0.0078125, %v2134_v28  ;;  %v2208_v54 = vadd.f32 1e-05, %v2200_v61 }
 0xa9d   : > { %v2191_v13 = vmul.f32 0.0078125, %v2184_v60 }
 0xa9e   : > { %v6632_v55 = vmul.f32 -1.442695, %v2166_v3  ;;  %v2148_v44 = vsub.f32 %v2140_v57, %v2144_v41 }
 0xa9f   : > { %v7096_v10 = vpop.eup %7095  ;;  %v2132_v38 = vpop.xlane.xlu0 %2131  ;;  %v2199_v48 = vsub.f32 %v2191_v13, %v2195_v49  ;;  %v2151_v13 = vsub.f32 %v8482_v5, %v2123_v23  ;;  %v7505_v5 = vld [vmem:[%s10211_s2 + $0x20] sm:$0xff] }
 0xaa0   : > { %v7098_v2 = vpop.eup %7097  ;;  %7101 = vpow2.f32 %v6632_v55  ;;  %v2217_v29 = vmul.f32 %v7096_v10, %v2205_v11  ;;  %v2139_v19 = vmul.f32 0.0078125, %v2132_v38  ;;  %v2156_v30 = vadd.f32 1e-05, %v2148_v44 }
 0xaa1   : > { %v2218_v34 = vmul.f32 %v7098_v2, %v2206_v37  ;;  %v2207_v16 = vadd.f32 1e-05, %v2199_v48 }
 0xaa2   : > { %v6631_v32 = vmul.f32 -1.442695, %v2217_v29  ;;  %v2147_v1 = vsub.f32 %v2139_v19, %v2143_v18 }
 0xaa3   : > { %v7100_v35 = vpop.eup %7099  ;;  %v6633_v6 = vmul.f32 -1.442695, %v2218_v34 }
 0xaa4   : > { %7103 = vpow2.f32 %v6631_v32  ;;  %v2165_v21 = vmul.f32 %v7100_v35, %v2153_v58  ;;  %v2155_v56 = vadd.f32 1e-05, %v2147_v1  ;;  %v2204_v58 = vsub.f32 %v8488_v7, %v2176_v24  ;;  %v7507_v24 = vld [vmem:[%s10211_s2 + $0x30] sm:$0xff] }
 0xaa5   : > { %7105 = vpow2.f32 %v6633_v6  ;;  %v2152_v35 = vsub.f32 %v8486_v4, %v2124_v17 }
 0xaa6   : > { %v6630_v63 = vmul.f32 -1.442695, %v2165_v21 }
 0xaa8   : > { %7107 = vpow2.f32 %v6630_v63 }
 0xaa9   : > { %7109 = vrsqrt.f32 %v2208_v54 }
 0xaaa   : > { %7111 = vrsqrt.f32 %v2207_v16 }
 0xaab   : > { %7113 = vrsqrt.f32 %v2156_v30 }
 0xaac   : > { %7115 = vrsqrt.f32 %v2155_v56 }
 0xaad   : > { %v7102_v0 = vpop.eup %7101 }
 0xaae   : > { %v2233_v12 = vadd.f32 1.0, %v7102_v0 }
 0xab0   : > { %7117 = vrcp.f32 %v2233_v12 }
 0xab1   : > { %v7104_v3 = vpop.eup %7103 }
 0xab2   : > { %v7106_v28 = vpop.eup %7105  ;;  %v2232_v11 = vadd.f32 1.0, %v7104_v3 }
 0xab3   : > { %v2234_v55 = vadd.f32 1.0, %v7106_v28 }
 0xab4   : > { %7119 = vrcp.f32 %v2232_v11 }
 0xab5   : > { %v7108_v10 = vpop.eup %7107  ;;  %7121 = vrcp.f32 %v2234_v55 }
 0xab6   : > { %v2231_v37 = vadd.f32 1.0, %v7108_v10  ;;  %v7110_v2 = vpop.eup %7109 }
 0xab7   : > { %v7112_v29 = vpop.eup %7111  ;;  %v2216_v38 = vmul.f32 %v7110_v2, %v2204_v58 }
 0xab8   : > { %7123 = vrcp.f32 %v2231_v37  ;;  %v7114_v34 = vpop.eup %7113  ;;  %v2215_v63 = vmul.f32 %v7112_v29, %v2203_v47 }
 0xab9   : > { %v7116_v60 = vpop.eup %7115  ;;  %v2164_v62 = vmul.f32 %v7114_v34, %v2152_v35 }
 0xaba   : > { %v2163_v19 = vmul.f32 %v7116_v60, %v2151_v13 }
 0xabd   : > { %v7118_v32 = vpop.eup %7117 }
 0xabe   : > { %v8532_v49 = vmul.f32 %v7118_v32, %v2164_v62 }
 0xac1   : > { %v7120_v6 = vpop.eup %7119 }
 0xac2   : > { %v7122_v21 = vpop.eup %7121  ;;  %v8535_v7 = vmul.f32 %v7120_v6, %v2215_v63 }
 0xac3   : > { %v8530_v57 = vmul.f32 %v7122_v21, %v2216_v38 }
 0xac5   : > { %v7124_v41 = vpop.eup %7123  ;;  %2275 = vmatprep.subr.mxu0 %v8530_v57 }
 0xac6   : > { %2276 = vmatpush1.msra.mxu0 %v8532_v49  ;;  %v8538_v4 = vmul.f32 %v7124_v41, %v2163_v19 }
 0xac7   : > { %2277 = vmatprep.subr.mxu0 %v8535_v7 }
 0xac8   : > { %2278 = vmatpush1.msra.mxu0 %v8538_v4 }
 0xac9   : > { %6634 = vmatmul.mubr.msk.f32.vlgmr.msra.gmra.mxu0 %vm371_vm0, %v7505_v5 }
 0xaca   : > { %2317 = vmatprep.mubr.f32.mxu0 %v7572_v14 }
 0xacd   : > { %6635 = vmatmul.mubr.msk.f32.gmra.mxu0 %vm371_vm0, %v7506_v15 }
 0xace   : > { %2323 = vmatprep.mubr.f32.mxu0 %v7572_v14 }
 0xad1   : > { %6636 = vmatmul.mubr.msk.f32.gmra.mxu0 %vm371_vm0, %v7507_v24 }
 0xad2   : > { %2329 = vmatprep.mubr.f32.mxu0 %v7572_v14 }
 0xad5   : > { %6637 = vmatmul.mubr.msk.f32.gmra.mxu0 %vm371_vm0, %v7508_v9 }
 0xad6   : > { %2803 = vmatprep.mubr.f32.mxu0 %v7572_v14 }
 0xb89   : > { %v8562_v17 = vpop.f32.mrf.mxu0 }
 0xb8a   : > { %v2348_v11 = vmul.f32 %v8562_v17, %v8562_v17 }
 0xb8b   : > { %v8564_v23 = vpop.f32.mrf.mxu0 }
 0xb8c   : > { %v2400_v3 = vmul.f32 %v8564_v23, %v8564_v23 }
 0xb8d   : > { %v8566_v61 = vpop.f32.mrf.mxu0 }
 0xb8e   : > { %v2349_v28 = vmul.f32 %v8566_v61, %v8566_v61 }
 0xb8f   : > { %v8568_v18 = vpop.f32.mrf.mxu0 }
 0xb90   : > { %v2401_v12 = vmul.f32 %v8568_v18, %v8568_v18 }
 0xb91   : > { %v8570_v48 = vpop.f32.mrf.mxu0 }
 0xb92   : > { %2340 = vadd.xlane.f32.xlu1 %v8570_v48  ;;  %v2350_v56 = vmul.f32 %v8570_v48, %v8570_v48 }
 0xb93   : > { %v8573_v44 = vpop.f32.mrf.mxu0 }
 0xb94   : > { %v2402_v0 = vmul.f32 %v8573_v44, %v8573_v44 }
 0xb95   : > { %v8575_v1 = vpop.f32.mrf.mxu0 }
 0xb96   : > { %2392 = vadd.xlane.f32.xlu1 %v8573_v44  ;;  %2342 = vadd.xlane.f32.xlu0 %v8575_v1  ;;  %v2351_v54 = vmul.f32 %v8575_v1, %v8575_v1 }
 0xb97   : > { %v8581_v16 = vpop.f32.mrf.mxu0 }
 0xb98   : > { %v2403_v30 = vmul.f32 %v8581_v16, %v8581_v16 }
 0xb9a   : > { %2358 = vadd.xlane.f32.xlu0 %v2351_v54  ;;  %2394 = vadd.xlane.f32.xlu1 %v8581_v16 }
 0xb9e   : > { %2408 = vadd.xlane.f32.xlu1 %v2402_v0  ;;  %2410 = vadd.xlane.f32.xlu0 %v2403_v30 }
 0xba2   : > { %2390 = vadd.xlane.f32.xlu1 %v8568_v18  ;;  %2356 = vadd.xlane.f32.xlu0 %v2350_v56 }
 0xba6   : > { %2388 = vadd.xlane.f32.xlu1 %v8564_v23  ;;  %2338 = vadd.xlane.f32.xlu0 %v8566_v61 }
 0xbaa   : > { %2336 = vadd.xlane.f32.xlu1 %v8562_v17  ;;  %2406 = vadd.xlane.f32.xlu0 %v2401_v12 }
 0xbae   : > { %2404 = vadd.xlane.f32.xlu1 %v2400_v3  ;;  %2354 = vadd.xlane.f32.xlu0 %v2349_v28 }
 0xbb2   : > { %2352 = vadd.xlane.f32.xlu0 %v2348_v11 }
 0xc1b   : > { %v2341_v55 = vpop.xlane.xlu1 %2340 }
 0xc1c   : > { %v2346_v47 = vmul.f32 0.0078125, %v2341_v55 }
 0xc1e   : > { %v2366_v54 = vmul.f32 %v2346_v47, %v2346_v47 }
 0xc1f   : > { %v2393_v10 = vpop.xlane.xlu1 %2392  ;;  %v2343_v37 = vpop.xlane.xlu0 %2342 }
 0xc20   : > { %v2347_v2 = vmul.f32 0.0078125, %v2343_v37  ;;  %v2398_v29 = vmul.f32 0.0078125, %v2393_v10 }
 0xc22   : > { %v2367_v58 = vmul.f32 %v2347_v2, %v2347_v2  ;;  %v2418_v38 = vmul.f32 %v2398_v29, %v2398_v29  ;;  %v2375_v10 = vsub.f32 %v8575_v1, %v2347_v2 }
 0xc23   : > { %v2359_v34 = vpop.xlane.xlu0 %2358  ;;  %v2395_v60 = vpop.xlane.xlu1 %2394 }
 0xc24   : > { %v2363_v32 = vmul.f32 0.0078125, %v2359_v34  ;;  %v2399_v35 = vmul.f32 0.0078125, %v2395_v60 }
 0xc26   : > { %v2371_v6 = vsub.f32 %v2363_v32, %v2367_v58  ;;  %v2419_v63 = vmul.f32 %v2399_v35, %v2399_v35  ;;  %v2426_v58 = vsub.f32 %v8573_v44, %v2398_v29 }
 0xc27   : > { %v2409_v21 = vpop.xlane.xlu1 %2408  ;;  %v2411_v13 = vpop.xlane.xlu0 %2410 }
 0xc28   : > { %v2379_v62 = vadd.f32 1e-05, %v2371_v6  ;;  %v2414_v19 = vmul.f32 0.0078125, %v2409_v21  ;;  %v2415_v41 = vmul.f32 0.0078125, %v2411_v13  ;;  %v2427_v21 = vsub.f32 %v8581_v16, %v2399_v35 }
 0xc2a   : > { %7125 = vrsqrt.f32 %v2379_v62  ;;  %v2422_v5 = vsub.f32 %v2414_v19, %v2418_v38  ;;  %v2423_v15 = vsub.f32 %v2415_v41, %v2419_v63 }
 0xc2b   : > { %v2391_v24 = vpop.xlane.xlu1 %2390  ;;  %v2357_v9 = vpop.xlane.xlu0 %2356 }
 0xc2c   : > { %v2430_v0 = vadd.f32 1e-05, %v2422_v5  ;;  %v2431_v30 = vadd.f32 1e-05, %v2423_v15  ;;  %v2362_v56 = vmul.f32 0.0078125, %v2357_v9  ;;  %v2374_v15 = vsub.f32 %v8570_v48, %v2346_v47 }
 0xc2e   : > { %7127 = vrsqrt.f32 %v2430_v0  ;;  %v2370_v12 = vsub.f32 %v2362_v56, %v2366_v54  ;;  %v2397_v0 = vmul.f32 0.0078125, %v2391_v24 }
 0xc2f   : > { %7129 = vrsqrt.f32 %v2431_v30  ;;  %v2339_v3 = vpop.xlane.xlu0 %2338  ;;  %v2389_v11 = vpop.xlane.xlu1 %2388 }
 0xc30   : > { %v2378_v28 = vadd.f32 1e-05, %v2370_v12  ;;  %v2345_v63 = vmul.f32 0.0078125, %v2339_v3  ;;  %v2396_v5 = vmul.f32 0.0078125, %v2389_v11 }
 0xc32   : > { %7131 = vrsqrt.f32 %v2378_v28  ;;  %v2365_v30 = vmul.f32 %v2345_v63, %v2345_v63  ;;  %v2416_v16 = vmul.f32 %v2396_v5, %v2396_v5 }
 0xc33   : > { %v2407_v55 = vpop.xlane.xlu0 %2406  ;;  %v2337_v37 = vpop.xlane.xlu1 %2336 }
 0xc34   : > { %v2344_v35 = vmul.f32 0.0078125, %v2337_v37  ;;  %v2413_v12 = vmul.f32 0.0078125, %v2407_v55 }
 0xc36   : > { %v2364_v48 = vmul.f32 %v2344_v35, %v2344_v35 }
 0xc37   : > { %v7126_v34 = vpop.eup %7125  ;;  %v2355_v6 = vpop.xlane.xlu0 %2354 }
 0xc38   : > { %v2387_v60 = vmul.f32 %v7126_v34, %v2375_v10  ;;  %v2405_v19 = vpop.xlane.xlu1 %2404  ;;  %v2361_v2 = vmul.f32 0.0078125, %v2355_v6  ;;  %v2417_v10 = vmul.f32 %v2397_v0, %v2397_v0 }
 0xc39   : > { %v2412_v44 = vmul.f32 0.0078125, %v2405_v19 }
 0xc3a   : > { %v6640_v32 = vmul.f32 -1.442695, %v2387_v60  ;;  %v2369_v28 = vsub.f32 %v2361_v2, %v2365_v30  ;;  %v2421_v47 = vsub.f32 %v2413_v12, %v2417_v10  ;;  %v2373_v2 = vsub.f32 %v8566_v61, %v2345_v63 }
 0xc3b   : > { %v7128_v38 = vpop.eup %7127  ;;  %v2353_v56 = vpop.xlane.xlu0 %2352  ;;  %v2420_v11 = vsub.f32 %v2412_v44, %v2416_v16  ;;  %v2424_v44 = vsub.f32 %v8564_v23, %v2396_v5  ;;  %v2425_v30 = vsub.f32 %v8568_v18, %v2397_v0 }
 0xc3c   : > { %v7130_v13 = vpop.eup %7129  ;;  %7133 = vpow2.f32 %v6640_v32  ;;  %v2438_v62 = vmul.f32 %v7128_v38, %v2426_v58  ;;  %v2360_v34 = vmul.f32 0.0078125, %v2353_v56  ;;  %v2377_v60 = vadd.f32 1e-05, %v2369_v28 }
 0xc3d   : > { %v2439_v41 = vmul.f32 %v7130_v13, %v2427_v21  ;;  %v2428_v58 = vadd.f32 1e-05, %v2420_v11  ;;  %v2429_v6 = vadd.f32 1e-05, %v2421_v47  ;;  %v2372_v11 = vsub.f32 %v8562_v17, %v2344_v35  ;;  %v6645_v35 = vld [vmem:[%s10211_s2 + $0x98] sm:$0xff] }
 0xc3e   : > { %v6639_v1 = vmul.f32 -1.442695, %v2438_v62  ;;  %v2368_v24 = vsub.f32 %v2360_v34, %v2364_v48 }
 0xc3f   : > { %v7132_v9 = vpop.eup %7131  ;;  %v6641_v54 = vmul.f32 -1.442695, %v2439_v41 }
 0xc40   : > { %7135 = vpow2.f32 %v6639_v1  ;;  %v2386_v29 = vmul.f32 %v7132_v9, %v2374_v15  ;;  %v2376_v21 = vadd.f32 1e-05, %v2368_v24 }
 0xc41   : > { %7137 = vpow2.f32 %v6641_v54 }
 0xc42   : > { %v6638_v3 = vmul.f32 -1.442695, %v2386_v29 }
 0xc44   : > { %7139 = vpow2.f32 %v6638_v3 }
 0xc45   : > { %7141 = vrsqrt.f32 %v2377_v60 }
 0xc46   : > { %7143 = vrsqrt.f32 %v2428_v58 }
 0xc49   : > { %v7134_v32 = vpop.eup %7133 }
 0xc4a   : > { %v2454_v38 = vadd.f32 1.0, %v7134_v32 }
 0xc4c   : > { %7145 = vrcp.f32 %v2454_v38 }
 0xc4d   : > { %v7136_v37 = vpop.eup %7135  ;;  %7147 = vrsqrt.f32 %v2429_v6 }
 0xc4e   : > { %v7138_v55 = vpop.eup %7137  ;;  %v2453_v13 = vadd.f32 1.0, %v7136_v37  ;;  %7149 = vrsqrt.f32 %v2376_v21 }
 0xc4f   : > { %v2455_v62 = vadd.f32 1.0, %v7138_v55 }
 0xc50   : > { %7151 = vrcp.f32 %v2453_v13 }
 0xc51   : > { %v7140_v19 = vpop.eup %7139  ;;  %7153 = vrcp.f32 %v2455_v62 }
 0xc52   : > { %v2452_v41 = vadd.f32 1.0, %v7140_v19  ;;  %v7142_v15 = vpop.eup %7141 }
 0xc53   : > { %v7144_v1 = vpop.eup %7143  ;;  %v2385_v29 = vmul.f32 %v7142_v15, %v2373_v2 }
 0xc54   : > { %7155 = vrcp.f32 %v2452_v41  ;;  %v2436_v12 = vmul.f32 %v7144_v1, %v2424_v44 }
 0xc59   : > { %v7146_v9 = vpop.eup %7145 }
 0xc5a   : > { %v7148_v54 = vpop.eup %7147  ;;  %v2466_v16 = vmul.f32 %v7146_v9, %v2385_v29 }
 0xc5b   : > { %v7150_v56 = vpop.eup %7149  ;;  %v2437_v28 = vmul.f32 %v7148_v54, %v2425_v30 }
 0xc5c   : > { %v2470_v47 = vadd.f32 %v2466_v16, %v8532_v49  ;;  %v2384_v61 = vmul.f32 %v7150_v56, %v2372_v11 }
 0xc5d   : > { %v7152_v3 = vpop.eup %7151 }
 0xc5e   : > { %v7154_v10 = vpop.eup %7153  ;;  %v2465_v34 = vmul.f32 %v7152_v3, %v2436_v12  ;;  %v8615_v0 = vmul.f32 0.70710677, %v2470_v47 }
 0xc5f   : > { %v2467_v48 = vmul.f32 %v7154_v10, %v2437_v28 }
 0xc60   : > { %v2469_v23 = vadd.f32 %v2465_v34, %v8535_v7  ;;  %v6643_v7 = vld [vmem:[%s10211_s2 + $0x88] sm:$0xff] }
 0xc61   : > { %v7156_v63 = vpop.eup %7155  ;;  %v2471_v60 = vadd.f32 %v2467_v48, %v8530_v57  ;;  %v6642_v57 = vld [vmem:[%s10211_s2 + $0x80] sm:$0xff] }
 0xc62   : > { %v2464_v5 = vmul.f32 %v7156_v63, %v2384_v61  ;;  %v8619_v17 = vmul.f32 0.70710677, %v2469_v23 }
 0xc63   : > { %v8613_v18 = vmul.f32 0.70710677, %v2471_v60 }
 0xc64   : > { %v2468_v58 = vadd.f32 %v2464_v5, %v8538_v4  ;;  %v6644_v4 = vld [vmem:[%s10211_s2 + $0x90] sm:$0xff] }
 0xc65   : > { %2521 = vmatprep.subr.mxu1 %v8613_v18 }
 0xc66   : > { %2522 = vmatpush1.msra.mxu1 %v8615_v0  ;;  %v8622_v49 = vmul.f32 0.70710677, %v2468_v58 }
 0xc67   : > { %2523 = vmatprep.subr.mxu1 %v8619_v17 }
 0xc68   : > { %2524 = vmatpush1.msra.mxu1 %v8622_v49 }
 0xc69   : > { %6646 = vmatmul.mubr.msk.f32.vlgmr.msra.gmra.mxu1 %vm371_vm0, %v6642_v57 }
 0xc6a   : > { %2563 = vmatprep.mubr.f32.mxu1 %v7572_v14 }
 0xc6d   : > { %6647 = vmatmul.mubr.msk.f32.gmra.mxu1 %vm371_vm0, %v6643_v7 }
 0xc6e   : > { %2569 = vmatprep.mubr.f32.mxu1 %v7572_v14 }
 0xc71   : > { %6648 = vmatmul.mubr.msk.f32.gmra.mxu1 %vm371_vm0, %v6644_v4 }
 0xc72   : > { %2575 = vmatprep.mubr.f32.mxu1 %v7572_v14 }
 0xc75   : > { %6649 = vmatmul.mubr.msk.f32.gmra.mxu1 %vm371_vm0, %v6645_v35 }
 0xc76   : > { %3045 = vmatprep.mubr.f32.mxu1 %v7572_v14 }
 0xd29   : > { %v8646_v24 = vpop.f32.mrf.mxu1 }
 0xd2a   : > { %v2594_v54 = vmul.f32 %v8646_v24, %v8646_v24 }
 0xd2b   : > { %v8648_v32 = vpop.f32.mrf.mxu1 }
 0xd2c   : > { %v2646_v2 = vmul.f32 %v8648_v32, %v8648_v32 }
 0xd2d   : > { %v8650_v6 = vpop.f32.mrf.mxu1 }
 0xd2e   : > { %v2595_v9 = vmul.f32 %v8650_v6, %v8650_v6 }
 0xd2f   : > { %v8652_v38 = vpop.f32.mrf.mxu1 }
 0xd30   : > { %v2647_v1 = vmul.f32 %v8652_v38, %v8652_v38 }
 0xd31   : > { %v8654_v21 = vpop.f32.mrf.mxu1 }
 0xd32   : > { %2586 = vadd.xlane.f32.xlu1 %v8654_v21  ;;  %v2596_v15 = vmul.f32 %v8654_v21, %v8654_v21 }
 0xd33   : > { %v8657_v37 = vpop.f32.mrf.mxu1 }
 0xd34   : > { %v2648_v19 = vmul.f32 %v8657_v37, %v8657_v37 }
 0xd35   : > { %v8659_v55 = vpop.f32.mrf.mxu1 }
 0xd36   : > { %2638 = vadd.xlane.f32.xlu1 %v8657_v37  ;;  %2588 = vadd.xlane.f32.xlu0 %v8659_v55  ;;  %v2597_v13 = vmul.f32 %v8659_v55, %v8659_v55 }
 0xd37   : > { %v8665_v62 = vpop.f32.mrf.mxu1 }
 0xd38   : > { %v2649_v41 = vmul.f32 %v8665_v62, %v8665_v62 }
 0xd3a   : > { %2604 = vadd.xlane.f32.xlu0 %v2597_v13  ;;  %2640 = vadd.xlane.f32.xlu1 %v8665_v62 }
 0xd3e   : > { %2654 = vadd.xlane.f32.xlu1 %v2648_v19  ;;  %2656 = vadd.xlane.f32.xlu0 %v2649_v41 }
 0xd42   : > { %2636 = vadd.xlane.f32.xlu1 %v8652_v38  ;;  %2602 = vadd.xlane.f32.xlu0 %v2596_v15 }
 0xd46   : > { %2634 = vadd.xlane.f32.xlu1 %v8648_v32  ;;  %2584 = vadd.xlane.f32.xlu0 %v8650_v6 }
 0xd4a   : > { %2582 = vadd.xlane.f32.xlu1 %v8646_v24  ;;  %2652 = vadd.xlane.f32.xlu0 %v2647_v1 }
 0xd4e   : > { %2650 = vadd.xlane.f32.xlu1 %v2646_v2  ;;  %2600 = vadd.xlane.f32.xlu0 %v2595_v9 }
 0xd52   : > { %2598 = vadd.xlane.f32.xlu0 %v2594_v54 }
 0xdbb   : > { %v2587_v44 = vpop.xlane.xlu1 %2586 }
 0xdbc   : > { %v2592_v48 = vmul.f32 0.0078125, %v2587_v44 }
 0xdbe   : > { %v2612_v13 = vmul.f32 %v2592_v48, %v2592_v48 }
 0xdbf   : > { %v2639_v29 = vpop.xlane.xlu1 %2638  ;;  %v2589_v30 = vpop.xlane.xlu0 %2588 }
 0xdc0   : > { %v2593_v56 = vmul.f32 0.0078125, %v2589_v30  ;;  %v2644_v16 = vmul.f32 0.0078125, %v2639_v29 }
 0xdc2   : > { %v2613_v28 = vmul.f32 %v2593_v56, %v2593_v56  ;;  %v2664_v47 = vmul.f32 %v2644_v16, %v2644_v16  ;;  %v2621_v29 = vsub.f32 %v8659_v55, %v2593_v56 }
 0xdc3   : > { %v2605_v12 = vpop.xlane.xlu0 %2604  ;;  %v2641_v3 = vpop.xlane.xlu1 %2640 }
 0xdc4   : > { %v2609_v10 = vmul.f32 0.0078125, %v2605_v12  ;;  %v2645_v11 = vmul.f32 0.0078125, %v2641_v3 }
 0xdc6   : > { %v2617_v34 = vsub.f32 %v2609_v10, %v2613_v28  ;;  %v2665_v23 = vmul.f32 %v2645_v11, %v2645_v11  ;;  %v2672_v28 = vsub.f32 %v8657_v37, %v2644_v16 }
 0xdc7   : > { %v2655_v61 = vpop.xlane.xlu1 %2654  ;;  %v2657_v63 = vpop.xlane.xlu0 %2656 }
 0xdc8   : > { %v2625_v60 = vadd.f32 1e-05, %v2617_v34  ;;  %v2660_v5 = vmul.f32 0.0078125, %v2655_v61  ;;  %v2661_v58 = vmul.f32 0.0078125, %v2657_v63  ;;  %v2673_v61 = vsub.f32 %v8665_v62, %v2645_v11 }
 0xdca   : > { %7157 = vrsqrt.f32 %v2625_v60  ;;  %v2668_v57 = vsub.f32 %v2660_v5, %v2664_v47  ;;  %v2669_v7 = vsub.f32 %v2661_v58, %v2665_v23 }
 0xdcb   : > { %v2637_v4 = vpop.xlane.xlu1 %2636  ;;  %v2603_v35 = vpop.xlane.xlu0 %2602 }
 0xdcc   : > { %v2676_v19 = vadd.f32 1e-05, %v2668_v57  ;;  %v2677_v41 = vadd.f32 1e-05, %v2669_v7  ;;  %v2608_v15 = vmul.f32 0.0078125, %v2603_v35  ;;  %v2620_v7 = vsub.f32 %v8654_v21, %v2592_v48 }
 0xdce   : > { %7159 = vrsqrt.f32 %v2676_v19  ;;  %v2616_v1 = vsub.f32 %v2608_v15, %v2612_v13  ;;  %v2643_v19 = vmul.f32 0.0078125, %v2637_v4 }
 0xdcf   : > { %7161 = vrsqrt.f32 %v2677_v41  ;;  %v2585_v2 = vpop.xlane.xlu0 %2584  ;;  %v2635_v54 = vpop.xlane.xlu1 %2634 }
 0xdd0   : > { %v2624_v9 = vadd.f32 1e-05, %v2616_v1  ;;  %v2591_v23 = vmul.f32 0.0078125, %v2585_v2  ;;  %v2642_v57 = vmul.f32 0.0078125, %v2635_v54 }
 0xdd2   : > { %7163 = vrsqrt.f32 %v2624_v9  ;;  %v2611_v41 = vmul.f32 %v2591_v23, %v2591_v23  ;;  %v2662_v62 = vmul.f32 %v2642_v57, %v2642_v57 }
 0xdd3   : > { %v2653_v44 = vpop.xlane.xlu0 %2652  ;;  %v2583_v30 = vpop.xlane.xlu1 %2582 }
 0xdd4   : > { %v2590_v11 = vmul.f32 0.0078125, %v2583_v30  ;;  %v2659_v1 = vmul.f32 0.0078125, %v2653_v44 }
 0xdd6   : > { %v2610_v21 = vmul.f32 %v2590_v11, %v2590_v11 }
 0xdd7   : > { %v7158_v12 = vpop.eup %7157  ;;  %v2601_v34 = vpop.xlane.xlu0 %2600 }
 0xdd8   : > { %v2633_v3 = vmul.f32 %v7158_v12, %v2621_v29  ;;  %v2651_v5 = vpop.xlane.xlu1 %2650  ;;  %v2607_v56 = vmul.f32 0.0078125, %v2601_v34  ;;  %v2663_v29 = vmul.f32 %v2643_v19, %v2643_v19 }
 0xdd9   : > { %v2658_v37 = vmul.f32 0.0078125, %v2651_v5 }
 0xdda   : > { %v6652_v10 = vmul.f32 -1.442695, %v2633_v3  ;;  %v2615_v9 = vsub.f32 %v2607_v56, %v2611_v41  ;;  %v2667_v48 = vsub.f32 %v2659_v1, %v2663_v29  ;;  %v2619_v56 = vsub.f32 %v8650_v6, %v2591_v23 }
 0xddb   : > { %v7160_v47 = vpop.eup %7159  ;;  %v2599_v15 = vpop.xlane.xlu0 %2598  ;;  %v2666_v54 = vsub.f32 %v2658_v37, %v2662_v62  ;;  %v2670_v37 = vsub.f32 %v8648_v32, %v2642_v57  ;;  %v2671_v41 = vsub.f32 %v8652_v38, %v2643_v19 }
 0xddc   : > { %v7162_v63 = vpop.eup %7161  ;;  %7165 = vpow2.f32 %v6652_v10  ;;  %v2684_v60 = vmul.f32 %v7160_v47, %v2672_v28  ;;  %v2606_v12 = vmul.f32 0.0078125, %v2599_v15  ;;  %v2623_v3 = vadd.f32 1e-05, %v2615_v9 }
 0xddd   : > { %v2685_v58 = vmul.f32 %v7162_v63, %v2673_v61  ;;  %v2674_v28 = vadd.f32 1e-05, %v2666_v54  ;;  %v2675_v34 = vadd.f32 1e-05, %v2667_v48  ;;  %v2618_v54 = vsub.f32 %v8646_v24, %v2590_v11  ;;  %v6657_v11 = vld [vmem:[%s10211_s2 + $0xb8] sm:$0xff] }
 0xdde   : > { %v6651_v55 = vmul.f32 -1.442695, %v2684_v60  ;;  %v2614_v4 = vsub.f32 %v2606_v12, %v2610_v21 }
 0xddf   : > { %v7164_v35 = vpop.eup %7163  ;;  %v6653_v13 = vmul.f32 -1.442695, %v2685_v58 }
 0xde0   : > { %7167 = vpow2.f32 %v6651_v55  ;;  %v2632_v16 = vmul.f32 %v7164_v35, %v2620_v7  ;;  %v2622_v61 = vadd.f32 1e-05, %v2614_v4 }
 0xde1   : > { %7169 = vpow2.f32 %v6653_v13 }
 0xde2   : > { %v6650_v2 = vmul.f32 -1.442695, %v2632_v16 }
 0xde4   : > { %7171 = vpow2.f32 %v6650_v2 }
 0xde5   : > { %7173 = vrsqrt.f32 %v2623_v3 }
 0xde6   : > { %7175 = vrsqrt.f32 %v2674_v28 }
 0xde9   : > { %v7166_v10 = vpop.eup %7165 }
 0xdea   : > { %v2700_v47 = vadd.f32 1.0, %v7166_v10 }
 0xdec   : > { %7177 = vrcp.f32 %v2700_v47 }
 0xded   : > { %v7168_v30 = vpop.eup %7167  ;;  %7179 = vrsqrt.f32 %v2675_v34 }
 0xdee   : > { %v7170_v44 = vpop.eup %7169  ;;  %v2699_v63 = vadd.f32 1.0, %v7168_v30  ;;  %7181 = vrsqrt.f32 %v2622_v61 }
 0xdef   : > { %v2701_v60 = vadd.f32 1.0, %v7170_v44 }
 0xdf0   : > { %7183 = vrcp.f32 %v2699_v63 }
 0xdf1   : > { %v7172_v5 = vpop.eup %7171  ;;  %7185 = vrcp.f32 %v2701_v60 }
 0xdf2   : > { %v2698_v58 = vadd.f32 1.0, %v7172_v5  ;;  %v7174_v7 = vpop.eup %7173 }
 0xdf3   : > { %v7176_v55 = vpop.eup %7175  ;;  %v2631_v16 = vmul.f32 %v7174_v7, %v2619_v56 }
 0xdf4   : > { %7187 = vrcp.f32 %v2698_v58  ;;  %v2682_v1 = vmul.f32 %v7176_v55, %v2670_v37 }
 0xdf9   : > { %v7178_v35 = vpop.eup %7177 }
 0xdfa   : > { %v7180_v13 = vpop.eup %7179  ;;  %v2712_v62 = vmul.f32 %v7178_v35, %v2631_v16 }
 0xdfb   : > { %v7182_v15 = vpop.eup %7181  ;;  %v2683_v9 = vmul.f32 %v7180_v13, %v2671_v41 }
 0xdfc   : > { %v2716_v48 = vadd.f32 %v2712_v62, %v8615_v0  ;;  %v2630_v6 = vmul.f32 %v7182_v15, %v2618_v54 }
 0xdfd   : > { %v7184_v2 = vpop.eup %7183 }
 0xdfe   : > { %v7186_v29 = vpop.eup %7185  ;;  %v2711_v12 = vmul.f32 %v7184_v2, %v2682_v1  ;;  %v8699_v19 = vmul.f32 0.70710677, %v2716_v48 }
 0xdff   : > { %v2713_v21 = vmul.f32 %v7186_v29, %v2683_v9 }
 0xe00   : > { %v2715_v32 = vadd.f32 %v2711_v12, %v8619_v17  ;;  %v6655_v17 = vld [vmem:[%s10211_s2 + $0xa8] sm:$0xff] }
 0xe01   : > { %v7188_v23 = vpop.eup %7187  ;;  %v2717_v3 = vadd.f32 %v2713_v21, %v8613_v18  ;;  %v6654_v18 = vld [vmem:[%s10211_s2 + $0xa0] sm:$0xff] }
 0xe02   : > { %v2710_v57 = vmul.f32 %v7188_v23, %v2630_v6  ;;  %v8703_v24 = vmul.f32 0.70710677, %v2715_v32 }
 0xe03   : > { %v8697_v38 = vmul.f32 0.70710677, %v2717_v3 }
 0xe04   : > { %v2714_v28 = vadd.f32 %v2710_v57, %v8622_v49  ;;  %10229 = vst [vmem:[#allocation5_spill] sm:$0xff] %v8703_v24  ;;  %v6656_v49 = vld [vmem:[%s10211_s2 + $0xb0] sm:$0xff] }
 0xe05   : > { %2767 = vmatprep.subr.mxu0 %v8697_v38 }
 0xe06   : > { %2768 = vmatpush1.msra.mxu0 %v8699_v19  ;;  %v8706_v0 = vmul.f32 0.70710677, %v2714_v28 }
 0xe07   : > { %2769 = vmatprep.subr.mxu0 %v8703_v24 }
 0xe08   : > { %10230 = vst [vmem:[#allocation6_spill] sm:$0xff] %v8706_v0  ;;  %2770 = vmatpush1.msra.mxu0 %v8706_v0 }
 0xe09   : > { %6658 = vmatmul.mubr.msk.f32.vlgmr.msra.gmra.mxu0 %vm371_vm0, %v6654_v18 }
 0xe0a   : > { %2809 = vmatprep.mubr.f32.mxu0 %v7572_v14 }
 0xe0d   : > { %6659 = vmatmul.mubr.msk.f32.gmra.mxu0 %vm371_vm0, %v6655_v17 }
 0xe0e   : > { %2815 = vmatprep.mubr.f32.mxu0 %v7572_v14 }
 0xe11   : > { %6660 = vmatmul.mubr.msk.f32.gmra.mxu0 %vm371_vm0, %v6656_v49 }
 0xe12   : > { %2821 = vmatprep.mubr.f32.mxu0 %v7572_v14 }
 0xe15   : > { %6661 = vmatmul.mubr.msk.f32.gmra.mxu0 %vm371_vm0, %v6657_v11 }
 0xe16   : > { %3816 = vmatprep.mubr.f32.mxu0 %v7572_v14 }
 0xec9   : > { %v8730_v4 = vpop.f32.mrf.mxu0 }
 0xeca   : > { %10231 = vst [vmem:[#allocation7_spill] sm:$0xff] %v8730_v4 }
 0xecb   : > { %v8732_v10 = vpop.f32.mrf.mxu0 }
 0xecc   : > { %10232 = vst [vmem:[#allocation8_spill] sm:$0xff] %v8732_v10 }
 0xecd   : > { %v8734_v34 = vpop.f32.mrf.mxu0 }
 0xece   : > { %v2841_v58 = vmul.f32 %v8734_v34, %v8734_v34 }
 0xecf   : > { %v8736_v47 = vpop.f32.mrf.mxu0 }
 0xed0   : > { %v2893_v7 = vmul.f32 %v8736_v47, %v8736_v47 }
 0xed1   : > { %v8738_v61 = vpop.f32.mrf.mxu0 }
 0xed3   : > { %v8740_v30 = vpop.f32.mrf.mxu0 }
 0xed4   : > { %10233 = vst [vmem:[#allocation9_spill] sm:$0xff] %v8740_v30 }
 0xed5   : > { %v2823_v44 = vpop.f32.mrf.mxu0 }
 0xed6   : > { %2834 = vadd.xlane.f32.xlu0 %v2823_v44  ;;  %v2843_v60 = vmul.f32 %v2823_v44, %v2823_v44 }
 0xed7   : > { %v2825_v63 = vpop.f32.mrf.mxu0 }
 0xed8   : > { %2886 = vadd.xlane.f32.xlu1 %v2825_v63  ;;  %v2895_v5 = vmul.f32 %v2825_v63, %v2825_v63 }
 0xeda   : > { %2850 = vadd.xlane.f32.xlu0 %v2843_v60 }
 0xedc   : > { %2902 = vadd.xlane.f32.xlu1 %v2895_v5 }
 0xede   : > { %2830 = vadd.xlane.f32.xlu0 %v8734_v34 }
 0xee0   : > { %2882 = vadd.xlane.f32.xlu1 %v8736_v47 }
 0xee2   : > { %2846 = vadd.xlane.f32.xlu0 %v2841_v58 }
 0xee4   : > { %2898 = vadd.xlane.f32.xlu1 %v2893_v7 }
 0xf5f   : > { %v2835_v55 = vpop.xlane.xlu0 %2834 }
 0xf60   : > { %v2839_v56 = vmul.f32 0.0078125, %v2835_v55 }
 0xf61   : > { %v2887_v35 = vpop.xlane.xlu1 %2886 }
 0xf62   : > { %v2891_v13 = vmul.f32 0.0078125, %v2887_v35  ;;  %v2859_v16 = vmul.f32 %v2839_v56, %v2839_v56  ;;  %v2867_v48 = vsub.f32 %v2823_v44, %v2839_v56 }
 0xf63   : > { %v2851_v37 = vpop.xlane.xlu0 %2850 }
 0xf64   : > { %v2855_v41 = vmul.f32 0.0078125, %v2851_v37  ;;  %v2911_v62 = vmul.f32 %v2891_v13, %v2891_v13  ;;  %v2919_v23 = vsub.f32 %v2825_v63, %v2891_v13 }
 0xf65   : > { %v2903_v15 = vpop.xlane.xlu1 %2902 }
 0xf66   : > { %v2863_v1 = vsub.f32 %v2855_v41, %v2859_v16  ;;  %v2907_v2 = vmul.f32 0.0078125, %v2903_v15 }
 0xf67   : > { %v2831_v12 = vpop.xlane.xlu0 %2830 }
 0xf68   : > { %v2871_v9 = vadd.f32 1e-05, %v2863_v1  ;;  %v2915_v29 = vsub.f32 %v2907_v2, %v2911_v62  ;;  %v2837_v17 = vmul.f32 0.0078125, %v2831_v12 }
 0xf69   : > { %v2883_v21 = vpop.xlane.xlu1 %2882 }
 0xf6a   : > { %7189 = vrsqrt.f32 %v2871_v9  ;;  %v2923_v54 = vadd.f32 1e-05, %v2915_v29  ;;  %v2889_v60 = vmul.f32 0.0078125, %v2883_v21  ;;  %v2857_v58 = vmul.f32 %v2837_v17, %v2837_v17 }
 0xf6b   : > { %v2847_v57 = vpop.xlane.xlu0 %2846  ;;  %v2865_v62 = vsub.f32 %v8734_v34, %v2837_v17  ;;  %v6667_v34 = vld [vmem:[%s10212_s3 + $0x18] sm:$0xff] }
 0xf6c   : > { %7191 = vrsqrt.f32 %v2923_v54  ;;  %v2853_v5 = vmul.f32 0.0078125, %v2847_v57  ;;  %v2909_v55 = vmul.f32 %v2889_v60, %v2889_v60  ;;  %v2917_v2 = vsub.f32 %v8736_v47, %v2889_v60  ;;  %v6666_v57 = vld [vmem:[%s10212_s3 + $0x10] sm:$0xff] }
 0xf6d   : > { %v2899_v49 = vpop.xlane.xlu1 %2898 }
 0xf6e   : > { %v2905_v7 = vmul.f32 0.0078125, %v2899_v49  ;;  %v2861_v35 = vsub.f32 %v2853_v5, %v2857_v58 }
 0xf70   : > { %v2913_v37 = vsub.f32 %v2905_v7, %v2909_v55  ;;  %v2869_v44 = vadd.f32 1e-05, %v2861_v35 }
 0xf72   : > { %v2921_v56 = vadd.f32 1e-05, %v2913_v37 }
 0xf77   : > { %v7190_v6 = vpop.eup %7189 }
 0xf78   : > { %v2879_v3 = vmul.f32 %v7190_v6, %v2867_v48 }
 0xf79   : > { %v7192_v32 = vpop.eup %7191 }
 0xf7a   : > { %v6664_v28 = vmul.f32 -1.442695, %v2879_v3  ;;  %v2931_v18 = vmul.f32 %v7192_v32, %v2919_v23 }
 0xf7c   : > { %7193 = vpow2.f32 %v6664_v28  ;;  %v6665_v11 = vmul.f32 -1.442695, %v2931_v18 }
 0xf7e   : > { %7195 = vpow2.f32 %v6665_v11 }
 0xf7f   : > { %7197 = vrsqrt.f32 %v2869_v44 }
 0xf80   : > { %7199 = vrsqrt.f32 %v2921_v56 }
 0xf89   : > { %v7194_v63 = vpop.eup %7193 }
 0xf8a   : > { %v2946_v13 = vadd.f32 1.0, %v7194_v63 }
 0xf8b   : > { %v7196_v16 = vpop.eup %7195 }
 0xf8c   : > { %7201 = vrcp.f32 %v2946_v13  ;;  %v2947_v41 = vadd.f32 1.0, %v7196_v16  ;;  %v7198_v15 = vpop.eup %7197 }
 0xf8d   : > { %v7200_v1 = vpop.eup %7199  ;;  %v2877_v9 = vmul.f32 %v7198_v15, %v2865_v62 }
 0xf8e   : > { %7203 = vrcp.f32 %v2947_v41  ;;  %v2929_v54 = vmul.f32 %v7200_v1, %v2917_v2 }
 0xf99   : > { %v7202_v29 = vpop.eup %7201 }
 0xf9a   : > { %v2958_v12 = vmul.f32 %v7202_v29, %v2877_v9 }
 0xf9b   : > { %v7204_v21 = vpop.eup %7203 }
 0xf9c   : > { %v2959_v48 = vmul.f32 %v7204_v21, %v2929_v54  ;;  %v2962_v6 = vadd.f32 %v2958_v12, %v8699_v19 }
 0xf9e   : > { %v2963_v23 = vadd.f32 %v2959_v48, %v8697_v38  ;;  %v2966_v32 = vmul.f32 0.70710677, %v2962_v6 }
 0xfa0   : > { %v2967_v3 = vmul.f32 0.70710677, %v2963_v23 }
 0xfa2   : > { %3011 = vmatprep.subr.mxu1 %v2967_v3 }
 0xfa3   : > { %3012 = vmatpush1.msra.mxu1 %v2966_v32 }
 0xfa4   : > { %6668 = vmatmul.mubr.msk.f32.vlgmr.msra.gmra.mxu1 %vm1272_vm1, %v6666_v57 }
 0xfa5   : > { %3051 = vmatprep.mubr.f32.mxu1 %v7572_v14 }
 0xfa8   : > { %6669 = vmatmul.mubr.msk.f32.gmra.mxu1 %vm1272_vm1, %v6667_v34 }
 0xfa9   : > { %4053 = vmatprep.mubr.f32.mxu1 %v7572_v14 }
0x1064   : > { %v3047_v38 = vpop.f32.mrf.mxu1 }
0x1065   : > { %3058 = vadd.xlane.f32.xlu0 %v3047_v38  ;;  %v3064_v47 = vmul.f32 %v3047_v38, %v3047_v38 }
0x1066   : > { %v3049_v19 = vpop.f32.mrf.mxu1 }
0x1067   : > { %3084 = vadd.xlane.f32.xlu1 %v3049_v19  ;;  %v3090_v18 = vmul.f32 %v3049_v19, %v3049_v19 }
0x1068   : > { %v8762_v28 = vpop.f32.mrf.mxu1 }
0x1069   : > { %3066 = vadd.xlane.f32.xlu0 %v3064_v47  ;;  %v3065_v49 = vmul.f32 %v8762_v28, %v8762_v28 }
0x106a   : > { %v8765_v17 = vpop.f32.mrf.mxu1 }
0x106b   : > { %3060 = vadd.xlane.f32.xlu1 %v8762_v28  ;;  %v3091_v11 = vmul.f32 %v8765_v17, %v8765_v17 }
0x106d   : > { %3092 = vadd.xlane.f32.xlu0 %v3090_v18  ;;  %v10219_v18 = vsub.f32 1.3, %v8448_v33 }
0x106f   : > { %3086 = vadd.xlane.f32.xlu1 %v8765_v17 }
0x1071   : > { %3068 = vadd.xlane.f32.xlu0 %v3065_v49 }
0x1073   : > { %3094 = vadd.xlane.f32.xlu1 %v3091_v11 }
0x10ee   : > { %v3059_v60 = vpop.xlane.xlu0 %3058 }
0x10ef   : > { %v3062_v5 = vmul.f32 0.0078125, %v3059_v60 }
0x10f0   : > { %v3085_v58 = vpop.xlane.xlu1 %3084 }
0x10f1   : > { %v3072_v55 = vmul.f32 %v3062_v5, %v3062_v5  ;;  %v3088_v35 = vmul.f32 0.0078125, %v3085_v58  ;;  %v3076_v34 = vsub.f32 %v3047_v38, %v3062_v5 }
0x10f2   : > { %v3067_v7 = vpop.xlane.xlu0 %3066 }
0x10f3   : > { %v3070_v37 = vmul.f32 0.0078125, %v3067_v7  ;;  %v3098_v13 = vmul.f32 %v3088_v35, %v3088_v35  ;;  %v3102_v11 = vsub.f32 %v3049_v19, %v3088_v35  ;;  %v10216_v7 = vsub.f32 1.3, %v8399_v27 }
0x10f4   : > { %v3061_v44 = vpop.xlane.xlu1 %3060 }
0x10f5   : > { %v3074_v56 = vsub.f32 %v3070_v37, %v3072_v55  ;;  %v3063_v41 = vmul.f32 0.0078125, %v3061_v44  ;;  %v10218_v55 = vsub.f32 1.3, %v8433_v50  ;;  %v10217_v44 = vsub.f32 1.3, %v8446_v42 }
0x10f6   : > { %v3093_v63 = vpop.xlane.xlu0 %3092 }
0x10f7   : > { %v3078_v16 = vadd.f32 1e-05, %v3074_v56  ;;  %v3096_v15 = vmul.f32 0.0078125, %v3093_v63  ;;  %v3073_v29 = vmul.f32 %v3063_v41, %v3063_v41  ;;  %v3077_v37 = vsub.f32 %v8762_v28, %v3063_v41 }
0x10f8   : > { %v3087_v62 = vpop.xlane.xlu1 %3086 }
0x10f9   : > { %7205 = vrsqrt.f32 %v3078_v16  ;;  %v3100_v1 = vsub.f32 %v3096_v15, %v3098_v13  ;;  %v3089_v2 = vmul.f32 0.0078125, %v3087_v62 }
0x10fa   : > { %v3069_v9 = vpop.xlane.xlu0 %3068 }
0x10fb   : > { %v3104_v54 = vadd.f32 1e-05, %v3100_v1  ;;  %v3071_v12 = vmul.f32 0.0078125, %v3069_v9  ;;  %v3099_v48 = vmul.f32 %v3089_v2, %v3089_v2  ;;  %v3103_v38 = vsub.f32 %v8765_v17, %v3089_v2 }
0x10fc   : > { %v3095_v21 = vpop.xlane.xlu1 %3094 }
0x10fd   : > { %7207 = vrsqrt.f32 %v3104_v54  ;;  %v3075_v6 = vsub.f32 %v3071_v12, %v3073_v29  ;;  %v3097_v23 = vmul.f32 0.0078125, %v3095_v21 }
0x10ff   : > { %v3079_v3 = vadd.f32 1e-05, %v3075_v6  ;;  %v3101_v32 = vsub.f32 %v3097_v23, %v3099_v48 }
0x1101   : > { %7209 = vrsqrt.f32 %v3079_v3  ;;  %v3105_v57 = vadd.f32 1e-05, %v3101_v32 }
0x1103   : > { %7211 = vrsqrt.f32 %v3105_v57 }
0x1106   : > { %v7206_v47 = vpop.eup %7205 }
0x1107   : > { %v3082_v49 = vmul.f32 %v7206_v47, %v3076_v34 }
0x1109   : > { %v8775_v60 = vmul.f32 %v3082_v49, %v10219_v18 }
0x110a   : > { %v7208_v58 = vpop.eup %7207 }
0x110b   : > { %v3108_v56 = vmul.f32 %v7208_v58, %v3102_v11  ;;  %v8784_v5 = vrot.slane %v8775_v60, %v8037_v36  ;;  %v8788_v19 = vrot.slane %v8775_v60, %v8040_v22  ;;  %v8792_v35 = vrot.slane %v8775_v60, %v8043_v8 }
0x110c   : > { %v8796_v28 = vrot.slane %v8775_v60, %v8046_v40  ;;  %v8800_v63 = vrot.slane %v8775_v60, %v8049_v20  ;;  %v8804_v17 = vrot.slane %v8775_v60, %v8054_v59  ;;  %v8816_v16 = vrot.slane %v8775_v60, %v8058_v25 }
0x110d   : > { %v8808_v13 = vmul.f32 %v3108_v56, %v10218_v55  ;;  %vm3122_vm14 = vcmp.ge.f32.partialorder %v8784_v5, %v8775_v60  ;;  %vm3154_vm15 = vcmp.ge.f32.partialorder %v8788_v19, %v8775_v60 }
0x110e   : > { %v7210_v41 = vpop.eup %7209  ;;  %v8819_v15 = vsel %vm3122_vm14, 1.0, %v7572_v14  ;;  %v8822_v62 = vsel %vm3122_vm14, %v8784_v5, 0.0  ;;  %v8825_v1 = vsel %vm3154_vm15, 1.0, %v7572_v14  ;;  %v8828_v2 = vsel %vm3154_vm15, %v8788_v19, 0.0 }
0x110f   : > { %v3083_v9 = vmul.f32 %v7210_v41, %v3077_v37  ;;  %v3121_v29 = vrot.slane %v8808_v13, %v8037_v36  ;;  %v3153_v54 = vrot.slane %v8808_v13, %v8040_v22  ;;  %v3185_v12 = vrot.slane %v8808_v13, %v8043_v8 }
0x1110   : > { %v7212_v21 = vpop.eup %7211  ;;  %v3217_v48 = vrot.slane %v8808_v13, %v8046_v40  ;;  %v3249_v6 = vrot.slane %v8808_v13, %v8049_v20  ;;  %v3281_v23 = vrot.slane %v8808_v13, %v8054_v59  ;;  %v8844_v3 = vrot.slane %v8808_v13, %v8058_v25 }
0x1111   : > { %v8848_v32 = vmul.f32 %v3083_v9, %v10217_v44  ;;  %v3109_v57 = vmul.f32 %v7212_v21, %v3103_v38  ;;  %vm3123_vm2 = vcmp.ge.f32.partialorder %v3121_v29, %v8808_v13  ;;  %vm3155_vm4 = vcmp.ge.f32.partialorder %v3153_v54, %v8808_v13 }
0x1112   : > { %v6671_v34 = vsel %vm3123_vm2, 1.0, %v7572_v14  ;;  %v3139_v47 = vsel %vm3123_vm2, %v3121_v29, 0.0  ;;  %v6675_v49 = vsel %vm3155_vm4, 1.0, %v7572_v14  ;;  %v3171_v11 = vsel %vm3155_vm4, %v3153_v54, 0.0 }
0x1113   : > { %v8856_v58 = vmul.f32 %v3109_v57, %v10216_v7  ;;  %v3167_v37 = vadd.f32 %v6675_v49, %v6671_v34  ;;  %v3175_v56 = vadd.f32 %v3171_v11, %v3139_v47  ;;  %vm3187_vm5 = vcmp.ge.f32.partialorder %v3185_v12, %v8808_v13 }
0x1114   : > { %v6679_v38 = vsel %vm3187_vm5, 1.0, %v7572_v14  ;;  %v3203_v41 = vsel %vm3187_vm5, %v3185_v12, 0.0  ;;  %vm3219_vm6 = vcmp.ge.f32.partialorder %v3217_v48, %v8808_v13  ;;  %vm3251_vm7 = vcmp.ge.f32.partialorder %v3249_v6, %v8808_v13 }
0x1115   : > { %vm3125_vm8 = vcmp.ge.f32.partialorder %v3121_v29, %v8856_v58  ;;  %vm3157_vm9 = vcmp.ge.f32.partialorder %v3153_v54, %v8856_v58  ;;  %vm3189_vm10 = vcmp.ge.f32.partialorder %v3185_v12, %v8856_v58  ;;  %v3199_v9 = vadd.f32 %v6679_v38, %v3167_v37 }
0x1116   : > { %v6673_v21 = vsel %vm3125_vm8, 1.0, %v7572_v14  ;;  %v3141_v57 = vsel %vm3125_vm8, %v3121_v29, 0.0  ;;  %v6677_v34 = vsel %vm3157_vm9, 1.0, %v7572_v14  ;;  %v3173_v47 = vsel %vm3157_vm9, %v3153_v54, 0.0 }
0x1117   : > { %v3169_v49 = vadd.f32 %v6677_v34, %v6673_v21  ;;  %v3177_v11 = vadd.f32 %v3173_v47, %v3141_v57  ;;  %v6681_v31 = vsel %vm3189_vm10, 1.0, %v7572_v14  ;;  %v3205_v7 = vsel %vm3189_vm10, %v3185_v12, 0.0 }
0x1118   : > { %v3207_v44 = vadd.f32 %v3203_v41, %v3175_v56  ;;  %vm3221_vm3 = vcmp.ge.f32.partialorder %v3217_v48, %v8856_v58  ;;  %v6683_v55 = vsel %vm3219_vm6, 1.0, %v7572_v14  ;;  %v3235_v37 = vsel %vm3219_vm6, %v3217_v48, 0.0 }
0x1119   : > { %v3201_v38 = vadd.f32 %v6681_v31, %v3169_v49  ;;  %v3209_v29 = vadd.f32 %v3205_v7, %v3177_v11  ;;  %v6685_v18 = vsel %vm3221_vm3, 1.0, %v7572_v14  ;;  %v3231_v54 = vadd.f32 %v6683_v55, %v3199_v9 }
0x111a   : > { %v3237_v21 = vsel %vm3221_vm3, %v3217_v48, 0.0  ;;  %v3239_v57 = vadd.f32 %v3235_v37, %v3207_v44  ;;  %vm3253_vm11 = vcmp.ge.f32.partialorder %v3249_v6, %v8856_v58  ;;  %v6687_v12 = vsel %vm3251_vm7, 1.0, %v7572_v14 }
0x111b   : > { %v3233_v56 = vadd.f32 %v6685_v18, %v3201_v38  ;;  %v3241_v41 = vadd.f32 %v3237_v21, %v3209_v29  ;;  %v6689_v34 = vsel %vm3253_vm11, 1.0, %v7572_v14  ;;  %v3263_v47 = vadd.f32 %v6687_v12, %v3231_v54 }
0x111c   : > { %v3267_v31 = vsel %vm3251_vm7, %v3249_v6, 0.0  ;;  %v3269_v7 = vsel %vm3253_vm11, %v3249_v6, 0.0  ;;  %vm3283_vm12 = vcmp.ge.f32.partialorder %v3281_v23, %v8808_v13  ;;  %vm3285_vm13 = vcmp.ge.f32.partialorder %v3281_v23, %v8856_v58 }
0x111d   : > { %v3265_v55 = vadd.f32 %v6689_v34, %v3233_v56  ;;  %v3271_v44 = vadd.f32 %v3267_v31, %v3239_v57  ;;  %v3273_v48 = vadd.f32 %v3269_v7, %v3241_v41  ;;  %v6691_v9 = vsel %vm3283_vm12, 1.0, %v7572_v14 }
0x111e   : > { %v6693_v49 = vsel %vm3285_vm13, 1.0, %v7572_v14  ;;  %v3295_v18 = vadd.f32 %v6691_v9, %v3263_v47  ;;  %v3299_v11 = vsel %vm3283_vm12, %v3281_v23, 0.0  ;;  %v3301_v37 = vsel %vm3285_vm13, %v3281_v23, 0.0 }
0x111f   : > { %v3297_v38 = vadd.f32 %v6693_v49, %v3265_v55  ;;  %v3303_v29 = vadd.f32 %v3299_v11, %v3271_v44  ;;  %v3305_v54 = vadd.f32 %v3301_v37, %v3273_v48  ;;  %vm3315_vm14 = vcmp.ge.f32.partialorder %v8844_v3, %v8808_v13 }
0x1120   : > { %vm3317_vm15 = vcmp.ge.f32.partialorder %v8844_v3, %v8856_v58  ;;  %v6695_v6 = vsel %vm3315_vm14, 1.0, %v7572_v14  ;;  %v3331_v21 = vsel %vm3315_vm14, %v8844_v3, 0.0  ;;  %v3345_v57 = vrot.slane %v8808_v13, %v8061_v39 }
0x1121   : > { %v6697_v12 = vsel %vm3317_vm15, 1.0, %v7572_v14  ;;  %v3327_v56 = vadd.f32 %v6695_v6, %v3295_v18  ;;  %v3333_v23 = vsel %vm3317_vm15, %v8844_v3, 0.0  ;;  %v3335_v41 = vadd.f32 %v3331_v21, %v3303_v29 }
0x1122   : > { %v3329_v34 = vadd.f32 %v6697_v12, %v3297_v38  ;;  %v3337_v47 = vadd.f32 %v3333_v23, %v3305_v54  ;;  %vm3347_vm2 = vcmp.ge.f32.partialorder %v3345_v57, %v8808_v13  ;;  %vm3349_vm4 = vcmp.ge.f32.partialorder %v3345_v57, %v8856_v58 }
0x1123   : > { %v6699_v31 = vsel %vm3347_vm2, 1.0, %v7572_v14  ;;  %v6701_v7 = vsel %vm3349_vm4, 1.0, %v7572_v14  ;;  %v3363_v55 = vsel %vm3347_vm2, %v3345_v57, 0.0  ;;  %v3365_v44 = vsel %vm3349_vm4, %v3345_v57, 0.0 }
0x1124   : > { %v3359_v48 = vadd.f32 %v6699_v31, %v3327_v56  ;;  %v3361_v9 = vadd.f32 %v6701_v7, %v3329_v34  ;;  %v3367_v49 = vadd.f32 %v3363_v55, %v3335_v41  ;;  %v3369_v11 = vadd.f32 %v3365_v44, %v3337_v47 }
0x1125   : > { %v3377_v3 = vrot.slane %v8856_v58, %v8037_v36  ;;  %v3409_v18 = vrot.slane %v8856_v58, %v8040_v22  ;;  %v3441_v37 = vrot.slane %v8856_v58, %v8043_v8  ;;  %v3473_v38 = vrot.slane %v8856_v58, %v8046_v40 }
0x1126   : > { %v3505_v29 = vrot.slane %v8856_v58, %v8049_v20  ;;  %v3537_v54 = vrot.slane %v8856_v58, %v8054_v59  ;;  %v8914_v6 = vrot.slane %v8856_v58, %v8058_v25  ;;  %v8918_v21 = vrot.slane %v8856_v58, %v8061_v39 }
0x1127   : > { %vm3379_vm5 = vcmp.ge.f32.partialorder %v3377_v3, %v8808_v13  ;;  %vm3381_vm6 = vcmp.ge.f32.partialorder %v3377_v3, %v8856_v58  ;;  %vm3411_vm7 = vcmp.ge.f32.partialorder %v3409_v18, %v8808_v13  ;;  %vm3413_vm8 = vcmp.ge.f32.partialorder %v3409_v18, %v8856_v58 }
0x1128   : > { %v6703_v57 = vsel %vm3379_vm5, 1.0, %v7572_v14  ;;  %v6705_v12 = vsel %vm3381_vm6, 1.0, %v7572_v14  ;;  %v3395_v56 = vsel %vm3379_vm5, %v3377_v3, 0.0  ;;  %v3397_v23 = vsel %vm3381_vm6, %v3377_v3, 0.0 }
0x1129   : > { %v3391_v41 = vadd.f32 %v6703_v57, %v3359_v48  ;;  %v3393_v34 = vadd.f32 %v6705_v12, %v3361_v9  ;;  %v3399_v47 = vadd.f32 %v3395_v56, %v3367_v49  ;;  %v3401_v31 = vadd.f32 %v3397_v23, %v3369_v11 }
0x112a   : > { %v6707_v7 = vsel %vm3411_vm7, 1.0, %v7572_v14  ;;  %v6709_v55 = vsel %vm3413_vm8, 1.0, %v7572_v14  ;;  %v3427_v44 = vsel %vm3411_vm7, %v3409_v18, 0.0  ;;  %v3429_v24 = vsel %vm3413_vm8, %v3409_v18, 0.0 }
0x112b   : > { %v3423_v0 = vadd.f32 %v6707_v7, %v3391_v41  ;;  %v3425_v10 = vadd.f32 %v6709_v55, %v3393_v34  ;;  %v3431_v4 = vadd.f32 %v3427_v44, %v3399_v47  ;;  %v3433_v30 = vadd.f32 %v3429_v24, %v3401_v31 }
0x112c   : > { %vm3443_vm9 = vcmp.ge.f32.partialorder %v3441_v37, %v8808_v13  ;;  %vm3445_vm10 = vcmp.ge.f32.partialorder %v3441_v37, %v8856_v58  ;;  %vm3475_vm3 = vcmp.ge.f32.partialorder %v3473_v38, %v8808_v13  ;;  %vm3477_vm11 = vcmp.ge.f32.partialorder %v3473_v38, %v8856_v58 }
0x112d   : > { %v6711_v48 = vsel %vm3443_vm9, 1.0, %v7572_v14  ;;  %v6713_v9 = vsel %vm3445_vm10, 1.0, %v7572_v14  ;;  %v3459_v49 = vsel %vm3443_vm9, %v3441_v37, 0.0  ;;  %v3461_v11 = vsel %vm3445_vm10, %v3441_v37, 0.0 }
0x112e   : > { %v3455_v3 = vadd.f32 %v6711_v48, %v3423_v0  ;;  %v3457_v18 = vadd.f32 %v6713_v9, %v3425_v10  ;;  %v3463_v57 = vadd.f32 %v3459_v49, %v3431_v4  ;;  %v3465_v12 = vadd.f32 %v3461_v11, %v3433_v30 }
0x112f   : > { %v6715_v24 = vsel %vm3475_vm3, 1.0, %v7572_v14  ;;  %v6717_v56 = vsel %vm3477_vm11, 1.0, %v7572_v14  ;;  %v3491_v23 = vsel %vm3475_vm3, %v3473_v38, 0.0  ;;  %v3493_v41 = vsel %vm3477_vm11, %v3473_v38, 0.0 }
0x1130   : > { %v3487_v34 = vadd.f32 %v6715_v24, %v3455_v3  ;;  %v3489_v47 = vadd.f32 %v6717_v56, %v3457_v18  ;;  %v3495_v31 = vadd.f32 %v3491_v23, %v3463_v57  ;;  %v3497_v7 = vadd.f32 %v3493_v41, %v3465_v12 }
0x1131   : > { %vm3507_vm12 = vcmp.ge.f32.partialorder %v3505_v29, %v8808_v13  ;;  %vm3509_vm13 = vcmp.ge.f32.partialorder %v3505_v29, %v8856_v58  ;;  %vm3539_vm14 = vcmp.ge.f32.partialorder %v3537_v54, %v8808_v13  ;;  %vm3541_vm15 = vcmp.ge.f32.partialorder %v3537_v54, %v8856_v58 }
0x1132   : > { %v6719_v0 = vsel %vm3507_vm12, 1.0, %v7572_v14  ;;  %v6721_v4 = vsel %vm3509_vm13, 1.0, %v7572_v14  ;;  %v3523_v10 = vsel %vm3507_vm12, %v3505_v29, 0.0  ;;  %v3525_v30 = vsel %vm3509_vm13, %v3505_v29, 0.0 }
0x1133   : > { %vm3186_vm2 = vcmp.ge.f32.partialorder %v8792_v35, %v8775_v60  ;;  %v3519_v37 = vadd.f32 %v6719_v0, %v3487_v34  ;;  %v3521_v38 = vadd.f32 %v6721_v4, %v3489_v47  ;;  %v3527_v55 = vadd.f32 %v3523_v10, %v3495_v31 }
0x1134   : > { %v3529_v44 = vadd.f32 %v3525_v30, %v3497_v7  ;;  %v6723_v48 = vsel %vm3539_vm14, 1.0, %v7572_v14  ;;  %v6725_v9 = vsel %vm3541_vm15, 1.0, %v7572_v14  ;;  %v3555_v49 = vsel %vm3539_vm14, %v3537_v54, 0.0 }
0x1135   : > { %v3557_v11 = vsel %vm3541_vm15, %v3537_v54, 0.0  ;;  %v3551_v3 = vadd.f32 %v6723_v48, %v3519_v37  ;;  %v3553_v18 = vadd.f32 %v6725_v9, %v3521_v38  ;;  %v3559_v57 = vadd.f32 %v3555_v49, %v3527_v55 }
0x1136   : > { %v3561_v12 = vadd.f32 %v3557_v11, %v3529_v44  ;;  %vm3571_vm4 = vcmp.ge.f32.partialorder %v8914_v6, %v8808_v13  ;;  %vm3573_vm5 = vcmp.ge.f32.partialorder %v8914_v6, %v8856_v58  ;;  %vm3603_vm6 = vcmp.ge.f32.partialorder %v8918_v21, %v8808_v13 }
0x1137   : > { %vm3605_vm7 = vcmp.ge.f32.partialorder %v8918_v21, %v8856_v58  ;;  %v6727_v29 = vsel %vm3571_vm4, 1.0, %v7572_v14  ;;  %v6729_v54 = vsel %vm3573_vm5, 1.0, %v7572_v14  ;;  %v3587_v24 = vsel %vm3571_vm4, %v8914_v6, 0.0 }
0x1138   : > { %v3589_v56 = vsel %vm3573_vm5, %v8914_v6, 0.0  ;;  %v3583_v23 = vadd.f32 %v6727_v29, %v3551_v3  ;;  %v3585_v41 = vadd.f32 %v6729_v54, %v3553_v18  ;;  %v3591_v34 = vadd.f32 %v3587_v24, %v3559_v57 }
0x1139   : > { %v3593_v47 = vadd.f32 %v3589_v56, %v3561_v12  ;;  %v6731_v31 = vsel %vm3603_vm6, 1.0, %v7572_v14  ;;  %v6733_v7 = vsel %vm3605_vm7, 1.0, %v7572_v14  ;;  %v3619_v0 = vsel %vm3603_vm6, %v8918_v21, 0.0 }
0x113a   : > { %v3621_v4 = vsel %vm3605_vm7, %v8918_v21, 0.0  ;;  %v3615_v10 = vadd.f32 %v6731_v31, %v3583_v23  ;;  %v3617_v30 = vadd.f32 %v6733_v7, %v3585_v41  ;;  %v3623_v37 = vadd.f32 %v3619_v0, %v3591_v34 }
0x113b   : > { %v3625_v38 = vadd.f32 %v3621_v4, %v3593_v47  ;;  %vm3124_vm8 = vcmp.ge.f32.partialorder %v8784_v5, %v8848_v32  ;;  %vm3156_vm9 = vcmp.ge.f32.partialorder %v8788_v19, %v8848_v32  ;;  %v3166_v6 = vadd.f32 %v8825_v1, %v8819_v15 }
0x113c   : > { %v3174_v55 = vadd.f32 %v8828_v2, %v8822_v62  ;;  %v3627_v44 = vmul.f32 %v3615_v10, %v8808_v13  ;;  %v3629_v21 = vmul.f32 %v3617_v30, %v8856_v58  ;;  %v6672_v48 = vsel %vm3124_vm8, 1.0, %v7572_v14 }
0x113d   : > { %v3140_v9 = vsel %vm3124_vm8, %v8784_v5, 0.0  ;;  %v6676_v49 = vsel %vm3156_vm9, 1.0, %v7572_v14  ;;  %v3172_v11 = vsel %vm3156_vm9, %v8788_v19, 0.0  ;;  %vm3188_vm10 = vcmp.ge.f32.partialorder %v8792_v35, %v8848_v32 }
0x113e   : > { %v6678_v15 = vsel %vm3186_vm2, 1.0, %v7572_v14  ;;  %v3631_v62 = vadd.f32 1.0, %v3627_v44  ;;  %v3633_v1 = vadd.f32 1.0, %v3629_v21  ;;  %v3168_v2 = vadd.f32 %v6676_v49, %v6672_v48 }
0x113f   : > { %v3176_v3 = vadd.f32 %v3172_v11, %v3140_v9  ;;  %v6680_v18 = vsel %vm3188_vm10, 1.0, %v7572_v14  ;;  %v3198_v57 = vadd.f32 %v6678_v15, %v3166_v6  ;;  %v3202_v5 = vsel %vm3186_vm2, %v8792_v35, 0.0 }
0x1140   : > { %v3204_v19 = vsel %vm3188_vm10, %v8792_v35, 0.0  ;;  %vm3635_vm3 = vcmp.gt.f32.partialorder %v3631_v62, %v3623_v37  ;;  %vm3637_vm11 = vcmp.gt.f32.partialorder %v3633_v1, %v3625_v38  ;;  %v3200_v12 = vadd.f32 %v6680_v18, %v3168_v2 }
0x1141   : > { %v3206_v29 = vadd.f32 %v3202_v5, %v3174_v55  ;;  %v6735_v54 = vsel %vm3635_vm3, 1.0, %v7572_v14  ;;  %v6737_v24 = vsel %vm3637_vm11, 1.0, %v7572_v14  ;;  %v3208_v56 = vadd.f32 %v3204_v19, %v3176_v3 }
0x1142   : > { %vm3218_vm12 = vcmp.ge.f32.partialorder %v8796_v28, %v8775_v60  ;;  %v3653_v23 = vadd.f32 %v6737_v24, %v6735_v54  ;;  %v3661_v41 = vmul.f32 %v6735_v54, %v8808_v13  ;;  %v3663_v34 = vmul.f32 %v6737_v24, %v8856_v58 }
0x1143   : > { %vm3220_vm13 = vcmp.ge.f32.partialorder %v8796_v28, %v8848_v32  ;;  %v6682_v35 = vsel %vm3218_vm12, 1.0, %v7572_v14  ;;  %v3234_v31 = vsel %vm3218_vm12, %v8796_v28, 0.0  ;;  %vm3250_vm14 = vcmp.ge.f32.partialorder %v8800_v63, %v8775_v60 }
0x1144   : > { %v6684_v47 = vsel %vm3220_vm13, 1.0, %v7572_v14  ;;  %v3236_v7 = vsel %vm3220_vm13, %v8796_v28, 0.0  ;;  %v3654_v0 = vrot.slane %v3653_v23, 4  ;;  %v3671_v4 = vadd.f32 %v3663_v34, %v3661_v41 }
0x1145   : > { %v3230_v10 = vadd.f32 %v6682_v35, %v3198_v57  ;;  %v3232_v30 = vadd.f32 %v6684_v47, %v3200_v12  ;;  %v3238_v37 = vadd.f32 %v3234_v31, %v3206_v29  ;;  %v3240_v38 = vadd.f32 %v3236_v7, %v3208_v56 }
0x1146   : > { %vm3252_vm15 = vcmp.ge.f32.partialorder %v8800_v63, %v8848_v32  ;;  %v3655_v6 = vadd.f32 %v3654_v0, %v3653_v23  ;;  %v3672_v55 = vrot.slane %v3671_v4, 4  ;;  %v6686_v44 = vsel %vm3250_vm14, 1.0, %v7572_v14 }
0x1147   : > { %v6688_v21 = vsel %vm3252_vm15, 1.0, %v7572_v14  ;;  %v3262_v48 = vadd.f32 %v6686_v44, %v3230_v10  ;;  %v3266_v9 = vsel %vm3250_vm14, %v8800_v63, 0.0  ;;  %v3268_v49 = vsel %vm3252_vm15, %v8800_v63, 0.0 }
0x1148   : > { %v3264_v28 = vadd.f32 %v6688_v21, %v3232_v30  ;;  %v3656_v11 = vrot.slane %v3655_v6, 2  ;;  %v3673_v15 = vadd.f32 %v3672_v55, %v3671_v4  ;;  %v3270_v62 = vadd.f32 %v3266_v9, %v3238_v37 }
0x1149   : > { %v3272_v1 = vadd.f32 %v3268_v49, %v3240_v38  ;;  %vm3282_vm2 = vcmp.ge.f32.partialorder %v8804_v17, %v8775_v60  ;;  %vm3284_vm4 = vcmp.ge.f32.partialorder %v8804_v17, %v8848_v32  ;;  %vm3314_vm5 = vcmp.ge.f32.partialorder %v8816_v16, %v8775_v60 }
0x114a   : > { %vm3316_vm6 = vcmp.ge.f32.partialorder %v8816_v16, %v8848_v32  ;;  %v3657_v2 = vadd.f32 %v3656_v11, %v3655_v6  ;;  %v3674_v3 = vrot.slane %v3673_v15, 2  ;;  %v6690_v63 = vsel %vm3282_vm2, 1.0, %v7572_v14 }
0x114b   : > { %v6692_v18 = vsel %vm3284_vm4, 1.0, %v7572_v14  ;;  %v3294_v57 = vadd.f32 %v6690_v63, %v3262_v48  ;;  %v3298_v19 = vsel %vm3282_vm2, %v8804_v17, 0.0  ;;  %v3300_v12 = vsel %vm3284_vm4, %v8804_v17, 0.0 }
0x114c   : > { %v3296_v5 = vadd.f32 %v6692_v18, %v3264_v28  ;;  %v3658_v29 = vrot.slane %v3657_v2, 1  ;;  %v3675_v54 = vadd.f32 %v3674_v3, %v3673_v15  ;;  %v3302_v24 = vadd.f32 %v3298_v19, %v3270_v62 }
0x114d   : > { %v3304_v56 = vadd.f32 %v3300_v12, %v3272_v1  ;;  %v6694_v23 = vsel %vm3314_vm5, 1.0, %v7572_v14  ;;  %v6696_v41 = vsel %vm3316_vm6, 1.0, %v7572_v14  ;;  %v3330_v34 = vsel %vm3314_vm5, %v8816_v16, 0.0 }
0x114e   : > { %v3659_v17 = vadd.f32 %v3658_v29, %v3657_v2  ;;  %v3676_v35 = vrot.slane %v3675_v54, 1  ;;  %v3326_v47 = vadd.f32 %v6694_v23, %v3294_v57  ;;  %v3332_v31 = vsel %vm3316_vm6, %v8816_v16, 0.0 }
0x114f   : > { %v3328_v7 = vadd.f32 %v6696_v41, %v3296_v5  ;;  %v3334_v0 = vadd.f32 %v3330_v34, %v3302_v24  ;;  %v3341_v4 = vrot.slane %v8775_v60, %v8061_v39  ;;  %v3373_v10 = vrot.slane %v8848_v32, %v8037_v36 }
0x1150   : > { %v3677_v30 = vadd.f32 %v3676_v35, %v3675_v54  ;;  %7213 = vrcp.f32 %v3659_v17  ;;  %v3336_v37 = vadd.f32 %v3332_v31, %v3304_v56  ;;  %v3405_v38 = vrot.slane %v8848_v32, %v8040_v22 }
0x1151   : > { %vm3346_vm7 = vcmp.ge.f32.partialorder %v3341_v4, %v8775_v60  ;;  %vm3348_vm8 = vcmp.ge.f32.partialorder %v3341_v4, %v8848_v32  ;;  %vm3378_vm9 = vcmp.ge.f32.partialorder %v3373_v10, %v8775_v60  ;;  %vm3380_vm10 = vcmp.ge.f32.partialorder %v3373_v10, %v8848_v32 }
0x1152   : > { %v6698_v16 = vsel %vm3346_vm7, 1.0, %v7572_v14  ;;  %v6700_v6 = vsel %vm3348_vm8, 1.0, %v7572_v14  ;;  %v3362_v55 = vsel %vm3346_vm7, %v3341_v4, 0.0  ;;  %v3437_v44 = vrot.slane %v8848_v32, %v8043_v8 }
0x1153   : > { %v3358_v21 = vadd.f32 %v6698_v16, %v3326_v47  ;;  %v3360_v48 = vadd.f32 %v6700_v6, %v3328_v7  ;;  %v3364_v28 = vsel %vm3348_vm8, %v3341_v4, 0.0  ;;  %v3366_v9 = vadd.f32 %v3362_v55, %v3334_v0 }
0x1154   : > { %v3368_v49 = vadd.f32 %v3364_v28, %v3336_v37  ;;  %v6702_v11 = vsel %vm3378_vm9, 1.0, %v7572_v14  ;;  %v6704_v15 = vsel %vm3380_vm10, 1.0, %v7572_v14  ;;  %v3394_v62 = vsel %vm3378_vm9, %v3373_v10, 0.0 }
0x1155   : > { %v3390_v1 = vadd.f32 %v6702_v11, %v3358_v21  ;;  %v3392_v2 = vadd.f32 %v6704_v15, %v3360_v48  ;;  %v3396_v3 = vsel %vm3380_vm10, %v3373_v10, 0.0  ;;  %v3398_v63 = vadd.f32 %v3394_v62, %v3366_v9 }
0x1156   : > { %v3400_v18 = vadd.f32 %v3396_v3, %v3368_v49  ;;  %vm3410_vm3 = vcmp.ge.f32.partialorder %v3405_v38, %v8775_v60  ;;  %vm3412_vm11 = vcmp.ge.f32.partialorder %v3405_v38, %v8848_v32  ;;  %vm3442_vm12 = vcmp.ge.f32.partialorder %v3437_v44, %v8775_v60 }
0x1157   : > { %v6706_v57 = vsel %vm3410_vm3, 1.0, %v7572_v14  ;;  %v6708_v5 = vsel %vm3412_vm11, 1.0, %v7572_v14  ;;  %v3426_v19 = vsel %vm3410_vm3, %v3405_v38, 0.0  ;;  %v3428_v12 = vsel %vm3412_vm11, %v3405_v38, 0.0 }
0x1158   : > { %v3422_v29 = vadd.f32 %v6706_v57, %v3390_v1  ;;  %v3424_v54 = vadd.f32 %v6708_v5, %v3392_v2  ;;  %v3430_v24 = vadd.f32 %v3426_v19, %v3398_v63  ;;  %v3432_v56 = vadd.f32 %v3428_v12, %v3400_v18 }
0x1159   : > { %vm3444_vm13 = vcmp.ge.f32.partialorder %v3437_v44, %v8848_v32  ;;  %v6710_v23 = vsel %vm3442_vm12, 1.0, %v7572_v14  ;;  %v3458_v41 = vsel %vm3442_vm12, %v3437_v44, 0.0  ;;  %v3469_v34 = vrot.slane %v8848_v32, %v8046_v40 }
0x115a   : > { %v6712_v17 = vsel %vm3444_vm13, 1.0, %v7572_v14  ;;  %v3454_v35 = vadd.f32 %v6710_v23, %v3422_v29  ;;  %v3460_v47 = vsel %vm3444_vm13, %v3437_v44, 0.0  ;;  %v3462_v31 = vadd.f32 %v3458_v41, %v3430_v24 }
0x115b   : > { %v3456_v7 = vadd.f32 %v6712_v17, %v3424_v54  ;;  %v3464_v0 = vadd.f32 %v3460_v47, %v3432_v56  ;;  %vm3474_vm14 = vcmp.ge.f32.partialorder %v3469_v34, %v8775_v60  ;;  %vm3476_vm15 = vcmp.ge.f32.partialorder %v3469_v34, %v8848_v32 }
0x115c   : > { %v6739_v4 = vadd.f32 -1.0, %v3677_v30  ;;  %v6714_v10 = vsel %vm3474_vm14, 1.0, %v7572_v14  ;;  %v6716_v38 = vsel %vm3476_vm15, 1.0, %v7572_v14  ;;  %v3490_v6 = vsel %vm3474_vm14, %v3469_v34, 0.0 }
0x115d   : > { %v7214_v37 = vpop.eup %7213  ;;  %v3486_v16 = vadd.f32 %v6714_v10, %v3454_v35  ;;  %v3492_v55 = vsel %vm3476_vm15, %v3469_v34, 0.0  ;;  %v3488_v48 = vadd.f32 %v6716_v38, %v3456_v7  ;;  %v3501_v44 = vrot.slane %v8848_v32, %v8049_v20 }
0x115e   : > { %v3683_v21 = vmul.f32 %v7214_v37, %v6739_v4  ;;  %v3533_v28 = vrot.slane %v8848_v32, %v8054_v59  ;;  %v3494_v9 = vadd.f32 %v3490_v6, %v3462_v31  ;;  %v3496_v49 = vadd.f32 %v3492_v55, %v3464_v0 }
0x115f   : > { %vm3506_vm2 = vcmp.ge.f32.partialorder %v3501_v44, %v8775_v60  ;;  %vm3508_vm4 = vcmp.ge.f32.partialorder %v3501_v44, %v8848_v32  ;;  %v3565_v11 = vrot.slane %v8848_v32, %v8058_v25  ;;  %v3597_v56 = vrot.slane %v8848_v32, %v8061_v39 }
0x1160   : > { %v3687_v30 = vsub.f32 %v8856_v58, %v3683_v21  ;;  %v6718_v15 = vsel %vm3506_vm2, 1.0, %v7572_v14  ;;  %v6720_v62 = vsel %vm3508_vm4, 1.0, %v7572_v14  ;;  %v3522_v1 = vsel %vm3506_vm2, %v3501_v44, 0.0 }
0x1161   : > { %vm3538_vm5 = vcmp.ge.f32.partialorder %v3533_v28, %v8775_v60  ;;  %v3518_v3 = vadd.f32 %v6718_v15, %v3486_v16  ;;  %v3520_v63 = vadd.f32 %v6720_v62, %v3488_v48  ;;  %v3524_v18 = vsel %vm3508_vm4, %v3501_v44, 0.0 }
0x1162   : > { %v9078_v2 = vmax.f32 %v3687_v30, 0.0  ;;  %v3526_v58 = vadd.f32 %v3522_v1, %v3494_v9  ;;  %v3528_v57 = vadd.f32 %v3524_v18, %v3496_v49  ;;  %vm3540_vm6 = vcmp.ge.f32.partialorder %v3533_v28, %v8848_v32 }
0x1163   : > { %v6722_v19 = vsel %vm3538_vm5, 1.0, %v7572_v14  ;;  %v6724_v12 = vsel %vm3540_vm6, 1.0, %v7572_v14  ;;  %v3554_v23 = vsel %vm3538_vm5, %v3533_v28, 0.0  ;;  %v3556_v41 = vsel %vm3540_vm6, %v3533_v28, 0.0 }
0x1164   : > { %v3735_v5 = vmul.f32 %v9078_v2, %v7708_v45  ;;  %v3703_v29 = vadd.f32 1e-15, %v9078_v2  ;;  %v3550_v54 = vadd.f32 %v6722_v19, %v3518_v3  ;;  %v3552_v24 = vadd.f32 %v6724_v12, %v3520_v63 }
0x1165   : > { %vm3570_vm7 = vcmp.ge.f32.partialorder %v3565_v11, %v8775_v60  ;;  %vm3572_vm8 = vcmp.ge.f32.partialorder %v3565_v11, %v8848_v32  ;;  %v3558_v34 = vadd.f32 %v3554_v23, %v3526_v58  ;;  %v3560_v17 = vadd.f32 %v3556_v41, %v3528_v57 }
0x1166   : > { %3780 = vmatprep.subr.mxu0 %v3735_v5  ;;  %v6726_v35 = vsel %vm3570_vm7, 1.0, %v7572_v14  ;;  %v6728_v47 = vsel %vm3572_vm8, 1.0, %v7572_v14  ;;  %7215 = vlog2.f32 %v3703_v29  ;;  %vm3602_vm9 = vcmp.ge.f32.partialorder %v3597_v56, %v8775_v60 }
0x1167   : > { %v3582_v31 = vadd.f32 %v6726_v35, %v3550_v54  ;;  %v3584_v7 = vadd.f32 %v6728_v47, %v3552_v24  ;;  %vm3604_vm10 = vcmp.ge.f32.partialorder %v3597_v56, %v8848_v32  ;;  %v3685_v0 = vsub.f32 %v8808_v13, %v3683_v21 }
0x1168   : > { %v3586_v4 = vsel %vm3570_vm7, %v3565_v11, 0.0  ;;  %v3588_v10 = vsel %vm3572_vm8, %v3565_v11, 0.0  ;;  %v6730_v37 = vsel %vm3602_vm9, 1.0, %v7572_v14  ;;  %v6732_v38 = vsel %vm3604_vm10, 1.0, %v7572_v14 }
0x1169   : > { %v3590_v16 = vadd.f32 %v3586_v4, %v3558_v34  ;;  %v3592_v6 = vadd.f32 %v3588_v10, %v3560_v17  ;;  %v3614_v55 = vadd.f32 %v6730_v37, %v3582_v31  ;;  %v3616_v48 = vadd.f32 %v6732_v38, %v3584_v7 }
0x116a   : > { %v9101_v44 = vmax.f32 %v3685_v0, 0.0  ;;  %v3618_v49 = vsel %vm3602_vm9, %v3597_v56, 0.0  ;;  %v3620_v30 = vsel %vm3604_vm10, %v3597_v56, 0.0  ;;  %v2014_v56 = vrot.slane %v8442_v46, 4 }
0x116b   : > { %v3626_v28 = vmul.f32 %v3614_v55, %v8775_v60  ;;  %v3628_v9 = vmul.f32 %v3616_v48, %v8848_v32  ;;  %v3622_v21 = vadd.f32 %v3618_v49, %v3590_v16  ;;  %v3624_v11 = vadd.f32 %v3620_v30, %v3592_v6 }
0x116c   : > { %v3701_v13 = vadd.f32 1e-15, %v9101_v44  ;;  %v2015_v47 = vadd.f32 %v2014_v56, %v8442_v46  ;;  %v3739_v56 = vld [vmem:[%s10211_s2 + $0x18] sm:$0xff] }
0x116d   : > { %v3630_v15 = vadd.f32 1.0, %v3626_v28  ;;  %v3632_v62 = vadd.f32 1.0, %v3628_v9 }
0x116e   : > { %7217 = vlog2.f32 %v3701_v13  ;;  %v2016_v37 = vrot.slane %v2015_v47, 2 }
0x116f   : > { %vm3634_vm3 = vcmp.gt.f32.partialorder %v3630_v15, %v3622_v21  ;;  %vm3636_vm11 = vcmp.gt.f32.partialorder %v3632_v62, %v3624_v11 }
0x1170   : > { %v6734_v1 = vsel %vm3634_vm3, 1.0, %v7572_v14  ;;  %v6736_v3 = vsel %vm3636_vm11, 1.0, %v7572_v14  ;;  %v2017_v55 = vadd.f32 %v2016_v37, %v2015_v47 }
0x1171   : > { %v3646_v63 = vadd.f32 %v6736_v3, %v6734_v1  ;;  %v3660_v18 = vmul.f32 %v6734_v1, %v8775_v60  ;;  %v3662_v58 = vmul.f32 %v6736_v3, %v8848_v32 }
0x1172   : > { %v2018_v49 = vrot.slane %v2017_v55, 1 }
0x1173   : > { %v3647_v57 = vrot.slane %v3646_v63, 4  ;;  %v3664_v5 = vadd.f32 %v3662_v58, %v3660_v18  ;;  %v7216_v19 = vpop.eup %7215 }
0x1174   : > { %v3711_v23 = vmul.f32 0.6931472, %v7216_v19  ;;  %v2019_v11 = vadd.f32 %v2018_v49, %v2017_v55 }
0x1175   : > { %v3648_v12 = vadd.f32 %v3647_v57, %v3646_v63  ;;  %v3665_v29 = vrot.slane %v3664_v5, 4 }
0x1176   : > { %v3715_v31 = vmul.f32 %v3711_v23, %v9078_v2 }
0x1177   : > { %v3649_v54 = vrot.slane %v3648_v12, 2  ;;  %v3666_v24 = vadd.f32 %v3665_v29, %v3664_v5  ;;  %v3737_v29 = vld [vmem:[%s10211_s2 + $0x8] sm:$0xff] }
0x1179   : > { %v3650_v41 = vadd.f32 %v3649_v54, %v3648_v12  ;;  %v3667_v35 = vrot.slane %v3666_v24, 2  ;;  %v3733_v12 = vmul.f32 %v9101_v44, %v7714_v52  ;;  %v3738_v54 = vld [vmem:[%s10211_s2 + $0x10] sm:$0xff] }
0x117b   : > { %v7218_v34 = vpop.eup %7217  ;;  %v3651_v17 = vrot.slane %v3650_v41, 1  ;;  %v3668_v10 = vadd.f32 %v3667_v35, %v3666_v24  ;;  %v2007_v24 = vrot.slane %v8480_v43, 4 }
0x117c   : > { %v3707_v7 = vmul.f32 0.6931472, %v7218_v34 }
0x117d   : > { %v3652_v0 = vadd.f32 %v3651_v17, %v3650_v41  ;;  %v3669_v6 = vrot.slane %v3668_v10, 1  ;;  %v2008_v17 = vadd.f32 %v2007_v24, %v8480_v43 }
0x117e   : > { %v3713_v4 = vmul.f32 %v3707_v7, %v9101_v44 }
0x117f   : > { %7219 = vrcp.f32 %v3652_v0  ;;  %v3670_v9 = vadd.f32 %v3669_v6, %v3668_v10  ;;  %v2009_v7 = vrot.slane %v2008_v17, 2 }
0x1180   : > { %v3723_v38 = vadd.f32 %v3715_v31, %v3713_v4 }
0x1181   : > { %v6738_v46 = vadd.f32 -1.0, %v3670_v9  ;;  %v2010_v10 = vadd.f32 %v2009_v7, %v2008_v17 }
0x1182   : > { %v3724_v16 = vrot.slane %v3723_v38, 4 }
0x1184   : > { %v3725_v48 = vadd.f32 %v3724_v16, %v3723_v38  ;;  %v2011_v16 = vrot.slane %v2010_v10, 1 }
0x1186   : > { %v3726_v28 = vrot.slane %v3725_v48, 2 }
0x1188   : > { %v3727_v30 = vadd.f32 %v3726_v28, %v3725_v48  ;;  %v2012_v48 = vadd.f32 %v2011_v16, %v2010_v10 }
0x118a   : > { %v3728_v13 = vrot.slane %v3727_v30, 1 }
0x118c   : > { %v7220_v21 = vpop.eup %7219  ;;  %v3729_v15 = vadd.f32 %v3728_v13, %v3727_v30 }
0x118d   : > { %v3681_v62 = vmul.f32 %v7220_v21, %v6738_v46 }
0x118e   : > { %v9114_v1 = vadd.f32 %v3729_v15, %v2019_v11 }
0x118f   : > { %v3686_v3 = vsub.f32 %v8848_v32, %v3681_v62  ;;  %v3684_v63 = vsub.f32 %v8775_v60, %v3681_v62  ;;  %v3736_v60 = vld [vmem:[%s10211_s2] sm:$0xff] }
0x1191   : > { %v9118_v18 = vmax.f32 %v3686_v3, 0.0  ;;  %v9120_v58 = vmax.f32 %v3684_v63, 0.0 }
0x1193   : > { %v3702_v57 = vadd.f32 1e-15, %v9118_v18  ;;  %v3734_v5 = vmul.f32 %v9118_v18, %v7712_v51  ;;  %v3700_v19 = vadd.f32 1e-15, %v9120_v58  ;;  %v3732_v32 = vmul.f32 %v9120_v58, %v7716_v53 }
0x1195   : > { %7221 = vlog2.f32 %v3702_v57  ;;  %3781 = vmatpush1.msra.mxu0 %v3734_v5 }
0x1196   : > { %3782 = vmatprep.subr.mxu0 %v3733_v12  ;;  %7223 = vlog2.f32 %v3700_v19 }
0x1197   : > { %3783 = vmatpush1.msra.mxu0 %v3732_v32 }
0x1198   : > { %6740 = vmatmul.mubr.msk.f32.vlgmr.msra.gmra.mxu0 %vm371_vm0, %v3736_v60 }
0x1199   : > { %3822 = vmatprep.mubr.f32.mxu0 %v7572_v14 }
0x119c   : > { %6741 = vmatmul.mubr.msk.f32.gmra.mxu0 %vm371_vm0, %v3737_v29 }
0x119d   : > { %3828 = vmatprep.mubr.f32.mxu0 %v7572_v14 }
0x11a0   : > { %6742 = vmatmul.mubr.msk.f32.gmra.mxu0 %vm371_vm0, %v3738_v54 }
0x11a1   : > { %3834 = vmatprep.mubr.f32.mxu0 %v7572_v14 }
0x11a2   : > { %v7222_v23 = vpop.eup %7221 }
0x11a3   : > { %v7224_v41 = vpop.eup %7223  ;;  %v3709_v34 = vmul.f32 0.6931472, %v7222_v23 }
0x11a4   : > { %v3705_v35 = vmul.f32 0.6931472, %v7224_v41  ;;  %6743 = vmatmul.mubr.msk.f32.gmra.mxu0 %vm371_vm0, %v3739_v56 }
0x11a5   : > { %v3714_v47 = vmul.f32 %v3709_v34, %v9118_v18  ;;  %4299 = vmatprep.mubr.f32.mxu0 %v7572_v14 }
0x11a6   : > { %v3712_v31 = vmul.f32 %v3705_v35, %v9120_v58 }
0x11a8   : > { %v3716_v0 = vadd.f32 %v3714_v47, %v3712_v31 }
0x11aa   : > { %v3717_v4 = vrot.slane %v3716_v0, 4 }
0x11ac   : > { %v3718_v37 = vadd.f32 %v3717_v4, %v3716_v0 }
0x11ae   : > { %v3719_v38 = vrot.slane %v3718_v37, 2 }
0x11b0   : > { %v3720_v6 = vadd.f32 %v3719_v38, %v3718_v37 }
0x11b2   : > { %v3721_v55 = vrot.slane %v3720_v6, 1 }
0x11b4   : > { %v3722_v43 = vadd.f32 %v3721_v55, %v3720_v6 }
0x11b6   : > { %v9154_v28 = vadd.f32 %v3722_v43, %v2012_v48 }
0x1258   : > { %v9156_v9 = vpop.f32.mrf.mxu0 }
0x1259   : > { %v3853_v32 = vmul.f32 %v9156_v9, %v9156_v9 }
0x125a   : > { %v9158_v49 = vpop.f32.mrf.mxu0 }
0x125b   : > { %v3905_v19 = vmul.f32 %v9158_v49, %v9158_v49 }
0x125c   : > { %v9160_v30 = vpop.f32.mrf.mxu0 }
0x125d   : > { %v3854_v12 = vmul.f32 %v9160_v30, %v9160_v30 }
0x125e   : > { %v9162_v13 = vpop.f32.mrf.mxu0 }
0x125f   : > { %v3906_v5 = vmul.f32 %v9162_v13, %v9162_v13 }
0x1260   : > { %v9164_v46 = vpop.f32.mrf.mxu0 }
0x1261   : > { %3845 = vadd.xlane.f32.xlu1 %v9164_v46  ;;  %v3855_v57 = vmul.f32 %v9164_v46, %v9164_v46 }
0x1262   : > { %v9167_v21 = vpop.f32.mrf.mxu0 }
0x1263   : > { %v3907_v3 = vmul.f32 %v9167_v21, %v9167_v21 }
0x1264   : > { %v9169_v11 = vpop.f32.mrf.mxu0 }
0x1265   : > { %3897 = vadd.xlane.f32.xlu1 %v9167_v21  ;;  %3847 = vadd.xlane.f32.xlu0 %v9169_v11  ;;  %v3856_v15 = vmul.f32 %v9169_v11, %v9169_v11 }
0x1266   : > { %v9175_v62 = vpop.f32.mrf.mxu0 }
0x1267   : > { %v3908_v63 = vmul.f32 %v9175_v62, %v9175_v62 }
0x1269   : > { %3863 = vadd.xlane.f32.xlu0 %v3856_v15  ;;  %3899 = vadd.xlane.f32.xlu1 %v9175_v62 }
0x126d   : > { %3913 = vadd.xlane.f32.xlu1 %v3907_v3  ;;  %3915 = vadd.xlane.f32.xlu0 %v3908_v63 }
0x1271   : > { %3895 = vadd.xlane.f32.xlu1 %v9162_v13  ;;  %3861 = vadd.xlane.f32.xlu0 %v3855_v57 }
0x1275   : > { %3893 = vadd.xlane.f32.xlu1 %v9158_v49  ;;  %3843 = vadd.xlane.f32.xlu0 %v9160_v30 }
0x1279   : > { %3841 = vadd.xlane.f32.xlu1 %v9156_v9  ;;  %3911 = vadd.xlane.f32.xlu0 %v3906_v5 }
0x127d   : > { %3909 = vadd.xlane.f32.xlu1 %v3905_v19  ;;  %3859 = vadd.xlane.f32.xlu0 %v3854_v12 }
0x1281   : > { %3857 = vadd.xlane.f32.xlu0 %v3853_v32 }
0x12ea   : > { %v3846_v60 = vpop.xlane.xlu1 %3845 }
0x12eb   : > { %v3851_v31 = vmul.f32 0.0078125, %v3846_v60 }
0x12ed   : > { %v3871_v15 = vmul.f32 %v3851_v31, %v3851_v31 }
0x12ee   : > { %v3898_v29 = vpop.xlane.xlu1 %3897  ;;  %v3848_v54 = vpop.xlane.xlu0 %3847 }
0x12ef   : > { %v3852_v24 = vmul.f32 0.0078125, %v3848_v54  ;;  %v3903_v56 = vmul.f32 0.0078125, %v3898_v29 }
0x12f1   : > { %v3872_v34 = vmul.f32 %v3852_v24, %v3852_v24  ;;  %v3923_v7 = vmul.f32 %v3903_v56, %v3903_v56  ;;  %v3880_v29 = vsub.f32 %v9169_v11, %v3852_v24 }
0x12f2   : > { %v3864_v23 = vpop.xlane.xlu0 %3863  ;;  %v3900_v41 = vpop.xlane.xlu1 %3899 }
0x12f3   : > { %v3868_v17 = vmul.f32 0.0078125, %v3864_v23  ;;  %v3904_v35 = vmul.f32 0.0078125, %v3900_v41 }
0x12f5   : > { %v3876_v47 = vsub.f32 %v3868_v17, %v3872_v34  ;;  %v3924_v37 = vmul.f32 %v3904_v35, %v3904_v35  ;;  %v3931_v17 = vsub.f32 %v9167_v21, %v3903_v56 }
0x12f6   : > { %v3914_v0 = vpop.xlane.xlu1 %3913  ;;  %v3916_v4 = vpop.xlane.xlu0 %3915 }
0x12f7   : > { %v3884_v10 = vadd.f32 1e-05, %v3876_v47  ;;  %v3919_v38 = vmul.f32 0.0078125, %v3914_v0  ;;  %v3920_v16 = vmul.f32 0.0078125, %v3916_v4  ;;  %v3932_v0 = vsub.f32 %v9175_v62, %v3904_v35 }
0x12f9   : > { %7225 = vrsqrt.f32 %v3884_v10  ;;  %v3927_v6 = vsub.f32 %v3919_v38, %v3923_v7  ;;  %v3928_v55 = vsub.f32 %v3920_v16, %v3924_v37 }
0x12fa   : > { %v3896_v48 = vpop.xlane.xlu1 %3895  ;;  %v3862_v43 = vpop.xlane.xlu0 %3861 }
0x12fb   : > { %v3935_v3 = vadd.f32 1e-05, %v3927_v6  ;;  %v3936_v63 = vadd.f32 1e-05, %v3928_v55  ;;  %v3867_v57 = vmul.f32 0.0078125, %v3862_v43  ;;  %v3902_v38 = vmul.f32 0.0078125, %v3896_v48 }
0x12fc   : > { %v3879_v6 = vsub.f32 %v9164_v46, %v3851_v31 }
0x12fd   : > { %7227 = vrsqrt.f32 %v3935_v3  ;;  %v3875_v5 = vsub.f32 %v3867_v57, %v3871_v15  ;;  %v3922_v62 = vmul.f32 %v3902_v38, %v3902_v38 }
0x12fe   : > { %7229 = vrsqrt.f32 %v3936_v63  ;;  %v3844_v19 = vpop.xlane.xlu0 %3843  ;;  %v3894_v32 = vpop.xlane.xlu1 %3893 }
0x12ff   : > { %v3883_v12 = vadd.f32 1e-05, %v3875_v5  ;;  %v3901_v11 = vmul.f32 0.0078125, %v3894_v32  ;;  %v3850_v15 = vmul.f32 0.0078125, %v3844_v19 }
0x1301   : > { %7231 = vrsqrt.f32 %v3883_v12  ;;  %v3921_v12 = vmul.f32 %v3901_v11, %v3901_v11 }
0x1302   : > { %v3912_v60 = vpop.xlane.xlu0 %3911  ;;  %v3842_v23 = vpop.xlane.xlu1 %3841 }
0x1303   : > { %v3918_v3 = vmul.f32 0.0078125, %v3912_v60  ;;  %v3849_v56 = vmul.f32 0.0078125, %v3842_v23 }
0x1305   : > { %v3869_v46 = vmul.f32 %v3849_v56, %v3849_v56 }
0x1306   : > { %v7226_v54 = vpop.eup %7225  ;;  %v3860_v34 = vpop.xlane.xlu0 %3859 }
0x1307   : > { %v3892_v41 = vmul.f32 %v7226_v54, %v3880_v29  ;;  %v3910_v16 = vpop.xlane.xlu1 %3909  ;;  %v3866_v35 = vmul.f32 0.0078125, %v3860_v34  ;;  %v3870_v29 = vmul.f32 %v3850_v15, %v3850_v15  ;;  %v3926_v54 = vsub.f32 %v3918_v3, %v3922_v62 }
0x1308   : > { %v3917_v57 = vmul.f32 0.0078125, %v3910_v16  ;;  %v3930_v3 = vsub.f32 %v9162_v13, %v3902_v38  ;;  %v3929_v62 = vsub.f32 %v9158_v49, %v3901_v11  ;;  %v6749_v49 = vld [vmem:[%s10211_s2 + $0x28] sm:$0xff]  ;;  %v6750_v38 = vld [vmem:[%s10211_s2 + $0x30] sm:$0xff]  ;;  %v6751_v11 = vld [vmem:[%s10211_s2 + $0x38] sm:$0xff] }
0x1309   : > { %v6746_v47 = vmul.f32 -1.442695, %v3892_v41  ;;  %v3874_v32 = vsub.f32 %v3866_v35, %v3870_v29  ;;  %v3934_v19 = vadd.f32 1e-05, %v3926_v54 }
0x130a   : > { %v7228_v7 = vpop.eup %7227  ;;  %v3858_v63 = vpop.xlane.xlu0 %3857  ;;  %v3925_v31 = vsub.f32 %v3917_v57, %v3921_v12  ;;  %v3877_v12 = vsub.f32 %v9156_v9, %v3849_v56  ;;  %v6748_v9 = vld [vmem:[%s10211_s2 + $0x20] sm:$0xff] }
0x130b   : > { %v7230_v4 = vpop.eup %7229  ;;  %7233 = vpow2.f32 %v6746_v47  ;;  %v3943_v10 = vmul.f32 %v7228_v7, %v3931_v17  ;;  %v3865_v48 = vmul.f32 0.0078125, %v3858_v63  ;;  %v3882_v47 = vadd.f32 1e-05, %v3874_v32 }
0x130c   : > { %v3944_v37 = vmul.f32 %v7230_v4, %v3932_v0  ;;  %v3933_v60 = vadd.f32 1e-05, %v3925_v31 }
0x130d   : > { %v6745_v55 = vmul.f32 -1.442695, %v3943_v10  ;;  %v3873_v41 = vsub.f32 %v3865_v48, %v3869_v46 }
0x130e   : > { %v7232_v24 = vpop.eup %7231  ;;  %v6747_v43 = vmul.f32 -1.442695, %v3944_v37 }
0x130f   : > { %7235 = vpow2.f32 %v6745_v55  ;;  %v3891_v21 = vmul.f32 %v7232_v24, %v3879_v6  ;;  %v3881_v7 = vadd.f32 1e-05, %v3873_v41 }
0x1310   : > { %7237 = vpow2.f32 %v6747_v43 }
0x1311   : > { %v6744_v5 = vmul.f32 -1.442695, %v3891_v21  ;;  %v3878_v21 = vsub.f32 %v9160_v30, %v3850_v15 }
0x1313   : > { %7239 = vpow2.f32 %v6744_v5 }
0x1314   : > { %7241 = vrsqrt.f32 %v3934_v19 }
0x1315   : > { %7243 = vrsqrt.f32 %v3933_v60 }
0x1316   : > { %7245 = vrsqrt.f32 %v3882_v47 }
0x1317   : > { %7247 = vrsqrt.f32 %v3881_v7 }
0x1318   : > { %v7234_v17 = vpop.eup %7233 }
0x1319   : > { %v3959_v23 = vadd.f32 1.0, %v7234_v17 }
0x131b   : > { %7249 = vrcp.f32 %v3959_v23 }
0x131c   : > { %v7236_v0 = vpop.eup %7235 }
0x131d   : > { %v7238_v34 = vpop.eup %7237  ;;  %v3958_v4 = vadd.f32 1.0, %v7236_v0 }
0x131e   : > { %v3960_v10 = vadd.f32 1.0, %v7238_v34 }
0x131f   : > { %7251 = vrcp.f32 %v3958_v4 }
0x1320   : > { %v7240_v37 = vpop.eup %7239  ;;  %7253 = vrcp.f32 %v3960_v10 }
0x1321   : > { %v3957_v16 = vadd.f32 1.0, %v7240_v37  ;;  %v7242_v6 = vpop.eup %7241 }
0x1322   : > { %v7244_v55 = vpop.eup %7243  ;;  %v3942_v35 = vmul.f32 %v7242_v6, %v3930_v3 }
0x1323   : > { %7255 = vrcp.f32 %v3957_v16  ;;  %v7246_v24 = vpop.eup %7245  ;;  %v3941_v54 = vmul.f32 %v7244_v55, %v3929_v62 }
0x1324   : > { %v7248_v43 = vpop.eup %7247  ;;  %v3890_v48 = vmul.f32 %v7246_v24, %v3878_v21 }
0x1325   : > { %v3889_v31 = vmul.f32 %v7248_v43, %v3877_v12 }
0x1328   : > { %v7250_v63 = vpop.eup %7249 }
0x1329   : > { %v9206_v46 = vmul.f32 %v7250_v63, %v3890_v48 }
0x132c   : > { %v7252_v57 = vpop.eup %7251 }
0x132d   : > { %v7254_v5 = vpop.eup %7253  ;;  %v9209_v13 = vmul.f32 %v7252_v57, %v3941_v54 }
0x132e   : > { %v9204_v29 = vmul.f32 %v7254_v5, %v3942_v35 }
0x1330   : > { %v7256_v32 = vpop.eup %7255  ;;  %4017 = vmatprep.subr.mxu1 %v9204_v29 }
0x1331   : > { %4018 = vmatpush1.msra.mxu1 %v9206_v46  ;;  %v9212_v30 = vmul.f32 %v7256_v32, %v3889_v31 }
0x1332   : > { %4019 = vmatprep.subr.mxu1 %v9209_v13 }
0x1333   : > { %4020 = vmatpush1.msra.mxu1 %v9212_v30 }
0x1334   : > { %6752 = vmatmul.mubr.msk.f32.vlgmr.msra.gmra.mxu1 %vm371_vm0, %v6748_v9 }
0x1335   : > { %4059 = vmatprep.mubr.f32.mxu1 %v7572_v14 }
0x1338   : > { %6753 = vmatmul.mubr.msk.f32.gmra.mxu1 %vm371_vm0, %v6749_v49 }
0x1339   : > { %4065 = vmatprep.mubr.f32.mxu1 %v7572_v14 }
0x133c   : > { %6754 = vmatmul.mubr.msk.f32.gmra.mxu1 %vm371_vm0, %v6750_v38 }
0x133d   : > { %4071 = vmatprep.mubr.f32.mxu1 %v7572_v14 }
0x1340   : > { %6755 = vmatmul.mubr.msk.f32.gmra.mxu1 %vm371_vm0, %v6751_v11 }
0x1341   : > { %4545 = vmatprep.mubr.f32.mxu1 %v7572_v14 }
0x13f4   : > { %v9236_v15 = vpop.f32.mrf.mxu1 }
0x13f5   : > { %v4090_v6 = vmul.f32 %v9236_v15, %v9236_v15 }
0x13f6   : > { %v9238_v56 = vpop.f32.mrf.mxu1 }
0x13f7   : > { %v4142_v37 = vmul.f32 %v9238_v56, %v9238_v56 }
0x13f8   : > { %v9240_v41 = vpop.f32.mrf.mxu1 }
0x13f9   : > { %v4091_v16 = vmul.f32 %v9240_v41, %v9240_v41 }
0x13fa   : > { %v9242_v19 = vpop.f32.mrf.mxu1 }
0x13fb   : > { %v4143_v10 = vmul.f32 %v9242_v19, %v9242_v19 }
0x13fc   : > { %v9244_v60 = vpop.f32.mrf.mxu1 }
0x13fd   : > { %4082 = vadd.xlane.f32.xlu1 %v9244_v60  ;;  %v4092_v4 = vmul.f32 %v9244_v60, %v9244_v60 }
0x13fe   : > { %v9247_v17 = vpop.f32.mrf.mxu1 }
0x13ff   : > { %v4144_v0 = vmul.f32 %v9247_v17, %v9247_v17 }
0x1400   : > { %v9249_v47 = vpop.f32.mrf.mxu1 }
0x1401   : > { %4134 = vadd.xlane.f32.xlu1 %v9247_v17  ;;  %4084 = vadd.xlane.f32.xlu0 %v9249_v47  ;;  %v4093_v7 = vmul.f32 %v9249_v47, %v9249_v47 }
0x1402   : > { %v9255_v23 = vpop.f32.mrf.mxu1 }
0x1403   : > { %v4145_v34 = vmul.f32 %v9255_v23, %v9255_v23 }
0x1405   : > { %4100 = vadd.xlane.f32.xlu0 %v4093_v7  ;;  %4136 = vadd.xlane.f32.xlu1 %v9255_v23 }
0x1409   : > { %4150 = vadd.xlane.f32.xlu1 %v4144_v0  ;;  %4152 = vadd.xlane.f32.xlu0 %v4145_v34 }
0x140d   : > { %4132 = vadd.xlane.f32.xlu1 %v9242_v19  ;;  %4098 = vadd.xlane.f32.xlu0 %v4092_v4 }
0x1411   : > { %4130 = vadd.xlane.f32.xlu1 %v9238_v56  ;;  %4080 = vadd.xlane.f32.xlu0 %v9240_v41 }
0x1415   : > { %4078 = vadd.xlane.f32.xlu1 %v9236_v15  ;;  %4148 = vadd.xlane.f32.xlu0 %v4143_v10 }
0x1419   : > { %4146 = vadd.xlane.f32.xlu1 %v4142_v37  ;;  %4096 = vadd.xlane.f32.xlu0 %v4091_v16 }
0x141d   : > { %4094 = vadd.xlane.f32.xlu0 %v4090_v6 }
0x1486   : > { %v4083_v55 = vpop.xlane.xlu1 %4082 }
0x1487   : > { %v4088_v48 = vmul.f32 0.0078125, %v4083_v55 }
0x1489   : > { %v4108_v10 = vmul.f32 %v4088_v48, %v4088_v48 }
0x148a   : > { %v4135_v24 = vpop.xlane.xlu1 %4134  ;;  %v4085_v43 = vpop.xlane.xlu0 %4084 }
0x148b   : > { %v4089_v3 = vmul.f32 0.0078125, %v4085_v43  ;;  %v4140_v63 = vmul.f32 0.0078125, %v4135_v24 }
0x148d   : > { %v4109_v62 = vmul.f32 %v4089_v3, %v4089_v3  ;;  %v4160_v54 = vmul.f32 %v4140_v63, %v4140_v63 }
0x148e   : > { %v4101_v21 = vpop.xlane.xlu0 %4100  ;;  %v4137_v57 = vpop.xlane.xlu1 %4136 }
0x148f   : > { %v4105_v35 = vmul.f32 0.0078125, %v4101_v21  ;;  %v4141_v5 = vmul.f32 0.0078125, %v4137_v57 }
0x1491   : > { %v4113_v12 = vsub.f32 %v4105_v35, %v4109_v62  ;;  %v4161_v49 = vmul.f32 %v4141_v5, %v4141_v5  ;;  %v4117_v62 = vsub.f32 %v9249_v47, %v4089_v3 }
0x1492   : > { %v4151_v31 = vpop.xlane.xlu1 %4150  ;;  %v4153_v32 = vpop.xlane.xlu0 %4152 }
0x1493   : > { %v4121_v9 = vadd.f32 1e-05, %v4113_v12  ;;  %v4156_v38 = vmul.f32 0.0078125, %v4151_v31  ;;  %v4157_v11 = vmul.f32 0.0078125, %v4153_v32  ;;  %v4168_v31 = vsub.f32 %v9247_v17, %v4140_v63 }
0x1495   : > { %7257 = vrsqrt.f32 %v4121_v9  ;;  %v4164_v7 = vsub.f32 %v4156_v38, %v4160_v54  ;;  %v4165_v0 = vsub.f32 %v4157_v11, %v4161_v49  ;;  %v4169_v38 = vsub.f32 %v9255_v23, %v4141_v5 }
0x1496   : > { %v4133_v34 = vpop.xlane.xlu1 %4132  ;;  %v4099_v4 = vpop.xlane.xlu0 %4098 }
0x1497   : > { %v4172_v37 = vadd.f32 1e-05, %v4164_v7  ;;  %v4173_v16 = vadd.f32 1e-05, %v4165_v0  ;;  %v4104_v6 = vmul.f32 0.0078125, %v4099_v4 }
0x1499   : > { %7259 = vrsqrt.f32 %v4172_v37  ;;  %v4112_v24 = vsub.f32 %v4104_v6, %v4108_v10 }
0x149a   : > { %7261 = vrsqrt.f32 %v4173_v16  ;;  %v4081_v55 = vpop.xlane.xlu0 %4080  ;;  %v4131_v21 = vpop.xlane.xlu1 %4130  ;;  %v4116_v16 = vsub.f32 %v9244_v60, %v4088_v48 }
0x149b   : > { %v4120_v43 = vadd.f32 1e-05, %v4112_v24  ;;  %v4087_v0 = vmul.f32 0.0078125, %v4081_v55  ;;  %v4138_v37 = vmul.f32 0.0078125, %v4131_v21 }
0x149d   : > { %7263 = vrsqrt.f32 %v4120_v43  ;;  %v4139_v43 = vmul.f32 0.0078125, %v4133_v34  ;;  %v4158_v23 = vmul.f32 %v4138_v37, %v4138_v37 }
0x149e   : > { %v4149_v57 = vpop.xlane.xlu0 %4148  ;;  %v4079_v35 = vpop.xlane.xlu1 %4078 }
0x149f   : > { %v4086_v5 = vmul.f32 0.0078125, %v4079_v35 }
0x14a1   : > { %v4106_v60 = vmul.f32 %v4086_v5, %v4086_v5 }
0x14a2   : > { %v7258_v12 = vpop.eup %7257  ;;  %v4097_v9 = vpop.xlane.xlu0 %4096 }
0x14a3   : > { %v4129_v54 = vmul.f32 %v7258_v12, %v4117_v62  ;;  %v4147_v4 = vpop.xlane.xlu1 %4146  ;;  %v4103_v3 = vmul.f32 0.0078125, %v4097_v9  ;;  %v4107_v62 = vmul.f32 %v4087_v0, %v4087_v0 }
0x14a4   : > { %v4154_v17 = vmul.f32 0.0078125, %v4147_v4 }
0x14a5   : > { %v6758_v32 = vmul.f32 -1.442695, %v4129_v54  ;;  %v4155_v54 = vmul.f32 0.0078125, %v4149_v57 }
0x14a6   : > { %v7260_v49 = vpop.eup %7259  ;;  %v4095_v12 = vpop.xlane.xlu0 %4094  ;;  %v4162_v21 = vsub.f32 %v4154_v17, %v4158_v23  ;;  %v4166_v23 = vsub.f32 %v9238_v56, %v4138_v37 }
0x14a7   : > { %v7262_v11 = vpop.eup %7261  ;;  %7265 = vpow2.f32 %v6758_v32  ;;  %v4180_v7 = vmul.f32 %v7260_v49, %v4168_v31  ;;  %v4111_v31 = vsub.f32 %v4103_v3, %v4107_v62  ;;  %v4159_v32 = vmul.f32 %v4139_v43, %v4139_v43 }
0x14a8   : > { %v4181_v10 = vmul.f32 %v7262_v11, %v4169_v38  ;;  %v4102_v49 = vmul.f32 0.0078125, %v4095_v12  ;;  %v4170_v38 = vadd.f32 1e-05, %v4162_v21 }
0x14a9   : > { %v6757_v47 = vmul.f32 -1.442695, %v4180_v7  ;;  %v4163_v48 = vsub.f32 %v4155_v54, %v4159_v32  ;;  %v4119_v9 = vadd.f32 1e-05, %v4111_v31 }
0x14aa   : > { %v7264_v6 = vpop.eup %7263  ;;  %v6759_v24 = vmul.f32 -1.442695, %v4181_v10  ;;  %v4110_v34 = vsub.f32 %v4102_v49, %v4106_v60 }
0x14ab   : > { %7267 = vpow2.f32 %v6757_v47  ;;  %v4128_v63 = vmul.f32 %v7264_v6, %v4116_v16  ;;  %v4171_v7 = vadd.f32 1e-05, %v4163_v48 }
0x14ac   : > { %7269 = vpow2.f32 %v6759_v24  ;;  %v4118_v10 = vadd.f32 1e-05, %v4110_v34 }
0x14ad   : > { %v6756_v55 = vmul.f32 -1.442695, %v4128_v63  ;;  %v4115_v63 = vsub.f32 %v9240_v41, %v4087_v0 }
0x14af   : > { %7271 = vpow2.f32 %v6756_v55  ;;  %v4167_v55 = vsub.f32 %v9242_v19, %v4139_v43 }
0x14b0   : > { %7273 = vrsqrt.f32 %v4119_v9  ;;  %v4114_v9 = vsub.f32 %v9236_v15, %v4086_v5  ;;  %v6763_v5 = vld [vmem:[%s10211_s2 + $0xd8] sm:$0xff] }
0x14b1   : > { %7275 = vrsqrt.f32 %v4170_v38 }
0x14b4   : > { %v7266_v11 = vpop.eup %7265 }
0x14b5   : > { %v4196_v4 = vadd.f32 1.0, %v7266_v11 }
0x14b7   : > { %7277 = vrcp.f32 %v4196_v4 }
0x14b8   : > { %v7268_v35 = vpop.eup %7267  ;;  %7279 = vrsqrt.f32 %v4171_v7 }
0x14b9   : > { %v7270_v57 = vpop.eup %7269  ;;  %v4195_v16 = vadd.f32 1.0, %v7268_v35  ;;  %7281 = vrsqrt.f32 %v4118_v10 }
0x14ba   : > { %v4197_v47 = vadd.f32 1.0, %v7270_v57 }
0x14bb   : > { %7283 = vrcp.f32 %v4195_v16 }
0x14bc   : > { %v7272_v3 = vpop.eup %7271  ;;  %7285 = vrcp.f32 %v4197_v47 }
0x14bd   : > { %v4194_v6 = vadd.f32 1.0, %v7272_v3  ;;  %v7274_v24 = vpop.eup %7273 }
0x14be   : > { %v7276_v17 = vpop.eup %7275  ;;  %v4127_v54 = vmul.f32 %v7274_v24, %v4115_v63 }
0x14bf   : > { %7287 = vrcp.f32 %v4194_v6  ;;  %v4178_v21 = vmul.f32 %v7276_v17, %v4166_v23 }
0x14c4   : > { %v7278_v62 = vpop.eup %7277 }
0x14c5   : > { %v7280_v12 = vpop.eup %7279  ;;  %v4208_v32 = vmul.f32 %v7278_v62, %v4127_v54 }
0x14c6   : > { %v7282_v31 = vpop.eup %7281  ;;  %v4179_v60 = vmul.f32 %v7280_v12, %v4167_v55 }
0x14c7   : > { %v4212_v11 = vadd.f32 %v4208_v32, %v9206_v46  ;;  %v4126_v41 = vmul.f32 %v7282_v31, %v4114_v9 }
0x14c8   : > { %v7284_v49 = vpop.eup %7283 }
0x14c9   : > { %v7286_v48 = vpop.eup %7285  ;;  %v4207_v38 = vmul.f32 %v7284_v49, %v4178_v21  ;;  %v9289_v43 = vmul.f32 0.70710677, %v4212_v11 }
0x14ca   : > { %v4209_v34 = vmul.f32 %v7286_v48, %v4179_v60 }
0x14cb   : > { %v4211_v56 = vadd.f32 %v4207_v38, %v9209_v13  ;;  %v6761_v13 = vld [vmem:[%s10211_s2 + $0xc8] sm:$0xff] }
0x14cc   : > { %v7288_v0 = vpop.eup %7287  ;;  %v4213_v7 = vadd.f32 %v4209_v34, %v9204_v29  ;;  %v6760_v29 = vld [vmem:[%s10211_s2 + $0xc0] sm:$0xff] }
0x14cd   : > { %v4206_v37 = vmul.f32 %v7288_v0, %v4126_v41  ;;  %v9293_v15 = vmul.f32 0.70710677, %v4211_v56 }
0x14ce   : > { %v9287_v19 = vmul.f32 0.70710677, %v4213_v7 }
0x14cf   : > { %v4210_v4 = vadd.f32 %v4206_v37, %v9212_v30  ;;  %v6762_v30 = vld [vmem:[%s10211_s2 + $0xd0] sm:$0xff] }
0x14d0   : > { %4263 = vmatprep.subr.mxu0 %v9287_v19 }
0x14d1   : > { %4264 = vmatpush1.msra.mxu0 %v9289_v43  ;;  %v9296_v46 = vmul.f32 0.70710677, %v4210_v4 }
0x14d2   : > { %4265 = vmatprep.subr.mxu0 %v9293_v15 }
0x14d3   : > { %4266 = vmatpush1.msra.mxu0 %v9296_v46 }
0x14d4   : > { %6764 = vmatmul.mubr.msk.f32.vlgmr.msra.gmra.mxu0 %vm371_vm0, %v6760_v29 }
0x14d5   : > { %4305 = vmatprep.mubr.f32.mxu0 %v7572_v14 }
0x14d8   : > { %6765 = vmatmul.mubr.msk.f32.gmra.mxu0 %vm371_vm0, %v6761_v13 }
0x14d9   : > { %4311 = vmatprep.mubr.f32.mxu0 %v7572_v14 }
0x14dc   : > { %6766 = vmatmul.mubr.msk.f32.gmra.mxu0 %vm371_vm0, %v6762_v30 }
0x14dd   : > { %4317 = vmatprep.mubr.f32.mxu0 %v7572_v14 }
0x14e0   : > { %6767 = vmatmul.mubr.msk.f32.gmra.mxu0 %vm371_vm0, %v6763_v5 }
0x14e1   : > { %4788 = vmatprep.mubr.f32.mxu0 %v7572_v14 }
0x1594   : > { %v9320_v10 = vpop.f32.mrf.mxu0 }
0x1595   : > { %v4336_v31 = vmul.f32 %v9320_v10, %v9320_v10 }
0x1596   : > { %v9322_v35 = vpop.f32.mrf.mxu0 }
0x1597   : > { %v4388_v54 = vmul.f32 %v9322_v35, %v9322_v35 }
0x1598   : > { %v9324_v57 = vpop.f32.mrf.mxu0 }
0x1599   : > { %v4337_v55 = vmul.f32 %v9324_v57, %v9324_v57 }
0x159a   : > { %v9326_v16 = vpop.f32.mrf.mxu0 }
0x159b   : > { %v4389_v23 = vmul.f32 %v9326_v16, %v9326_v16 }
0x159c   : > { %v9328_v47 = vpop.f32.mrf.mxu0 }
0x159d   : > { %4328 = vadd.xlane.f32.xlu1 %v9328_v47  ;;  %v4338_v12 = vmul.f32 %v9328_v47, %v9328_v47 }
0x159e   : > { %v9331_v3 = vpop.f32.mrf.mxu0 }
0x159f   : > { %v4390_v63 = vmul.f32 %v9331_v3, %v9331_v3 }
0x15a0   : > { %v9333_v6 = vpop.f32.mrf.mxu0 }
0x15a1   : > { %4380 = vadd.xlane.f32.xlu1 %v9331_v3  ;;  %4330 = vadd.xlane.f32.xlu0 %v9333_v6  ;;  %v4339_v24 = vmul.f32 %v9333_v6, %v9333_v6 }
0x15a2   : > { %v9339_v17 = vpop.f32.mrf.mxu0 }
0x15a3   : > { %v4391_v62 = vmul.f32 %v9339_v17, %v9339_v17 }
0x15a5   : > { %4346 = vadd.xlane.f32.xlu0 %v4339_v24  ;;  %4382 = vadd.xlane.f32.xlu1 %v9339_v17 }
0x15a9   : > { %4396 = vadd.xlane.f32.xlu1 %v4390_v63  ;;  %4398 = vadd.xlane.f32.xlu0 %v4391_v62 }
0x15ad   : > { %4378 = vadd.xlane.f32.xlu1 %v9326_v16  ;;  %4344 = vadd.xlane.f32.xlu0 %v4338_v12 }
0x15b1   : > { %4376 = vadd.xlane.f32.xlu1 %v9322_v35  ;;  %4326 = vadd.xlane.f32.xlu0 %v9324_v57 }
0x15b5   : > { %4324 = vadd.xlane.f32.xlu1 %v9320_v10  ;;  %4394 = vadd.xlane.f32.xlu0 %v4389_v23 }
0x15b9   : > { %4392 = vadd.xlane.f32.xlu1 %v4388_v54  ;;  %4342 = vadd.xlane.f32.xlu0 %v4337_v55 }
0x15bd   : > { %4340 = vadd.xlane.f32.xlu0 %v4336_v31 }
0x1626   : > { %v4329_v32 = vpop.xlane.xlu1 %4328 }
0x1627   : > { %v4334_v7 = vmul.f32 0.0078125, %v4329_v32 }
0x1629   : > { %v4354_v23 = vmul.f32 %v4334_v7, %v4334_v7 }
0x162a   : > { %v4381_v21 = vpop.xlane.xlu1 %4380  ;;  %v4331_v49 = vpop.xlane.xlu0 %4330 }
0x162b   : > { %v4335_v60 = vmul.f32 0.0078125, %v4331_v49  ;;  %v4386_v48 = vmul.f32 0.0078125, %v4381_v21 }
0x162d   : > { %v4355_v34 = vmul.f32 %v4335_v60, %v4335_v60  ;;  %v4406_v56 = vmul.f32 %v4386_v48, %v4386_v48 }
0x162e   : > { %v4347_v9 = vpop.xlane.xlu0 %4346  ;;  %v4383_v38 = vpop.xlane.xlu1 %4382 }
0x162f   : > { %v4351_v11 = vmul.f32 0.0078125, %v4347_v9  ;;  %v4387_v41 = vmul.f32 0.0078125, %v4383_v38 }
0x1631   : > { %v4359_v0 = vsub.f32 %v4351_v11, %v4355_v34  ;;  %v4407_v13 = vmul.f32 %v4387_v41, %v4387_v41  ;;  %v4363_v34 = vsub.f32 %v9333_v6, %v4335_v60 }
0x1632   : > { %v4397_v37 = vpop.xlane.xlu1 %4396  ;;  %v4399_v4 = vpop.xlane.xlu0 %4398 }
0x1633   : > { %v4367_v29 = vadd.f32 1e-05, %v4359_v0  ;;  %v4402_v30 = vmul.f32 0.0078125, %v4397_v37  ;;  %v4403_v5 = vmul.f32 0.0078125, %v4399_v4  ;;  %v4414_v37 = vsub.f32 %v9331_v3, %v4386_v48 }
0x1635   : > { %7289 = vrsqrt.f32 %v4367_v29  ;;  %v4410_v24 = vsub.f32 %v4402_v30, %v4406_v56  ;;  %v4411_v63 = vsub.f32 %v4403_v5, %v4407_v13  ;;  %v4415_v30 = vsub.f32 %v9339_v17, %v4387_v41 }
0x1636   : > { %v4379_v62 = vpop.xlane.xlu1 %4378  ;;  %v4345_v12 = vpop.xlane.xlu0 %4344 }
0x1637   : > { %v4418_v54 = vadd.f32 1e-05, %v4410_v24  ;;  %v4419_v55 = vadd.f32 1e-05, %v4411_v63  ;;  %v4350_v31 = vmul.f32 0.0078125, %v4345_v12 }
0x1639   : > { %7291 = vrsqrt.f32 %v4418_v54  ;;  %v4358_v21 = vsub.f32 %v4350_v31, %v4354_v23 }
0x163a   : > { %7293 = vrsqrt.f32 %v4419_v55  ;;  %v4327_v32 = vpop.xlane.xlu0 %4326  ;;  %v4377_v9 = vpop.xlane.xlu1 %4376  ;;  %v4362_v55 = vsub.f32 %v9328_v47, %v4334_v7 }
0x163b   : > { %v4366_v49 = vadd.f32 1e-05, %v4358_v21  ;;  %v4333_v63 = vmul.f32 0.0078125, %v4327_v32  ;;  %v4384_v54 = vmul.f32 0.0078125, %v4377_v9 }
0x163d   : > { %7295 = vrsqrt.f32 %v4366_v49  ;;  %v4385_v49 = vmul.f32 0.0078125, %v4379_v62  ;;  %v4404_v17 = vmul.f32 %v4384_v54, %v4384_v54 }
0x163e   : > { %v4395_v38 = vpop.xlane.xlu0 %4394  ;;  %v4325_v11 = vpop.xlane.xlu1 %4324 }
0x163f   : > { %v4332_v41 = vmul.f32 0.0078125, %v4325_v11 }
0x1641   : > { %v4352_v47 = vmul.f32 %v4332_v41, %v4332_v41 }
0x1642   : > { %v7290_v0 = vpop.eup %7289  ;;  %v4343_v29 = vpop.xlane.xlu0 %4342 }
0x1643   : > { %v4375_v56 = vmul.f32 %v7290_v0, %v4363_v34  ;;  %v4393_v12 = vpop.xlane.xlu1 %4392  ;;  %v4349_v60 = vmul.f32 0.0078125, %v4343_v29  ;;  %v4353_v34 = vmul.f32 %v4333_v63, %v4333_v63 }
0x1644   : > { %v4400_v3 = vmul.f32 0.0078125, %v4393_v12 }
0x1645   : > { %v6770_v4 = vmul.f32 -1.442695, %v4375_v56  ;;  %v4401_v56 = vmul.f32 0.0078125, %v4395_v38 }
0x1646   : > { %v7292_v13 = vpop.eup %7291  ;;  %v4341_v0 = vpop.xlane.xlu0 %4340  ;;  %v4408_v9 = vsub.f32 %v4400_v3, %v4404_v17  ;;  %v4412_v17 = vsub.f32 %v9322_v35, %v4384_v54 }
0x1647   : > { %v7294_v5 = vpop.eup %7293  ;;  %7297 = vpow2.f32 %v6770_v4  ;;  %v4426_v24 = vmul.f32 %v7292_v13, %v4414_v37  ;;  %v4357_v37 = vsub.f32 %v4349_v60, %v4353_v34  ;;  %v4405_v4 = vmul.f32 %v4385_v49, %v4385_v49 }
0x1648   : > { %v4427_v23 = vmul.f32 %v7294_v5, %v4415_v30  ;;  %v4348_v13 = vmul.f32 0.0078125, %v4341_v0  ;;  %v4416_v30 = vadd.f32 1e-05, %v4408_v9 }
0x1649   : > { %v6769_v6 = vmul.f32 -1.442695, %v4426_v24  ;;  %v4409_v7 = vsub.f32 %v4401_v56, %v4405_v4  ;;  %v4365_v29 = vadd.f32 1e-05, %v4357_v37 }
0x164a   : > { %v7296_v31 = vpop.eup %7295  ;;  %v6771_v21 = vmul.f32 -1.442695, %v4427_v23  ;;  %v4356_v62 = vsub.f32 %v4348_v13, %v4352_v47 }
0x164b   : > { %7299 = vpow2.f32 %v6769_v6  ;;  %v4374_v48 = vmul.f32 %v7296_v31, %v4362_v55  ;;  %v4417_v24 = vadd.f32 1e-05, %v4409_v7 }
0x164c   : > { %7301 = vpow2.f32 %v6771_v21  ;;  %v4364_v23 = vadd.f32 1e-05, %v4356_v62 }
0x164d   : > { %v6768_v32 = vmul.f32 -1.442695, %v4374_v48  ;;  %v4361_v48 = vsub.f32 %v9324_v57, %v4333_v63 }
0x164f   : > { %7303 = vpow2.f32 %v6768_v32  ;;  %v4413_v32 = vsub.f32 %v9326_v16, %v4385_v49 }
0x1650   : > { %7305 = vrsqrt.f32 %v4365_v29  ;;  %v4360_v29 = vsub.f32 %v9320_v10, %v4332_v41  ;;  %v6775_v41 = vld [vmem:[%s10211_s2 + $0xf8] sm:$0xff] }
0x1651   : > { %7307 = vrsqrt.f32 %v4416_v30 }
0x1654   : > { %v7298_v5 = vpop.eup %7297 }
0x1655   : > { %v4442_v12 = vadd.f32 1.0, %v7298_v5 }
0x1657   : > { %7309 = vrcp.f32 %v4442_v12 }
0x1658   : > { %v7300_v11 = vpop.eup %7299  ;;  %7311 = vrsqrt.f32 %v4417_v24 }
0x1659   : > { %v7302_v38 = vpop.eup %7301  ;;  %v4441_v55 = vadd.f32 1.0, %v7300_v11  ;;  %7313 = vrsqrt.f32 %v4364_v23 }
0x165a   : > { %v4443_v6 = vadd.f32 1.0, %v7302_v38 }
0x165b   : > { %7315 = vrcp.f32 %v4441_v55 }
0x165c   : > { %v7304_v60 = vpop.eup %7303  ;;  %7317 = vrcp.f32 %v4443_v6 }
0x165d   : > { %v4440_v31 = vadd.f32 1.0, %v7304_v60  ;;  %v7306_v21 = vpop.eup %7305 }
0x165e   : > { %v7308_v3 = vpop.eup %7307  ;;  %v4373_v56 = vmul.f32 %v7306_v21, %v4361_v48 }
0x165f   : > { %7319 = vrcp.f32 %v4440_v31  ;;  %v4424_v9 = vmul.f32 %v7308_v3, %v4412_v17 }
0x1664   : > { %v7310_v34 = vpop.eup %7309 }
0x1665   : > { %v7312_v0 = vpop.eup %7311  ;;  %v4454_v4 = vmul.f32 %v7310_v34, %v4373_v56 }
0x1666   : > { %v7314_v37 = vpop.eup %7313  ;;  %v4425_v47 = vmul.f32 %v7312_v0, %v4413_v32 }
0x1667   : > { %v4458_v5 = vadd.f32 %v4454_v4, %v9289_v43  ;;  %v4372_v57 = vmul.f32 %v7314_v37, %v4360_v29 }
0x1668   : > { %v7316_v13 = vpop.eup %7315 }
0x1669   : > { %v7318_v7 = vpop.eup %7317  ;;  %v4453_v30 = vmul.f32 %v7316_v13, %v4424_v9  ;;  %v9373_v49 = vmul.f32 0.70710677, %v4458_v5 }
0x166a   : > { %v4455_v62 = vmul.f32 %v7318_v7, %v4425_v47 }
0x166b   : > { %v4457_v35 = vadd.f32 %v4453_v30, %v9293_v15  ;;  %v6773_v15 = vld [vmem:[%s10211_s2 + $0xe8] sm:$0xff] }
0x166c   : > { %v7320_v63 = vpop.eup %7319  ;;  %v4459_v24 = vadd.f32 %v4455_v62, %v9287_v19  ;;  %v6772_v19 = vld [vmem:[%s10211_s2 + $0xe0] sm:$0xff] }
0x166d   : > { %v4452_v54 = vmul.f32 %v7320_v63, %v4372_v57  ;;  %v9377_v10 = vmul.f32 0.70710677, %v4457_v35 }
0x166e   : > { %v9371_v16 = vmul.f32 0.70710677, %v4459_v24 }
0x166f   : > { %v4456_v12 = vadd.f32 %v4452_v54, %v9296_v46  ;;  %10234 = vst [vmem:[#allocation10_spill] sm:$0xff] %v9377_v10  ;;  %v6774_v46 = vld [vmem:[%s10211_s2 + $0xf0] sm:$0xff] }
0x1670   : > { %4509 = vmatprep.subr.mxu1 %v9371_v16 }
0x1671   : > { %4510 = vmatpush1.msra.mxu1 %v9373_v49  ;;  %v9380_v43 = vmul.f32 0.70710677, %v4456_v12 }
0x1672   : > { %4511 = vmatprep.subr.mxu1 %v9377_v10 }
0x1673   : > { %10235 = vst [vmem:[#allocation11_spill] sm:$0xff] %v9380_v43  ;;  %4512 = vmatpush1.msra.mxu1 %v9380_v43 }
0x1674   : > { %6776 = vmatmul.mubr.msk.f32.vlgmr.msra.gmra.mxu1 %vm371_vm0, %v6772_v19 }
0x1675   : > { %4551 = vmatprep.mubr.f32.mxu1 %v7572_v14 }
0x1678   : > { %6777 = vmatmul.mubr.msk.f32.gmra.mxu1 %vm371_vm0, %v6773_v15 }
0x1679   : > { %4557 = vmatprep.mubr.f32.mxu1 %v7572_v14 }
0x167c   : > { %6778 = vmatmul.mubr.msk.f32.gmra.mxu1 %vm371_vm0, %v6774_v46 }
0x167d   : > { %4563 = vmatprep.mubr.f32.mxu1 %v7572_v14 }
0x1680   : > { %6779 = vmatmul.mubr.msk.f32.gmra.mxu1 %vm371_vm0, %v6775_v41 }
0x1681   : > { %5551 = vmatprep.mubr.f32.mxu1 %v7572_v14 }
0x1734   : > { %v9404_v23 = vpop.f32.mrf.mxu1 }
0x1736   : > { %v9406_v11 = vpop.f32.mrf.mxu1 }
0x1738   : > { %v9408_v38 = vpop.f32.mrf.mxu1 }
0x1739   : > { %v4583_v34 = vmul.f32 %v9408_v38, %v9408_v38 }
0x173a   : > { %v9410_v55 = vpop.f32.mrf.mxu1 }
0x173b   : > { %v4635_v0 = vmul.f32 %v9410_v55, %v9410_v55 }
0x173c   : > { %v9412_v6 = vpop.f32.mrf.mxu1 }
0x173e   : > { %v9414_v60 = vpop.f32.mrf.mxu1 }
0x1740   : > { %v4565_v31 = vpop.f32.mrf.mxu1 }
0x1741   : > { %4576 = vadd.xlane.f32.xlu0 %v4565_v31  ;;  %v4585_v3 = vmul.f32 %v4565_v31, %v4565_v31 }
0x1742   : > { %v4567_v21 = vpop.f32.mrf.mxu1 }
0x1743   : > { %4628 = vadd.xlane.f32.xlu1 %v4567_v21  ;;  %v4637_v48 = vmul.f32 %v4567_v21, %v4567_v21 }
0x1745   : > { %4592 = vadd.xlane.f32.xlu0 %v4585_v3 }
0x1747   : > { %4644 = vadd.xlane.f32.xlu1 %v4637_v48 }
0x1749   : > { %4572 = vadd.xlane.f32.xlu0 %v9408_v38 }
0x174b   : > { %4624 = vadd.xlane.f32.xlu1 %v9410_v55 }
0x174d   : > { %4588 = vadd.xlane.f32.xlu0 %v4583_v34 }
0x174f   : > { %4640 = vadd.xlane.f32.xlu1 %v4635_v0 }
0x17ca   : > { %v4577_v17 = vpop.xlane.xlu0 %4576 }
0x17cb   : > { %v4581_v56 = vmul.f32 0.0078125, %v4577_v17 }
0x17cc   : > { %v4629_v32 = vpop.xlane.xlu1 %4628 }
0x17cd   : > { %v4633_v37 = vmul.f32 0.0078125, %v4629_v32  ;;  %v4601_v9 = vmul.f32 %v4581_v56, %v4581_v56  ;;  %v4609_v35 = vsub.f32 %v4565_v31, %v4581_v56 }
0x17ce   : > { %v4593_v4 = vpop.xlane.xlu0 %4592 }
0x17cf   : > { %v4597_v13 = vmul.f32 0.0078125, %v4593_v4  ;;  %v4653_v7 = vmul.f32 %v4633_v37, %v4633_v37  ;;  %v4661_v12 = vsub.f32 %v4567_v21, %v4633_v37 }
0x17d0   : > { %v4645_v47 = vpop.xlane.xlu1 %4644 }
0x17d1   : > { %v4605_v29 = vsub.f32 %v4597_v13, %v4601_v9  ;;  %v4649_v30 = vmul.f32 0.0078125, %v4645_v47 }
0x17d2   : > { %v4573_v63 = vpop.xlane.xlu0 %4572 }
0x17d3   : > { %v4613_v62 = vadd.f32 1e-05, %v4605_v29  ;;  %v4657_v5 = vsub.f32 %v4649_v30, %v4653_v7  ;;  %v4579_v48 = vmul.f32 0.0078125, %v4573_v63 }
0x17d4   : > { %v4625_v24 = vpop.xlane.xlu1 %4624 }
0x17d5   : > { %7321 = vrsqrt.f32 %v4613_v62  ;;  %v4665_v57 = vadd.f32 1e-05, %v4657_v5  ;;  %v4631_v17 = vmul.f32 0.0078125, %v4625_v24  ;;  %v4599_v4 = vmul.f32 %v4579_v48, %v4579_v48 }
0x17d6   : > { %v4589_v46 = vpop.xlane.xlu0 %4588  ;;  %v4607_v5 = vsub.f32 %v9408_v38, %v4579_v48  ;;  %v6787_v38 = vld [vmem:[%s10212_s3 + $0x28] sm:$0xff] }
0x17d7   : > { %7323 = vrsqrt.f32 %v4665_v57  ;;  %v4595_v32 = vmul.f32 0.0078125, %v4589_v46  ;;  %v4651_v13 = vmul.f32 %v4631_v17, %v4631_v17  ;;  %v4659_v63 = vsub.f32 %v9410_v55, %v4631_v17 }
0x17d8   : > { %v4641_v34 = vpop.xlane.xlu1 %4640 }
0x17d9   : > { %v4647_v9 = vmul.f32 0.0078125, %v4641_v34  ;;  %v4603_v47 = vsub.f32 %v4595_v32, %v4599_v4 }
0x17db   : > { %v4655_v7 = vsub.f32 %v4647_v9, %v4651_v13  ;;  %v4611_v31 = vadd.f32 1e-05, %v4603_v47 }
0x17dd   : > { %v4663_v56 = vadd.f32 1e-05, %v4655_v7 }
0x17e2   : > { %v7322_v54 = vpop.eup %7321 }
0x17e3   : > { %v4621_v19 = vmul.f32 %v7322_v54, %v4609_v35 }
0x17e4   : > { %v7324_v15 = vpop.eup %7323 }
0x17e5   : > { %v6782_v41 = vmul.f32 -1.442695, %v4621_v19  ;;  %v4673_v3 = vmul.f32 %v7324_v15, %v4661_v12 }
0x17e7   : > { %7325 = vpow2.f32 %v6782_v41  ;;  %v6783_v0 = vmul.f32 -1.442695, %v4673_v3 }
0x17e9   : > { %7327 = vpow2.f32 %v6783_v0  ;;  %v6786_v0 = vld [vmem:[%s10212_s3 + $0x20] sm:$0xff] }
0x17ea   : > { %7329 = vrsqrt.f32 %v4611_v31 }
0x17eb   : > { %7331 = vrsqrt.f32 %v4663_v56 }
0x17f4   : > { %v7326_v21 = vpop.eup %7325 }
0x17f5   : > { %v4688_v37 = vadd.f32 1.0, %v7326_v21 }
0x17f6   : > { %v7328_v29 = vpop.eup %7327 }
0x17f7   : > { %7333 = vrcp.f32 %v4688_v37  ;;  %v4689_v30 = vadd.f32 1.0, %v7328_v29  ;;  %v7330_v62 = vpop.eup %7329 }
0x17f8   : > { %v7332_v57 = vpop.eup %7331  ;;  %v4619_v24 = vmul.f32 %v7330_v62, %v4607_v5 }
0x17f9   : > { %7335 = vrcp.f32 %v4689_v30  ;;  %v4671_v54 = vmul.f32 %v7332_v57, %v4659_v63 }
0x1804   : > { %v7334_v35 = vpop.eup %7333 }
0x1805   : > { %v4700_v12 = vmul.f32 %v7334_v35, %v4619_v24 }
0x1806   : > { %v7336_v19 = vpop.eup %7335 }
0x1807   : > { %v4701_v15 = vmul.f32 %v7336_v19, %v4671_v54  ;;  %v4704_v46 = vadd.f32 %v4700_v12, %v9373_v49 }
0x1809   : > { %v4705_v41 = vadd.f32 %v4701_v15, %v9371_v16  ;;  %v4708_v34 = vmul.f32 0.70710677, %v4704_v46 }
0x180b   : > { %v4709_v3 = vmul.f32 0.70710677, %v4705_v41 }
0x180d   : > { %4754 = vmatprep.subr.mxu0 %v4709_v3 }
0x180e   : > { %4755 = vmatpush1.msra.mxu0 %v4708_v34 }
0x180f   : > { %6788 = vmatmul.mubr.msk.f32.vlgmr.msra.gmra.mxu0 %vm1272_vm1, %v6786_v0 }
0x1810   : > { %4794 = vmatprep.mubr.f32.mxu0 %v7572_v14 }
0x1813   : > { %6789 = vmatmul.mubr.msk.f32.gmra.mxu0 %vm1272_vm1, %v6787_v38 }
0x1814   : > { %5788 = vmatprep.mubr.f32.mxu0 %v7572_v14 }
0x18cf   : > { %v4790_v16 = vpop.f32.mrf.mxu0 }
0x18d0   : > { %4801 = vadd.xlane.f32.xlu0 %v4790_v16  ;;  %v4807_v55 = vmul.f32 %v4790_v16, %v4790_v16 }
0x18d1   : > { %v4792_v49 = vpop.f32.mrf.mxu0 }
0x18d2   : > { %4827 = vadd.xlane.f32.xlu1 %v4792_v49  ;;  %v4833_v17 = vmul.f32 %v4792_v49, %v4792_v49 }
0x18d3   : > { %v9436_v48 = vpop.f32.mrf.mxu0 }
0x18d4   : > { %4809 = vadd.xlane.f32.xlu0 %v4807_v55  ;;  %v4808_v4 = vmul.f32 %v9436_v48, %v9436_v48 }
0x18d5   : > { %v9439_v32 = vpop.f32.mrf.mxu0 }
0x18d6   : > { %4803 = vadd.xlane.f32.xlu1 %v9436_v48  ;;  %v4834_v9 = vmul.f32 %v9439_v32, %v9439_v32 }
0x18d8   : > { %4835 = vadd.xlane.f32.xlu0 %v4833_v17 }
0x18da   : > { %4829 = vadd.xlane.f32.xlu1 %v9439_v32 }
0x18dc   : > { %4811 = vadd.xlane.f32.xlu0 %v4808_v4 }
0x18de   : > { %4837 = vadd.xlane.f32.xlu1 %v4834_v9  ;;  %v3692_v9 = vsub.f32 1.3, %v9120_v58  ;;  %v10237_v58 = vsub.f32 1.3, %v8433_v50 }
0x1959   : > { %v4802_v13 = vpop.xlane.xlu0 %4801 }
0x195a   : > { %v4805_v47 = vmul.f32 0.0078125, %v4802_v13 }
0x195b   : > { %v4828_v7 = vpop.xlane.xlu1 %4827 }
0x195c   : > { %v4815_v56 = vmul.f32 %v4805_v47, %v4805_v47  ;;  %v4831_v21 = vmul.f32 0.0078125, %v4828_v7  ;;  %v4819_v13 = vsub.f32 %v4790_v16, %v4805_v47  ;;  %v10238_v47 = vsub.f32 1.3, %v8446_v42 }
0x195d   : > { %v4810_v31 = vpop.xlane.xlu0 %4809 }
0x195e   : > { %v4813_v37 = vmul.f32 0.0078125, %v4810_v31  ;;  %v4841_v5 = vmul.f32 %v4831_v21, %v4831_v21  ;;  %v3695_v31 = vsub.f32 1.3, %v9078_v2 }
0x195f   : > { %v4804_v29 = vpop.xlane.xlu1 %4803 }
0x1960   : > { %v4817_v30 = vsub.f32 %v4813_v37, %v4815_v56  ;;  %v4806_v63 = vmul.f32 0.0078125, %v4804_v29  ;;  %v3693_v56 = vsub.f32 1.3, %v9101_v44  ;;  %v3694_v37 = vsub.f32 1.3, %v9118_v18 }
0x1961   : > { %v4836_v62 = vpop.xlane.xlu0 %4835  ;;  %v10236_v29 = vsub.f32 1.3, %v8448_v33  ;;  %v10239_v44 = vsub.f32 1.3, %v8399_v27 }
0x1962   : > { %v4821_v57 = vadd.f32 1e-05, %v4817_v30  ;;  %v4839_v24 = vmul.f32 0.0078125, %v4836_v62  ;;  %v4816_v15 = vmul.f32 %v4806_v63, %v4806_v63  ;;  %v3697_v16 = vmul.f32 %v3693_v56, %v10237_v58 }
0x1963   : > { %v4830_v35 = vpop.xlane.xlu1 %4829  ;;  %v3696_v30 = vmul.f32 %v3692_v9, %v10236_v29  ;;  %v3698_v2 = vmul.f32 %v3694_v37, %v10238_v47 }
0x1964   : > { %7337 = vrsqrt.f32 %v4821_v57  ;;  %v4843_v54 = vsub.f32 %v4839_v24, %v4841_v5  ;;  %v4832_v12 = vmul.f32 0.0078125, %v4830_v35  ;;  %v4845_v5 = vsub.f32 %v4792_v49, %v4831_v21 }
0x1965   : > { %v4812_v19 = vpop.xlane.xlu0 %4811  ;;  %v4820_v35 = vsub.f32 %v9436_v48, %v4806_v63 }
0x1966   : > { %v4847_v46 = vadd.f32 1e-05, %v4843_v54  ;;  %v4814_v41 = vmul.f32 0.0078125, %v4812_v19  ;;  %v4842_v34 = vmul.f32 %v4832_v12, %v4832_v12  ;;  %v3699_v54 = vmul.f32 %v3695_v31, %v10239_v44 }
0x1967   : > { %v4838_v3 = vpop.xlane.xlu1 %4837  ;;  %v4846_v33 = vsub.f32 %v9439_v32, %v4832_v12 }
0x1968   : > { %7339 = vrsqrt.f32 %v4847_v46  ;;  %v4818_v0 = vsub.f32 %v4814_v41, %v4816_v15  ;;  %v4840_v38 = vmul.f32 0.0078125, %v4838_v3 }
0x196a   : > { %v4822_v55 = vadd.f32 1e-05, %v4818_v0  ;;  %v4844_v17 = vsub.f32 %v4840_v38, %v4842_v34 }
0x196c   : > { %7341 = vrsqrt.f32 %v4822_v55  ;;  %v4848_v4 = vadd.f32 1e-05, %v4844_v17 }
0x196e   : > { %7343 = vrsqrt.f32 %v4848_v4 }
0x1971   : > { %v7338_v7 = vpop.eup %7337 }
0x1972   : > { %v4825_v62 = vmul.f32 %v7338_v7, %v4819_v13 }
0x1974   : > { %v9452_v57 = vmul.f32 %v4825_v62, %v3696_v30 }
0x1975   : > { %v7340_v24 = vpop.eup %7339 }
0x1976   : > { %v4851_v18 = vmul.f32 %v7340_v24, %v4845_v5  ;;  %v9464_v49 = vrot.slane %v9452_v57, %v8037_v36  ;;  %v9468_v21 = vrot.slane %v9452_v57, %v8040_v22  ;;  %v9472_v50 = vrot.slane %v9452_v57, %v8043_v8 }
0x1977   : > { %v9476_v42 = vrot.slane %v9452_v57, %v8046_v40  ;;  %v9480_v27 = vrot.slane %v9452_v57, %v8049_v20  ;;  %v9484_v48 = vrot.slane %v9452_v57, %v8054_v59  ;;  %v9494_v63 = vrot.slane %v9452_v57, %v8058_v25 }
0x1978   : > { %v9486_v32 = vmul.f32 %v4851_v18, %v3697_v16  ;;  %vm4865_vm1 = vcmp.ge.f32.partialorder %v9464_v49, %v9452_v57  ;;  %vm4897_vm12 = vcmp.ge.f32.partialorder %v9468_v21, %v9452_v57 }
0x1979   : > { %v7342_v12 = vpop.eup %7341  ;;  %v9497_v19 = vsel %vm4865_vm1, 1.0, %v7572_v14  ;;  %v9500_v15 = vsel %vm4865_vm1, %v9464_v49, 0.0  ;;  %v9503_v46 = vsel %vm4897_vm12, 1.0, %v7572_v14  ;;  %v9506_v41 = vsel %vm4897_vm12, %v9468_v21, 0.0 }
0x197a   : > { %v4826_v3 = vmul.f32 %v7342_v12, %v4820_v35  ;;  %v4864_v34 = vrot.slane %v9486_v32, %v8037_v36  ;;  %v4896_v0 = vrot.slane %v9486_v32, %v8040_v22  ;;  %v4928_v38 = vrot.slane %v9486_v32, %v8043_v8 }
0x197b   : > { %v7344_v55 = vpop.eup %7343  ;;  %v4960_v17 = vrot.slane %v9486_v32, %v8046_v40  ;;  %v4992_v4 = vrot.slane %v9486_v32, %v8049_v20  ;;  %v5024_v9 = vrot.slane %v9486_v32, %v8054_v59  ;;  %v9522_v13 = vrot.slane %v9486_v32, %v8058_v25 }
0x197c   : > { %v9524_v7 = vmul.f32 %v4826_v3, %v3698_v2  ;;  %v4852_v31 = vmul.f32 %v7344_v55, %v4846_v33  ;;  %vm4866_vm13 = vcmp.ge.f32.partialorder %v4864_v34, %v9486_v32  ;;  %vm4898_vm14 = vcmp.ge.f32.partialorder %v4896_v0, %v9486_v32 }
0x197d   : > { %v6791_v56 = vsel %vm4866_vm13, 1.0, %v7572_v14  ;;  %v4882_v37 = vsel %vm4866_vm13, %v4864_v34, 0.0  ;;  %v6795_v29 = vsel %vm4898_vm14, 1.0, %v7572_v14  ;;  %v4914_v30 = vsel %vm4898_vm14, %v4896_v0, 0.0 }
0x197e   : > { %v9530_v62 = vmul.f32 %v4852_v31, %v3699_v54  ;;  %v4910_v5 = vadd.f32 %v6795_v29, %v6791_v56  ;;  %v4918_v24 = vadd.f32 %v4914_v30, %v4882_v37  ;;  %vm4930_vm15 = vcmp.ge.f32.partialorder %v4928_v38, %v9486_v32 }
0x197f   : > { %v6799_v35 = vsel %vm4930_vm15, 1.0, %v7572_v14  ;;  %v4946_v58 = vsel %vm4930_vm15, %v4928_v38, 0.0  ;;  %vm4962_vm2 = vcmp.ge.f32.partialorder %v4960_v17, %v9486_v32  ;;  %vm4994_vm4 = vcmp.ge.f32.partialorder %v4992_v4, %v9486_v32 }
0x1980   : > { %vm4868_vm5 = vcmp.ge.f32.partialorder %v4864_v34, %v9530_v62  ;;  %vm4900_vm6 = vcmp.ge.f32.partialorder %v4896_v0, %v9530_v62  ;;  %vm4932_vm7 = vcmp.ge.f32.partialorder %v4928_v38, %v9530_v62  ;;  %v4942_v16 = vadd.f32 %v6799_v35, %v4910_v5 }
0x1981   : > { %v6793_v47 = vsel %vm4868_vm5, 1.0, %v7572_v14  ;;  %v4884_v2 = vsel %vm4868_vm5, %v4864_v34, 0.0  ;;  %v6797_v44 = vsel %vm4900_vm6, 1.0, %v7572_v14  ;;  %v4916_v54 = vsel %vm4900_vm6, %v4896_v0, 0.0 }
0x1982   : > { %v4912_v18 = vadd.f32 %v6797_v44, %v6793_v47  ;;  %v4920_v33 = vadd.f32 %v4916_v54, %v4884_v2  ;;  %v6801_v12 = vsel %vm4932_vm7, 1.0, %v7572_v14  ;;  %v4948_v3 = vsel %vm4932_vm7, %v4928_v38, 0.0 }
0x1983   : > { %v4950_v55 = vadd.f32 %v4946_v58, %v4918_v24  ;;  %vm4964_vm8 = vcmp.ge.f32.partialorder %v4960_v17, %v9530_v62  ;;  %v6803_v31 = vsel %vm4962_vm2, 1.0, %v7572_v14  ;;  %v4978_v56 = vsel %vm4962_vm2, %v4960_v17, 0.0 }
0x1984   : > { %v4944_v37 = vadd.f32 %v6801_v12, %v4912_v18  ;;  %v4952_v34 = vadd.f32 %v4948_v3, %v4920_v33  ;;  %v6805_v29 = vsel %vm4964_vm8, 1.0, %v7572_v14  ;;  %v4974_v0 = vadd.f32 %v6803_v31, %v4942_v16 }
0x1985   : > { %v4980_v30 = vsel %vm4964_vm8, %v4960_v17, 0.0  ;;  %v4982_v5 = vadd.f32 %v4978_v56, %v4950_v55  ;;  %vm4996_vm9 = vcmp.ge.f32.partialorder %v4992_v4, %v9530_v62  ;;  %v6807_v38 = vsel %vm4994_vm4, 1.0, %v7572_v14 }
0x1986   : > { %v4976_v24 = vadd.f32 %v6805_v29, %v4944_v37  ;;  %v4984_v35 = vadd.f32 %v4980_v30, %v4952_v34  ;;  %v6809_v58 = vsel %vm4996_vm9, 1.0, %v7572_v14  ;;  %v5006_v47 = vadd.f32 %v6807_v38, %v4974_v0 }
0x1987   : > { %v5010_v2 = vsel %vm4994_vm4, %v4992_v4, 0.0  ;;  %v5012_v44 = vsel %vm4996_vm9, %v4992_v4, 0.0  ;;  %vm5026_vm10 = vcmp.ge.f32.partialorder %v5024_v9, %v9486_v32  ;;  %vm5028_vm3 = vcmp.ge.f32.partialorder %v5024_v9, %v9530_v62 }
0x1988   : > { %v5008_v17 = vadd.f32 %v6809_v58, %v4976_v24  ;;  %v5014_v16 = vadd.f32 %v5010_v2, %v4982_v5  ;;  %v5016_v54 = vadd.f32 %v5012_v44, %v4984_v35  ;;  %v6811_v18 = vsel %vm5026_vm10, 1.0, %v7572_v14 }
0x1989   : > { %v6813_v33 = vsel %vm5028_vm3, 1.0, %v7572_v14  ;;  %v5038_v12 = vadd.f32 %v6811_v18, %v5006_v47  ;;  %v5042_v3 = vsel %vm5026_vm10, %v5024_v9, 0.0  ;;  %v5044_v55 = vsel %vm5028_vm3, %v5024_v9, 0.0 }
0x198a   : > { %v5040_v31 = vadd.f32 %v6813_v33, %v5008_v17  ;;  %v5046_v56 = vadd.f32 %v5042_v3, %v5014_v16  ;;  %v5048_v37 = vadd.f32 %v5044_v55, %v5016_v54  ;;  %vm5058_vm11 = vcmp.ge.f32.partialorder %v9522_v13, %v9486_v32 }
0x198b   : > { %vm5060_vm1 = vcmp.ge.f32.partialorder %v9522_v13, %v9530_v62  ;;  %v6815_v4 = vsel %vm5058_vm11, 1.0, %v7572_v14  ;;  %v5074_v34 = vsel %vm5058_vm11, %v9522_v13, 0.0  ;;  %v5088_v29 = vrot.slane %v9486_v32, %v8061_v39 }
0x198c   : > { %v6817_v0 = vsel %vm5060_vm1, 1.0, %v7572_v14  ;;  %v5070_v30 = vadd.f32 %v6815_v4, %v5038_v12  ;;  %v5076_v9 = vsel %vm5060_vm1, %v9522_v13, 0.0  ;;  %v5078_v5 = vadd.f32 %v5074_v34, %v5046_v56 }
0x198d   : > { %v5072_v38 = vadd.f32 %v6817_v0, %v5040_v31  ;;  %v5080_v24 = vadd.f32 %v5076_v9, %v5048_v37  ;;  %vm5090_vm12 = vcmp.ge.f32.partialorder %v5088_v29, %v9486_v32  ;;  %vm5092_vm13 = vcmp.ge.f32.partialorder %v5088_v29, %v9530_v62 }
0x198e   : > { %v6819_v35 = vsel %vm5090_vm12, 1.0, %v7572_v14  ;;  %v6821_v58 = vsel %vm5092_vm13, 1.0, %v7572_v14  ;;  %v5106_v47 = vsel %vm5090_vm12, %v5088_v29, 0.0  ;;  %v5108_v2 = vsel %vm5092_vm13, %v5088_v29, 0.0 }
0x198f   : > { %v5102_v44 = vadd.f32 %v6819_v35, %v5070_v30  ;;  %v5104_v17 = vadd.f32 %v6821_v58, %v5072_v38  ;;  %v5110_v16 = vadd.f32 %v5106_v47, %v5078_v5  ;;  %v5112_v54 = vadd.f32 %v5108_v2, %v5080_v24 }
0x1990   : > { %v5120_v13 = vrot.slane %v9530_v62, %v8037_v36  ;;  %v5152_v18 = vrot.slane %v9530_v62, %v8040_v22  ;;  %v5184_v33 = vrot.slane %v9530_v62, %v8043_v8  ;;  %v5216_v12 = vrot.slane %v9530_v62, %v8046_v40 }
0x1991   : > { %v5248_v3 = vrot.slane %v9530_v62, %v8049_v20  ;;  %v5280_v55 = vrot.slane %v9530_v62, %v8054_v59  ;;  %v9588_v31 = vrot.slane %v9530_v62, %v8058_v25  ;;  %v9592_v56 = vrot.slane %v9530_v62, %v8061_v39 }
0x1992   : > { %vm5122_vm14 = vcmp.ge.f32.partialorder %v5120_v13, %v9486_v32  ;;  %vm5124_vm15 = vcmp.ge.f32.partialorder %v5120_v13, %v9530_v62  ;;  %vm5154_vm2 = vcmp.ge.f32.partialorder %v5152_v18, %v9486_v32  ;;  %vm5156_vm4 = vcmp.ge.f32.partialorder %v5152_v18, %v9530_v62 }
0x1993   : > { %v6823_v37 = vsel %vm5122_vm14, 1.0, %v7572_v14  ;;  %v6825_v4 = vsel %vm5124_vm15, 1.0, %v7572_v14  ;;  %v5138_v34 = vsel %vm5122_vm14, %v5120_v13, 0.0  ;;  %v5140_v29 = vsel %vm5124_vm15, %v5120_v13, 0.0 }
0x1994   : > { %v5134_v0 = vadd.f32 %v6823_v37, %v5102_v44  ;;  %v5136_v30 = vadd.f32 %v6825_v4, %v5104_v17  ;;  %v5142_v9 = vadd.f32 %v5138_v34, %v5110_v16  ;;  %v5144_v5 = vadd.f32 %v5140_v29, %v5112_v54 }
0x1995   : > { %v6827_v38 = vsel %vm5154_vm2, 1.0, %v7572_v14  ;;  %v6829_v24 = vsel %vm5156_vm4, 1.0, %v7572_v14  ;;  %v5170_v35 = vsel %vm5154_vm2, %v5152_v18, 0.0  ;;  %v5172_v58 = vsel %vm5156_vm4, %v5152_v18, 0.0 }
0x1996   : > { %v5166_v47 = vadd.f32 %v6827_v38, %v5134_v0  ;;  %v5168_v2 = vadd.f32 %v6829_v24, %v5136_v30  ;;  %v5174_v10 = vadd.f32 %v5170_v35, %v5142_v9  ;;  %v5176_v43 = vadd.f32 %v5172_v58, %v5144_v5 }
0x1997   : > { %vm5186_vm5 = vcmp.ge.f32.partialorder %v5184_v33, %v9486_v32  ;;  %vm5188_vm6 = vcmp.ge.f32.partialorder %v5184_v33, %v9530_v62  ;;  %vm5218_vm7 = vcmp.ge.f32.partialorder %v5216_v12, %v9486_v32  ;;  %vm5220_vm8 = vcmp.ge.f32.partialorder %v5216_v12, %v9530_v62 }
0x1998   : > { %v6831_v44 = vsel %vm5186_vm5, 1.0, %v7572_v14  ;;  %v6833_v17 = vsel %vm5188_vm6, 1.0, %v7572_v14  ;;  %v5202_v16 = vsel %vm5186_vm5, %v5184_v33, 0.0  ;;  %v5204_v54 = vsel %vm5188_vm6, %v5184_v33, 0.0 }
0x1999   : > { %v5198_v13 = vadd.f32 %v6831_v44, %v5166_v47  ;;  %v5200_v18 = vadd.f32 %v6833_v17, %v5168_v2  ;;  %v5206_v37 = vadd.f32 %v5202_v16, %v5174_v10  ;;  %v5208_v4 = vadd.f32 %v5204_v54, %v5176_v43 }
0x199a   : > { %v6835_v34 = vsel %vm5218_vm7, 1.0, %v7572_v14  ;;  %v6837_v29 = vsel %vm5220_vm8, 1.0, %v7572_v14  ;;  %v5234_v0 = vsel %vm5218_vm7, %v5216_v12, 0.0  ;;  %v5236_v30 = vsel %vm5220_vm8, %v5216_v12, 0.0 }
0x199b   : > { %v5230_v9 = vadd.f32 %v6835_v34, %v5198_v13  ;;  %v5232_v5 = vadd.f32 %v6837_v29, %v5200_v18  ;;  %v5238_v38 = vadd.f32 %v5234_v0, %v5206_v37  ;;  %v5240_v24 = vadd.f32 %v5236_v30, %v5208_v4 }
0x199c   : > { %vm5250_vm9 = vcmp.ge.f32.partialorder %v5248_v3, %v9486_v32  ;;  %vm5252_vm10 = vcmp.ge.f32.partialorder %v5248_v3, %v9530_v62  ;;  %vm5282_vm3 = vcmp.ge.f32.partialorder %v5280_v55, %v9486_v32  ;;  %vm5284_vm11 = vcmp.ge.f32.partialorder %v5280_v55, %v9530_v62 }
0x199d   : > { %v6839_v10 = vsel %vm5250_vm9, 1.0, %v7572_v14  ;;  %v6841_v43 = vsel %vm5252_vm10, 1.0, %v7572_v14  ;;  %v5266_v33 = vsel %vm5250_vm9, %v5248_v3, 0.0  ;;  %v5268_v35 = vsel %vm5252_vm10, %v5248_v3, 0.0 }
0x199e   : > { %vm4929_vm1 = vcmp.ge.f32.partialorder %v9472_v50, %v9452_v57  ;;  %v5262_v12 = vadd.f32 %v6839_v10, %v5230_v9  ;;  %v5264_v58 = vadd.f32 %v6841_v43, %v5232_v5  ;;  %v5270_v47 = vadd.f32 %v5266_v33, %v5238_v38 }
0x199f   : > { %v5272_v2 = vadd.f32 %v5268_v35, %v5240_v24  ;;  %v6843_v44 = vsel %vm5282_vm3, 1.0, %v7572_v14  ;;  %v6845_v17 = vsel %vm5284_vm11, 1.0, %v7572_v14  ;;  %v5298_v16 = vsel %vm5282_vm3, %v5280_v55, 0.0 }
0x19a0   : > { %v5300_v54 = vsel %vm5284_vm11, %v5280_v55, 0.0  ;;  %v5294_v13 = vadd.f32 %v6843_v44, %v5262_v12  ;;  %v5296_v18 = vadd.f32 %v6845_v17, %v5264_v58  ;;  %v5302_v37 = vadd.f32 %v5298_v16, %v5270_v47 }
0x19a1   : > { %v5304_v4 = vadd.f32 %v5300_v54, %v5272_v2  ;;  %vm5314_vm12 = vcmp.ge.f32.partialorder %v9588_v31, %v9486_v32  ;;  %vm5316_vm13 = vcmp.ge.f32.partialorder %v9588_v31, %v9530_v62  ;;  %vm5346_vm14 = vcmp.ge.f32.partialorder %v9592_v56, %v9486_v32 }
0x19a2   : > { %vm5348_vm15 = vcmp.ge.f32.partialorder %v9592_v56, %v9530_v62  ;;  %v6847_v3 = vsel %vm5314_vm12, 1.0, %v7572_v14  ;;  %v6849_v55 = vsel %vm5316_vm13, 1.0, %v7572_v14  ;;  %v5330_v34 = vsel %vm5314_vm12, %v9588_v31, 0.0 }
0x19a3   : > { %v5332_v29 = vsel %vm5316_vm13, %v9588_v31, 0.0  ;;  %v5326_v0 = vadd.f32 %v6847_v3, %v5294_v13  ;;  %v5328_v30 = vadd.f32 %v6849_v55, %v5296_v18  ;;  %v5334_v9 = vadd.f32 %v5330_v34, %v5302_v37 }
0x19a4   : > { %v5336_v5 = vadd.f32 %v5332_v29, %v5304_v4  ;;  %v6851_v38 = vsel %vm5346_vm14, 1.0, %v7572_v14  ;;  %v6853_v24 = vsel %vm5348_vm15, 1.0, %v7572_v14  ;;  %v5362_v10 = vsel %vm5346_vm14, %v9592_v56, 0.0 }
0x19a5   : > { %v5364_v43 = vsel %vm5348_vm15, %v9592_v56, 0.0  ;;  %v5358_v33 = vadd.f32 %v6851_v38, %v5326_v0  ;;  %v5360_v35 = vadd.f32 %v6853_v24, %v5328_v30  ;;  %v5366_v12 = vadd.f32 %v5362_v10, %v5334_v9 }
0x19a6   : > { %v5368_v58 = vadd.f32 %v5364_v43, %v5336_v5  ;;  %vm4867_vm2 = vcmp.ge.f32.partialorder %v9464_v49, %v9524_v7  ;;  %vm4899_vm4 = vcmp.ge.f32.partialorder %v9468_v21, %v9524_v7  ;;  %v4909_v31 = vadd.f32 %v9503_v46, %v9497_v19 }
0x19a7   : > { %v4917_v47 = vadd.f32 %v9506_v41, %v9500_v15  ;;  %v5370_v2 = vmul.f32 %v5358_v33, %v9486_v32  ;;  %v5372_v56 = vmul.f32 %v5360_v35, %v9530_v62  ;;  %v6792_v44 = vsel %vm4867_vm2, 1.0, %v7572_v14 }
0x19a8   : > { %v4883_v17 = vsel %vm4867_vm2, %v9464_v49, 0.0  ;;  %v6796_v16 = vsel %vm4899_vm4, 1.0, %v7572_v14  ;;  %v4915_v54 = vsel %vm4899_vm4, %v9468_v21, 0.0  ;;  %vm4931_vm5 = vcmp.ge.f32.partialorder %v9472_v50, %v9524_v7 }
0x19a9   : > { %v6798_v19 = vsel %vm4929_vm1, 1.0, %v7572_v14  ;;  %v5374_v15 = vadd.f32 1.0, %v5370_v2  ;;  %v5376_v46 = vadd.f32 1.0, %v5372_v56  ;;  %v4911_v41 = vadd.f32 %v6796_v16, %v6792_v44 }
0x19aa   : > { %v4919_v13 = vadd.f32 %v4915_v54, %v4883_v17  ;;  %v6800_v18 = vsel %vm4931_vm5, 1.0, %v7572_v14  ;;  %v4941_v37 = vadd.f32 %v6798_v19, %v4909_v31  ;;  %v4945_v49 = vsel %vm4929_vm1, %v9472_v50, 0.0 }
0x19ab   : > { %v4947_v21 = vsel %vm4931_vm5, %v9472_v50, 0.0  ;;  %vm5378_vm6 = vcmp.gt.f32.partialorder %v5374_v15, %v5366_v12  ;;  %vm5380_vm7 = vcmp.gt.f32.partialorder %v5376_v46, %v5368_v58  ;;  %v4943_v4 = vadd.f32 %v6800_v18, %v4911_v41 }
0x19ac   : > { %v4949_v3 = vadd.f32 %v4945_v49, %v4917_v47  ;;  %v6855_v55 = vsel %vm5378_vm6, 1.0, %v7572_v14  ;;  %v6857_v34 = vsel %vm5380_vm7, 1.0, %v7572_v14  ;;  %v4951_v29 = vadd.f32 %v4947_v21, %v4919_v13 }
0x19ad   : > { %vm4961_vm8 = vcmp.ge.f32.partialorder %v9476_v42, %v9452_v57  ;;  %v5396_v0 = vadd.f32 %v6857_v34, %v6855_v55  ;;  %v5404_v30 = vmul.f32 %v6855_v55, %v9486_v32  ;;  %v5406_v9 = vmul.f32 %v6857_v34, %v9530_v62 }
0x19ae   : > { %vm4963_vm9 = vcmp.ge.f32.partialorder %v9476_v42, %v9524_v7  ;;  %v6802_v50 = vsel %vm4961_vm8, 1.0, %v7572_v14  ;;  %v4977_v38 = vsel %vm4961_vm8, %v9476_v42, 0.0  ;;  %vm4993_vm10 = vcmp.ge.f32.partialorder %v9480_v27, %v9452_v57 }
0x19af   : > { %v6804_v5 = vsel %vm4963_vm9, 1.0, %v7572_v14  ;;  %v4979_v24 = vsel %vm4963_vm9, %v9476_v42, 0.0  ;;  %v5397_v10 = vrot.slane %v5396_v0, 4  ;;  %v5414_v43 = vadd.f32 %v5406_v9, %v5404_v30 }
0x19b0   : > { %v4973_v33 = vadd.f32 %v6802_v50, %v4941_v37  ;;  %v4975_v35 = vadd.f32 %v6804_v5, %v4943_v4  ;;  %v4981_v12 = vadd.f32 %v4977_v38, %v4949_v3  ;;  %v4983_v58 = vadd.f32 %v4979_v24, %v4951_v29 }
0x19b1   : > { %vm4995_vm3 = vcmp.ge.f32.partialorder %v9480_v27, %v9524_v7  ;;  %v5398_v31 = vadd.f32 %v5397_v10, %v5396_v0  ;;  %v5415_v47 = vrot.slane %v5414_v43, 4  ;;  %v6806_v2 = vsel %vm4993_vm10, 1.0, %v7572_v14 }
0x19b2   : > { %v6808_v56 = vsel %vm4995_vm3, 1.0, %v7572_v14  ;;  %v5005_v44 = vadd.f32 %v6806_v2, %v4973_v33  ;;  %v5009_v17 = vsel %vm4993_vm10, %v9480_v27, 0.0  ;;  %v5011_v16 = vsel %vm4995_vm3, %v9480_v27, 0.0 }
0x19b3   : > { %v5007_v42 = vadd.f32 %v6808_v56, %v4975_v35  ;;  %v5399_v54 = vrot.slane %v5398_v31, 2  ;;  %v5416_v19 = vadd.f32 %v5415_v47, %v5414_v43  ;;  %v5013_v15 = vadd.f32 %v5009_v17, %v4981_v12 }
0x19b4   : > { %v5015_v46 = vadd.f32 %v5011_v16, %v4983_v58  ;;  %vm5025_vm11 = vcmp.ge.f32.partialorder %v9484_v48, %v9452_v57  ;;  %vm5027_vm1 = vcmp.ge.f32.partialorder %v9484_v48, %v9524_v7  ;;  %vm5057_vm12 = vcmp.ge.f32.partialorder %v9494_v63, %v9452_v57 }
0x19b5   : > { %vm5059_vm13 = vcmp.ge.f32.partialorder %v9494_v63, %v9524_v7  ;;  %v5400_v41 = vadd.f32 %v5399_v54, %v5398_v31  ;;  %v5417_v13 = vrot.slane %v5416_v19, 2  ;;  %v6810_v27 = vsel %vm5025_vm11, 1.0, %v7572_v14 }
0x19b6   : > { %v6812_v18 = vsel %vm5027_vm1, 1.0, %v7572_v14  ;;  %v5037_v37 = vadd.f32 %v6810_v27, %v5005_v44  ;;  %v5041_v21 = vsel %vm5025_vm11, %v9484_v48, 0.0  ;;  %v5043_v4 = vsel %vm5027_vm1, %v9484_v48, 0.0 }
0x19b7   : > { %v5039_v49 = vadd.f32 %v6812_v18, %v5007_v42  ;;  %v5401_v3 = vrot.slane %v5400_v41, 1  ;;  %v5418_v55 = vadd.f32 %v5417_v13, %v5416_v19  ;;  %v5045_v34 = vadd.f32 %v5041_v21, %v5013_v15 }
0x19b8   : > { %v5047_v29 = vadd.f32 %v5043_v4, %v5015_v46  ;;  %v6814_v0 = vsel %vm5057_vm12, 1.0, %v7572_v14  ;;  %v6816_v30 = vsel %vm5059_vm13, 1.0, %v7572_v14  ;;  %v5073_v9 = vsel %vm5057_vm12, %v9494_v63, 0.0 }
0x19b9   : > { %v5402_v48 = vadd.f32 %v5401_v3, %v5400_v41  ;;  %v5419_v50 = vrot.slane %v5418_v55, 1  ;;  %v5069_v5 = vadd.f32 %v6814_v0, %v5037_v37  ;;  %v5075_v38 = vsel %vm5059_vm13, %v9494_v63, 0.0 }
0x19ba   : > { %v5071_v24 = vadd.f32 %v6816_v30, %v5039_v49  ;;  %v5077_v10 = vadd.f32 %v5073_v9, %v5045_v34  ;;  %v5084_v43 = vrot.slane %v9452_v57, %v8061_v39  ;;  %v5116_v33 = vrot.slane %v9524_v7, %v8037_v36 }
0x19bb   : > { %v5420_v35 = vadd.f32 %v5419_v50, %v5418_v55  ;;  %7345 = vrcp.f32 %v5402_v48  ;;  %v5079_v12 = vadd.f32 %v5075_v38, %v5047_v29  ;;  %v5148_v58 = vrot.slane %v9524_v7, %v8040_v22 }
0x19bc   : > { %vm5089_vm14 = vcmp.ge.f32.partialorder %v5084_v43, %v9452_v57  ;;  %vm5091_vm15 = vcmp.ge.f32.partialorder %v5084_v43, %v9524_v7  ;;  %vm5121_vm2 = vcmp.ge.f32.partialorder %v5116_v33, %v9452_v57  ;;  %vm5123_vm4 = vcmp.ge.f32.partialorder %v5116_v33, %v9524_v7 }
0x19bd   : > { %v6818_v63 = vsel %vm5089_vm14, 1.0, %v7572_v14  ;;  %v6820_v31 = vsel %vm5091_vm15, 1.0, %v7572_v14  ;;  %v5105_v47 = vsel %vm5089_vm14, %v5084_v43, 0.0  ;;  %v5180_v36 = vrot.slane %v9524_v7, %v8043_v8 }
0x19be   : > { %v5101_v2 = vadd.f32 %v6818_v63, %v5069_v5  ;;  %v5103_v56 = vadd.f32 %v6820_v31, %v5071_v24  ;;  %v5107_v44 = vsel %vm5091_vm15, %v5084_v43, 0.0  ;;  %v5109_v22 = vadd.f32 %v5105_v47, %v5077_v10 }
0x19bf   : > { %v5111_v42 = vadd.f32 %v5107_v44, %v5079_v12  ;;  %v6822_v17 = vsel %vm5121_vm2, 1.0, %v7572_v14  ;;  %v6824_v16 = vsel %vm5123_vm4, 1.0, %v7572_v14  ;;  %v5137_v54 = vsel %vm5121_vm2, %v5116_v33, 0.0 }
0x19c0   : > { %v5133_v19 = vadd.f32 %v6822_v17, %v5101_v2  ;;  %v5135_v15 = vadd.f32 %v6824_v16, %v5103_v56  ;;  %v5139_v46 = vsel %vm5123_vm4, %v5116_v33, 0.0  ;;  %v5141_v41 = vadd.f32 %v5137_v54, %v5109_v22 }
0x19c1   : > { %v5143_v13 = vadd.f32 %v5139_v46, %v5111_v42  ;;  %vm5153_vm5 = vcmp.ge.f32.partialorder %v5148_v58, %v9452_v57  ;;  %vm5155_vm6 = vcmp.ge.f32.partialorder %v5148_v58, %v9524_v7  ;;  %vm5185_vm7 = vcmp.ge.f32.partialorder %v5180_v36, %v9452_v57 }
0x19c2   : > { %v6826_v8 = vsel %vm5153_vm5, 1.0, %v7572_v14  ;;  %v6828_v27 = vsel %vm5155_vm6, 1.0, %v7572_v14  ;;  %v5169_v18 = vsel %vm5153_vm5, %v5148_v58, 0.0  ;;  %v5171_v37 = vsel %vm5155_vm6, %v5148_v58, 0.0 }
0x19c3   : > { %v5165_v49 = vadd.f32 %v6826_v8, %v5133_v19  ;;  %v5167_v21 = vadd.f32 %v6828_v27, %v5135_v15  ;;  %v5173_v4 = vadd.f32 %v5169_v18, %v5141_v41  ;;  %v5175_v3 = vadd.f32 %v5171_v37, %v5143_v13 }
0x19c4   : > { %vm5187_vm8 = vcmp.ge.f32.partialorder %v5180_v36, %v9524_v7  ;;  %v6830_v55 = vsel %vm5185_vm7, 1.0, %v7572_v14  ;;  %v5201_v34 = vsel %vm5185_vm7, %v5180_v36, 0.0  ;;  %v5212_v29 = vrot.slane %v9524_v7, %v8046_v40 }
0x19c5   : > { %v6832_v0 = vsel %vm5187_vm8, 1.0, %v7572_v14  ;;  %v5197_v30 = vadd.f32 %v6830_v55, %v5165_v49  ;;  %v5203_v9 = vsel %vm5187_vm8, %v5180_v36, 0.0  ;;  %v5205_v48 = vadd.f32 %v5201_v34, %v5173_v4 }
0x19c6   : > { %v5199_v50 = vadd.f32 %v6832_v0, %v5167_v21  ;;  %v5207_v5 = vadd.f32 %v5203_v9, %v5175_v3  ;;  %vm5217_vm9 = vcmp.ge.f32.partialorder %v5212_v29, %v9452_v57  ;;  %vm5219_vm10 = vcmp.ge.f32.partialorder %v5212_v29, %v9524_v7 }
0x19c7   : > { %v6859_v38 = vadd.f32 -1.0, %v5420_v35  ;;  %v6834_v24 = vsel %vm5217_vm9, 1.0, %v7572_v14  ;;  %v6836_v10 = vsel %vm5219_vm10, 1.0, %v7572_v14  ;;  %v5233_v40 = vsel %vm5217_vm9, %v5212_v29, 0.0 }
0x19c8   : > { %v7346_v43 = vpop.eup %7345  ;;  %v5229_v33 = vadd.f32 %v6834_v24, %v5197_v30  ;;  %v5231_v12 = vadd.f32 %v6836_v10, %v5199_v50  ;;  %v5235_v58 = vsel %vm5219_vm10, %v5212_v29, 0.0  ;;  %v5237_v31 = vadd.f32 %v5233_v40, %v5205_v48 }
0x19c9   : > { %v5426_v63 = vmul.f32 %v7346_v43, %v6859_v38  ;;  %v5244_v47 = vrot.slane %v9524_v7, %v8049_v20  ;;  %v5276_v36 = vrot.slane %v9524_v7, %v8054_v59  ;;  %v5239_v2 = vadd.f32 %v5235_v58, %v5207_v5 }
0x19ca   : > { %v5308_v35 = vrot.slane %v9524_v7, %v8058_v25  ;;  %v5340_v19 = vrot.slane %v9524_v7, %v8061_v39 }
0x19cb   : > { %v5430_v56 = vsub.f32 %v9530_v62, %v5426_v63  ;;  %vm5249_vm3 = vcmp.ge.f32.partialorder %v5244_v47, %v9452_v57  ;;  %vm5251_vm11 = vcmp.ge.f32.partialorder %v5244_v47, %v9524_v7  ;;  %vm5281_vm1 = vcmp.ge.f32.partialorder %v5276_v36, %v9452_v57 }
0x19cc   : > { %v6838_v44 = vsel %vm5249_vm3, 1.0, %v7572_v14  ;;  %v6840_v22 = vsel %vm5251_vm11, 1.0, %v7572_v14  ;;  %v5265_v20 = vsel %vm5249_vm3, %v5244_v47, 0.0  ;;  %v5267_v42 = vsel %vm5251_vm11, %v5244_v47, 0.0 }
0x19cd   : > { %v9752_v17 = vmax.f32 %v5430_v56, 0.0  ;;  %v5261_v59 = vadd.f32 %v6838_v44, %v5229_v33  ;;  %v5263_v16 = vadd.f32 %v6840_v22, %v5231_v12  ;;  %v5269_v54 = vadd.f32 %v5265_v20, %v5237_v31 }
0x19ce   : > { %v5271_v25 = vadd.f32 %v5267_v42, %v5239_v2  ;;  %vm5283_vm12 = vcmp.ge.f32.partialorder %v5276_v36, %v9524_v7  ;;  %v6842_v62 = vsel %vm5281_vm1, 1.0, %v7572_v14  ;;  %v5297_v27 = vsel %vm5281_vm1, %v5276_v36, 0.0 }
0x19cf   : > { %v5438_v15 = vadd.f32 1e-15, %v9752_v17  ;;  %v5470_v46 = vmul.f32 %v9752_v17, %v7708_v45  ;;  %v6844_v41 = vsel %vm5283_vm12, 1.0, %v7572_v14  ;;  %v5293_v13 = vadd.f32 %v6842_v62, %v5261_v59 }
0x19d0   : > { %v5295_v8 = vadd.f32 %v6844_v41, %v5263_v16  ;;  %vm5313_vm13 = vcmp.ge.f32.partialorder %v5308_v35, %v9452_v57  ;;  %v5299_v18 = vsel %vm5283_vm12, %v5276_v36, 0.0  ;;  %v5301_v37 = vadd.f32 %v5297_v27, %v5269_v54 }
0x19d1   : > { %5515 = vmatprep.subr.mxu1 %v5470_v46  ;;  %vm5315_vm14 = vcmp.ge.f32.partialorder %v5308_v35, %v9524_v7  ;;  %v6846_v39 = vsel %vm5313_vm13, 1.0, %v7572_v14  ;;  %v5303_v49 = vadd.f32 %v5299_v18, %v5271_v25  ;;  %7347 = vlog2.f32 %v5438_v15 }
0x19d2   : > { %v6848_v21 = vsel %vm5315_vm14, 1.0, %v7572_v14  ;;  %v5325_v45 = vadd.f32 %v6846_v39, %v5293_v13  ;;  %vm5345_vm15 = vcmp.ge.f32.partialorder %v5340_v19, %v9452_v57  ;;  %v5329_v3 = vsel %vm5313_vm13, %v5308_v35, 0.0 }
0x19d3   : > { %v5327_v4 = vadd.f32 %v6848_v21, %v5295_v8  ;;  %vm5347_vm2 = vcmp.ge.f32.partialorder %v5340_v19, %v9524_v7  ;;  %v6850_v55 = vsel %vm5345_vm15, 1.0, %v7572_v14  ;;  %v5428_v34 = vsub.f32 %v9486_v32, %v5426_v63 }
0x19d4   : > { %v5331_v29 = vsel %vm5315_vm14, %v5308_v35, 0.0  ;;  %v5333_v0 = vadd.f32 %v5329_v3, %v5301_v37  ;;  %v6852_v30 = vsel %vm5347_vm2, 1.0, %v7572_v14  ;;  %v5357_v9 = vadd.f32 %v6850_v55, %v5325_v45 }
0x19d5   : > { %v5335_v48 = vadd.f32 %v5331_v29, %v5303_v49  ;;  %v5359_v50 = vadd.f32 %v6852_v30, %v5327_v4  ;;  %v5432_v5 = vmax.f32 %v5428_v34, 0.0  ;;  %v5361_v24 = vsel %vm5345_vm15, %v5340_v19, 0.0 }
0x19d6   : > { %v5369_v38 = vmul.f32 %v5357_v9, %v9452_v57  ;;  %v5363_v33 = vsel %vm5347_vm2, %v5340_v19, 0.0  ;;  %v5365_v12 = vadd.f32 %v5361_v24, %v5333_v0 }
0x19d7   : > { %v5371_v10 = vmul.f32 %v5359_v50, %v9524_v7  ;;  %v5436_v43 = vadd.f32 1e-15, %v5432_v5  ;;  %v5367_v58 = vadd.f32 %v5363_v33, %v5335_v48 }
0x19d8   : > { %v5373_v40 = vadd.f32 1.0, %v5369_v38 }
0x19d9   : > { %v5375_v31 = vadd.f32 1.0, %v5371_v10  ;;  %7349 = vlog2.f32 %v5436_v43  ;;  %v5468_v10 = vmul.f32 %v5432_v5, %v7714_v52  ;;  %v5473_v52 = vld [vmem:[%s10211_s2 + $0x10] sm:$0xff] }
0x19da   : > { %vm5377_vm4 = vcmp.gt.f32.partialorder %v5373_v40, %v5365_v12 }
0x19db   : > { %vm5379_vm5 = vcmp.gt.f32.partialorder %v5375_v31, %v5367_v58  ;;  %v6854_v32 = vsel %vm5377_vm4, 1.0, %v7572_v14 }
0x19dc   : > { %v6856_v63 = vsel %vm5379_vm5, 1.0, %v7572_v14  ;;  %v5403_v36 = vmul.f32 %v6854_v32, %v9452_v57 }
0x19dd   : > { %v5389_v47 = vadd.f32 %v6856_v63, %v6854_v32  ;;  %v5405_v2 = vmul.f32 %v6856_v63, %v9524_v7 }
0x19de   : > { %v7348_v35 = vpop.eup %7347 }
0x19df   : > { %v5390_v56 = vrot.slane %v5389_v47, 4  ;;  %v5407_v44 = vadd.f32 %v5405_v2, %v5403_v36  ;;  %v5446_v42 = vmul.f32 0.6931472, %v7348_v35 }
0x19e1   : > { %v5391_v22 = vadd.f32 %v5390_v56, %v5389_v47  ;;  %v5408_v20 = vrot.slane %v5407_v44, 4  ;;  %v5450_v62 = vmul.f32 %v5446_v42, %v9752_v17  ;;  %v7573_v47 = vmov 1966171168  }
0x19e2   : > { %v6380_v36 = vunpack.c.l.s4 %v7573_v47 }
0x19e3   : > { %v5392_v59 = vrot.slane %v5391_v22, 2  ;;  %v5409_v16 = vadd.f32 %v5408_v20, %v5407_v44 }
0x19e4   : > { %v6381_v56 = vunpack.c.0.s8 %v6380_v36 }
0x19e5   : > { %v5393_v54 = vadd.f32 %v5392_v59, %v5391_v22  ;;  %v5410_v15 = vrot.slane %v5409_v16, 2 }
0x19e6   : > { %v7350_v25 = vpop.eup %7349  ;;  %v6384_v20 = vsub.s32 %v6381_v56, %v8034_v26 }
0x19e7   : > { %v5394_v19 = vrot.slane %v5393_v54, 1  ;;  %v5442_v46 = vmul.f32 0.6931472, %v7350_v25  ;;  %v5411_v8 = vadd.f32 %v5410_v15, %v5409_v16  ;;  %v10240_v16 = vlaneseq }
0x19e9   : > { %v5395_v41 = vadd.f32 %v5394_v19, %v5393_v54  ;;  %v5448_v13 = vmul.f32 %v5442_v46, %v5432_v5  ;;  %v5412_v37 = vrot.slane %v5411_v8, 1  ;;  %vm6396_vm6 = vcmp.lt.s32.totalorder %v10240_v16, 256 }
0x19eb   : > { %7351 = vrcp.f32 %v5395_v41  ;;  %v5458_v27 = vadd.f32 %v5450_v62, %v5448_v13  ;;  %v5413_v21 = vadd.f32 %v5412_v37, %v5411_v8 }
0x19ed   : > { %v5459_v18 = vrot.slane %v5458_v27, 4  ;;  %v6858_v3 = vadd.f32 -1.0, %v5413_v21 }
0x19ef   : > { %v5460_v39 = vadd.f32 %v5459_v18, %v5458_v27 }
0x19f1   : > { %v5461_v49 = vrot.slane %v5460_v39, 2 }
0x19f3   : > { %v5462_v45 = vadd.f32 %v5461_v49, %v5460_v39 }
0x19f5   : > { %v5463_v4 = vrot.slane %v5462_v45, 1 }
0x19f7   : > { %v5464_v55 = vadd.f32 %v5463_v4, %v5462_v45 }
0x19f8   : > { %v7352_v34 = vpop.eup %7351 }
0x19f9   : > { %v5424_v29 = vmul.f32 %v7352_v34, %v6858_v3  ;;  %v5466_v17 = vadd.f32 %v5464_v55, %v9114_v1  ;;  %v5471_v1 = vld [vmem:[%s10211_s2] sm:$0xff] }
0x19fb   : > { %v5429_v0 = vsub.f32 %v9524_v7, %v5424_v29  ;;  %v5427_v30 = vsub.f32 %v9452_v57, %v5424_v29 }
0x19fd   : > { %v5433_v9 = vmax.f32 %v5429_v0, 0.0  ;;  %v5431_v48 = vmax.f32 %v5427_v30, 0.0 }
0x19ff   : > { %v5437_v50 = vadd.f32 1e-15, %v5433_v9  ;;  %v5469_v38 = vmul.f32 %v5433_v9, %v7712_v51  ;;  %v5435_v24 = vadd.f32 1e-15, %v5431_v48  ;;  %v5467_v43 = vmul.f32 %v5431_v48, %v7716_v53  ;;  %v5472_v51 = vld [vmem:[%s10211_s2 + $0x8] sm:$0xff]  ;;  %v5474_v53 = vld [vmem:[%s10211_s2 + $0x18] sm:$0xff] }
0x1a01   : > { %7353 = vlog2.f32 %v5437_v50  ;;  %5516 = vmatpush1.msra.mxu1 %v5469_v38 }
0x1a02   : > { %5517 = vmatprep.subr.mxu1 %v5468_v10  ;;  %7355 = vlog2.f32 %v5435_v24 }
0x1a03   : > { %5518 = vmatpush1.msra.mxu1 %v5467_v43 }
0x1a04   : > { %6860 = vmatmul.mubr.msk.f32.vlgmr.msra.gmra.mxu1 %vm371_vm0, %v5471_v1 }
0x1a05   : > { %5557 = vmatprep.mubr.f32.mxu1 %v7572_v14 }
0x1a08   : > { %6861 = vmatmul.mubr.msk.f32.gmra.mxu1 %vm371_vm0, %v5472_v51 }
0x1a09   : > { %5563 = vmatprep.mubr.f32.mxu1 %v7572_v14 }
0x1a0c   : > { %6862 = vmatmul.mubr.msk.f32.gmra.mxu1 %vm371_vm0, %v5473_v52 }
0x1a0d   : > { %5569 = vmatprep.mubr.f32.mxu1 %v7572_v14 }
0x1a0e   : > { %v7354_v57 = vpop.eup %7353 }
0x1a0f   : > { %v7356_v7 = vpop.eup %7355  ;;  %v5444_v5 = vmul.f32 0.6931472, %v7354_v57 }
0x1a10   : > { %v5440_v33 = vmul.f32 0.6931472, %v7356_v7  ;;  %6863 = vmatmul.mubr.msk.f32.gmra.mxu1 %vm371_vm0, %v5474_v53 }
0x1a11   : > { %v5449_v12 = vmul.f32 %v5444_v5, %v5433_v9  ;;  %6034 = vmatprep.mubr.f32.mxu1 %v7572_v14 }
0x1a12   : > { %v5447_v40 = vmul.f32 %v5440_v33, %v5431_v48 }
0x1a14   : > { %v5451_v58 = vadd.f32 %v5449_v12, %v5447_v40 }
0x1a16   : > { %v5452_v31 = vrot.slane %v5451_v58, 4 }
0x1a18   : > { %v5453_v32 = vadd.f32 %v5452_v31, %v5451_v58 }
0x1a1a   : > { %v5454_v63 = vrot.slane %v5453_v32, 2 }
0x1a1c   : > { %v5455_v2 = vadd.f32 %v5454_v63, %v5453_v32 }
0x1a1e   : > { %v5456_v35 = vrot.slane %v5455_v2, 1 }
0x1a20   : > { %v5457_v44 = vadd.f32 %v5456_v35, %v5455_v2 }
0x1a22   : > { %v5465_v22 = vadd.f32 %v5457_v44, %v9154_v28 }
0x1a24   : > { %v6378_v42 = vcombine.low %v5465_v22, %v5466_v17 }
0x1a26   : > { %v6385_v59 = vrot.slane %v6378_v42, %v6384_v20 }
0x1a28   : > { %v6392_v54 = vrot.slane %v6385_v59, %v6384_v20 }
0x1a2a   : > { %6398 = vst.msk [vmem:[%s236_s9] sm:$0x3] %vm6396_vm6, %v6392_v54  ;;  %s10161_s9 = scalar_lea.hbm %s10213_s4, %s6908_s30 }
0x1ac4   : > { %v9815_v25 = vpop.f32.mrf.mxu1 }
0x1ac5   : > { %v5588_v21 = vmul.f32 %v9815_v25, %v9815_v25 }
0x1ac6   : > { %v9817_v62 = vpop.f32.mrf.mxu1 }
0x1ac7   : > { %v5640_v39 = vmul.f32 %v9817_v62, %v9817_v62 }
0x1ac8   : > { %v9819_v19 = vpop.f32.mrf.mxu1 }
0x1ac9   : > { %v5589_v49 = vmul.f32 %v9819_v19, %v9819_v19 }
0x1aca   : > { %v9821_v28 = vpop.f32.mrf.mxu1 }
0x1acb   : > { %v5641_v37 = vmul.f32 %v9821_v28, %v9821_v28 }
0x1acc   : > { %v9823_v26 = vpop.f32.mrf.mxu1 }
0x1acd   : > { %5580 = vadd.xlane.f32.xlu1 %v9823_v26  ;;  %v5590_v18 = vmul.f32 %v9823_v26, %v9823_v26 }
0x1ace   : > { %v9826_v15 = vpop.f32.mrf.mxu1 }
0x1acf   : > { %v5642_v8 = vmul.f32 %v9826_v15, %v9826_v15 }
0x1ad0   : > { %v9828_v46 = vpop.f32.mrf.mxu1 }
0x1ad1   : > { %5632 = vadd.xlane.f32.xlu1 %v9826_v15  ;;  %5582 = vadd.xlane.f32.xlu0 %v9828_v46  ;;  %v5591_v41 = vmul.f32 %v9828_v46, %v9828_v46 }
0x1ad2   : > { %v9834_v13 = vpop.f32.mrf.mxu1 }
0x1ad3   : > { %v5643_v27 = vmul.f32 %v9834_v13, %v9834_v13 }
0x1ad5   : > { %5598 = vadd.xlane.f32.xlu0 %v5591_v41  ;;  %5634 = vadd.xlane.f32.xlu1 %v9834_v13 }
0x1ad9   : > { %5648 = vadd.xlane.f32.xlu1 %v5642_v8  ;;  %5650 = vadd.xlane.f32.xlu0 %v5643_v27 }
0x1add   : > { %5630 = vadd.xlane.f32.xlu1 %v9821_v28  ;;  %5596 = vadd.xlane.f32.xlu0 %v5590_v18 }
0x1ae1   : > { %5628 = vadd.xlane.f32.xlu1 %v9817_v62  ;;  %5578 = vadd.xlane.f32.xlu0 %v9819_v19 }
0x1ae5   : > { %5576 = vadd.xlane.f32.xlu1 %v9815_v25  ;;  %5646 = vadd.xlane.f32.xlu0 %v5641_v37 }
0x1ae9   : > { %5644 = vadd.xlane.f32.xlu1 %v5640_v39  ;;  %5594 = vadd.xlane.f32.xlu0 %v5589_v49 }
0x1aed   : > { %5592 = vadd.xlane.f32.xlu0 %v5588_v21 }
0x1b56   : > { %v5581_v45 = vpop.xlane.xlu1 %5580 }
0x1b57   : > { %v5586_v50 = vmul.f32 0.0078125, %v5581_v45 }
0x1b59   : > { %v5606_v33 = vmul.f32 %v5586_v50, %v5586_v50  ;;  %v5614_v37 = vsub.f32 %v9823_v26, %v5586_v50 }
0x1b5a   : > { %v5633_v4 = vpop.xlane.xlu1 %5632  ;;  %v5583_v3 = vpop.xlane.xlu0 %5582 }
0x1b5b   : > { %v5587_v55 = vmul.f32 0.0078125, %v5583_v3  ;;  %v5638_v34 = vmul.f32 0.0078125, %v5633_v4 }
0x1b5d   : > { %v5607_v0 = vmul.f32 %v5587_v55, %v5587_v55  ;;  %v5658_v38 = vmul.f32 %v5638_v34, %v5638_v34  ;;  %v5615_v2 = vsub.f32 %v9828_v46, %v5587_v55  ;;  %v5666_v20 = vsub.f32 %v9826_v15, %v5638_v34 }
0x1b5e   : > { %v5599_v29 = vpop.xlane.xlu0 %5598  ;;  %v5635_v17 = vpop.xlane.xlu1 %5634 }
0x1b5f   : > { %v5603_v30 = vmul.f32 0.0078125, %v5599_v29  ;;  %v5639_v9 = vmul.f32 0.0078125, %v5635_v17 }
0x1b61   : > { %v5611_v48 = vsub.f32 %v5603_v30, %v5607_v0  ;;  %v5659_v1 = vmul.f32 %v5639_v9, %v5639_v9  ;;  %v5667_v16 = vsub.f32 %v9834_v13, %v5639_v9 }
0x1b62   : > { %v5649_v24 = vpop.xlane.xlu1 %5648  ;;  %v5651_v10 = vpop.xlane.xlu0 %5650 }
0x1b63   : > { %v5619_v43 = vadd.f32 1e-05, %v5611_v48  ;;  %v5654_v51 = vmul.f32 0.0078125, %v5649_v24  ;;  %v5655_v52 = vmul.f32 0.0078125, %v5651_v10 }
0x1b65   : > { %7357 = vrsqrt.f32 %v5619_v43  ;;  %v5662_v53 = vsub.f32 %v5654_v51, %v5658_v38  ;;  %v5663_v57 = vsub.f32 %v5655_v52, %v5659_v1 }
0x1b66   : > { %v5631_v7 = vpop.xlane.xlu1 %5630  ;;  %v5597_v5 = vpop.xlane.xlu0 %5596 }
0x1b67   : > { %v5670_v12 = vadd.f32 1e-05, %v5662_v53  ;;  %v5671_v40 = vadd.f32 1e-05, %v5663_v57  ;;  %v5602_v58 = vmul.f32 0.0078125, %v5597_v5  ;;  %v5637_v27 = vmul.f32 0.0078125, %v5631_v7 }
0x1b69   : > { %7359 = vrsqrt.f32 %v5670_v12  ;;  %v5610_v31 = vsub.f32 %v5602_v58, %v5606_v33  ;;  %v5657_v13 = vmul.f32 %v5637_v27, %v5637_v27 }
0x1b6a   : > { %7361 = vrsqrt.f32 %v5671_v40  ;;  %v5579_v32 = vpop.xlane.xlu0 %5578  ;;  %v5629_v47 = vpop.xlane.xlu1 %5628 }
0x1b6b   : > { %v5618_v63 = vadd.f32 1e-05, %v5610_v31  ;;  %v5636_v46 = vmul.f32 0.0078125, %v5629_v47  ;;  %v5585_v45 = vmul.f32 0.0078125, %v5579_v32  ;;  %v5665_v47 = vsub.f32 %v9821_v28, %v5637_v27  ;;  %v6870_v27 = vld [vmem:[%s10211_s2 + $0x30] sm:$0xff] }
0x1b6d   : > { %7363 = vrsqrt.f32 %v5618_v63  ;;  %v5656_v0 = vmul.f32 %v5636_v46, %v5636_v46  ;;  %v5605_v9 = vmul.f32 %v5585_v45, %v5585_v45 }
0x1b6e   : > { %v5647_v36 = vpop.xlane.xlu0 %5646  ;;  %v5577_v56 = vpop.xlane.xlu1 %5576 }
0x1b6f   : > { %v5653_v4 = vmul.f32 0.0078125, %v5647_v36  ;;  %v5584_v55 = vmul.f32 0.0078125, %v5577_v56  ;;  %v5664_v56 = vsub.f32 %v9817_v62, %v5636_v46  ;;  %v6869_v62 = vld [vmem:[%s10211_s2 + $0x28] sm:$0xff] }
0x1b71   : > { %v5661_v48 = vsub.f32 %v5653_v4, %v5657_v13  ;;  %v5604_v26 = vmul.f32 %v5584_v55, %v5584_v55 }
0x1b72   : > { %v7358_v35 = vpop.eup %7357  ;;  %v5595_v22 = vpop.xlane.xlu0 %5594 }
0x1b73   : > { %v5627_v44 = vmul.f32 %v7358_v35, %v5615_v2  ;;  %v5645_v18 = vpop.xlane.xlu1 %5644  ;;  %v5601_v29 = vmul.f32 0.0078125, %v5595_v22  ;;  %v5669_v10 = vadd.f32 1e-05, %v5661_v48  ;;  %v5613_v2 = vsub.f32 %v9819_v19, %v5585_v45 }
0x1b74   : > { %v5652_v34 = vmul.f32 0.0078125, %v5645_v18  ;;  %v6871_v18 = vld [vmem:[%s10211_s2 + $0x38] sm:$0xff] }
0x1b75   : > { %v6866_v42 = vmul.f32 -1.442695, %v5627_v44  ;;  %v5609_v38 = vsub.f32 %v5601_v29, %v5605_v9 }
0x1b76   : > { %v7360_v59 = vpop.eup %7359  ;;  %v5593_v3 = vpop.xlane.xlu0 %5592  ;;  %v5660_v50 = vsub.f32 %v5652_v34, %v5656_v0 }
0x1b77   : > { %v7362_v54 = vpop.eup %7361  ;;  %7365 = vpow2.f32 %v6866_v42  ;;  %v5678_v41 = vmul.f32 %v7360_v59, %v5666_v20  ;;  %v5600_v30 = vmul.f32 0.0078125, %v5593_v3  ;;  %v5617_v51 = vadd.f32 1e-05, %v5609_v38 }
0x1b78   : > { %v5679_v8 = vmul.f32 %v7362_v54, %v5667_v16  ;;  %v5668_v43 = vadd.f32 1e-05, %v5660_v50  ;;  %v5612_v20 = vsub.f32 %v9815_v25, %v5584_v55  ;;  %v6868_v25 = vld [vmem:[%s10211_s2 + $0x20] sm:$0xff] }
0x1b79   : > { %v6865_v39 = vmul.f32 -1.442695, %v5678_v41  ;;  %v5608_v24 = vsub.f32 %v5600_v30, %v5604_v26 }
0x1b7a   : > { %v7364_v49 = vpop.eup %7363  ;;  %v6867_v21 = vmul.f32 -1.442695, %v5679_v8 }
0x1b7b   : > { %7367 = vpow2.f32 %v6865_v39  ;;  %v5626_v15 = vmul.f32 %v7364_v49, %v5614_v37  ;;  %v5616_v52 = vadd.f32 1e-05, %v5608_v24 }
0x1b7c   : > { %7369 = vpow2.f32 %v6867_v21 }
0x1b7d   : > { %v6864_v17 = vmul.f32 -1.442695, %v5626_v15 }
0x1b7f   : > { %7371 = vpow2.f32 %v6864_v17 }
0x1b80   : > { %7373 = vrsqrt.f32 %v5669_v10 }
0x1b81   : > { %7375 = vrsqrt.f32 %v5668_v43 }
0x1b82   : > { %7377 = vrsqrt.f32 %v5617_v51 }
0x1b83   : > { %7379 = vrsqrt.f32 %v5616_v52 }
0x1b84   : > { %v7366_v1 = vpop.eup %7365 }
0x1b85   : > { %v5694_v53 = vadd.f32 1.0, %v7366_v1 }
0x1b87   : > { %7381 = vrcp.f32 %v5694_v53 }
0x1b88   : > { %v7368_v57 = vpop.eup %7367 }
0x1b89   : > { %v7370_v7 = vpop.eup %7369  ;;  %v5693_v5 = vadd.f32 1.0, %v7368_v57 }
0x1b8a   : > { %v5695_v33 = vadd.f32 1.0, %v7370_v7 }
0x1b8b   : > { %7383 = vrcp.f32 %v5693_v5 }
0x1b8c   : > { %v7372_v12 = vpop.eup %7371  ;;  %7385 = vrcp.f32 %v5695_v33 }
0x1b8d   : > { %v5692_v40 = vadd.f32 1.0, %v7372_v12  ;;  %v7374_v58 = vpop.eup %7373 }
0x1b8e   : > { %v7376_v31 = vpop.eup %7375  ;;  %v5677_v44 = vmul.f32 %v7374_v58, %v5665_v47 }
0x1b8f   : > { %7387 = vrcp.f32 %v5692_v40  ;;  %v7378_v32 = vpop.eup %7377  ;;  %v5676_v16 = vmul.f32 %v7376_v31, %v5664_v56 }
0x1b90   : > { %v7380_v63 = vpop.eup %7379  ;;  %v5625_v42 = vmul.f32 %v7378_v32, %v5613_v2 }
0x1b91   : > { %v5624_v41 = vmul.f32 %v7380_v63, %v5612_v20 }
0x1b94   : > { %v7382_v36 = vpop.eup %7381 }
0x1b95   : > { %v9865_v54 = vmul.f32 %v7382_v36, %v5625_v42 }
0x1b98   : > { %v7384_v35 = vpop.eup %7383 }
0x1b99   : > { %v7386_v22 = vpop.eup %7385  ;;  %v9868_v28 = vmul.f32 %v7384_v35, %v5676_v16 }
0x1b9a   : > { %v9863_v59 = vmul.f32 %v7386_v22, %v5677_v44 }
0x1b9c   : > { %v7388_v8 = vpop.eup %7387  ;;  %5752 = vmatprep.subr.mxu0 %v9863_v59 }
0x1b9d   : > { %5753 = vmatpush1.msra.mxu0 %v9865_v54  ;;  %v9871_v19 = vmul.f32 %v7388_v8, %v5624_v41 }
0x1b9e   : > { %5754 = vmatprep.subr.mxu0 %v9868_v28 }
0x1b9f   : > { %5755 = vmatpush1.msra.mxu0 %v9871_v19 }
0x1ba0   : > { %6872 = vmatmul.mubr.msk.f32.vlgmr.msra.gmra.mxu0 %vm371_vm0, %v6868_v25 }
0x1ba1   : > { %5794 = vmatprep.mubr.f32.mxu0 %v7572_v14 }
0x1ba4   : > { %6873 = vmatmul.mubr.msk.f32.gmra.mxu0 %vm371_vm0, %v6869_v62 }
0x1ba5   : > { %5800 = vmatprep.mubr.f32.mxu0 %v7572_v14 }
0x1ba8   : > { %6874 = vmatmul.mubr.msk.f32.gmra.mxu0 %vm371_vm0, %v6870_v27 }
0x1ba9   : > { %5806 = vmatprep.mubr.f32.mxu0 %v7572_v14 }
0x1bac   : > { %6875 = vmatmul.mubr.msk.f32.gmra.mxu0 %vm371_vm0, %v6871_v18 }
0x1bad   : > { %6280 = vmatprep.mubr.f32.mxu0 %v7572_v14 }
0x1c60   : > { %v9895_v37 = vpop.f32.mrf.mxu0 }
0x1c61   : > { %v5825_v30 = vmul.f32 %v9895_v37, %v9895_v37 }
0x1c62   : > { %v9897_v39 = vpop.f32.mrf.mxu0 }
0x1c63   : > { %v5877_v17 = vmul.f32 %v9897_v39, %v9897_v39 }
0x1c64   : > { %v9899_v46 = vpop.f32.mrf.mxu0 }
0x1c65   : > { %v5826_v0 = vmul.f32 %v9899_v46, %v9899_v46 }
0x1c66   : > { %v9901_v49 = vpop.f32.mrf.mxu0 }
0x1c67   : > { %v5878_v29 = vmul.f32 %v9901_v49, %v9901_v49 }
0x1c68   : > { %v9903_v21 = vpop.f32.mrf.mxu0 }
0x1c69   : > { %5817 = vadd.xlane.f32.xlu1 %v9903_v21  ;;  %v5827_v13 = vmul.f32 %v9903_v21, %v9903_v21 }
0x1c6a   : > { %v9906_v45 = vpop.f32.mrf.mxu0 }
0x1c6b   : > { %v5879_v55 = vmul.f32 %v9906_v45, %v9906_v45 }
0x1c6c   : > { %v9908_v4 = vpop.f32.mrf.mxu0 }
0x1c6d   : > { %5869 = vadd.xlane.f32.xlu1 %v9906_v45  ;;  %5819 = vadd.xlane.f32.xlu0 %v9908_v4  ;;  %v5828_v3 = vmul.f32 %v9908_v4, %v9908_v4 }
0x1c6e   : > { %v9914_v15 = vpop.f32.mrf.mxu0 }
0x1c6f   : > { %v5880_v34 = vmul.f32 %v9914_v15, %v9914_v15 }
0x1c71   : > { %5835 = vadd.xlane.f32.xlu0 %v5828_v3  ;;  %5871 = vadd.xlane.f32.xlu1 %v9914_v15 }
0x1c75   : > { %5885 = vadd.xlane.f32.xlu1 %v5879_v55  ;;  %5887 = vadd.xlane.f32.xlu0 %v5880_v34 }
0x1c79   : > { %5867 = vadd.xlane.f32.xlu1 %v9901_v49  ;;  %5833 = vadd.xlane.f32.xlu0 %v5827_v13 }
0x1c7d   : > { %5865 = vadd.xlane.f32.xlu1 %v9897_v39  ;;  %5815 = vadd.xlane.f32.xlu0 %v9899_v46 }
0x1c81   : > { %5813 = vadd.xlane.f32.xlu1 %v9895_v37  ;;  %5883 = vadd.xlane.f32.xlu0 %v5878_v29 }
0x1c85   : > { %5881 = vadd.xlane.f32.xlu1 %v5877_v17  ;;  %5831 = vadd.xlane.f32.xlu0 %v5826_v0 }
0x1c89   : > { %5829 = vadd.xlane.f32.xlu0 %v5825_v30 }
0x1cf2   : > { %v5818_v9 = vpop.xlane.xlu1 %5817 }
0x1cf3   : > { %v5823_v53 = vmul.f32 0.0078125, %v5818_v9 }
0x1cf5   : > { %v5843_v36 = vmul.f32 %v5823_v53, %v5823_v53 }
0x1cf6   : > { %v5870_v48 = vpop.xlane.xlu1 %5869  ;;  %v5820_v26 = vpop.xlane.xlu0 %5819 }
0x1cf7   : > { %v5824_v50 = vmul.f32 0.0078125, %v5820_v26  ;;  %v5875_v38 = vmul.f32 0.0078125, %v5870_v48  ;;  %v5851_v48 = vsub.f32 %v9903_v21, %v5823_v53 }
0x1cf9   : > { %v5844_v43 = vmul.f32 %v5824_v50, %v5824_v50  ;;  %v5895_v57 = vmul.f32 %v5875_v38, %v5875_v38  ;;  %v5852_v41 = vsub.f32 %v9908_v4, %v5824_v50  ;;  %v5903_v27 = vsub.f32 %v9906_v45, %v5875_v38 }
0x1cfa   : > { %v5836_v24 = vpop.xlane.xlu0 %5835  ;;  %v5872_v10 = vpop.xlane.xlu1 %5871 }
0x1cfb   : > { %v5840_v1 = vmul.f32 0.0078125, %v5836_v24  ;;  %v5876_v51 = vmul.f32 0.0078125, %v5872_v10 }
0x1cfd   : > { %v5848_v52 = vsub.f32 %v5840_v1, %v5844_v43  ;;  %v5896_v12 = vmul.f32 %v5876_v51, %v5876_v51  ;;  %v5904_v34 = vsub.f32 %v9914_v15, %v5876_v51 }
0x1cfe   : > { %v5886_v7 = vpop.xlane.xlu1 %5885  ;;  %v5888_v5 = vpop.xlane.xlu0 %5887 }
0x1cff   : > { %v5856_v33 = vadd.f32 1e-05, %v5848_v52  ;;  %v5891_v40 = vmul.f32 0.0078125, %v5886_v7  ;;  %v5892_v58 = vmul.f32 0.0078125, %v5888_v5 }
0x1d01   : > { %7389 = vrsqrt.f32 %v5856_v33  ;;  %v5899_v31 = vsub.f32 %v5891_v40, %v5895_v57  ;;  %v5900_v32 = vsub.f32 %v5892_v58, %v5896_v12 }
0x1d02   : > { %v5868_v63 = vpop.xlane.xlu1 %5867  ;;  %v5834_v47 = vpop.xlane.xlu0 %5833 }
0x1d03   : > { %v5907_v2 = vadd.f32 1e-05, %v5899_v31  ;;  %v5908_v35 = vadd.f32 1e-05, %v5900_v32  ;;  %v5839_v56 = vmul.f32 0.0078125, %v5834_v47  ;;  %v5874_v10 = vmul.f32 0.0078125, %v5868_v63 }
0x1d05   : > { %7391 = vrsqrt.f32 %v5907_v2  ;;  %v5847_v44 = vsub.f32 %v5839_v56, %v5843_v36  ;;  %v5894_v5 = vmul.f32 %v5874_v10, %v5874_v10 }
0x1d06   : > { %7393 = vrsqrt.f32 %v5908_v35  ;;  %v5816_v22 = vpop.xlane.xlu0 %5815  ;;  %v5866_v42 = vpop.xlane.xlu1 %5865 }
0x1d07   : > { %v5855_v20 = vadd.f32 1e-05, %v5847_v44  ;;  %v5822_v17 = vmul.f32 0.0078125, %v5816_v22  ;;  %v5873_v9 = vmul.f32 0.0078125, %v5866_v42 }
0x1d09   : > { %7395 = vrsqrt.f32 %v5855_v20  ;;  %v5842_v43 = vmul.f32 %v5822_v17, %v5822_v17  ;;  %v5893_v15 = vmul.f32 %v5873_v9, %v5873_v9 }
0x1d0a   : > { %v5884_v16 = vpop.xlane.xlu0 %5883  ;;  %v5814_v8 = vpop.xlane.xlu1 %5813 }
0x1d0b   : > { %v5821_v51 = vmul.f32 0.0078125, %v5814_v8  ;;  %v5890_v52 = vmul.f32 0.0078125, %v5884_v16 }
0x1d0d   : > { %v5841_v21 = vmul.f32 %v5821_v51, %v5821_v51  ;;  %v5898_v53 = vsub.f32 %v5890_v52, %v5894_v5 }
0x1d0e   : > { %v7390_v25 = vpop.eup %7389  ;;  %v5832_v3 = vpop.xlane.xlu0 %5831 }
0x1d0f   : > { %v5864_v62 = vmul.f32 %v7390_v25, %v5852_v41  ;;  %v5882_v0 = vpop.xlane.xlu1 %5881  ;;  %v5838_v26 = vmul.f32 0.0078125, %v5832_v3  ;;  %v5906_v63 = vadd.f32 1e-05, %v5898_v53  ;;  %v5850_v41 = vsub.f32 %v9899_v46, %v5822_v17 }
0x1d10   : > { %v5889_v45 = vmul.f32 0.0078125, %v5882_v0 }
0x1d11   : > { %v6878_v18 = vmul.f32 -1.442695, %v5864_v62  ;;  %v5846_v7 = vsub.f32 %v5838_v26, %v5842_v43  ;;  %v5901_v62 = vsub.f32 %v9897_v39, %v5873_v9 }
0x1d12   : > { %v7392_v55 = vpop.eup %7391  ;;  %v5830_v1 = vpop.xlane.xlu0 %5829  ;;  %v5897_v33 = vsub.f32 %v5889_v45, %v5893_v15  ;;  %v6883_v45 = vld [vmem:[%s10211_s2 + $0x118] sm:$0xff] }
0x1d13   : > { %v7394_v13 = vpop.eup %7393  ;;  %7397 = vpow2.f32 %v6878_v18  ;;  %v5915_v29 = vmul.f32 %v7392_v55, %v5903_v27  ;;  %v5837_v12 = vmul.f32 0.0078125, %v5830_v1  ;;  %v5854_v40 = vadd.f32 1e-05, %v5846_v7 }
0x1d14   : > { %v5916_v30 = vmul.f32 %v7394_v13, %v5904_v34  ;;  %v5905_v58 = vadd.f32 1e-05, %v5897_v33  ;;  %v5902_v18 = vsub.f32 %v9901_v49, %v5874_v10 }
0x1d15   : > { %v6877_v4 = vmul.f32 -1.442695, %v5915_v29  ;;  %v5845_v31 = vsub.f32 %v5837_v12, %v5841_v21 }
0x1d16   : > { %v7396_v50 = vpop.eup %7395  ;;  %v6879_v24 = vmul.f32 -1.442695, %v5916_v30  ;;  %v5849_v30 = vsub.f32 %v9895_v37, %v5821_v51 }
0x1d17   : > { %7399 = vpow2.f32 %v6877_v4  ;;  %v5863_v38 = vmul.f32 %v7396_v50, %v5851_v48  ;;  %v5853_v36 = vadd.f32 1e-05, %v5845_v31 }
0x1d18   : > { %7401 = vpow2.f32 %v6879_v24 }
0x1d19   : > { %v6876_v57 = vmul.f32 -1.442695, %v5863_v38 }
0x1d1b   : > { %7403 = vpow2.f32 %v6876_v57 }
0x1d1c   : > { %7405 = vrsqrt.f32 %v5854_v40 }
0x1d1d   : > { %7407 = vrsqrt.f32 %v5905_v58 }
0x1d20   : > { %v7398_v32 = vpop.eup %7397 }
0x1d21   : > { %v5931_v47 = vadd.f32 1.0, %v7398_v32  ;;  %v10241_v32 = vld [vmem:[#allocation9_spill] sm:$0xff] }
0x1d23   : > { %7409 = vrcp.f32 %v5931_v47  ;;  %v2894_v47 = vmul.f32 %v10241_v32, %v10241_v32 }
0x1d24   : > { %v7400_v2 = vpop.eup %7399  ;;  %7411 = vrsqrt.f32 %v5906_v63  ;;  %v2842_v63 = vmul.f32 %v8738_v61, %v8738_v61 }
0x1d25   : > { %v7402_v35 = vpop.eup %7401  ;;  %v5930_v56 = vadd.f32 1.0, %v7400_v2  ;;  %7413 = vrsqrt.f32 %v5853_v36  ;;  %v4584_v36 = vmul.f32 %v9412_v6, %v9412_v6  ;;  %v4636_v2 = vmul.f32 %v9414_v60, %v9414_v60 }
0x1d26   : > { %v5932_v44 = vadd.f32 1.0, %v7402_v35 }
0x1d27   : > { %7415 = vrcp.f32 %v5930_v56 }
0x1d28   : > { %v7404_v22 = vpop.eup %7403  ;;  %7417 = vrcp.f32 %v5932_v44 }
0x1d29   : > { %v5929_v20 = vadd.f32 1.0, %v7404_v22  ;;  %v7406_v42 = vpop.eup %7405 }
0x1d2a   : > { %v7408_v16 = vpop.eup %7407  ;;  %v5862_v27 = vmul.f32 %v7406_v42, %v5850_v41 }
0x1d2b   : > { %7419 = vrcp.f32 %v5929_v20  ;;  %v5913_v34 = vmul.f32 %v7408_v16, %v5901_v62 }
0x1d30   : > { %v7410_v8 = vpop.eup %7409 }
0x1d31   : > { %v7412_v25 = vpop.eup %7411  ;;  %v5943_v55 = vmul.f32 %v7410_v8, %v5862_v27 }
0x1d32   : > { %v7414_v3 = vpop.eup %7413  ;;  %v5914_v29 = vmul.f32 %v7412_v25, %v5902_v18 }
0x1d33   : > { %v5947_v26 = vadd.f32 %v5943_v55, %v9865_v54  ;;  %v5861_v46 = vmul.f32 %v7414_v3, %v5849_v30 }
0x1d34   : > { %v7416_v13 = vpop.eup %7415 }
0x1d35   : > { %v7418_v0 = vpop.eup %7417  ;;  %v5942_v48 = vmul.f32 %v7416_v13, %v5913_v34  ;;  %v9948_v24 = vmul.f32 0.70710677, %v5947_v26 }
0x1d36   : > { %v5944_v4 = vmul.f32 %v7418_v0, %v5914_v29 }
0x1d37   : > { %v5946_v39 = vadd.f32 %v5942_v48, %v9868_v28  ;;  %v6881_v28 = vld [vmem:[%s10211_s2 + $0x108] sm:$0xff] }
0x1d38   : > { %v7420_v17 = vpop.eup %7419  ;;  %v5948_v50 = vadd.f32 %v5944_v4, %v9863_v59  ;;  %v6880_v59 = vld [vmem:[%s10211_s2 + $0x100] sm:$0xff] }
0x1d39   : > { %v5941_v9 = vmul.f32 %v7420_v17, %v5861_v46  ;;  %v9952_v37 = vmul.f32 0.70710677, %v5946_v39 }
0x1d3a   : > { %v9946_v49 = vmul.f32 0.70710677, %v5948_v50 }
0x1d3b   : > { %v5945_v10 = vadd.f32 %v5941_v9, %v9871_v19  ;;  %v6882_v19 = vld [vmem:[%s10211_s2 + $0x110] sm:$0xff] }
0x1d3c   : > { %5998 = vmatprep.subr.mxu1 %v9946_v49 }
0x1d3d   : > { %5999 = vmatpush1.msra.mxu1 %v9948_v24  ;;  %v9955_v54 = vmul.f32 0.70710677, %v5945_v10 }
0x1d3e   : > { %6000 = vmatprep.subr.mxu1 %v9952_v37 }
0x1d3f   : > { %6001 = vmatpush1.msra.mxu1 %v9955_v54 }
0x1d40   : > { %6884 = vmatmul.mubr.msk.f32.vlgmr.msra.gmra.mxu1 %vm371_vm0, %v6880_v59 }
0x1d41   : > { %6040 = vmatprep.mubr.f32.mxu1 %v7572_v14 }
0x1d44   : > { %6885 = vmatmul.mubr.msk.f32.gmra.mxu1 %vm371_vm0, %v6881_v28 }
0x1d45   : > { %6046 = vmatprep.mubr.f32.mxu1 %v7572_v14 }
0x1d48   : > { %6886 = vmatmul.mubr.msk.f32.gmra.mxu1 %vm371_vm0, %v6882_v19 }
0x1d49   : > { %6052 = vmatprep.mubr.f32.mxu1 %v7572_v14 }
0x1d4c   : > { %6887 = vmatmul.mubr.msk.f32.gmra.mxu1 %vm371_vm0, %v6883_v45 }
0x1e00   : > { %v9978_v38 = vpop.f32.mrf.mxu1 }
0x1e01   : > { %v6071_v31 = vmul.f32 %v9978_v38, %v9978_v38 }
0x1e02   : > { %v9980_v43 = vpop.f32.mrf.mxu1 }
0x1e03   : > { %v6123_v40 = vmul.f32 %v9980_v43, %v9980_v43 }
0x1e04   : > { %v9982_v1 = vpop.f32.mrf.mxu1 }
0x1e05   : > { %v6072_v58 = vmul.f32 %v9982_v1, %v9982_v1 }
0x1e06   : > { %v9984_v15 = vpop.f32.mrf.mxu1 }
0x1e07   : > { %v6124_v53 = vmul.f32 %v9984_v15, %v9984_v15 }
0x1e08   : > { %v9986_v51 = vpop.f32.mrf.mxu1 }
0x1e09   : > { %6063 = vadd.xlane.f32.xlu1 %v9986_v51  ;;  %v6073_v21 = vmul.f32 %v9986_v51, %v9986_v51 }
0x1e0a   : > { %v9989_v52 = vpop.f32.mrf.mxu1 }
0x1e0b   : > { %v6125_v33 = vmul.f32 %v9989_v52, %v9989_v52 }
0x1e0c   : > { %v9991_v57 = vpop.f32.mrf.mxu1 }
0x1e0d   : > { %6115 = vadd.xlane.f32.xlu1 %v9989_v52  ;;  %6065 = vadd.xlane.f32.xlu0 %v9991_v57  ;;  %v6074_v7 = vmul.f32 %v9991_v57, %v9991_v57 }
0x1e0e   : > { %v9997_v5 = vpop.f32.mrf.mxu1 }
0x1e0f   : > { %v6126_v12 = vmul.f32 %v9997_v5, %v9997_v5 }
0x1e11   : > { %6081 = vadd.xlane.f32.xlu0 %v6074_v7  ;;  %6117 = vadd.xlane.f32.xlu1 %v9997_v5 }
0x1e15   : > { %6131 = vadd.xlane.f32.xlu1 %v6125_v33  ;;  %6133 = vadd.xlane.f32.xlu0 %v6126_v12 }
0x1e19   : > { %6113 = vadd.xlane.f32.xlu1 %v9984_v15  ;;  %6079 = vadd.xlane.f32.xlu0 %v6073_v21 }
0x1e1d   : > { %6111 = vadd.xlane.f32.xlu1 %v9980_v43  ;;  %6061 = vadd.xlane.f32.xlu0 %v9982_v1 }
0x1e21   : > { %6059 = vadd.xlane.f32.xlu1 %v9978_v38  ;;  %6129 = vadd.xlane.f32.xlu0 %v6124_v53 }
0x1e25   : > { %6127 = vadd.xlane.f32.xlu1 %v6123_v40  ;;  %6077 = vadd.xlane.f32.xlu0 %v6072_v58 }
0x1e29   : > { %2832 = vadd.xlane.f32.xlu1 %v8738_v61  ;;  %6075 = vadd.xlane.f32.xlu0 %v6071_v31 }
0x1e2d   : > { %4574 = vadd.xlane.f32.xlu1 %v9412_v6  ;;  %2884 = vadd.xlane.f32.xlu0 %v10241_v32 }
0x1e31   : > { %2848 = vadd.xlane.f32.xlu1 %v2842_v63  ;;  %4626 = vadd.xlane.f32.xlu0 %v9414_v60 }
0x1e35   : > { %4590 = vadd.xlane.f32.xlu1 %v4584_v36  ;;  %2900 = vadd.xlane.f32.xlu0 %v2894_v47 }
0x1e39   : > { %4642 = vadd.xlane.f32.xlu0 %v4636_v2 }
0x1e92   : > { %v6064_v35 = vpop.xlane.xlu1 %6063 }
0x1e93   : > { %v6069_v27 = vmul.f32 0.0078125, %v6064_v35 }
0x1e95   : > { %v6089_v46 = vmul.f32 %v6069_v27, %v6069_v27 }
0x1e96   : > { %v6116_v56 = vpop.xlane.xlu1 %6115  ;;  %v6066_v44 = vpop.xlane.xlu0 %6065 }
0x1e97   : > { %v6070_v22 = vmul.f32 0.0078125, %v6066_v44  ;;  %v6121_v20 = vmul.f32 0.0078125, %v6116_v56  ;;  %v6097_v44 = vsub.f32 %v9986_v51, %v6069_v27 }
0x1e99   : > { %v6090_v41 = vmul.f32 %v6070_v22, %v6070_v22  ;;  %v6141_v18 = vmul.f32 %v6121_v20, %v6121_v20  ;;  %v6098_v45 = vsub.f32 %v9991_v57, %v6070_v22  ;;  %v6149_v21 = vsub.f32 %v9989_v52, %v6121_v20 }
0x1e9a   : > { %v6082_v42 = vpop.xlane.xlu0 %6081  ;;  %v6118_v16 = vpop.xlane.xlu1 %6117 }
0x1e9b   : > { %v6086_v8 = vmul.f32 0.0078125, %v6082_v42  ;;  %v6122_v25 = vmul.f32 0.0078125, %v6118_v16 }
0x1e9d   : > { %v6094_v62 = vsub.f32 %v6086_v8, %v6090_v41  ;;  %v6142_v13 = vmul.f32 %v6122_v25, %v6122_v25  ;;  %v6150_v31 = vsub.f32 %v9997_v5, %v6122_v25 }
0x1e9e   : > { %v6132_v3 = vpop.xlane.xlu1 %6131  ;;  %v6134_v55 = vpop.xlane.xlu0 %6133 }
0x1e9f   : > { %v6102_v34 = vadd.f32 1e-05, %v6094_v62  ;;  %v6137_v29 = vmul.f32 0.0078125, %v6132_v3  ;;  %v6138_v0 = vmul.f32 0.0078125, %v6134_v55 }
0x1ea1   : > { %7421 = vrsqrt.f32 %v6102_v34  ;;  %v6145_v30 = vsub.f32 %v6137_v29, %v6141_v18  ;;  %v6146_v48 = vsub.f32 %v6138_v0, %v6142_v13 }
0x1ea2   : > { %v6114_v4 = vpop.xlane.xlu1 %6113  ;;  %v6080_v26 = vpop.xlane.xlu0 %6079 }
0x1ea3   : > { %v6153_v17 = vadd.f32 1e-05, %v6145_v30  ;;  %v6154_v50 = vadd.f32 1e-05, %v6146_v48  ;;  %v6085_v39 = vmul.f32 0.0078125, %v6080_v26  ;;  %v6120_v41 = vmul.f32 0.0078125, %v6114_v4 }
0x1ea5   : > { %7423 = vrsqrt.f32 %v6153_v17  ;;  %v6093_v9 = vsub.f32 %v6085_v39, %v6089_v46  ;;  %v6140_v34 = vmul.f32 %v6120_v41, %v6120_v41 }
0x1ea6   : > { %7425 = vrsqrt.f32 %v6154_v50  ;;  %v6062_v10 = vpop.xlane.xlu0 %6061  ;;  %v6112_v28 = vpop.xlane.xlu1 %6111 }
0x1ea7   : > { %v6101_v59 = vadd.f32 1e-05, %v6093_v9  ;;  %v6068_v36 = vmul.f32 0.0078125, %v6062_v10  ;;  %v6119_v56 = vmul.f32 0.0078125, %v6112_v28 }
0x1ea9   : > { %7427 = vrsqrt.f32 %v6101_v59  ;;  %v6088_v8 = vmul.f32 %v6068_v36, %v6068_v36  ;;  %v6139_v5 = vmul.f32 %v6119_v56, %v6119_v56 }
0x1eaa   : > { %v6130_v19 = vpop.xlane.xlu0 %6129  ;;  %v6060_v7 = vpop.xlane.xlu1 %6059 }
0x1eab   : > { %v6067_v25 = vmul.f32 0.0078125, %v6060_v7  ;;  %v6136_v18 = vmul.f32 0.0078125, %v6130_v19  ;;  %v6096_v7 = vsub.f32 %v9982_v1, %v6068_v36 }
0x1ead   : > { %v6087_v51 = vmul.f32 %v6067_v25, %v6067_v25  ;;  %v6144_v27 = vsub.f32 %v6136_v18, %v6140_v34  ;;  %v10242_v34 = vld [vmem:[#allocation7_spill] sm:$0xff] }
0x1eae   : > { %v7422_v33 = vpop.eup %7421  ;;  %v6078_v40 = vpop.xlane.xlu0 %6077 }
0x1eaf   : > { %v6110_v12 = vmul.f32 %v7422_v33, %v6098_v45  ;;  %v6128_v2 = vpop.xlane.xlu1 %6127  ;;  %v6084_v22 = vmul.f32 0.0078125, %v6078_v40  ;;  %v6152_v26 = vadd.f32 1e-05, %v6144_v27  ;;  %v6148_v40 = vsub.f32 %v9984_v15, %v6120_v41 }
0x1eb0   : > { %v6135_v52 = vmul.f32 0.0078125, %v6128_v2  ;;  %v4582_v27 = vmul.f32 %v9404_v23, %v9404_v23 }
0x1eb1   : > { %v6890_v53 = vmul.f32 -1.442695, %v6110_v12  ;;  %v6092_v55 = vsub.f32 %v6084_v22, %v6088_v8 }
0x1eb2   : > { %v7424_v58 = vpop.eup %7423  ;;  %v6076_v62 = vpop.xlane.xlu0 %6075  ;;  %v6143_v13 = vsub.f32 %v6135_v52, %v6139_v5 }
0x1eb3   : > { %v7426_v63 = vpop.eup %7425  ;;  %7429 = vpow2.f32 %v6890_v53  ;;  %v6161_v47 = vmul.f32 %v7424_v58, %v6149_v21  ;;  %v6083_v29 = vmul.f32 0.0078125, %v6076_v62  ;;  %v6100_v0 = vadd.f32 1e-05, %v6092_v55 }
0x1eb4   : > { %v6162_v35 = vmul.f32 %v7426_v63, %v6150_v31  ;;  %v6151_v30 = vadd.f32 1e-05, %v6143_v13  ;;  %v6147_v21 = vsub.f32 %v9980_v43, %v6119_v56  ;;  %v10243_v13 = vld [vmem:[#allocation8_spill] sm:$0xff] }
0x1eb5   : > { %v6889_v57 = vmul.f32 -1.442695, %v6161_v47  ;;  %v6091_v48 = vsub.f32 %v6083_v29, %v6087_v51  ;;  %v2840_v29 = vmul.f32 %v10242_v34, %v10242_v34  ;;  %v2892_v51 = vmul.f32 %v10243_v13, %v10243_v13 }
0x1eb6   : > { %v7428_v42 = vpop.eup %7427  ;;  %v6891_v16 = vmul.f32 -1.442695, %v6162_v35 }
0x1eb7   : > { %7431 = vpow2.f32 %v6889_v57  ;;  %v6109_v20 = vmul.f32 %v7428_v42, %v6097_v44  ;;  %v6099_v17 = vadd.f32 1e-05, %v6091_v48  ;;  %v6095_v44 = vsub.f32 %v9978_v38, %v6067_v25 }
0x1eb8   : > { %7433 = vpow2.f32 %v6891_v16 }
0x1eb9   : > { %v6888_v3 = vmul.f32 -1.442695, %v6109_v20 }
0x1ebb   : > { %7435 = vpow2.f32 %v6888_v3 }
0x1ebc   : > { %7437 = vrsqrt.f32 %v6100_v0  ;;  %v4634_v0 = vmul.f32 %v9406_v11, %v9406_v11 }
0x1ebd   : > { %7439 = vrsqrt.f32 %v6151_v30 }
0x1ec0   : > { %v7430_v4 = vpop.eup %7429 }
0x1ec1   : > { %v6177_v46 = vadd.f32 1.0, %v7430_v4 }
0x1ec3   : > { %7441 = vrcp.f32 %v6177_v46 }
0x1ec4   : > { %v7432_v50 = vpop.eup %7431  ;;  %7443 = vrsqrt.f32 %v6152_v26  ;;  %v2833_v26 = vpop.xlane.xlu1 %2832 }
0x1ec5   : > { %v7434_v39 = vpop.eup %7433  ;;  %v6176_v9 = vadd.f32 1.0, %v7432_v50  ;;  %7445 = vrsqrt.f32 %v6099_v17  ;;  %v2885_v17 = vpop.xlane.xlu0 %2884 }
0x1ec6   : > { %v6178_v10 = vadd.f32 1.0, %v7434_v39 }
0x1ec7   : > { %7447 = vrcp.f32 %v6176_v9 }
0x1ec8   : > { %v7436_v59 = vpop.eup %7435  ;;  %7449 = vrcp.f32 %v6178_v10  ;;  %v4575_v50 = vpop.xlane.xlu1 %4574  ;;  %v2838_v10 = vmul.f32 0.0078125, %v2833_v26 }
0x1ec9   : > { %v6175_v28 = vadd.f32 1.0, %v7436_v59  ;;  %v7438_v19 = vpop.eup %7437  ;;  %v4627_v39 = vpop.xlane.xlu0 %4626 }
0x1eca   : > { %v7440_v45 = vpop.eup %7439  ;;  %v6108_v53 = vmul.f32 %v7438_v19, %v6096_v7  ;;  %v2858_v7 = vmul.f32 %v2838_v10, %v2838_v10 }
0x1ecb   : > { %7451 = vrcp.f32 %v6175_v28  ;;  %v6159_v63 = vmul.f32 %v7440_v45, %v6147_v21  ;;  %v2890_v28 = vmul.f32 0.0078125, %v2885_v17 }
0x1ecc   : > { %v2849_v9 = vpop.xlane.xlu1 %2848 }
0x1ecd   : > { %v2901_v59 = vpop.xlane.xlu0 %2900  ;;  %v2854_v19 = vmul.f32 0.0078125, %v2849_v9  ;;  %v2910_v21 = vmul.f32 %v2890_v28, %v2890_v28 }
0x1ed0   : > { %v7442_v33 = vpop.eup %7441  ;;  %v4591_v45 = vpop.xlane.xlu1 %4590 }
0x1ed1   : > { %v7444_v12 = vpop.eup %7443  ;;  %v6189_v31 = vmul.f32 %v7442_v33, %v6108_v53  ;;  %v4580_v33 = vmul.f32 0.0078125, %v4575_v50  ;;  %v2862_v53 = vsub.f32 %v2854_v19, %v2858_v7 }
0x1ed2   : > { %v7446_v58 = vpop.eup %7445  ;;  %v6160_v2 = vmul.f32 %v7444_v12, %v6148_v40  ;;  %v2906_v12 = vmul.f32 0.0078125, %v2901_v59  ;;  %v4596_v40 = vmul.f32 0.0078125, %v4591_v45 }
0x1ed3   : > { %v6193_v42 = vadd.f32 %v6189_v31, %v9948_v24  ;;  %v6107_v1 = vmul.f32 %v7446_v58, %v6095_v44  ;;  %v6892_v24 = vld [vmem:[%s10211_s2 + $0x120] sm:$0xff]  ;;  %v4600_v58 = vmul.f32 %v4580_v33, %v4580_v33 }
0x1ed4   : > { %v7448_v47 = vpop.eup %7447  ;;  %v2914_v31 = vsub.f32 %v2906_v12, %v2910_v21 }
0x1ed5   : > { %v7450_v35 = vpop.eup %7449  ;;  %v6188_v57 = vmul.f32 %v7448_v47, %v6159_v63  ;;  %v6197_v41 = vmul.f32 0.70710677, %v6193_v42  ;;  %v4643_v63 = vpop.xlane.xlu0 %4642  ;;  %v2870_v47 = vadd.f32 1e-05, %v2862_v53 }
0x1ed6   : > { %v6190_v22 = vmul.f32 %v7450_v35, %v6160_v2  ;;  %v4632_v2 = vmul.f32 0.0078125, %v4627_v39  ;;  %v4604_v35 = vsub.f32 %v4596_v40, %v4600_v58  ;;  %v2922_v44 = vadd.f32 1e-05, %v2914_v31 }
0x1ed7   : > { %v6192_v43 = vadd.f32 %v6188_v57, %v9952_v37  ;;  %v6894_v37 = vld [vmem:[%s10211_s2 + $0x130] sm:$0xff]  ;;  %v4648_v57 = vmul.f32 0.0078125, %v4643_v63  ;;  %7453 = vrsqrt.f32 %v2870_v47 }
0x1ed8   : > { %v7452_v36 = vpop.eup %7451  ;;  %v6194_v16 = vadd.f32 %v6190_v22, %v9946_v49  ;;  %v6893_v49 = vld [vmem:[%s10211_s2 + $0x128] sm:$0xff]  ;;  %v4652_v22 = vmul.f32 %v4632_v2, %v4632_v2  ;;  %v4612_v42 = vadd.f32 1e-05, %v4604_v35  ;;  %7455 = vrsqrt.f32 %v2922_v44 }
0x1ed9   : > { %v6187_v56 = vmul.f32 %v7452_v36, %v6107_v1  ;;  %v10042_v20 = vmul.f32 0.70710677, %v6192_v43  ;;  %v2866_v43 = vsub.f32 %v8738_v61, %v2838_v10  ;;  %v4660_v61 = vsub.f32 %v9414_v60, %v4632_v2 }
0x1eda   : > { %v6198_v15 = vmul.f32 0.70710677, %v6194_v16  ;;  %v4656_v1 = vsub.f32 %v4648_v57, %v4652_v22  ;;  %7457 = vrsqrt.f32 %v4612_v42 }
0x1edb   : > { %v6191_v52 = vadd.f32 %v6187_v56, %v9955_v54  ;;  %v6895_v54 = vld [vmem:[%s10211_s2 + $0x138] sm:$0xff] }
0x1edc   : > { %6244 = vmatprep.subr.mxu0 %v6198_v15  ;;  %v4664_v36 = vadd.f32 1e-05, %v4656_v1  ;;  %v2918_v15 = vsub.f32 %v10241_v32, %v2890_v28 }
0x1edd   : > { %6245 = vmatpush1.msra.mxu0 %v6197_v41  ;;  %v10044_v38 = vmul.f32 0.70710677, %v6191_v52 }
0x1ede   : > { %6246 = vmatprep.subr.mxu0 %v10042_v20  ;;  %7459 = vrsqrt.f32 %v4664_v36 }
0x1edf   : > { %6247 = vmatpush1.msra.mxu0 %v10044_v38 }
0x1ee0   : > { %6896 = vmatmul.mubr.msk.f32.vlgmr.msra.gmra.mxu0 %vm371_vm0, %v6892_v24  ;;  %v4608_v24 = vsub.f32 %v9412_v6, %v4580_v33 }
0x1ee1   : > { %6286 = vmatprep.mubr.f32.mxu0 %v7572_v14 }
0x1ee4   : > { %6897 = vmatmul.mubr.msk.f32.gmra.mxu0 %vm371_vm0, %v6893_v49  ;;  %v7454_v16 = vpop.eup %7453 }
0x1ee5   : > { %6290 = vmatprep.mubr.f32.mxu0 %v7572_v14  ;;  %v7456_v56 = vpop.eup %7455  ;;  %v2878_v41 = vmul.f32 %v7454_v16, %v2866_v43 }
0x1ee6   : > { %v2930_v49 = vmul.f32 %v7456_v56, %v2918_v15 }
0x1ee7   : > { %v7458_v52 = vpop.eup %7457 }
0x1ee8   : > { %6898 = vmatmul.mubr.msk.f32.gmra.mxu0 %vm371_vm0, %v6894_v37 }
0x1ee9   : > { %6296 = vmatprep.mubr.f32.mxu0 %v7572_v14 }
0x1eec   : > { %6899 = vmatmul.mubr.msk.f32.gmra.mxu0 %vm371_vm0, %v6895_v54 }
0x1fa0   : > { %v10067_v8 = vpop.f32.mrf.mxu0 }
0x1fa1   : > { %v6307_v30 = vmul.f32 %v10067_v8, %v10067_v8 }
0x1fa2   : > { %v10069_v62 = vpop.f32.mrf.mxu0 }
0x1fa3   : > { %v6333_v48 = vmul.f32 %v10069_v62, %v10069_v62 }
0x1fa4   : > { %v6288_v5 = vpop.f32.mrf.mxu0 }
0x1fa5   : > { %v6662_v5 = vmul.f32 -1.442695, %v2878_v41 }
0x1fa6   : > { %v6289_v25 = vpop.f32.mrf.mxu0 }
0x1fa7   : > { %v4620_v25 = vmul.f32 %v7458_v52, %v4608_v24  ;;  %7461 = vpow2.f32 %v6662_v5 }
0x1fa8   : > { %v10071_v18 = vpop.f32.mrf.mxu0 }
0x1fa9   : > { %6303 = vadd.xlane.f32.xlu1 %v10071_v18  ;;  %v6308_v14 = vmul.f32 %v10071_v18, %v10071_v18  ;;  %v6780_v32 = vmul.f32 -1.442695, %v4620_v25 }
0x1faa   : > { %v10074_v3 = vpop.f32.mrf.mxu0 }
0x1fab   : > { %6329 = vadd.xlane.f32.xlu0 %v10074_v3  ;;  %v6334_v55 = vmul.f32 %v10074_v3, %v10074_v3 }
0x1fac   : > { %v6298_v4 = vpop.f32.mrf.mxu0 }
0x1fad   : > { %6311 = vadd.xlane.f32.xlu1 %v6308_v14 }
0x1fae   : > { %v6299_v46 = vpop.f32.mrf.mxu0 }
0x1faf   : > { %6337 = vadd.xlane.f32.xlu0 %v6334_v55 }
0x1fb1   : > { %2828 = vadd.xlane.f32.xlu1 %v10242_v34 }
0x1fb3   : > { %2880 = vadd.xlane.f32.xlu0 %v10243_v13 }
0x1fb5   : > { %4570 = vadd.xlane.f32.xlu1 %v9404_v23 }
0x1fb7   : > { %4622 = vadd.xlane.f32.xlu0 %v9406_v11 }
0x1fb9   : > { %6301 = vadd.xlane.f32.xlu1 %v10067_v8 }
0x1fbb   : > { %6327 = vadd.xlane.f32.xlu0 %v10069_v62 }
0x1fbd   : > { %2844 = vadd.xlane.f32.xlu1 %v2840_v29  ;;  %v6663_v29 = vmul.f32 -1.442695, %v2930_v49 }
0x1fbf   : > { %2896 = vadd.xlane.f32.xlu0 %v2892_v51  ;;  %7463 = vpow2.f32 %v6663_v29 }
0x1fc0   : > { %7465 = vpow2.f32 %v6780_v32 }
0x1fc1   : > { %4586 = vadd.xlane.f32.xlu1 %v4582_v27  ;;  %v7460_v27 = vpop.eup %7459 }
0x1fc2   : > { %v4672_v46 = vmul.f32 %v7460_v27, %v4660_v61  ;;  %v7462_v33 = vpop.eup %7461 }
0x1fc3   : > { %4638 = vadd.xlane.f32.xlu0 %v4634_v0  ;;  %v2944_v31 = vadd.f32 1.0, %v7462_v33 }
0x1fc4   : > { %v6781_v59 = vmul.f32 -1.442695, %v4672_v46 }
0x1fc5   : > { %6309 = vadd.xlane.f32.xlu1 %v6307_v30 }
0x1fc7   : > { %6335 = vadd.xlane.f32.xlu0 %v6333_v48 }
0x1fcc   : > { %v7464_v53 = vpop.eup %7463 }
0x1fcd   : > { %v7466_v2 = vpop.eup %7465  ;;  %v2945_v1 = vadd.f32 1.0, %v7464_v53 }
0x1fce   : > { %v4686_v49 = vadd.f32 1.0, %v7466_v2 }
0x2032   : > { %v6304_v37 = vpop.xlane.xlu1 %6303 }
0x2033   : > { %v6306_v54 = vmul.f32 0.0078125, %v6304_v37 }
0x2034   : > { %v6330_v14 = vpop.xlane.xlu0 %6329 }
0x2035   : > { %v6332_v55 = vmul.f32 0.0078125, %v6330_v14  ;;  %v6316_v0 = vmul.f32 %v6306_v54, %v6306_v54  ;;  %v6320_v35 = vsub.f32 %v10071_v18, %v6306_v54 }
0x2036   : > { %v6312_v51 = vpop.xlane.xlu1 %6311 }
0x2037   : > { %v6314_v30 = vmul.f32 0.0078125, %v6312_v51  ;;  %v6342_v4 = vmul.f32 %v6332_v55, %v6332_v55  ;;  %v6346_v36 = vsub.f32 %v10074_v3, %v6332_v55 }
0x2038   : > { %v6338_v48 = vpop.xlane.xlu0 %6337 }
0x2039   : > { %v6318_v26 = vsub.f32 %v6314_v30, %v6316_v0  ;;  %v6340_v6 = vmul.f32 0.0078125, %v6338_v48 }
0x203a   : > { %v2829_v17 = vpop.xlane.xlu1 %2828 }
0x203b   : > { %v6322_v50 = vadd.f32 1e-05, %v6318_v26  ;;  %v6344_v39 = vsub.f32 %v6340_v6, %v6342_v4  ;;  %v10103_v45 = vmul.f32 0.0078125, %v2829_v17 }
0x203c   : > { %v2881_v9 = vpop.xlane.xlu0 %2880 }
0x203d   : > { %7467 = vrsqrt.f32 %v6322_v50  ;;  %v6348_v10 = vadd.f32 1e-05, %v6344_v39  ;;  %v10105_v12 = vmul.f32 0.0078125, %v2881_v9  ;;  %v2856_v40 = vmul.f32 %v10103_v45, %v10103_v45 }
0x203e   : > { %v4571_v28 = vpop.xlane.xlu1 %4570 }
0x203f   : > { %7469 = vrsqrt.f32 %v6348_v10  ;;  %v10109_v63 = vmul.f32 0.0078125, %v4571_v28  ;;  %v2908_v44 = vmul.f32 %v10105_v12, %v10105_v12  ;;  %v2864_v28 = vsub.f32 %v10242_v34, %v10103_v45 }
0x2040   : > { %v4623_v19 = vpop.xlane.xlu0 %4622  ;;  %7471 = vpow2.f32 %v6781_v59  ;;  %v2916_v53 = vsub.f32 %v10243_v13, %v10105_v12 }
0x2041   : > { %v10115_v16 = vmul.f32 0.0078125, %v4623_v19  ;;  %7473 = vrcp.f32 %v2944_v31  ;;  %v4598_v18 = vmul.f32 %v10109_v63, %v10109_v63  ;;  %v4606_v2 = vsub.f32 %v9404_v23, %v10109_v63 }
0x2042   : > { %v6302_v60 = vpop.xlane.xlu1 %6301 }
0x2043   : > { %v10119_v37 = vmul.f32 0.0078125, %v6302_v60  ;;  %v4650_v14 = vmul.f32 %v10115_v16, %v10115_v16  ;;  %v4658_v13 = vsub.f32 %v9406_v11, %v10115_v16 }
0x2044   : > { %v6328_v7 = vpop.xlane.xlu0 %6327 }
0x2045   : > { %v10123_v30 = vmul.f32 0.0078125, %v6328_v7  ;;  %v6315_v26 = vmul.f32 %v10119_v37, %v10119_v37 }
0x2046   : > { %v2845_v21 = vpop.xlane.xlu1 %2844 }
0x2047   : > { %v2852_v58 = vmul.f32 0.0078125, %v2845_v21  ;;  %v6341_v50 = vmul.f32 %v10123_v30, %v10123_v30 }
0x2048   : > { %v2897_v47 = vpop.xlane.xlu0 %2896 }
0x2049   : > { %v2860_v57 = vsub.f32 %v2852_v58, %v2856_v40  ;;  %v2904_v22 = vmul.f32 0.0078125, %v2897_v47 }
0x204a   : > { %v7468_v42 = vpop.eup %7467  ;;  %v4587_v43 = vpop.xlane.xlu1 %4586 }
0x204b   : > { %v6326_v56 = vmul.f32 %v7468_v42, %v6320_v35  ;;  %v2868_v15 = vadd.f32 1e-05, %v2860_v57  ;;  %v2912_v41 = vsub.f32 %v2904_v22, %v2908_v44  ;;  %v4594_v52 = vmul.f32 0.0078125, %v4587_v43  ;;  %v10244_v44 = vld [vmem:[#allocation6_spill] sm:$0xff]  ;;  %v10245_v43 = vld [vmem:[#allocation5_spill] sm:$0xff] }
0x204c   : > { %v7470_v24 = vpop.eup %7469  ;;  %v4639_v54 = vpop.xlane.xlu0 %4638 }
0x204d   : > { %v6900_v5 = vmul.f32 -1.442695, %v6326_v56  ;;  %v6352_v25 = vmul.f32 %v7470_v24, %v6346_v36  ;;  %7475 = vrsqrt.f32 %v2868_v15  ;;  %v2920_v3 = vadd.f32 1e-05, %v2912_v41  ;;  %v7472_v27 = vpop.eup %7471  ;;  %v10246_v24 = vld [vmem:[#allocation11_spill] sm:$0xff] }
0x204e   : > { %7477 = vrcp.f32 %v2945_v1  ;;  %v4602_v55 = vsub.f32 %v4594_v52, %v4598_v18  ;;  %v4646_v29 = vmul.f32 0.0078125, %v4639_v54  ;;  %v6310_v51 = vpop.xlane.xlu1 %6309  ;;  %v4687_v46 = vadd.f32 1.0, %v7472_v27  ;;  %v7474_v59 = vpop.eup %7473  ;;  %v10247_v54 = vld [vmem:[#allocation10_spill] sm:$0xff] }
0x204f   : > { %7479 = vpow2.f32 %v6900_v5  ;;  %v6901_v0 = vmul.f32 -1.442695, %v6352_v25  ;;  %v6313_v61 = vmul.f32 0.0078125, %v6310_v51  ;;  %v6345_v27 = vsub.f32 %v10069_v62, %v10123_v30 }
0x2050   : > { %7481 = vrsqrt.f32 %v2920_v3  ;;  %v4610_v32 = vadd.f32 1e-05, %v4602_v55  ;;  %v4654_v48 = vsub.f32 %v4646_v29, %v4650_v14  ;;  %v6336_v4 = vpop.xlane.xlu0 %6335  ;;  %v6319_v55 = vsub.f32 %v10067_v8, %v10119_v37 }
0x2051   : > { %7483 = vpow2.f32 %v6901_v0  ;;  %v6339_v6 = vmul.f32 0.0078125, %v6336_v4  ;;  %v6317_v39 = vsub.f32 %v6313_v61, %v6315_v26 }
0x2052   : > { %7485 = vrsqrt.f32 %v4610_v32  ;;  %v4662_v17 = vadd.f32 1e-05, %v4654_v48 }
0x2053   : > { %7487 = vrcp.f32 %v4686_v49  ;;  %v6343_v9 = vsub.f32 %v6339_v6, %v6341_v50  ;;  %v6321_v10 = vadd.f32 1e-05, %v6317_v39 }
0x2054   : > { %7489 = vrsqrt.f32 %v4662_v17 }
0x2055   : > { %7491 = vrcp.f32 %v4687_v46  ;;  %v6347_v19 = vadd.f32 1e-05, %v6343_v9 }
0x2056   : > { %7493 = vrsqrt.f32 %v6321_v10 }
0x2057   : > { %7495 = vrsqrt.f32 %v6347_v19 }
0x205a   : > { %v7476_v60 = vpop.eup %7475 }
0x205b   : > { %v7478_v7 = vpop.eup %7477  ;;  %v2876_v33 = vmul.f32 %v7476_v60, %v2864_v28 }
0x205c   : > { %v7480_v21 = vpop.eup %7479 }
0x205d   : > { %v7482_v40 = vpop.eup %7481  ;;  %v6359_v58 = vadd.f32 1.0, %v7480_v21  ;;  %v2956_v31 = vmul.f32 %v7474_v59, %v2876_v33 }
0x205e   : > { %v7484_v47 = vpop.eup %7483  ;;  %v2928_v34 = vmul.f32 %v7482_v40, %v2916_v53 }
0x205f   : > { %v7486_v45 = vpop.eup %7485  ;;  %7497 = vrcp.f32 %v6359_v58  ;;  %v6360_v35 = vadd.f32 1.0, %v7484_v47  ;;  %v2960_v57 = vadd.f32 %v2956_v31, %v10244_v44 }
0x2060   : > { %v7488_v22 = vpop.eup %7487  ;;  %v2957_v12 = vmul.f32 %v7478_v7, %v2928_v34  ;;  %v4618_v42 = vmul.f32 %v7486_v45, %v4606_v2 }
0x2061   : > { %v7490_v1 = vpop.eup %7489  ;;  %7499 = vrcp.f32 %v6360_v35  ;;  %v2964_v36 = vmul.f32 0.70710677, %v2960_v57 }
0x2062   : > { %v2961_v56 = vadd.f32 %v2957_v12, %v10245_v43  ;;  %v4698_v23 = vmul.f32 %v7488_v22, %v4618_v42  ;;  %v4670_v63 = vmul.f32 %v7490_v1, %v4658_v13  ;;  %v7492_v15 = vpop.eup %7491 }
0x2063   : > { %v2968_v41 = vmax.f32 %v2964_v36, 0.0  ;;  %v7494_v25 = vpop.eup %7493 }
0x2064   : > { %v2965_v52 = vmul.f32 0.70710677, %v2961_v56  ;;  %v4702_v49 = vadd.f32 %v4698_v23, %v10246_v24  ;;  %v4699_v18 = vmul.f32 %v7492_v15, %v4670_v63  ;;  %v7496_v29 = vpop.eup %7495  ;;  %v6325_v0 = vmul.f32 %v7494_v25, %v6319_v55 }
0x2065   : > { %2970 = vst [vmem:[%s10143_s26] sm:$0xff] %v2968_v41  ;;  %v6351_v48 = vmul.f32 %v7496_v29, %v6345_v27 }
0x2066   : > { %v2969_v11 = vmax.f32 %v2965_v52, 0.0  ;;  %v4706_v16 = vmul.f32 0.70710677, %v4702_v49  ;;  %v4703_v5 = vadd.f32 %v4699_v18, %v10247_v54 }
0x2068   : > { %2971 = vst [vmem:[%s10143_s26 + $0x8] sm:$0xff] %v2969_v11  ;;  %v4710_v3 = vmax.f32 %v4706_v16, 0.0  ;;  %v4707_v14 = vmul.f32 0.70710677, %v4703_v5 }
0x206a   : > { %6784 = vst [vmem:[%s10143_s26 + $0x10] sm:$0xff] %v4710_v3  ;;  %v4711_v51 = vmax.f32 %v4707_v14, 0.0 }
0x206c   : > { %v7498_v61 = vpop.eup %7497  ;;  %6785 = vst [vmem:[%s10143_s26 + $0x18] sm:$0xff] %v4711_v51 }
0x206d   : > { %v6365_v32 = vmul.f32 %v7498_v61, %v6325_v0 }
0x206e   : > { %v7500_v4 = vpop.eup %7499 }
0x206f   : > { %v6367_v26 = vadd.f32 %v6365_v32, %v10044_v38  ;;  %v6366_v8 = vmul.f32 %v7500_v4, %v6351_v48 }
0x2071   : > { %v6369_v37 = vmul.f32 0.70710677, %v6367_v26  ;;  %v6368_v6 = vadd.f32 %v6366_v8, %v10042_v20 }
0x2073   : > { %v6371_v46 = vmax.f32 %v6369_v37, 0.0  ;;  %v6370_v62 = vmul.f32 0.70710677, %v6368_v6 }
0x2075   : > { %6902 = vst [vmem:[%s10143_s26 + $0x20] sm:$0xff] %v6371_v46  ;;  %v6372_v38 = vmax.f32 %v6370_v62, 0.0 }
0x2077   : > { %6903 = vst [vmem:[%s10143_s26 + $0x28] sm:$0xff] %v6372_v38 }
0x2078   : > { %7522 = shalt.err (!%p7519_p4)
}
0x2079   : > { %s7523_s14 = scalar_lea.hbm %s10161_s9, 768  ;;  %s7527_s17 = scalar_lea.hbm %s10213_s4, 1536 }
0x207a   : > { %p7524_p7 = scmp.ne.s32.totalorder %s10161_s9, %s7523_s14  ;;  %p7528_p10 = scmp.lt.s32.totalorder %s10161_s9, %s10213_s4 }
0x207b   : > { %p7529_p11 = scmp.lt.s32.totalorder %s7527_s17, %s7523_s14 }
0x207c   : > { %p7525_p8 = pnand %p7524_p7, %p7646_p5 }
0x207d   : > { %p7530_p12 = por %p7529_p11, %p7528_p10 }
0x207e   : > { %p7526_p9 = pneg %p7525_p8 }
0x2080   : > { %p7531_p13 = pnand %p7530_p12, %p7526_p9 }
0x2082   : > { %7534 = shalt.err (!%p7531_p13)
}
0x2083   : > { %s7575_s26 = smov 256   ;;  %s7576_s30 = smov 512  }
0x2084   : > { %s7577_s7 = smov 16  }
0x2085   : > { %6914 = dma.vmem_to_hbm [thread:$0]  (%p7646_p5), %s10163_s6, 768, %s10161_s9, %s10169_s22, %s7575_s26, %s7576_s30, %s7577_s7  }
0x2086 PF: > { %p6920_p0 = scmp.ge.s32.totalorder %s7569_s21, 2  ;;  %s6436_s8 = sand.u32 1, %s7557_s18  }
0x2087   : > { %s6437_s10 = scalar_lea.sflag [#allocation3], %s6436_s8 }
0x2088   : > { %p6917_p1 = pnand %p6920_p0, %p7650_p6 }
0x208a   : > { %p6918_p2 = pneg %p6917_p1 }
0x208c   : > { %7552 = dma.done.wait (%p6918_p2), %s6437_s10, 768  }
0x208d   : > { %7554 = vsyncadd (%p6918_p2), %s6437_s10, 4294966528  ;;  %p16_p3 = scmp.ge.s32.totalorder %s7633_s24, 4   ;;  %s10248_s18 = smov %s7561_s19 }
0x208e   : > { %s10249_s19 = smov %s7565_s20  ;;  %s10250_s20 = smov %s7644_s27 }
0x208f   : > { %s10251_s21 = smov %s7633_s24  ;;  %18 = sbr.rel (!%p16_p3) target bundleno = 3 (0x3), region = 97 }
0x2094   :  { %6449 = vsyncpa [#allocation3], 1 }
0x2095   :  { %6451 = vsyncpa [#allocation3 + $0x1], 1 }

</bundles_post_ra>
